<compile_context>
chip_gen: v6e
topology: v6e:2x2x1
jax: 0.10.0
libtpu: 0.0.40
codegen_flags: <defaults>
</compile_context>

<pallas_src>
import math

import numpy as np
import jax
import jax.numpy as jnp
from jax import lax
from jax.experimental import pallas as pl
from jax.experimental.pallas import tpu as pltpu

EPS = 1e-5
CP = 128                    # lane-padded channel width used for every layer
PAD = 16                    # top halo rows in the padded conv scratch
PBUF_ROWS = PAD + 256 + 16  # 288: halo + largest H*W + halo


# ----------------------------------------------------------------------------
# Fused Pallas kernel: full FloodCNN forward for one batch element / grid step
# ----------------------------------------------------------------------------
def _flood_cnn_kernel(x_ref, ew_ref, et_ref, dw_ref, dt_ref, mask_ref,
                      sel0_ref, sel1_ref, sel2_ref,
                      scat0_ref, scat1_ref, scat2_ref,
                      o_ref, pbuf, abuf):
    f32 = jnp.float32
    bf16 = jnp.bfloat16
    sel_refs = (sel0_ref, sel1_ref, sel2_ref)

    def conv_bn_relu_pool(l, H, W, T, load_input):
        """3x3 same conv (BN scale folded in weights) + shift + ReLU + MaxPool2.
        Reads the (H*W, CP) bf16 input via load_input(); writes the pooled
        (H*W/4, CP) bf16 result into abuf[:H*W/4]."""
        HW = H * W
        TP = T // 4                          # pooled rows produced per chunk
        sel = sel_refs[l]
        # Zero ONLY the halo rows actually read (16 above, 16 below), then store
        # the activation.  Lower halo must be re-zeroed every layer (stale rows
        # from the previous, larger layer).
        pbuf[PAD - 16:PAD, :] = jnp.zeros((16, CP), bf16)
        pbuf[PAD + HW:PAD + HW + 16, :] = jnp.zeros((16, CP), bf16)
        pbuf[PAD:PAD + HW, :] = load_input()

        lm = mask_ref[l, 0, :T, :]           # ox = -1 valid (x != 0)
        rm = mask_ref[l, 1, :T, :]           # ox = +1 valid (x != W-1)
        shift = et_ref[l]                    # (1, CP) folded conv-bias + BN shift

        # Row-chunked (T rows) to bound vreg pressure on the 16x16 layer.
        for c in range(HW // T):
            r0 = c * T
            # Partial sums grouped by ox; ox=0 partial starts from the shift.
            parts = [jnp.zeros((T, CP), f32),
                     jnp.broadcast_to(shift, (T, CP)),
                     jnp.zeros((T, CP), f32)]
            for oy in (-1, 0, 1):
                # Sublane-aligned slab load, reused for all three ox taps.
                base = PAD + oy * W + r0
                slab = pbuf[base:base + T, :]
                for ox in (-1, 0, 1):
                    tap = (oy + 1) * 3 + (ox + 1)
                    parts[ox + 1] = parts[ox + 1] + jnp.dot(
                        slab, ew_ref[l, tap], preferred_element_type=f32)
            # ox = +-1 columns = sublane rotate of the per-ox partials (XLU);
            # the rows that wrap are exactly image-edge columns -> masked.
            conv = jnp.maximum(
                parts[1]
                + pltpu.roll(parts[0], shift=1, axis=0) * lm
                + pltpu.roll(parts[2], shift=T - 1, axis=0) * rm,
                0.0)
            # 2x2 maxpool: 4 precomputed one-hot row-selection matmuls.
            pooled = None
            for off in range(4):
                pick = jnp.dot(sel[off], conv, preferred_element_type=f32)
                pooled = pick if pooled is None else jnp.maximum(pooled, pick)
            abuf[c * TP:(c + 1) * TP, :] = pooled.astype(bf16)

    def deconv_bn_relu(l, H, W, scat_ref, a_bf16):
        """ConvTranspose2d(k=2, s=2) (+ folded BN) + ReLU.
        a_bf16: (H*W, CP) -> (4*H*W, CP) bf16 at 2x resolution."""
        HW, OHW = H * W, 4 * H * W
        # One lane-dense matmul against the 4 sub-kernels laid side by side.
        y = jnp.dot(a_bf16, dw_ref[l], preferred_element_type=f32)  # (HW, 4*CP)
        out = jnp.broadcast_to(dt_ref[l], (OHW, CP))
        for blk in range(4):
            out = out + jnp.dot(scat_ref[blk], y[:, blk * CP:(blk + 1) * CP],
                                preferred_element_type=f32)
        return jnp.maximum(out, 0.0).astype(bf16)

    def deconv_sigmoid_out(l, scat_ref, a_bf16):
        """Final ConvTranspose2d + Sigmoid, written straight to o_ref in two
        lane-dense 128-row chunks."""
        y = jnp.dot(a_bf16, dw_ref[l], preferred_element_type=f32)  # (64, 4*CP)
        for c in range(2):
            r0 = c * 128
            out = jnp.broadcast_to(dt_ref[l], (128, CP))
            for blk in range(4):
                out = out + jnp.dot(scat_ref[blk, r0:r0 + 128, :],
                                    y[:, blk * CP:(blk + 1) * CP],
                                    preferred_element_type=f32)
            o_ref[0, r0:r0 + 128, :] = jax.nn.sigmoid(out)

    # ---------------- encoder ----------------
    conv_bn_relu_pool(0, 16, 16, 64, lambda: x_ref[0])        # -> abuf[:64]
    conv_bn_relu_pool(1, 8, 8, 64, lambda: abuf[0:64, :])     # -> abuf[:16]
    conv_bn_relu_pool(2, 4, 4, 16, lambda: abuf[0:16, :])     # -> abuf[:4]
    # ---------------- decoder ----------------
    a = deconv_bn_relu(0, 2, 2, scat0_ref, abuf[0:4, :])      # (16, CP)
    a = deconv_bn_relu(1, 4, 4, scat1_ref, a)                 # (64, CP)
    deconv_sigmoid_out(2, scat2_ref, a)                       # (256, CP) -> o_ref


# ----------------------------------------------------------------------------
# Wrapper (one pallas_call for the whole net)
# ----------------------------------------------------------------------------
def flood_cnn_forward(x_nchw, params):
    # TODO(synk): training-mode Dropout2d / batch-stat BatchNorm are stochastic /
    # batch-dependent; inference (eval) semantics are implemented instead.
    N, Cin, H, W = x_nchw.shape
    HW = H * W
    x = jnp.transpose(x_nchw, (0, 2, 3, 1)).reshape(N, HW, Cin)
    x = jnp.pad(x, ((0, 0), (0, 0), (0, CP - Cin))).astype(jnp.bfloat16)

    out = pl.pallas_call(
        _flood_cnn_kernel,
        out_shape=jax.ShapeDtypeStruct((N, HW, CP), jnp.float32),
        grid=(N,),
        in_specs=[
            pl.BlockSpec((1, HW, CP), lambda n: (n, 0, 0)),          # x (bf16)
            pl.BlockSpec((3, 9, CP, CP), lambda n: (0, 0, 0, 0)),    # enc_w (bf16)
            pl.BlockSpec((3, 1, CP), lambda n: (0, 0, 0)),           # enc_t (f32)
            pl.BlockSpec((3, CP, 4 * CP), lambda n: (0, 0, 0)),      # dec_w (bf16)
            pl.BlockSpec((3, 1, CP), lambda n: (0, 0, 0)),           # dec_t (f32)
            pl.BlockSpec((3, 2, 64, CP), lambda n: (0, 0, 0, 0)),    # edge masks
            pl.BlockSpec((4, 16, 64), lambda n: (0, 0, 0)),          # pool sel L0
            pl.BlockSpec((4, 16, 64), lambda n: (0, 0, 0)),          # pool sel L1
            pl.BlockSpec((4, 4, 16), lambda n: (0, 0, 0)),           # pool sel L2
            pl.BlockSpec((4, 16, 4), lambda n: (0, 0, 0)),           # deconv scat 0
            pl.BlockSpec((4, 64, 16), lambda n: (0, 0, 0)),          # deconv scat 1
            pl.BlockSpec((4, 256, 64), lambda n: (0, 0, 0)),         # deconv scat 2
        ],
        out_specs=pl.BlockSpec((1, HW, CP), lambda n: (n, 0, 0)),
        scratch_shapes=[pltpu.VMEM((PBUF_ROWS, CP), jnp.bfloat16),
                        pltpu.VMEM((64, CP), jnp.bfloat16)],
        compiler_params=pltpu.CompilerParams(
            dimension_semantics=("parallel",)),
    )(x, params["enc_w"], params["enc_t"], params["dec_w"], params["dec_t"],
      params["mask"], params["sel0"], params["sel1"], params["sel2"],
      params["scat0"], params["scat1"], params["scat2"])

    # Only channel 0 of the final (padded) layer is real; slice it out on host.
    return out[:, :, 0].reshape(N, H, W)


# ----------------------------------------------------------------------------
# Host-precomputed constants: edge masks, pool one-hots, deconv scatter one-hots
# ----------------------------------------------------------------------------
def _build_constants():
    # Left/right column-validity masks, one (T, CP) slab per conv layer.
    mask = np.zeros((3, 2, 64, CP), np.float32)
    for l, (W, T) in enumerate([(16, 64), (8, 64), (4, 16)]):
        xc = np.arange(T) % W
        mask[l, 0, :T, :] = (xc != 0).astype(np.float32)[:, None]
        mask[l, 1, :T, :] = (xc != W - 1).astype(np.float32)[:, None]

    def pool_sel(W, T):
        W2, TP = W // 2, T // 4
        sel = np.zeros((4, TP, T), np.float32)
        for p in range(TP):
            y2, x2 = p // W2, p % W2
            base = y2 * 2 * W + 2 * x2
            for k, off in enumerate((0, 1, W, W + 1)):
                sel[k, p, base + off] = 1.0
        return sel

    def scat_mat(H, W):
        HW = H * W
        s = np.zeros((4, 4 * HW, HW), np.float32)
        for i in range(2):
            for j in range(2):
                blk = i * 2 + j
                for y in range(H):
                    for x in range(W):
                        s[blk, (2 * y + i) * 2 * W + 2 * x + j, y * W + x] = 1.0
        return s

    return {
        "mask": jnp.asarray(mask),
        "sel0": jnp.asarray(pool_sel(16, 64)),   # 16x16 layer, per 64-row chunk
        "sel1": jnp.asarray(pool_sel(8, 64)),    # 8x8 layer, full
        "sel2": jnp.asarray(pool_sel(4, 16)),    # 4x4 layer, full
        "scat0": jnp.asarray(scat_mat(2, 2)),
        "scat1": jnp.asarray(scat_mat(4, 4)),
        "scat2": jnp.asarray(scat_mat(8, 8)),
    }


# ----------------------------------------------------------------------------
# Parameter construction (BN scale folded into weights, channels padded to 128)
# ----------------------------------------------------------------------------
def fold_bn(bias, gamma, beta, mean, var):
    s = gamma / jnp.sqrt(var + EPS)
    t = beta + (bias - mean) * s
    return s, t


def make_params(key):
    keys = iter(jax.random.split(key, 64))
    nk = lambda: next(keys)

    enc_raw, enc_w, enc_t = [], [], []
    for cin, cout in [(2, 16), (16, 32), (32, 64)]:
        Wc = jax.random.normal(nk(), (cout, cin, 3, 3), jnp.float32) / math.sqrt(cin * 9)
        bc = 0.05 * jax.random.normal(nk(), (cout,), jnp.float32)
        g = 1.0 + 0.1 * jax.random.normal(nk(), (cout,), jnp.float32)
        bt = 0.05 * jax.random.normal(nk(), (cout,), jnp.float32)
        mu = 0.05 * jax.random.normal(nk(), (cout,), jnp.float32)
        var = 0.5 + jax.random.uniform(nk(), (cout,), jnp.float32)
        enc_raw.append((Wc, bc, g, bt, mu, var))
        s, t = fold_bn(bc, g, bt, mu, var)
        # (9 taps, cin, cout) with BN scale folded in, padded to 128x128.
        Wm = jnp.transpose(Wc, (2, 3, 1, 0)).reshape(9, cin, cout) * s[None, None, :]
        enc_w.append(jnp.zeros((9, CP, CP), jnp.float32).at[:, :cin, :cout].set(Wm))
        enc_t.append(jnp.zeros((1, CP), jnp.float32).at[0, :cout].set(t))

    dec_raw, dec_w, dec_t = [], [], []
    for cin, cout, has_bn in [(64, 32, True), (32, 16, True), (16, 1, False)]:
        Wt = jax.random.normal(nk(), (cin, cout, 2, 2), jnp.float32) / math.sqrt(cin * 4)
        bd = 0.05 * jax.random.normal(nk(), (cout,), jnp.float32)
        if has_bn:
            g = 1.0 + 0.1 * jax.random.normal(nk(), (cout,), jnp.float32)
            bt = 0.05 * jax.random.normal(nk(), (cout,), jnp.float32)
            mu = 0.05 * jax.random.normal(nk(), (cout,), jnp.float32)
            var = 0.5 + jax.random.uniform(nk(), (cout,), jnp.float32)
            dec_raw.append((Wt, bd, g, bt, mu, var))
            s, t = fold_bn(bd, g, bt, mu, var)
        else:
            dec_raw.append((Wt, bd))
            s = jnp.ones((cout,), jnp.float32)
            t = bd
        Wk = jnp.transpose(Wt, (2, 3, 0, 1)) * s            # (2,2,cin,cout), BN folded
        D = jnp.zeros((CP, 4 * CP), jnp.float32)
        for i in range(2):
            for j in range(2):
                c0 = (i * 2 + j) * CP
                D = D.at[:cin, c0:c0 + cout].set(Wk[i, j])
        dec_w.append(D)
        dec_t.append(jnp.zeros((1, CP), jnp.float32).at[0, :cout].set(t))

    params = {
        "enc_raw": enc_raw, "dec_raw": dec_raw,
        "enc_w": jnp.stack(enc_w).astype(jnp.bfloat16),
        "enc_t": jnp.stack(enc_t),
        "dec_w": jnp.stack(dec_w).astype(jnp.bfloat16),
        "dec_t": jnp.stack(dec_t),
    }
    params.update(_build_constants())
    return params


# ----------------------------------------------------------------------------
# Pure-JAX reference (for numerical verification)
# ----------------------------------------------------------------------------
def reference_forward(x, params):
    h = x
    for Wc, bc, g, bt, mu, var in params["enc_raw"]:
        h = lax.conv_general_dilated(
            h, Wc, (1, 1), "SAME",
            dimension_numbers=("NCHW", "OIHW", "NCHW"),
            precision=jax.lax.Precision.HIGHEST,
        ) + bc.reshape(1, -1, 1, 1)
        h = g.reshape(1, -1, 1, 1) * (h - mu.reshape(1, -1, 1, 1)) / jnp.sqrt(
            var.reshape(1, -1, 1, 1) + EPS
        ) + bt.reshape(1, -1, 1, 1)
        h = jnp.maximum(h, 0.0)
        N, C, H, W = h.shape
        h = h.reshape(N, C, H // 2, 2, W // 2, 2).max(axis=(3, 5))

    for k, layer in enumerate(params["dec_raw"]):
        Wt, bd = layer[0], layer[1]
        N, C, H, W = h.shape
        cout = Wt.shape[1]
        y = jnp.einsum(
            "nchw,cdij->ndhiwj", h, Wt, precision=jax.lax.Precision.HIGHEST
        ).reshape(N, cout, 2 * H, 2 * W) + bd.reshape(1, -1, 1, 1)
        if k < 2:
            g, bt, mu, var = layer[2:]
            y = g.reshape(1, -1, 1, 1) * (y - mu.reshape(1, -1, 1, 1)) / jnp.sqrt(
                var.reshape(1, -1, 1, 1) + EPS
            ) + bt.reshape(1, -1, 1, 1)
            y = jnp.maximum(y, 0.0)
        else:
            y = jax.nn.sigmoid(y)
        h = y
    return h[:, 0]


# ----------------------------------------------------------------------------
if __name__ == "__main__":
    key = jax.random.PRNGKey(0)
    kx, kp = jax.random.split(key)

    # NCHW input, 2 channels (matches nn.Conv2d(2, 16, ...))
    x = jax.random.normal(kx, (2, 2, 16, 16), jnp.float32)
    params = make_params(kp)

    out = jax.jit(flood_cnn_forward)(x, params)
    out = jax.block_until_ready(out)
    assert out.shape == (2, 16, 16), out.shape

    ref = reference_forward(x, params)
    np.testing.assert_allclose(np.asarray(out), np.asarray(ref), rtol=3e-2, atol=3e-2)

    print("KERNEL_OK")
</pallas_src>

<mosaic_0001>
module attributes {stable_mosaic.version = 11 : i64} {
  func.func @_flood_cnn_kernel(%arg0: i32, %arg1: memref<1x256x128xbf16, #tpu.memory_space<vmem>>, %arg2: memref<3x9x128x128xbf16, #tpu.memory_space<vmem>>, %arg3: memref<3x1x128xf32, #tpu.memory_space<vmem>>, %arg4: memref<3x128x512xbf16, #tpu.memory_space<vmem>>, %arg5: memref<3x1x128xf32, #tpu.memory_space<vmem>>, %arg6: memref<3x2x64x128xf32, #tpu.memory_space<vmem>>, %arg7: memref<4x16x64xf32, #tpu.memory_space<vmem>>, %arg8: memref<4x16x64xf32, #tpu.memory_space<vmem>>, %arg9: memref<4x4x16xf32, #tpu.memory_space<vmem>>, %arg10: memref<4x16x4xf32, #tpu.memory_space<vmem>>, %arg11: memref<4x64x16xf32, #tpu.memory_space<vmem>>, %arg12: memref<4x256x64xf32, #tpu.memory_space<vmem>>, %arg13: memref<1x256x128xf32, #tpu.memory_space<vmem>>, %arg14: memref<288x128xbf16, #tpu.memory_space<vmem>>, %arg15: memref<64x128xbf16, #tpu.memory_space<vmem>>) attributes {dimension_semantics = [#tpu.dimension_semantics<parallel>], iteration_bounds = array<i64: 2>, scalar_prefetch = 0 : i64, scratch_operands = 2 : i64, tpu.core_type = #tpu.core_type<tc>, window_params = [{transform_indices = @transform_0, window_bounds = array<i64: 1, 256, 128>}, {pipeline_mode = #tpu.pipeline_mode<synchronous>, transform_indices = @transform_1, window_bounds = array<i64: 3, 9, 128, 128>}, {pipeline_mode = #tpu.pipeline_mode<synchronous>, transform_indices = @transform_2, window_bounds = array<i64: 3, 1, 128>}, {pipeline_mode = #tpu.pipeline_mode<synchronous>, transform_indices = @transform_3, window_bounds = array<i64: 3, 128, 512>}, {pipeline_mode = #tpu.pipeline_mode<synchronous>, transform_indices = @transform_4, window_bounds = array<i64: 3, 1, 128>}, {pipeline_mode = #tpu.pipeline_mode<synchronous>, transform_indices = @transform_5, window_bounds = array<i64: 3, 2, 64, 128>}, {pipeline_mode = #tpu.pipeline_mode<synchronous>, transform_indices = @transform_6, window_bounds = array<i64: 4, 16, 64>}, {pipeline_mode = #tpu.pipeline_mode<synchronous>, transform_indices = @transform_7, window_bounds = array<i64: 4, 16, 64>}, {pipeline_mode = #tpu.pipeline_mode<synchronous>, transform_indices = @transform_8, window_bounds = array<i64: 4, 4, 16>}, {pipeline_mode = #tpu.pipeline_mode<synchronous>, transform_indices = @transform_9, window_bounds = array<i64: 4, 16, 4>}, {pipeline_mode = #tpu.pipeline_mode<synchronous>, transform_indices = @transform_10, window_bounds = array<i64: 4, 64, 16>}, {pipeline_mode = #tpu.pipeline_mode<synchronous>, transform_indices = @transform_11, window_bounds = array<i64: 4, 256, 64>}, {transform_indices = @transform_12, window_bounds = array<i64: 1, 256, 128>}]} {
    %cst = arith.constant 0.000000e+00 : bf16
    %0 = vector.broadcast %cst : bf16 to vector<16x128xbf16>
    %c0 = arith.constant 0 : index
    %c0_0 = arith.constant 0 : index
    %1 = vector.load %arg14[%c0, %c0_0] : memref<288x128xbf16, #tpu.memory_space<vmem>>, vector<16x128xbf16>
    tpu.vector_store %arg14[%c0, %c0_0], %0 {strides = array<i32>} : memref<288x128xbf16, #tpu.memory_space<vmem>>, vector<16x128xbf16>,
    %cst_1 = arith.constant 0.000000e+00 : bf16
    %2 = vector.broadcast %cst_1 : bf16 to vector<16x128xbf16>
    %c272 = arith.constant 272 : index
    %c0_2 = arith.constant 0 : index
    %3 = vector.load %arg14[%c272, %c0_2] : memref<288x128xbf16, #tpu.memory_space<vmem>>, vector<16x128xbf16>
    tpu.vector_store %arg14[%c272, %c0_2], %2 {strides = array<i32>} : memref<288x128xbf16, #tpu.memory_space<vmem>>, vector<16x128xbf16>,
    %c0_3 = arith.constant 0 : index
    %c0_4 = arith.constant 0 : index
    %c0_5 = arith.constant 0 : index
    %4 = vector.load %arg1[%c0_3, %c0_4, %c0_5] : memref<1x256x128xbf16, #tpu.memory_space<vmem>>, vector<1x256x128xbf16>
    %5 = vector.shape_cast %4 : vector<1x256x128xbf16> to vector<256x128xbf16>
    %c16 = arith.constant 16 : index
    %c0_6 = arith.constant 0 : index
    %6 = vector.load %arg14[%c16, %c0_6] : memref<288x128xbf16, #tpu.memory_space<vmem>>, vector<256x128xbf16>
    tpu.vector_store %arg14[%c16, %c0_6], %5 {strides = array<i32>} : memref<288x128xbf16, #tpu.memory_space<vmem>>, vector<256x128xbf16>,
    %c0_7 = arith.constant 0 : index
    %c0_8 = arith.constant 0 : index
    %c0_9 = arith.constant 0 : index
    %c0_10 = arith.constant 0 : index
    %7 = vector.load %arg6[%c0_7, %c0_8, %c0_9, %c0_10] : memref<3x2x64x128xf32, #tpu.memory_space<vmem>>, vector<1x1x64x128xf32>
    %8 = vector.shape_cast %7 : vector<1x1x64x128xf32> to vector<64x128xf32>
    %c0_11 = arith.constant 0 : index
    %c1 = arith.constant 1 : index
    %c0_12 = arith.constant 0 : index
    %c0_13 = arith.constant 0 : index
    %9 = vector.load %arg6[%c0_11, %c1, %c0_12, %c0_13] : memref<3x2x64x128xf32, #tpu.memory_space<vmem>>, vector<1x1x64x128xf32>
    %10 = vector.shape_cast %9 : vector<1x1x64x128xf32> to vector<64x128xf32>
    %c0_14 = arith.constant 0 : index
    %c0_15 = arith.constant 0 : index
    %c0_16 = arith.constant 0 : index
    %11 = vector.load %arg3[%c0_14, %c0_15, %c0_16] : memref<3x1x128xf32, #tpu.memory_space<vmem>>, vector<1x1x128xf32>
    %12 = vector.shape_cast %11 : vector<1x1x128xf32> to vector<1x128xf32>
    %cst_17 = arith.constant 0.000000e+00 : f32
    %13 = vector.broadcast %cst_17 : f32 to vector<64x128xf32>
    %14 = vector.shape_cast %12 : vector<1x128xf32> to vector<1x128xf32>
    %15 = vector.broadcast %14 : vector<1x128xf32> to vector<64x128xf32>
    %cst_18 = arith.constant 0.000000e+00 : f32
    %16 = vector.broadcast %cst_18 : f32 to vector<64x128xf32>
    %c0_19 = arith.constant 0 : index
    %c0_20 = arith.constant 0 : index
    %17 = vector.load %arg14[%c0_19, %c0_20] : memref<288x128xbf16, #tpu.memory_space<vmem>>, vector<64x128xbf16>
    %c0_21 = arith.constant 0 : index
    %c0_22 = arith.constant 0 : index
    %c0_23 = arith.constant 0 : index
    %c0_24 = arith.constant 0 : index
    %18 = vector.load %arg2[%c0_21, %c0_22, %c0_23, %c0_24] : memref<3x9x128x128xbf16, #tpu.memory_space<vmem>>, vector<1x1x128x128xbf16>
    %19 = vector.shape_cast %18 : vector<1x1x128x128xbf16> to vector<128x128xbf16>
    %cst_25 = arith.constant dense<0.000000e+00> : vector<64x128xf32>
    %20 = tpu.matmul %17, %19, %cst_25 {dimension_numbers = #tpu.dot_dimension_numbers<[1], [0], [0], [1], [0, 0, 1, 1], [], []>} : vector<64x128xbf16>, vector<128x128xbf16>, vector<64x128xf32> -> vector<64x128xf32>
    %21 = arith.addf %13, %20 : vector<64x128xf32>
    %c0_26 = arith.constant 0 : index
    %c1_27 = arith.constant 1 : index
    %c0_28 = arith.constant 0 : index
    %c0_29 = arith.constant 0 : index
    %22 = vector.load %arg2[%c0_26, %c1_27, %c0_28, %c0_29] : memref<3x9x128x128xbf16, #tpu.memory_space<vmem>>, vector<1x1x128x128xbf16>
    %23 = vector.shape_cast %22 : vector<1x1x128x128xbf16> to vector<128x128xbf16>
    %cst_30 = arith.constant dense<0.000000e+00> : vector<64x128xf32>
    %24 = tpu.matmul %17, %23, %cst_30 {dimension_numbers = #tpu.dot_dimension_numbers<[1], [0], [0], [1], [0, 0, 1, 1], [], []>} : vector<64x128xbf16>, vector<128x128xbf16>, vector<64x128xf32> -> vector<64x128xf32>
    %25 = arith.addf %15, %24 : vector<64x128xf32>
    %c0_31 = arith.constant 0 : index
    %c2 = arith.constant 2 : index
    %c0_32 = arith.constant 0 : index
    %c0_33 = arith.constant 0 : index
    %26 = vector.load %arg2[%c0_31, %c2, %c0_32, %c0_33] : memref<3x9x128x128xbf16, #tpu.memory_space<vmem>>, vector<1x1x128x128xbf16>
    %27 = vector.shape_cast %26 : vector<1x1x128x128xbf16> to vector<128x128xbf16>
    %cst_34 = arith.constant dense<0.000000e+00> : vector<64x128xf32>
    %28 = tpu.matmul %17, %27, %cst_34 {dimension_numbers = #tpu.dot_dimension_numbers<[1], [0], [0], [1], [0, 0, 1, 1], [], []>} : vector<64x128xbf16>, vector<128x128xbf16>, vector<64x128xf32> -> vector<64x128xf32>
    %29 = arith.addf %16, %28 : vector<64x128xf32>
    %c16_35 = arith.constant 16 : index
    %c0_36 = arith.constant 0 : index
    %30 = vector.load %arg14[%c16_35, %c0_36] : memref<288x128xbf16, #tpu.memory_space<vmem>>, vector<64x128xbf16>
    %c0_37 = arith.constant 0 : index
    %c3 = arith.constant 3 : index
    %c0_38 = arith.constant 0 : index
    %c0_39 = arith.constant 0 : index
    %31 = vector.load %arg2[%c0_37, %c3, %c0_38, %c0_39] : memref<3x9x128x128xbf16, #tpu.memory_space<vmem>>, vector<1x1x128x128xbf16>
    %32 = vector.shape_cast %31 : vector<1x1x128x128xbf16> to vector<128x128xbf16>
    %cst_40 = arith.constant dense<0.000000e+00> : vector<64x128xf32>
    %33 = tpu.matmul %30, %32, %cst_40 {dimension_numbers = #tpu.dot_dimension_numbers<[1], [0], [0], [1], [0, 0, 1, 1], [], []>} : vector<64x128xbf16>, vector<128x128xbf16>, vector<64x128xf32> -> vector<64x128xf32>
    %34 = arith.addf %21, %33 : vector<64x128xf32>
    %c0_41 = arith.constant 0 : index
    %c4 = arith.constant 4 : index
    %c0_42 = arith.constant 0 : index
    %c0_43 = arith.constant 0 : index
    %35 = vector.load %arg2[%c0_41, %c4, %c0_42, %c0_43] : memref<3x9x128x128xbf16, #tpu.memory_space<vmem>>, vector<1x1x128x128xbf16>
    %36 = vector.shape_cast %35 : vector<1x1x128x128xbf16> to vector<128x128xbf16>
    %cst_44 = arith.constant dense<0.000000e+00> : vector<64x128xf32>
    %37 = tpu.matmul %30, %36, %cst_44 {dimension_numbers = #tpu.dot_dimension_numbers<[1], [0], [0], [1], [0, 0, 1, 1], [], []>} : vector<64x128xbf16>, vector<128x128xbf16>, vector<64x128xf32> -> vector<64x128xf32>
    %38 = arith.addf %25, %37 : vector<64x128xf32>
    %c0_45 = arith.constant 0 : index
    %c5 = arith.constant 5 : index
    %c0_46 = arith.constant 0 : index
    %c0_47 = arith.constant 0 : index
    %39 = vector.load %arg2[%c0_45, %c5, %c0_46, %c0_47] : memref<3x9x128x128xbf16, #tpu.memory_space<vmem>>, vector<1x1x128x128xbf16>
    %40 = vector.shape_cast %39 : vector<1x1x128x128xbf16> to vector<128x128xbf16>
    %cst_48 = arith.constant dense<0.000000e+00> : vector<64x128xf32>
    %41 = tpu.matmul %30, %40, %cst_48 {dimension_numbers = #tpu.dot_dimension_numbers<[1], [0], [0], [1], [0, 0, 1, 1], [], []>} : vector<64x128xbf16>, vector<128x128xbf16>, vector<64x128xf32> -> vector<64x128xf32>
    %42 = arith.addf %29, %41 : vector<64x128xf32>
    %c32 = arith.constant 32 : index
    %c0_49 = arith.constant 0 : index
    %43 = vector.load %arg14[%c32, %c0_49] : memref<288x128xbf16, #tpu.memory_space<vmem>>, vector<64x128xbf16>
    %c0_50 = arith.constant 0 : index
    %c6 = arith.constant 6 : index
    %c0_51 = arith.constant 0 : index
    %c0_52 = arith.constant 0 : index
    %44 = vector.load %arg2[%c0_50, %c6, %c0_51, %c0_52] : memref<3x9x128x128xbf16, #tpu.memory_space<vmem>>, vector<1x1x128x128xbf16>
    %45 = vector.shape_cast %44 : vector<1x1x128x128xbf16> to vector<128x128xbf16>
    %cst_53 = arith.constant dense<0.000000e+00> : vector<64x128xf32>
    %46 = tpu.matmul %43, %45, %cst_53 {dimension_numbers = #tpu.dot_dimension_numbers<[1], [0], [0], [1], [0, 0, 1, 1], [], []>} : vector<64x128xbf16>, vector<128x128xbf16>, vector<64x128xf32> -> vector<64x128xf32>
    %47 = arith.addf %34, %46 : vector<64x128xf32>
    %c0_54 = arith.constant 0 : index
    %c7 = arith.constant 7 : index
    %c0_55 = arith.constant 0 : index
    %c0_56 = arith.constant 0 : index
    %48 = vector.load %arg2[%c0_54, %c7, %c0_55, %c0_56] : memref<3x9x128x128xbf16, #tpu.memory_space<vmem>>, vector<1x1x128x128xbf16>
    %49 = vector.shape_cast %48 : vector<1x1x128x128xbf16> to vector<128x128xbf16>
    %cst_57 = arith.constant dense<0.000000e+00> : vector<64x128xf32>
    %50 = tpu.matmul %43, %49, %cst_57 {dimension_numbers = #tpu.dot_dimension_numbers<[1], [0], [0], [1], [0, 0, 1, 1], [], []>} : vector<64x128xbf16>, vector<128x128xbf16>, vector<64x128xf32> -> vector<64x128xf32>
    %51 = arith.addf %38, %50 : vector<64x128xf32>
    %c0_58 = arith.constant 0 : index
    %c8 = arith.constant 8 : index
    %c0_59 = arith.constant 0 : index
    %c0_60 = arith.constant 0 : index
    %52 = vector.load %arg2[%c0_58, %c8, %c0_59, %c0_60] : memref<3x9x128x128xbf16, #tpu.memory_space<vmem>>, vector<1x1x128x128xbf16>
    %53 = vector.shape_cast %52 : vector<1x1x128x128xbf16> to vector<128x128xbf16>
    %cst_61 = arith.constant dense<0.000000e+00> : vector<64x128xf32>
    %54 = tpu.matmul %43, %53, %cst_61 {dimension_numbers = #tpu.dot_dimension_numbers<[1], [0], [0], [1], [0, 0, 1, 1], [], []>} : vector<64x128xbf16>, vector<128x128xbf16>, vector<64x128xf32> -> vector<64x128xf32>
    %55 = arith.addf %42, %54 : vector<64x128xf32>
    %c1_i32 = arith.constant 1 : i32
    %56 = tpu.dynamic_rotate %47 by %c1_i32 dim 0 : vector<64x128xf32>, i32 -> vector<64x128xf32>
    %57 = arith.mulf %56, %8 : vector<64x128xf32>
    %58 = arith.addf %51, %57 : vector<64x128xf32>
    %c63_i32 = arith.constant 63 : i32
    %59 = tpu.dynamic_rotate %55 by %c63_i32 dim 0 : vector<64x128xf32>, i32 -> vector<64x128xf32>
    %60 = arith.mulf %59, %10 : vector<64x128xf32>
    %61 = arith.addf %58, %60 : vector<64x128xf32>
    %cst_62 = arith.constant 0.000000e+00 : f32
    %62 = vector.broadcast %cst_62 : f32 to vector<64x128xf32>
    %63 = arith.maximumf %61, %62 : vector<64x128xf32>
    %c0_63 = arith.constant 0 : index
    %c0_64 = arith.constant 0 : index
    %c0_65 = arith.constant 0 : index
    %64 = vector.load %arg7[%c0_63, %c0_64, %c0_65] : memref<4x16x64xf32, #tpu.memory_space<vmem>>, vector<1x16x64xf32>
    %65 = vector.shape_cast %64 : vector<1x16x64xf32> to vector<16x64xf32>
    %cst_66 = arith.constant dense<0.000000e+00> : vector<16x128xf32>
    %66 = tpu.matmul %65, %63, %cst_66 {dimension_numbers = #tpu.dot_dimension_numbers<[1], [0], [0], [1], [0, 0, 1, 1], [], []>} : vector<16x64xf32>, vector<64x128xf32>, vector<16x128xf32> -> vector<16x128xf32>
    %c1_67 = arith.constant 1 : index
    %c0_68 = arith.constant 0 : index
    %c0_69 = arith.constant 0 : index
    %67 = vector.load %arg7[%c1_67, %c0_68, %c0_69] : memref<4x16x64xf32, #tpu.memory_space<vmem>>, vector<1x16x64xf32>
    %68 = vector.shape_cast %67 : vector<1x16x64xf32> to vector<16x64xf32>
    %cst_70 = arith.constant dense<0.000000e+00> : vector<16x128xf32>
    %69 = tpu.matmul %68, %63, %cst_70 {dimension_numbers = #tpu.dot_dimension_numbers<[1], [0], [0], [1], [0, 0, 1, 1], [], []>} : vector<16x64xf32>, vector<64x128xf32>, vector<16x128xf32> -> vector<16x128xf32>
    %70 = arith.maximumf %66, %69 : vector<16x128xf32>
    %c2_71 = arith.constant 2 : index
    %c0_72 = arith.constant 0 : index
    %c0_73 = arith.constant 0 : index
    %71 = vector.load %arg7[%c2_71, %c0_72, %c0_73] : memref<4x16x64xf32, #tpu.memory_space<vmem>>, vector<1x16x64xf32>
    %72 = vector.shape_cast %71 : vector<1x16x64xf32> to vector<16x64xf32>
    %cst_74 = arith.constant dense<0.000000e+00> : vector<16x128xf32>
    %73 = tpu.matmul %72, %63, %cst_74 {dimension_numbers = #tpu.dot_dimension_numbers<[1], [0], [0], [1], [0, 0, 1, 1], [], []>} : vector<16x64xf32>, vector<64x128xf32>, vector<16x128xf32> -> vector<16x128xf32>
    %74 = arith.maximumf %70, %73 : vector<16x128xf32>
    %c3_75 = arith.constant 3 : index
    %c0_76 = arith.constant 0 : index
    %c0_77 = arith.constant 0 : index
    %75 = vector.load %arg7[%c3_75, %c0_76, %c0_77] : memref<4x16x64xf32, #tpu.memory_space<vmem>>, vector<1x16x64xf32>
    %76 = vector.shape_cast %75 : vector<1x16x64xf32> to vector<16x64xf32>
    %cst_78 = arith.constant dense<0.000000e+00> : vector<16x128xf32>
    %77 = tpu.matmul %76, %63, %cst_78 {dimension_numbers = #tpu.dot_dimension_numbers<[1], [0], [0], [1], [0, 0, 1, 1], [], []>} : vector<16x64xf32>, vector<64x128xf32>, vector<16x128xf32> -> vector<16x128xf32>
    %78 = arith.maximumf %74, %77 : vector<16x128xf32>
    %79 = arith.truncf %78 : vector<16x128xf32> to vector<16x128xbf16>
    %c0_79 = arith.constant 0 : index
    %c0_80 = arith.constant 0 : index
    %80 = vector.load %arg15[%c0_79, %c0_80] : memref<64x128xbf16, #tpu.memory_space<vmem>>, vector<16x128xbf16>
    tpu.vector_store %arg15[%c0_79, %c0_80], %79 {strides = array<i32>} : memref<64x128xbf16, #tpu.memory_space<vmem>>, vector<16x128xbf16>,
    %cst_81 = arith.constant 0.000000e+00 : f32
    %81 = vector.broadcast %cst_81 : f32 to vector<64x128xf32>
    %82 = vector.shape_cast %12 : vector<1x128xf32> to vector<1x128xf32>
    %83 = vector.broadcast %82 : vector<1x128xf32> to vector<64x128xf32>
    %cst_82 = arith.constant 0.000000e+00 : f32
    %84 = vector.broadcast %cst_82 : f32 to vector<64x128xf32>
    %c64 = arith.constant 64 : index
    %c0_83 = arith.constant 0 : index
    %85 = vector.load %arg14[%c64, %c0_83] : memref<288x128xbf16, #tpu.memory_space<vmem>>, vector<64x128xbf16>
    %c0_84 = arith.constant 0 : index
    %c0_85 = arith.constant 0 : index
    %c0_86 = arith.constant 0 : index
    %c0_87 = arith.constant 0 : index
    %86 = vector.load %arg2[%c0_84, %c0_85, %c0_86, %c0_87] : memref<3x9x128x128xbf16, #tpu.memory_space<vmem>>, vector<1x1x128x128xbf16>
    %87 = vector.shape_cast %86 : vector<1x1x128x128xbf16> to vector<128x128xbf16>
    %cst_88 = arith.constant dense<0.000000e+00> : vector<64x128xf32>
    %88 = tpu.matmul %85, %87, %cst_88 {dimension_numbers = #tpu.dot_dimension_numbers<[1], [0], [0], [1], [0, 0, 1, 1], [], []>} : vector<64x128xbf16>, vector<128x128xbf16>, vector<64x128xf32> -> vector<64x128xf32>
    %89 = arith.addf %81, %88 : vector<64x128xf32>
    %c0_89 = arith.constant 0 : index
    %c1_90 = arith.constant 1 : index
    %c0_91 = arith.constant 0 : index
    %c0_92 = arith.constant 0 : index
    %90 = vector.load %arg2[%c0_89, %c1_90, %c0_91, %c0_92] : memref<3x9x128x128xbf16, #tpu.memory_space<vmem>>, vector<1x1x128x128xbf16>
    %91 = vector.shape_cast %90 : vector<1x1x128x128xbf16> to vector<128x128xbf16>
    %cst_93 = arith.constant dense<0.000000e+00> : vector<64x128xf32>
    %92 = tpu.matmul %85, %91, %cst_93 {dimension_numbers = #tpu.dot_dimension_numbers<[1], [0], [0], [1], [0, 0, 1, 1], [], []>} : vector<64x128xbf16>, vector<128x128xbf16>, vector<64x128xf32> -> vector<64x128xf32>
    %93 = arith.addf %83, %92 : vector<64x128xf32>
    %c0_94 = arith.constant 0 : index
    %c2_95 = arith.constant 2 : index
    %c0_96 = arith.constant 0 : index
    %c0_97 = arith.constant 0 : index
    %94 = vector.load %arg2[%c0_94, %c2_95, %c0_96, %c0_97] : memref<3x9x128x128xbf16, #tpu.memory_space<vmem>>, vector<1x1x128x128xbf16>
    %95 = vector.shape_cast %94 : vector<1x1x128x128xbf16> to vector<128x128xbf16>
    %cst_98 = arith.constant dense<0.000000e+00> : vector<64x128xf32>
    %96 = tpu.matmul %85, %95, %cst_98 {dimension_numbers = #tpu.dot_dimension_numbers<[1], [0], [0], [1], [0, 0, 1, 1], [], []>} : vector<64x128xbf16>, vector<128x128xbf16>, vector<64x128xf32> -> vector<64x128xf32>
    %97 = arith.addf %84, %96 : vector<64x128xf32>
    %c80 = arith.constant 80 : index
    %c0_99 = arith.constant 0 : index
    %98 = vector.load %arg14[%c80, %c0_99] : memref<288x128xbf16, #tpu.memory_space<vmem>>, vector<64x128xbf16>
    %c0_100 = arith.constant 0 : index
    %c3_101 = arith.constant 3 : index
    %c0_102 = arith.constant 0 : index
    %c0_103 = arith.constant 0 : index
    %99 = vector.load %arg2[%c0_100, %c3_101, %c0_102, %c0_103] : memref<3x9x128x128xbf16, #tpu.memory_space<vmem>>, vector<1x1x128x128xbf16>
    %100 = vector.shape_cast %99 : vector<1x1x128x128xbf16> to vector<128x128xbf16>
    %cst_104 = arith.constant dense<0.000000e+00> : vector<64x128xf32>
    %101 = tpu.matmul %98, %100, %cst_104 {dimension_numbers = #tpu.dot_dimension_numbers<[1], [0], [0], [1], [0, 0, 1, 1], [], []>} : vector<64x128xbf16>, vector<128x128xbf16>, vector<64x128xf32> -> vector<64x128xf32>
    %102 = arith.addf %89, %101 : vector<64x128xf32>
    %c0_105 = arith.constant 0 : index
    %c4_106 = arith.constant 4 : index
    %c0_107 = arith.constant 0 : index
    %c0_108 = arith.constant 0 : index
    %103 = vector.load %arg2[%c0_105, %c4_106, %c0_107, %c0_108] : memref<3x9x128x128xbf16, #tpu.memory_space<vmem>>, vector<1x1x128x128xbf16>
    %104 = vector.shape_cast %103 : vector<1x1x128x128xbf16> to vector<128x128xbf16>
    %cst_109 = arith.constant dense<0.000000e+00> : vector<64x128xf32>
    %105 = tpu.matmul %98, %104, %cst_109 {dimension_numbers = #tpu.dot_dimension_numbers<[1], [0], [0], [1], [0, 0, 1, 1], [], []>} : vector<64x128xbf16>, vector<128x128xbf16>, vector<64x128xf32> -> vector<64x128xf32>
    %106 = arith.addf %93, %105 : vector<64x128xf32>
    %c0_110 = arith.constant 0 : index
    %c5_111 = arith.constant 5 : index
    %c0_112 = arith.constant 0 : index
    %c0_113 = arith.constant 0 : index
    %107 = vector.load %arg2[%c0_110, %c5_111, %c0_112, %c0_113] : memref<3x9x128x128xbf16, #tpu.memory_space<vmem>>, vector<1x1x128x128xbf16>
    %108 = vector.shape_cast %107 : vector<1x1x128x128xbf16> to vector<128x128xbf16>
    %cst_114 = arith.constant dense<0.000000e+00> : vector<64x128xf32>
    %109 = tpu.matmul %98, %108, %cst_114 {dimension_numbers = #tpu.dot_dimension_numbers<[1], [0], [0], [1], [0, 0, 1, 1], [], []>} : vector<64x128xbf16>, vector<128x128xbf16>, vector<64x128xf32> -> vector<64x128xf32>
    %110 = arith.addf %97, %109 : vector<64x128xf32>
    %c96 = arith.constant 96 : index
    %c0_115 = arith.constant 0 : index
    %111 = vector.load %arg14[%c96, %c0_115] : memref<288x128xbf16, #tpu.memory_space<vmem>>, vector<64x128xbf16>
    %c0_116 = arith.constant 0 : index
    %c6_117 = arith.constant 6 : index
    %c0_118 = arith.constant 0 : index
    %c0_119 = arith.constant 0 : index
    %112 = vector.load %arg2[%c0_116, %c6_117, %c0_118, %c0_119] : memref<3x9x128x128xbf16, #tpu.memory_space<vmem>>, vector<1x1x128x128xbf16>
    %113 = vector.shape_cast %112 : vector<1x1x128x128xbf16> to vector<128x128xbf16>
    %cst_120 = arith.constant dense<0.000000e+00> : vector<64x128xf32>
    %114 = tpu.matmul %111, %113, %cst_120 {dimension_numbers = #tpu.dot_dimension_numbers<[1], [0], [0], [1], [0, 0, 1, 1], [], []>} : vector<64x128xbf16>, vector<128x128xbf16>, vector<64x128xf32> -> vector<64x128xf32>
    %115 = arith.addf %102, %114 : vector<64x128xf32>
    %c0_121 = arith.constant 0 : index
    %c7_122 = arith.constant 7 : index
    %c0_123 = arith.constant 0 : index
    %c0_124 = arith.constant 0 : index
    %116 = vector.load %arg2[%c0_121, %c7_122, %c0_123, %c0_124] : memref<3x9x128x128xbf16, #tpu.memory_space<vmem>>, vector<1x1x128x128xbf16>
    %117 = vector.shape_cast %116 : vector<1x1x128x128xbf16> to vector<128x128xbf16>
    %cst_125 = arith.constant dense<0.000000e+00> : vector<64x128xf32>
    %118 = tpu.matmul %111, %117, %cst_125 {dimension_numbers = #tpu.dot_dimension_numbers<[1], [0], [0], [1], [0, 0, 1, 1], [], []>} : vector<64x128xbf16>, vector<128x128xbf16>, vector<64x128xf32> -> vector<64x128xf32>
    %119 = arith.addf %106, %118 : vector<64x128xf32>
    %c0_126 = arith.constant 0 : index
    %c8_127 = arith.constant 8 : index
    %c0_128 = arith.constant 0 : index
    %c0_129 = arith.constant 0 : index
    %120 = vector.load %arg2[%c0_126, %c8_127, %c0_128, %c0_129] : memref<3x9x128x128xbf16, #tpu.memory_space<vmem>>, vector<1x1x128x128xbf16>
    %121 = vector.shape_cast %120 : vector<1x1x128x128xbf16> to vector<128x128xbf16>
    %cst_130 = arith.constant dense<0.000000e+00> : vector<64x128xf32>
    %122 = tpu.matmul %111, %121, %cst_130 {dimension_numbers = #tpu.dot_dimension_numbers<[1], [0], [0], [1], [0, 0, 1, 1], [], []>} : vector<64x128xbf16>, vector<128x128xbf16>, vector<64x128xf32> -> vector<64x128xf32>
    %123 = arith.addf %110, %122 : vector<64x128xf32>
    %c1_i32_131 = arith.constant 1 : i32
    %124 = tpu.dynamic_rotate %115 by %c1_i32_131 dim 0 : vector<64x128xf32>, i32 -> vector<64x128xf32>
    %125 = arith.mulf %124, %8 : vector<64x128xf32>
    %126 = arith.addf %119, %125 : vector<64x128xf32>
    %c63_i32_132 = arith.constant 63 : i32
    %127 = tpu.dynamic_rotate %123 by %c63_i32_132 dim 0 : vector<64x128xf32>, i32 -> vector<64x128xf32>
    %128 = arith.mulf %127, %10 : vector<64x128xf32>
    %129 = arith.addf %126, %128 : vector<64x128xf32>
    %cst_133 = arith.constant 0.000000e+00 : f32
    %130 = vector.broadcast %cst_133 : f32 to vector<64x128xf32>
    %131 = arith.maximumf %129, %130 : vector<64x128xf32>
    %c0_134 = arith.constant 0 : index
    %c0_135 = arith.constant 0 : index
    %c0_136 = arith.constant 0 : index
    %132 = vector.load %arg7[%c0_134, %c0_135, %c0_136] : memref<4x16x64xf32, #tpu.memory_space<vmem>>, vector<1x16x64xf32>
    %133 = vector.shape_cast %132 : vector<1x16x64xf32> to vector<16x64xf32>
    %cst_137 = arith.constant dense<0.000000e+00> : vector<16x128xf32>
    %134 = tpu.matmul %133, %131, %cst_137 {dimension_numbers = #tpu.dot_dimension_numbers<[1], [0], [0], [1], [0, 0, 1, 1], [], []>} : vector<16x64xf32>, vector<64x128xf32>, vector<16x128xf32> -> vector<16x128xf32>
    %c1_138 = arith.constant 1 : index
    %c0_139 = arith.constant 0 : index
    %c0_140 = arith.constant 0 : index
    %135 = vector.load %arg7[%c1_138, %c0_139, %c0_140] : memref<4x16x64xf32, #tpu.memory_space<vmem>>, vector<1x16x64xf32>
    %136 = vector.shape_cast %135 : vector<1x16x64xf32> to vector<16x64xf32>
    %cst_141 = arith.constant dense<0.000000e+00> : vector<16x128xf32>
    %137 = tpu.matmul %136, %131, %cst_141 {dimension_numbers = #tpu.dot_dimension_numbers<[1], [0], [0], [1], [0, 0, 1, 1], [], []>} : vector<16x64xf32>, vector<64x128xf32>, vector<16x128xf32> -> vector<16x128xf32>
    %138 = arith.maximumf %134, %137 : vector<16x128xf32>
    %c2_142 = arith.constant 2 : index
    %c0_143 = arith.constant 0 : index
    %c0_144 = arith.constant 0 : index
    %139 = vector.load %arg7[%c2_142, %c0_143, %c0_144] : memref<4x16x64xf32, #tpu.memory_space<vmem>>, vector<1x16x64xf32>
    %140 = vector.shape_cast %139 : vector<1x16x64xf32> to vector<16x64xf32>
    %cst_145 = arith.constant dense<0.000000e+00> : vector<16x128xf32>
    %141 = tpu.matmul %140, %131, %cst_145 {dimension_numbers = #tpu.dot_dimension_numbers<[1], [0], [0], [1], [0, 0, 1, 1], [], []>} : vector<16x64xf32>, vector<64x128xf32>, vector<16x128xf32> -> vector<16x128xf32>
    %142 = arith.maximumf %138, %141 : vector<16x128xf32>
    %c3_146 = arith.constant 3 : index
    %c0_147 = arith.constant 0 : index
    %c0_148 = arith.constant 0 : index
    %143 = vector.load %arg7[%c3_146, %c0_147, %c0_148] : memref<4x16x64xf32, #tpu.memory_space<vmem>>, vector<1x16x64xf32>
    %144 = vector.shape_cast %143 : vector<1x16x64xf32> to vector<16x64xf32>
    %cst_149 = arith.constant dense<0.000000e+00> : vector<16x128xf32>
    %145 = tpu.matmul %144, %131, %cst_149 {dimension_numbers = #tpu.dot_dimension_numbers<[1], [0], [0], [1], [0, 0, 1, 1], [], []>} : vector<16x64xf32>, vector<64x128xf32>, vector<16x128xf32> -> vector<16x128xf32>
    %146 = arith.maximumf %142, %145 : vector<16x128xf32>
    %147 = arith.truncf %146 : vector<16x128xf32> to vector<16x128xbf16>
    %c16_150 = arith.constant 16 : index
    %c0_151 = arith.constant 0 : index
    %148 = vector.load %arg15[%c16_150, %c0_151] : memref<64x128xbf16, #tpu.memory_space<vmem>>, vector<16x128xbf16>
    tpu.vector_store %arg15[%c16_150, %c0_151], %147 {strides = array<i32>} : memref<64x128xbf16, #tpu.memory_space<vmem>>, vector<16x128xbf16>,
    %cst_152 = arith.constant 0.000000e+00 : f32
    %149 = vector.broadcast %cst_152 : f32 to vector<64x128xf32>
    %150 = vector.shape_cast %12 : vector<1x128xf32> to vector<1x128xf32>
    %151 = vector.broadcast %150 : vector<1x128xf32> to vector<64x128xf32>
    %cst_153 = arith.constant 0.000000e+00 : f32
    %152 = vector.broadcast %cst_153 : f32 to vector<64x128xf32>
    %c128 = arith.constant 128 : index
    %c0_154 = arith.constant 0 : index
    %153 = vector.load %arg14[%c128, %c0_154] : memref<288x128xbf16, #tpu.memory_space<vmem>>, vector<64x128xbf16>
    %c0_155 = arith.constant 0 : index
    %c0_156 = arith.constant 0 : index
    %c0_157 = arith.constant 0 : index
    %c0_158 = arith.constant 0 : index
    %154 = vector.load %arg2[%c0_155, %c0_156, %c0_157, %c0_158] : memref<3x9x128x128xbf16, #tpu.memory_space<vmem>>, vector<1x1x128x128xbf16>
    %155 = vector.shape_cast %154 : vector<1x1x128x128xbf16> to vector<128x128xbf16>
    %cst_159 = arith.constant dense<0.000000e+00> : vector<64x128xf32>
    %156 = tpu.matmul %153, %155, %cst_159 {dimension_numbers = #tpu.dot_dimension_numbers<[1], [0], [0], [1], [0, 0, 1, 1], [], []>} : vector<64x128xbf16>, vector<128x128xbf16>, vector<64x128xf32> -> vector<64x128xf32>
    %157 = arith.addf %149, %156 : vector<64x128xf32>
    %c0_160 = arith.constant 0 : index
    %c1_161 = arith.constant 1 : index
    %c0_162 = arith.constant 0 : index
    %c0_163 = arith.constant 0 : index
    %158 = vector.load %arg2[%c0_160, %c1_161, %c0_162, %c0_163] : memref<3x9x128x128xbf16, #tpu.memory_space<vmem>>, vector<1x1x128x128xbf16>
    %159 = vector.shape_cast %158 : vector<1x1x128x128xbf16> to vector<128x128xbf16>
    %cst_164 = arith.constant dense<0.000000e+00> : vector<64x128xf32>
    %160 = tpu.matmul %153, %159, %cst_164 {dimension_numbers = #tpu.dot_dimension_numbers<[1], [0], [0], [1], [0, 0, 1, 1], [], []>} : vector<64x128xbf16>, vector<128x128xbf16>, vector<64x128xf32> -> vector<64x128xf32>
    %161 = arith.addf %151, %160 : vector<64x128xf32>
    %c0_165 = arith.constant 0 : index
    %c2_166 = arith.constant 2 : index
    %c0_167 = arith.constant 0 : index
    %c0_168 = arith.constant 0 : index
    %162 = vector.load %arg2[%c0_165, %c2_166, %c0_167, %c0_168] : memref<3x9x128x128xbf16, #tpu.memory_space<vmem>>, vector<1x1x128x128xbf16>
    %163 = vector.shape_cast %162 : vector<1x1x128x128xbf16> to vector<128x128xbf16>
    %cst_169 = arith.constant dense<0.000000e+00> : vector<64x128xf32>
    %164 = tpu.matmul %153, %163, %cst_169 {dimension_numbers = #tpu.dot_dimension_numbers<[1], [0], [0], [1], [0, 0, 1, 1], [], []>} : vector<64x128xbf16>, vector<128x128xbf16>, vector<64x128xf32> -> vector<64x128xf32>
    %165 = arith.addf %152, %164 : vector<64x128xf32>
    %c144 = arith.constant 144 : index
    %c0_170 = arith.constant 0 : index
    %166 = vector.load %arg14[%c144, %c0_170] : memref<288x128xbf16, #tpu.memory_space<vmem>>, vector<64x128xbf16>
    %c0_171 = arith.constant 0 : index
    %c3_172 = arith.constant 3 : index
    %c0_173 = arith.constant 0 : index
    %c0_174 = arith.constant 0 : index
    %167 = vector.load %arg2[%c0_171, %c3_172, %c0_173, %c0_174] : memref<3x9x128x128xbf16, #tpu.memory_space<vmem>>, vector<1x1x128x128xbf16>
    %168 = vector.shape_cast %167 : vector<1x1x128x128xbf16> to vector<128x128xbf16>
    %cst_175 = arith.constant dense<0.000000e+00> : vector<64x128xf32>
    %169 = tpu.matmul %166, %168, %cst_175 {dimension_numbers = #tpu.dot_dimension_numbers<[1], [0], [0], [1], [0, 0, 1, 1], [], []>} : vector<64x128xbf16>, vector<128x128xbf16>, vector<64x128xf32> -> vector<64x128xf32>
    %170 = arith.addf %157, %169 : vector<64x128xf32>
    %c0_176 = arith.constant 0 : index
    %c4_177 = arith.constant 4 : index
    %c0_178 = arith.constant 0 : index
    %c0_179 = arith.constant 0 : index
    %171 = vector.load %arg2[%c0_176, %c4_177, %c0_178, %c0_179] : memref<3x9x128x128xbf16, #tpu.memory_space<vmem>>, vector<1x1x128x128xbf16>
    %172 = vector.shape_cast %171 : vector<1x1x128x128xbf16> to vector<128x128xbf16>
    %cst_180 = arith.constant dense<0.000000e+00> : vector<64x128xf32>
    %173 = tpu.matmul %166, %172, %cst_180 {dimension_numbers = #tpu.dot_dimension_numbers<[1], [0], [0], [1], [0, 0, 1, 1], [], []>} : vector<64x128xbf16>, vector<128x128xbf16>, vector<64x128xf32> -> vector<64x128xf32>
    %174 = arith.addf %161, %173 : vector<64x128xf32>
    %c0_181 = arith.constant 0 : index
    %c5_182 = arith.constant 5 : index
    %c0_183 = arith.constant 0 : index
    %c0_184 = arith.constant 0 : index
    %175 = vector.load %arg2[%c0_181, %c5_182, %c0_183, %c0_184] : memref<3x9x128x128xbf16, #tpu.memory_space<vmem>>, vector<1x1x128x128xbf16>
    %176 = vector.shape_cast %175 : vector<1x1x128x128xbf16> to vector<128x128xbf16>
    %cst_185 = arith.constant dense<0.000000e+00> : vector<64x128xf32>
    %177 = tpu.matmul %166, %176, %cst_185 {dimension_numbers = #tpu.dot_dimension_numbers<[1], [0], [0], [1], [0, 0, 1, 1], [], []>} : vector<64x128xbf16>, vector<128x128xbf16>, vector<64x128xf32> -> vector<64x128xf32>
    %178 = arith.addf %165, %177 : vector<64x128xf32>
    %c160 = arith.constant 160 : index
    %c0_186 = arith.constant 0 : index
    %179 = vector.load %arg14[%c160, %c0_186] : memref<288x128xbf16, #tpu.memory_space<vmem>>, vector<64x128xbf16>
    %c0_187 = arith.constant 0 : index
    %c6_188 = arith.constant 6 : index
    %c0_189 = arith.constant 0 : index
    %c0_190 = arith.constant 0 : index
    %180 = vector.load %arg2[%c0_187, %c6_188, %c0_189, %c0_190] : memref<3x9x128x128xbf16, #tpu.memory_space<vmem>>, vector<1x1x128x128xbf16>
    %181 = vector.shape_cast %180 : vector<1x1x128x128xbf16> to vector<128x128xbf16>
    %cst_191 = arith.constant dense<0.000000e+00> : vector<64x128xf32>
    %182 = tpu.matmul %179, %181, %cst_191 {dimension_numbers = #tpu.dot_dimension_numbers<[1], [0], [0], [1], [0, 0, 1, 1], [], []>} : vector<64x128xbf16>, vector<128x128xbf16>, vector<64x128xf32> -> vector<64x128xf32>
    %183 = arith.addf %170, %182 : vector<64x128xf32>
    %c0_192 = arith.constant 0 : index
    %c7_193 = arith.constant 7 : index
    %c0_194 = arith.constant 0 : index
    %c0_195 = arith.constant 0 : index
    %184 = vector.load %arg2[%c0_192, %c7_193, %c0_194, %c0_195] : memref<3x9x128x128xbf16, #tpu.memory_space<vmem>>, vector<1x1x128x128xbf16>
    %185 = vector.shape_cast %184 : vector<1x1x128x128xbf16> to vector<128x128xbf16>
    %cst_196 = arith.constant dense<0.000000e+00> : vector<64x128xf32>
    %186 = tpu.matmul %179, %185, %cst_196 {dimension_numbers = #tpu.dot_dimension_numbers<[1], [0], [0], [1], [0, 0, 1, 1], [], []>} : vector<64x128xbf16>, vector<128x128xbf16>, vector<64x128xf32> -> vector<64x128xf32>
    %187 = arith.addf %174, %186 : vector<64x128xf32>
    %c0_197 = arith.constant 0 : index
    %c8_198 = arith.constant 8 : index
    %c0_199 = arith.constant 0 : index
    %c0_200 = arith.constant 0 : index
    %188 = vector.load %arg2[%c0_197, %c8_198, %c0_199, %c0_200] : memref<3x9x128x128xbf16, #tpu.memory_space<vmem>>, vector<1x1x128x128xbf16>
    %189 = vector.shape_cast %188 : vector<1x1x128x128xbf16> to vector<128x128xbf16>
    %cst_201 = arith.constant dense<0.000000e+00> : vector<64x128xf32>
    %190 = tpu.matmul %179, %189, %cst_201 {dimension_numbers = #tpu.dot_dimension_numbers<[1], [0], [0], [1], [0, 0, 1, 1], [], []>} : vector<64x128xbf16>, vector<128x128xbf16>, vector<64x128xf32> -> vector<64x128xf32>
    %191 = arith.addf %178, %190 : vector<64x128xf32>
    %c1_i32_202 = arith.constant 1 : i32
    %192 = tpu.dynamic_rotate %183 by %c1_i32_202 dim 0 : vector<64x128xf32>, i32 -> vector<64x128xf32>
    %193 = arith.mulf %192, %8 : vector<64x128xf32>
    %194 = arith.addf %187, %193 : vector<64x128xf32>
    %c63_i32_203 = arith.constant 63 : i32
    %195 = tpu.dynamic_rotate %191 by %c63_i32_203 dim 0 : vector<64x128xf32>, i32 -> vector<64x128xf32>
    %196 = arith.mulf %195, %10 : vector<64x128xf32>
    %197 = arith.addf %194, %196 : vector<64x128xf32>
    %cst_204 = arith.constant 0.000000e+00 : f32
    %198 = vector.broadcast %cst_204 : f32 to vector<64x128xf32>
    %199 = arith.maximumf %197, %198 : vector<64x128xf32>
    %c0_205 = arith.constant 0 : index
    %c0_206 = arith.constant 0 : index
    %c0_207 = arith.constant 0 : index
    %200 = vector.load %arg7[%c0_205, %c0_206, %c0_207] : memref<4x16x64xf32, #tpu.memory_space<vmem>>, vector<1x16x64xf32>
    %201 = vector.shape_cast %200 : vector<1x16x64xf32> to vector<16x64xf32>
    %cst_208 = arith.constant dense<0.000000e+00> : vector<16x128xf32>
    %202 = tpu.matmul %201, %199, %cst_208 {dimension_numbers = #tpu.dot_dimension_numbers<[1], [0], [0], [1], [0, 0, 1, 1], [], []>} : vector<16x64xf32>, vector<64x128xf32>, vector<16x128xf32> -> vector<16x128xf32>
    %c1_209 = arith.constant 1 : index
    %c0_210 = arith.constant 0 : index
    %c0_211 = arith.constant 0 : index
    %203 = vector.load %arg7[%c1_209, %c0_210, %c0_211] : memref<4x16x64xf32, #tpu.memory_space<vmem>>, vector<1x16x64xf32>
    %204 = vector.shape_cast %203 : vector<1x16x64xf32> to vector<16x64xf32>
    %cst_212 = arith.constant dense<0.000000e+00> : vector<16x128xf32>
    %205 = tpu.matmul %204, %199, %cst_212 {dimension_numbers = #tpu.dot_dimension_numbers<[1], [0], [0], [1], [0, 0, 1, 1], [], []>} : vector<16x64xf32>, vector<64x128xf32>, vector<16x128xf32> -> vector<16x128xf32>
    %206 = arith.maximumf %202, %205 : vector<16x128xf32>
    %c2_213 = arith.constant 2 : index
    %c0_214 = arith.constant 0 : index
    %c0_215 = arith.constant 0 : index
    %207 = vector.load %arg7[%c2_213, %c0_214, %c0_215] : memref<4x16x64xf32, #tpu.memory_space<vmem>>, vector<1x16x64xf32>
    %208 = vector.shape_cast %207 : vector<1x16x64xf32> to vector<16x64xf32>
    %cst_216 = arith.constant dense<0.000000e+00> : vector<16x128xf32>
    %209 = tpu.matmul %208, %199, %cst_216 {dimension_numbers = #tpu.dot_dimension_numbers<[1], [0], [0], [1], [0, 0, 1, 1], [], []>} : vector<16x64xf32>, vector<64x128xf32>, vector<16x128xf32> -> vector<16x128xf32>
    %210 = arith.maximumf %206, %209 : vector<16x128xf32>
    %c3_217 = arith.constant 3 : index
    %c0_218 = arith.constant 0 : index
    %c0_219 = arith.constant 0 : index
    %211 = vector.load %arg7[%c3_217, %c0_218, %c0_219] : memref<4x16x64xf32, #tpu.memory_space<vmem>>, vector<1x16x64xf32>
    %212 = vector.shape_cast %211 : vector<1x16x64xf32> to vector<16x64xf32>
    %cst_220 = arith.constant dense<0.000000e+00> : vector<16x128xf32>
    %213 = tpu.matmul %212, %199, %cst_220 {dimension_numbers = #tpu.dot_dimension_numbers<[1], [0], [0], [1], [0, 0, 1, 1], [], []>} : vector<16x64xf32>, vector<64x128xf32>, vector<16x128xf32> -> vector<16x128xf32>
    %214 = arith.maximumf %210, %213 : vector<16x128xf32>
    %215 = arith.truncf %214 : vector<16x128xf32> to vector<16x128xbf16>
    %c32_221 = arith.constant 32 : index
    %c0_222 = arith.constant 0 : index
    %216 = vector.load %arg15[%c32_221, %c0_222] : memref<64x128xbf16, #tpu.memory_space<vmem>>, vector<16x128xbf16>
    tpu.vector_store %arg15[%c32_221, %c0_222], %215 {strides = array<i32>} : memref<64x128xbf16, #tpu.memory_space<vmem>>, vector<16x128xbf16>,
    %cst_223 = arith.constant 0.000000e+00 : f32
    %217 = vector.broadcast %cst_223 : f32 to vector<64x128xf32>
    %218 = vector.shape_cast %12 : vector<1x128xf32> to vector<1x128xf32>
    %219 = vector.broadcast %218 : vector<1x128xf32> to vector<64x128xf32>
    %cst_224 = arith.constant 0.000000e+00 : f32
    %220 = vector.broadcast %cst_224 : f32 to vector<64x128xf32>
    %c192 = arith.constant 192 : index
    %c0_225 = arith.constant 0 : index
    %221 = vector.load %arg14[%c192, %c0_225] : memref<288x128xbf16, #tpu.memory_space<vmem>>, vector<64x128xbf16>
    %c0_226 = arith.constant 0 : index
    %c0_227 = arith.constant 0 : index
    %c0_228 = arith.constant 0 : index
    %c0_229 = arith.constant 0 : index
    %222 = vector.load %arg2[%c0_226, %c0_227, %c0_228, %c0_229] : memref<3x9x128x128xbf16, #tpu.memory_space<vmem>>, vector<1x1x128x128xbf16>
    %223 = vector.shape_cast %222 : vector<1x1x128x128xbf16> to vector<128x128xbf16>
    %cst_230 = arith.constant dense<0.000000e+00> : vector<64x128xf32>
    %224 = tpu.matmul %221, %223, %cst_230 {dimension_numbers = #tpu.dot_dimension_numbers<[1], [0], [0], [1], [0, 0, 1, 1], [], []>} : vector<64x128xbf16>, vector<128x128xbf16>, vector<64x128xf32> -> vector<64x128xf32>
    %225 = arith.addf %217, %224 : vector<64x128xf32>
    %c0_231 = arith.constant 0 : index
    %c1_232 = arith.constant 1 : index
    %c0_233 = arith.constant 0 : index
    %c0_234 = arith.constant 0 : index
    %226 = vector.load %arg2[%c0_231, %c1_232, %c0_233, %c0_234] : memref<3x9x128x128xbf16, #tpu.memory_space<vmem>>, vector<1x1x128x128xbf16>
    %227 = vector.shape_cast %226 : vector<1x1x128x128xbf16> to vector<128x128xbf16>
    %cst_235 = arith.constant dense<0.000000e+00> : vector<64x128xf32>
    %228 = tpu.matmul %221, %227, %cst_235 {dimension_numbers = #tpu.dot_dimension_numbers<[1], [0], [0], [1], [0, 0, 1, 1], [], []>} : vector<64x128xbf16>, vector<128x128xbf16>, vector<64x128xf32> -> vector<64x128xf32>
    %229 = arith.addf %219, %228 : vector<64x128xf32>
    %c0_236 = arith.constant 0 : index
    %c2_237 = arith.constant 2 : index
    %c0_238 = arith.constant 0 : index
    %c0_239 = arith.constant 0 : index
    %230 = vector.load %arg2[%c0_236, %c2_237, %c0_238, %c0_239] : memref<3x9x128x128xbf16, #tpu.memory_space<vmem>>, vector<1x1x128x128xbf16>
    %231 = vector.shape_cast %230 : vector<1x1x128x128xbf16> to vector<128x128xbf16>
    %cst_240 = arith.constant dense<0.000000e+00> : vector<64x128xf32>
    %232 = tpu.matmul %221, %231, %cst_240 {dimension_numbers = #tpu.dot_dimension_numbers<[1], [0], [0], [1], [0, 0, 1, 1], [], []>} : vector<64x128xbf16>, vector<128x128xbf16>, vector<64x128xf32> -> vector<64x128xf32>
    %233 = arith.addf %220, %232 : vector<64x128xf32>
    %c208 = arith.constant 208 : index
    %c0_241 = arith.constant 0 : index
    %234 = vector.load %arg14[%c208, %c0_241] : memref<288x128xbf16, #tpu.memory_space<vmem>>, vector<64x128xbf16>
    %c0_242 = arith.constant 0 : index
    %c3_243 = arith.constant 3 : index
    %c0_244 = arith.constant 0 : index
    %c0_245 = arith.constant 0 : index
    %235 = vector.load %arg2[%c0_242, %c3_243, %c0_244, %c0_245] : memref<3x9x128x128xbf16, #tpu.memory_space<vmem>>, vector<1x1x128x128xbf16>
    %236 = vector.shape_cast %235 : vector<1x1x128x128xbf16> to vector<128x128xbf16>
    %cst_246 = arith.constant dense<0.000000e+00> : vector<64x128xf32>
    %237 = tpu.matmul %234, %236, %cst_246 {dimension_numbers = #tpu.dot_dimension_numbers<[1], [0], [0], [1], [0, 0, 1, 1], [], []>} : vector<64x128xbf16>, vector<128x128xbf16>, vector<64x128xf32> -> vector<64x128xf32>
    %238 = arith.addf %225, %237 : vector<64x128xf32>
    %c0_247 = arith.constant 0 : index
    %c4_248 = arith.constant 4 : index
    %c0_249 = arith.constant 0 : index
    %c0_250 = arith.constant 0 : index
    %239 = vector.load %arg2[%c0_247, %c4_248, %c0_249, %c0_250] : memref<3x9x128x128xbf16, #tpu.memory_space<vmem>>, vector<1x1x128x128xbf16>
    %240 = vector.shape_cast %239 : vector<1x1x128x128xbf16> to vector<128x128xbf16>
    %cst_251 = arith.constant dense<0.000000e+00> : vector<64x128xf32>
    %241 = tpu.matmul %234, %240, %cst_251 {dimension_numbers = #tpu.dot_dimension_numbers<[1], [0], [0], [1], [0, 0, 1, 1], [], []>} : vector<64x128xbf16>, vector<128x128xbf16>, vector<64x128xf32> -> vector<64x128xf32>
    %242 = arith.addf %229, %241 : vector<64x128xf32>
    %c0_252 = arith.constant 0 : index
    %c5_253 = arith.constant 5 : index
    %c0_254 = arith.constant 0 : index
    %c0_255 = arith.constant 0 : index
    %243 = vector.load %arg2[%c0_252, %c5_253, %c0_254, %c0_255] : memref<3x9x128x128xbf16, #tpu.memory_space<vmem>>, vector<1x1x128x128xbf16>
    %244 = vector.shape_cast %243 : vector<1x1x128x128xbf16> to vector<128x128xbf16>
    %cst_256 = arith.constant dense<0.000000e+00> : vector<64x128xf32>
    %245 = tpu.matmul %234, %244, %cst_256 {dimension_numbers = #tpu.dot_dimension_numbers<[1], [0], [0], [1], [0, 0, 1, 1], [], []>} : vector<64x128xbf16>, vector<128x128xbf16>, vector<64x128xf32> -> vector<64x128xf32>
    %246 = arith.addf %233, %245 : vector<64x128xf32>
    %c224 = arith.constant 224 : index
    %c0_257 = arith.constant 0 : index
    %247 = vector.load %arg14[%c224, %c0_257] : memref<288x128xbf16, #tpu.memory_space<vmem>>, vector<64x128xbf16>
    %c0_258 = arith.constant 0 : index
    %c6_259 = arith.constant 6 : index
    %c0_260 = arith.constant 0 : index
    %c0_261 = arith.constant 0 : index
    %248 = vector.load %arg2[%c0_258, %c6_259, %c0_260, %c0_261] : memref<3x9x128x128xbf16, #tpu.memory_space<vmem>>, vector<1x1x128x128xbf16>
    %249 = vector.shape_cast %248 : vector<1x1x128x128xbf16> to vector<128x128xbf16>
    %cst_262 = arith.constant dense<0.000000e+00> : vector<64x128xf32>
    %250 = tpu.matmul %247, %249, %cst_262 {dimension_numbers = #tpu.dot_dimension_numbers<[1], [0], [0], [1], [0, 0, 1, 1], [], []>} : vector<64x128xbf16>, vector<128x128xbf16>, vector<64x128xf32> -> vector<64x128xf32>
    %251 = arith.addf %238, %250 : vector<64x128xf32>
    %c0_263 = arith.constant 0 : index
    %c7_264 = arith.constant 7 : index
    %c0_265 = arith.constant 0 : index
    %c0_266 = arith.constant 0 : index
    %252 = vector.load %arg2[%c0_263, %c7_264, %c0_265, %c0_266] : memref<3x9x128x128xbf16, #tpu.memory_space<vmem>>, vector<1x1x128x128xbf16>
    %253 = vector.shape_cast %252 : vector<1x1x128x128xbf16> to vector<128x128xbf16>
    %cst_267 = arith.constant dense<0.000000e+00> : vector<64x128xf32>
    %254 = tpu.matmul %247, %253, %cst_267 {dimension_numbers = #tpu.dot_dimension_numbers<[1], [0], [0], [1], [0, 0, 1, 1], [], []>} : vector<64x128xbf16>, vector<128x128xbf16>, vector<64x128xf32> -> vector<64x128xf32>
    %255 = arith.addf %242, %254 : vector<64x128xf32>
    %c0_268 = arith.constant 0 : index
    %c8_269 = arith.constant 8 : index
    %c0_270 = arith.constant 0 : index
    %c0_271 = arith.constant 0 : index
    %256 = vector.load %arg2[%c0_268, %c8_269, %c0_270, %c0_271] : memref<3x9x128x128xbf16, #tpu.memory_space<vmem>>, vector<1x1x128x128xbf16>
    %257 = vector.shape_cast %256 : vector<1x1x128x128xbf16> to vector<128x128xbf16>
    %cst_272 = arith.constant dense<0.000000e+00> : vector<64x128xf32>
    %258 = tpu.matmul %247, %257, %cst_272 {dimension_numbers = #tpu.dot_dimension_numbers<[1], [0], [0], [1], [0, 0, 1, 1], [], []>} : vector<64x128xbf16>, vector<128x128xbf16>, vector<64x128xf32> -> vector<64x128xf32>
    %259 = arith.addf %246, %258 : vector<64x128xf32>
    %c1_i32_273 = arith.constant 1 : i32
    %260 = tpu.dynamic_rotate %251 by %c1_i32_273 dim 0 : vector<64x128xf32>, i32 -> vector<64x128xf32>
    %261 = arith.mulf %260, %8 : vector<64x128xf32>
    %262 = arith.addf %255, %261 : vector<64x128xf32>
    %c63_i32_274 = arith.constant 63 : i32
    %263 = tpu.dynamic_rotate %259 by %c63_i32_274 dim 0 : vector<64x128xf32>, i32 -> vector<64x128xf32>
    %264 = arith.mulf %263, %10 : vector<64x128xf32>
    %265 = arith.addf %262, %264 : vector<64x128xf32>
    %cst_275 = arith.constant 0.000000e+00 : f32
    %266 = vector.broadcast %cst_275 : f32 to vector<64x128xf32>
    %267 = arith.maximumf %265, %266 : vector<64x128xf32>
    %c0_276 = arith.constant 0 : index
    %c0_277 = arith.constant 0 : index
    %c0_278 = arith.constant 0 : index
    %268 = vector.load %arg7[%c0_276, %c0_277, %c0_278] : memref<4x16x64xf32, #tpu.memory_space<vmem>>, vector<1x16x64xf32>
    %269 = vector.shape_cast %268 : vector<1x16x64xf32> to vector<16x64xf32>
    %cst_279 = arith.constant dense<0.000000e+00> : vector<16x128xf32>
    %270 = tpu.matmul %269, %267, %cst_279 {dimension_numbers = #tpu.dot_dimension_numbers<[1], [0], [0], [1], [0, 0, 1, 1], [], []>} : vector<16x64xf32>, vector<64x128xf32>, vector<16x128xf32> -> vector<16x128xf32>
    %c1_280 = arith.constant 1 : index
    %c0_281 = arith.constant 0 : index
    %c0_282 = arith.constant 0 : index
    %271 = vector.load %arg7[%c1_280, %c0_281, %c0_282] : memref<4x16x64xf32, #tpu.memory_space<vmem>>, vector<1x16x64xf32>
    %272 = vector.shape_cast %271 : vector<1x16x64xf32> to vector<16x64xf32>
    %cst_283 = arith.constant dense<0.000000e+00> : vector<16x128xf32>
    %273 = tpu.matmul %272, %267, %cst_283 {dimension_numbers = #tpu.dot_dimension_numbers<[1], [0], [0], [1], [0, 0, 1, 1], [], []>} : vector<16x64xf32>, vector<64x128xf32>, vector<16x128xf32> -> vector<16x128xf32>
    %274 = arith.maximumf %270, %273 : vector<16x128xf32>
    %c2_284 = arith.constant 2 : index
    %c0_285 = arith.constant 0 : index
    %c0_286 = arith.constant 0 : index
    %275 = vector.load %arg7[%c2_284, %c0_285, %c0_286] : memref<4x16x64xf32, #tpu.memory_space<vmem>>, vector<1x16x64xf32>
    %276 = vector.shape_cast %275 : vector<1x16x64xf32> to vector<16x64xf32>
    %cst_287 = arith.constant dense<0.000000e+00> : vector<16x128xf32>
    %277 = tpu.matmul %276, %267, %cst_287 {dimension_numbers = #tpu.dot_dimension_numbers<[1], [0], [0], [1], [0, 0, 1, 1], [], []>} : vector<16x64xf32>, vector<64x128xf32>, vector<16x128xf32> -> vector<16x128xf32>
    %278 = arith.maximumf %274, %277 : vector<16x128xf32>
    %c3_288 = arith.constant 3 : index
    %c0_289 = arith.constant 0 : index
    %c0_290 = arith.constant 0 : index
    %279 = vector.load %arg7[%c3_288, %c0_289, %c0_290] : memref<4x16x64xf32, #tpu.memory_space<vmem>>, vector<1x16x64xf32>
    %280 = vector.shape_cast %279 : vector<1x16x64xf32> to vector<16x64xf32>
    %cst_291 = arith.constant dense<0.000000e+00> : vector<16x128xf32>
    %281 = tpu.matmul %280, %267, %cst_291 {dimension_numbers = #tpu.dot_dimension_numbers<[1], [0], [0], [1], [0, 0, 1, 1], [], []>} : vector<16x64xf32>, vector<64x128xf32>, vector<16x128xf32> -> vector<16x128xf32>
    %282 = arith.maximumf %278, %281 : vector<16x128xf32>
    %283 = arith.truncf %282 : vector<16x128xf32> to vector<16x128xbf16>
    %c48 = arith.constant 48 : index
    %c0_292 = arith.constant 0 : index
    %284 = vector.load %arg15[%c48, %c0_292] : memref<64x128xbf16, #tpu.memory_space<vmem>>, vector<16x128xbf16>
    tpu.vector_store %arg15[%c48, %c0_292], %283 {strides = array<i32>} : memref<64x128xbf16, #tpu.memory_space<vmem>>, vector<16x128xbf16>,
    %cst_293 = arith.constant 0.000000e+00 : bf16
    %285 = vector.broadcast %cst_293 : bf16 to vector<16x128xbf16>
    %c0_294 = arith.constant 0 : index
    %c0_295 = arith.constant 0 : index
    %286 = vector.load %arg14[%c0_294, %c0_295] : memref<288x128xbf16, #tpu.memory_space<vmem>>, vector<16x128xbf16>
    tpu.vector_store %arg14[%c0_294, %c0_295], %285 {strides = array<i32>} : memref<288x128xbf16, #tpu.memory_space<vmem>>, vector<16x128xbf16>,
    %cst_296 = arith.constant 0.000000e+00 : bf16
    %287 = vector.broadcast %cst_296 : bf16 to vector<16x128xbf16>
    %c80_297 = arith.constant 80 : index
    %c0_298 = arith.constant 0 : index
    %288 = vector.load %arg14[%c80_297, %c0_298] : memref<288x128xbf16, #tpu.memory_space<vmem>>, vector<16x128xbf16>
    tpu.vector_store %arg14[%c80_297, %c0_298], %287 {strides = array<i32>} : memref<288x128xbf16, #tpu.memory_space<vmem>>, vector<16x128xbf16>,
    %c0_299 = arith.constant 0 : index
    %c0_300 = arith.constant 0 : index
    %289 = vector.load %arg15[%c0_299, %c0_300] : memref<64x128xbf16, #tpu.memory_space<vmem>>, vector<64x128xbf16>
    %c16_301 = arith.constant 16 : index
    %c0_302 = arith.constant 0 : index
    %290 = vector.load %arg14[%c16_301, %c0_302] : memref<288x128xbf16, #tpu.memory_space<vmem>>, vector<64x128xbf16>
    tpu.vector_store %arg14[%c16_301, %c0_302], %289 {strides = array<i32>} : memref<288x128xbf16, #tpu.memory_space<vmem>>, vector<64x128xbf16>,
    %c1_303 = arith.constant 1 : index
    %c0_304 = arith.constant 0 : index
    %c0_305 = arith.constant 0 : index
    %c0_306 = arith.constant 0 : index
    %291 = vector.load %arg6[%c1_303, %c0_304, %c0_305, %c0_306] : memref<3x2x64x128xf32, #tpu.memory_space<vmem>>, vector<1x1x64x128xf32>
    %292 = vector.shape_cast %291 : vector<1x1x64x128xf32> to vector<64x128xf32>
    %c1_307 = arith.constant 1 : index
    %c1_308 = arith.constant 1 : index
    %c0_309 = arith.constant 0 : index
    %c0_310 = arith.constant 0 : index
    %293 = vector.load %arg6[%c1_307, %c1_308, %c0_309, %c0_310] : memref<3x2x64x128xf32, #tpu.memory_space<vmem>>, vector<1x1x64x128xf32>
    %294 = vector.shape_cast %293 : vector<1x1x64x128xf32> to vector<64x128xf32>
    %c1_311 = arith.constant 1 : index
    %c0_312 = arith.constant 0 : index
    %c0_313 = arith.constant 0 : index
    %295 = vector.load %arg3[%c1_311, %c0_312, %c0_313] : memref<3x1x128xf32, #tpu.memory_space<vmem>>, vector<1x1x128xf32>
    %296 = vector.shape_cast %295 : vector<1x1x128xf32> to vector<1x128xf32>
    %cst_314 = arith.constant 0.000000e+00 : f32
    %297 = vector.broadcast %cst_314 : f32 to vector<64x128xf32>
    %298 = vector.shape_cast %296 : vector<1x128xf32> to vector<1x128xf32>
    %299 = vector.broadcast %298 : vector<1x128xf32> to vector<64x128xf32>
    %cst_315 = arith.constant 0.000000e+00 : f32
    %300 = vector.broadcast %cst_315 : f32 to vector<64x128xf32>
    %c8_316 = arith.constant 8 : index
    %c0_317 = arith.constant 0 : index
    %301 = vector.load %arg14[%c8_316, %c0_317] : memref<288x128xbf16, #tpu.memory_space<vmem>>, vector<64x128xbf16>
    %c1_318 = arith.constant 1 : index
    %c0_319 = arith.constant 0 : index
    %c0_320 = arith.constant 0 : index
    %c0_321 = arith.constant 0 : index
    %302 = vector.load %arg2[%c1_318, %c0_319, %c0_320, %c0_321] : memref<3x9x128x128xbf16, #tpu.memory_space<vmem>>, vector<1x1x128x128xbf16>
    %303 = vector.shape_cast %302 : vector<1x1x128x128xbf16> to vector<128x128xbf16>
    %cst_322 = arith.constant dense<0.000000e+00> : vector<64x128xf32>
    %304 = tpu.matmul %301, %303, %cst_322 {dimension_numbers = #tpu.dot_dimension_numbers<[1], [0], [0], [1], [0, 0, 1, 1], [], []>} : vector<64x128xbf16>, vector<128x128xbf16>, vector<64x128xf32> -> vector<64x128xf32>
    %305 = arith.addf %297, %304 : vector<64x128xf32>
    %c1_323 = arith.constant 1 : index
    %c1_324 = arith.constant 1 : index
    %c0_325 = arith.constant 0 : index
    %c0_326 = arith.constant 0 : index
    %306 = vector.load %arg2[%c1_323, %c1_324, %c0_325, %c0_326] : memref<3x9x128x128xbf16, #tpu.memory_space<vmem>>, vector<1x1x128x128xbf16>
    %307 = vector.shape_cast %306 : vector<1x1x128x128xbf16> to vector<128x128xbf16>
    %cst_327 = arith.constant dense<0.000000e+00> : vector<64x128xf32>
    %308 = tpu.matmul %301, %307, %cst_327 {dimension_numbers = #tpu.dot_dimension_numbers<[1], [0], [0], [1], [0, 0, 1, 1], [], []>} : vector<64x128xbf16>, vector<128x128xbf16>, vector<64x128xf32> -> vector<64x128xf32>
    %309 = arith.addf %299, %308 : vector<64x128xf32>
    %c1_328 = arith.constant 1 : index
    %c2_329 = arith.constant 2 : index
    %c0_330 = arith.constant 0 : index
    %c0_331 = arith.constant 0 : index
    %310 = vector.load %arg2[%c1_328, %c2_329, %c0_330, %c0_331] : memref<3x9x128x128xbf16, #tpu.memory_space<vmem>>, vector<1x1x128x128xbf16>
    %311 = vector.shape_cast %310 : vector<1x1x128x128xbf16> to vector<128x128xbf16>
    %cst_332 = arith.constant dense<0.000000e+00> : vector<64x128xf32>
    %312 = tpu.matmul %301, %311, %cst_332 {dimension_numbers = #tpu.dot_dimension_numbers<[1], [0], [0], [1], [0, 0, 1, 1], [], []>} : vector<64x128xbf16>, vector<128x128xbf16>, vector<64x128xf32> -> vector<64x128xf32>
    %313 = arith.addf %300, %312 : vector<64x128xf32>
    %c16_333 = arith.constant 16 : index
    %c0_334 = arith.constant 0 : index
    %314 = vector.load %arg14[%c16_333, %c0_334] : memref<288x128xbf16, #tpu.memory_space<vmem>>, vector<64x128xbf16>
    %c1_335 = arith.constant 1 : index
    %c3_336 = arith.constant 3 : index
    %c0_337 = arith.constant 0 : index
    %c0_338 = arith.constant 0 : index
    %315 = vector.load %arg2[%c1_335, %c3_336, %c0_337, %c0_338] : memref<3x9x128x128xbf16, #tpu.memory_space<vmem>>, vector<1x1x128x128xbf16>
    %316 = vector.shape_cast %315 : vector<1x1x128x128xbf16> to vector<128x128xbf16>
    %cst_339 = arith.constant dense<0.000000e+00> : vector<64x128xf32>
    %317 = tpu.matmul %314, %316, %cst_339 {dimension_numbers = #tpu.dot_dimension_numbers<[1], [0], [0], [1], [0, 0, 1, 1], [], []>} : vector<64x128xbf16>, vector<128x128xbf16>, vector<64x128xf32> -> vector<64x128xf32>
    %318 = arith.addf %305, %317 : vector<64x128xf32>
    %c1_340 = arith.constant 1 : index
    %c4_341 = arith.constant 4 : index
    %c0_342 = arith.constant 0 : index
    %c0_343 = arith.constant 0 : index
    %319 = vector.load %arg2[%c1_340, %c4_341, %c0_342, %c0_343] : memref<3x9x128x128xbf16, #tpu.memory_space<vmem>>, vector<1x1x128x128xbf16>
    %320 = vector.shape_cast %319 : vector<1x1x128x128xbf16> to vector<128x128xbf16>
    %cst_344 = arith.constant dense<0.000000e+00> : vector<64x128xf32>
    %321 = tpu.matmul %314, %320, %cst_344 {dimension_numbers = #tpu.dot_dimension_numbers<[1], [0], [0], [1], [0, 0, 1, 1], [], []>} : vector<64x128xbf16>, vector<128x128xbf16>, vector<64x128xf32> -> vector<64x128xf32>
    %322 = arith.addf %309, %321 : vector<64x128xf32>
    %c1_345 = arith.constant 1 : index
    %c5_346 = arith.constant 5 : index
    %c0_347 = arith.constant 0 : index
    %c0_348 = arith.constant 0 : index
    %323 = vector.load %arg2[%c1_345, %c5_346, %c0_347, %c0_348] : memref<3x9x128x128xbf16, #tpu.memory_space<vmem>>, vector<1x1x128x128xbf16>
    %324 = vector.shape_cast %323 : vector<1x1x128x128xbf16> to vector<128x128xbf16>
    %cst_349 = arith.constant dense<0.000000e+00> : vector<64x128xf32>
    %325 = tpu.matmul %314, %324, %cst_349 {dimension_numbers = #tpu.dot_dimension_numbers<[1], [0], [0], [1], [0, 0, 1, 1], [], []>} : vector<64x128xbf16>, vector<128x128xbf16>, vector<64x128xf32> -> vector<64x128xf32>
    %326 = arith.addf %313, %325 : vector<64x128xf32>
    %c24 = arith.constant 24 : index
    %c0_350 = arith.constant 0 : index
    %327 = vector.load %arg14[%c24, %c0_350] : memref<288x128xbf16, #tpu.memory_space<vmem>>, vector<64x128xbf16>
    %c1_351 = arith.constant 1 : index
    %c6_352 = arith.constant 6 : index
    %c0_353 = arith.constant 0 : index
    %c0_354 = arith.constant 0 : index
    %328 = vector.load %arg2[%c1_351, %c6_352, %c0_353, %c0_354] : memref<3x9x128x128xbf16, #tpu.memory_space<vmem>>, vector<1x1x128x128xbf16>
    %329 = vector.shape_cast %328 : vector<1x1x128x128xbf16> to vector<128x128xbf16>
    %cst_355 = arith.constant dense<0.000000e+00> : vector<64x128xf32>
    %330 = tpu.matmul %327, %329, %cst_355 {dimension_numbers = #tpu.dot_dimension_numbers<[1], [0], [0], [1], [0, 0, 1, 1], [], []>} : vector<64x128xbf16>, vector<128x128xbf16>, vector<64x128xf32> -> vector<64x128xf32>
    %331 = arith.addf %318, %330 : vector<64x128xf32>
    %c1_356 = arith.constant 1 : index
    %c7_357 = arith.constant 7 : index
    %c0_358 = arith.constant 0 : index
    %c0_359 = arith.constant 0 : index
    %332 = vector.load %arg2[%c1_356, %c7_357, %c0_358, %c0_359] : memref<3x9x128x128xbf16, #tpu.memory_space<vmem>>, vector<1x1x128x128xbf16>
    %333 = vector.shape_cast %332 : vector<1x1x128x128xbf16> to vector<128x128xbf16>
    %cst_360 = arith.constant dense<0.000000e+00> : vector<64x128xf32>
    %334 = tpu.matmul %327, %333, %cst_360 {dimension_numbers = #tpu.dot_dimension_numbers<[1], [0], [0], [1], [0, 0, 1, 1], [], []>} : vector<64x128xbf16>, vector<128x128xbf16>, vector<64x128xf32> -> vector<64x128xf32>
    %335 = arith.addf %322, %334 : vector<64x128xf32>
    %c1_361 = arith.constant 1 : index
    %c8_362 = arith.constant 8 : index
    %c0_363 = arith.constant 0 : index
    %c0_364 = arith.constant 0 : index
    %336 = vector.load %arg2[%c1_361, %c8_362, %c0_363, %c0_364] : memref<3x9x128x128xbf16, #tpu.memory_space<vmem>>, vector<1x1x128x128xbf16>
    %337 = vector.shape_cast %336 : vector<1x1x128x128xbf16> to vector<128x128xbf16>
    %cst_365 = arith.constant dense<0.000000e+00> : vector<64x128xf32>
    %338 = tpu.matmul %327, %337, %cst_365 {dimension_numbers = #tpu.dot_dimension_numbers<[1], [0], [0], [1], [0, 0, 1, 1], [], []>} : vector<64x128xbf16>, vector<128x128xbf16>, vector<64x128xf32> -> vector<64x128xf32>
    %339 = arith.addf %326, %338 : vector<64x128xf32>
    %c1_i32_366 = arith.constant 1 : i32
    %340 = tpu.dynamic_rotate %331 by %c1_i32_366 dim 0 : vector<64x128xf32>, i32 -> vector<64x128xf32>
    %341 = arith.mulf %340, %292 : vector<64x128xf32>
    %342 = arith.addf %335, %341 : vector<64x128xf32>
    %c63_i32_367 = arith.constant 63 : i32
    %343 = tpu.dynamic_rotate %339 by %c63_i32_367 dim 0 : vector<64x128xf32>, i32 -> vector<64x128xf32>
    %344 = arith.mulf %343, %294 : vector<64x128xf32>
    %345 = arith.addf %342, %344 : vector<64x128xf32>
    %cst_368 = arith.constant 0.000000e+00 : f32
    %346 = vector.broadcast %cst_368 : f32 to vector<64x128xf32>
    %347 = arith.maximumf %345, %346 : vector<64x128xf32>
    %c0_369 = arith.constant 0 : index
    %c0_370 = arith.constant 0 : index
    %c0_371 = arith.constant 0 : index
    %348 = vector.load %arg8[%c0_369, %c0_370, %c0_371] : memref<4x16x64xf32, #tpu.memory_space<vmem>>, vector<1x16x64xf32>
    %349 = vector.shape_cast %348 : vector<1x16x64xf32> to vector<16x64xf32>
    %cst_372 = arith.constant dense<0.000000e+00> : vector<16x128xf32>
    %350 = tpu.matmul %349, %347, %cst_372 {dimension_numbers = #tpu.dot_dimension_numbers<[1], [0], [0], [1], [0, 0, 1, 1], [], []>} : vector<16x64xf32>, vector<64x128xf32>, vector<16x128xf32> -> vector<16x128xf32>
    %c1_373 = arith.constant 1 : index
    %c0_374 = arith.constant 0 : index
    %c0_375 = arith.constant 0 : index
    %351 = vector.load %arg8[%c1_373, %c0_374, %c0_375] : memref<4x16x64xf32, #tpu.memory_space<vmem>>, vector<1x16x64xf32>
    %352 = vector.shape_cast %351 : vector<1x16x64xf32> to vector<16x64xf32>
    %cst_376 = arith.constant dense<0.000000e+00> : vector<16x128xf32>
    %353 = tpu.matmul %352, %347, %cst_376 {dimension_numbers = #tpu.dot_dimension_numbers<[1], [0], [0], [1], [0, 0, 1, 1], [], []>} : vector<16x64xf32>, vector<64x128xf32>, vector<16x128xf32> -> vector<16x128xf32>
    %354 = arith.maximumf %350, %353 : vector<16x128xf32>
    %c2_377 = arith.constant 2 : index
    %c0_378 = arith.constant 0 : index
    %c0_379 = arith.constant 0 : index
    %355 = vector.load %arg8[%c2_377, %c0_378, %c0_379] : memref<4x16x64xf32, #tpu.memory_space<vmem>>, vector<1x16x64xf32>
    %356 = vector.shape_cast %355 : vector<1x16x64xf32> to vector<16x64xf32>
    %cst_380 = arith.constant dense<0.000000e+00> : vector<16x128xf32>
    %357 = tpu.matmul %356, %347, %cst_380 {dimension_numbers = #tpu.dot_dimension_numbers<[1], [0], [0], [1], [0, 0, 1, 1], [], []>} : vector<16x64xf32>, vector<64x128xf32>, vector<16x128xf32> -> vector<16x128xf32>
    %358 = arith.maximumf %354, %357 : vector<16x128xf32>
    %c3_381 = arith.constant 3 : index
    %c0_382 = arith.constant 0 : index
    %c0_383 = arith.constant 0 : index
    %359 = vector.load %arg8[%c3_381, %c0_382, %c0_383] : memref<4x16x64xf32, #tpu.memory_space<vmem>>, vector<1x16x64xf32>
    %360 = vector.shape_cast %359 : vector<1x16x64xf32> to vector<16x64xf32>
    %cst_384 = arith.constant dense<0.000000e+00> : vector<16x128xf32>
    %361 = tpu.matmul %360, %347, %cst_384 {dimension_numbers = #tpu.dot_dimension_numbers<[1], [0], [0], [1], [0, 0, 1, 1], [], []>} : vector<16x64xf32>, vector<64x128xf32>, vector<16x128xf32> -> vector<16x128xf32>
    %362 = arith.maximumf %358, %361 : vector<16x128xf32>
    %363 = arith.truncf %362 : vector<16x128xf32> to vector<16x128xbf16>
    %c0_385 = arith.constant 0 : index
    %c0_386 = arith.constant 0 : index
    %364 = vector.load %arg15[%c0_385, %c0_386] : memref<64x128xbf16, #tpu.memory_space<vmem>>, vector<16x128xbf16>
    tpu.vector_store %arg15[%c0_385, %c0_386], %363 {strides = array<i32>} : memref<64x128xbf16, #tpu.memory_space<vmem>>, vector<16x128xbf16>,
    %cst_387 = arith.constant 0.000000e+00 : bf16
    %365 = vector.broadcast %cst_387 : bf16 to vector<16x128xbf16>
    %c0_388 = arith.constant 0 : index
    %c0_389 = arith.constant 0 : index
    %366 = vector.load %arg14[%c0_388, %c0_389] : memref<288x128xbf16, #tpu.memory_space<vmem>>, vector<16x128xbf16>
    tpu.vector_store %arg14[%c0_388, %c0_389], %365 {strides = array<i32>} : memref<288x128xbf16, #tpu.memory_space<vmem>>, vector<16x128xbf16>,
    %cst_390 = arith.constant 0.000000e+00 : bf16
    %367 = vector.broadcast %cst_390 : bf16 to vector<16x128xbf16>
    %c32_391 = arith.constant 32 : index
    %c0_392 = arith.constant 0 : index
    %368 = vector.load %arg14[%c32_391, %c0_392] : memref<288x128xbf16, #tpu.memory_space<vmem>>, vector<16x128xbf16>
    tpu.vector_store %arg14[%c32_391, %c0_392], %367 {strides = array<i32>} : memref<288x128xbf16, #tpu.memory_space<vmem>>, vector<16x128xbf16>,
    %c0_393 = arith.constant 0 : index
    %c0_394 = arith.constant 0 : index
    %369 = vector.load %arg15[%c0_393, %c0_394] : memref<64x128xbf16, #tpu.memory_space<vmem>>, vector<16x128xbf16>
    %c16_395 = arith.constant 16 : index
    %c0_396 = arith.constant 0 : index
    %370 = vector.load %arg14[%c16_395, %c0_396] : memref<288x128xbf16, #tpu.memory_space<vmem>>, vector<16x128xbf16>
    tpu.vector_store %arg14[%c16_395, %c0_396], %369 {strides = array<i32>} : memref<288x128xbf16, #tpu.memory_space<vmem>>, vector<16x128xbf16>,
    %c2_397 = arith.constant 2 : index
    %c0_398 = arith.constant 0 : index
    %c0_399 = arith.constant 0 : index
    %c0_400 = arith.constant 0 : index
    %371 = vector.load %arg6[%c2_397, %c0_398, %c0_399, %c0_400] : memref<3x2x64x128xf32, #tpu.memory_space<vmem>>, vector<1x1x16x128xf32>
    %372 = vector.shape_cast %371 : vector<1x1x16x128xf32> to vector<16x128xf32>
    %c2_401 = arith.constant 2 : index
    %c1_402 = arith.constant 1 : index
    %c0_403 = arith.constant 0 : index
    %c0_404 = arith.constant 0 : index
    %373 = vector.load %arg6[%c2_401, %c1_402, %c0_403, %c0_404] : memref<3x2x64x128xf32, #tpu.memory_space<vmem>>, vector<1x1x16x128xf32>
    %374 = vector.shape_cast %373 : vector<1x1x16x128xf32> to vector<16x128xf32>
    %c2_405 = arith.constant 2 : index
    %c0_406 = arith.constant 0 : index
    %c0_407 = arith.constant 0 : index
    %375 = vector.load %arg3[%c2_405, %c0_406, %c0_407] : memref<3x1x128xf32, #tpu.memory_space<vmem>>, vector<1x1x128xf32>
    %376 = vector.shape_cast %375 : vector<1x1x128xf32> to vector<1x128xf32>
    %cst_408 = arith.constant 0.000000e+00 : f32
    %377 = vector.broadcast %cst_408 : f32 to vector<16x128xf32>
    %378 = vector.shape_cast %376 : vector<1x128xf32> to vector<1x128xf32>
    %379 = vector.broadcast %378 : vector<1x128xf32> to vector<16x128xf32>
    %cst_409 = arith.constant 0.000000e+00 : f32
    %380 = vector.broadcast %cst_409 : f32 to vector<16x128xf32>
    %c12 = arith.constant 12 : index
    %c0_410 = arith.constant 0 : index
    %381 = vector.load %arg14[%c12, %c0_410] : memref<288x128xbf16, #tpu.memory_space<vmem>>, vector<16x128xbf16>
    %c2_411 = arith.constant 2 : index
    %c0_412 = arith.constant 0 : index
    %c0_413 = arith.constant 0 : index
    %c0_414 = arith.constant 0 : index
    %382 = vector.load %arg2[%c2_411, %c0_412, %c0_413, %c0_414] : memref<3x9x128x128xbf16, #tpu.memory_space<vmem>>, vector<1x1x128x128xbf16>
    %383 = vector.shape_cast %382 : vector<1x1x128x128xbf16> to vector<128x128xbf16>
    %cst_415 = arith.constant dense<0.000000e+00> : vector<16x128xf32>
    %384 = tpu.matmul %381, %383, %cst_415 {dimension_numbers = #tpu.dot_dimension_numbers<[1], [0], [0], [1], [0, 0, 1, 1], [], []>} : vector<16x128xbf16>, vector<128x128xbf16>, vector<16x128xf32> -> vector<16x128xf32>
    %385 = arith.addf %377, %384 : vector<16x128xf32>
    %c2_416 = arith.constant 2 : index
    %c1_417 = arith.constant 1 : index
    %c0_418 = arith.constant 0 : index
    %c0_419 = arith.constant 0 : index
    %386 = vector.load %arg2[%c2_416, %c1_417, %c0_418, %c0_419] : memref<3x9x128x128xbf16, #tpu.memory_space<vmem>>, vector<1x1x128x128xbf16>
    %387 = vector.shape_cast %386 : vector<1x1x128x128xbf16> to vector<128x128xbf16>
    %cst_420 = arith.constant dense<0.000000e+00> : vector<16x128xf32>
    %388 = tpu.matmul %381, %387, %cst_420 {dimension_numbers = #tpu.dot_dimension_numbers<[1], [0], [0], [1], [0, 0, 1, 1], [], []>} : vector<16x128xbf16>, vector<128x128xbf16>, vector<16x128xf32> -> vector<16x128xf32>
    %389 = arith.addf %379, %388 : vector<16x128xf32>
    %c2_421 = arith.constant 2 : index
    %c2_422 = arith.constant 2 : index
    %c0_423 = arith.constant 0 : index
    %c0_424 = arith.constant 0 : index
    %390 = vector.load %arg2[%c2_421, %c2_422, %c0_423, %c0_424] : memref<3x9x128x128xbf16, #tpu.memory_space<vmem>>, vector<1x1x128x128xbf16>
    %391 = vector.shape_cast %390 : vector<1x1x128x128xbf16> to vector<128x128xbf16>
    %cst_425 = arith.constant dense<0.000000e+00> : vector<16x128xf32>
    %392 = tpu.matmul %381, %391, %cst_425 {dimension_numbers = #tpu.dot_dimension_numbers<[1], [0], [0], [1], [0, 0, 1, 1], [], []>} : vector<16x128xbf16>, vector<128x128xbf16>, vector<16x128xf32> -> vector<16x128xf32>
    %393 = arith.addf %380, %392 : vector<16x128xf32>
    %c16_426 = arith.constant 16 : index
    %c0_427 = arith.constant 0 : index
    %394 = vector.load %arg14[%c16_426, %c0_427] : memref<288x128xbf16, #tpu.memory_space<vmem>>, vector<16x128xbf16>
    %c2_428 = arith.constant 2 : index
    %c3_429 = arith.constant 3 : index
    %c0_430 = arith.constant 0 : index
    %c0_431 = arith.constant 0 : index
    %395 = vector.load %arg2[%c2_428, %c3_429, %c0_430, %c0_431] : memref<3x9x128x128xbf16, #tpu.memory_space<vmem>>, vector<1x1x128x128xbf16>
    %396 = vector.shape_cast %395 : vector<1x1x128x128xbf16> to vector<128x128xbf16>
    %cst_432 = arith.constant dense<0.000000e+00> : vector<16x128xf32>
    %397 = tpu.matmul %394, %396, %cst_432 {dimension_numbers = #tpu.dot_dimension_numbers<[1], [0], [0], [1], [0, 0, 1, 1], [], []>} : vector<16x128xbf16>, vector<128x128xbf16>, vector<16x128xf32> -> vector<16x128xf32>
    %398 = arith.addf %385, %397 : vector<16x128xf32>
    %c2_433 = arith.constant 2 : index
    %c4_434 = arith.constant 4 : index
    %c0_435 = arith.constant 0 : index
    %c0_436 = arith.constant 0 : index
    %399 = vector.load %arg2[%c2_433, %c4_434, %c0_435, %c0_436] : memref<3x9x128x128xbf16, #tpu.memory_space<vmem>>, vector<1x1x128x128xbf16>
    %400 = vector.shape_cast %399 : vector<1x1x128x128xbf16> to vector<128x128xbf16>
    %cst_437 = arith.constant dense<0.000000e+00> : vector<16x128xf32>
    %401 = tpu.matmul %394, %400, %cst_437 {dimension_numbers = #tpu.dot_dimension_numbers<[1], [0], [0], [1], [0, 0, 1, 1], [], []>} : vector<16x128xbf16>, vector<128x128xbf16>, vector<16x128xf32> -> vector<16x128xf32>
    %402 = arith.addf %389, %401 : vector<16x128xf32>
    %c2_438 = arith.constant 2 : index
    %c5_439 = arith.constant 5 : index
    %c0_440 = arith.constant 0 : index
    %c0_441 = arith.constant 0 : index
    %403 = vector.load %arg2[%c2_438, %c5_439, %c0_440, %c0_441] : memref<3x9x128x128xbf16, #tpu.memory_space<vmem>>, vector<1x1x128x128xbf16>
    %404 = vector.shape_cast %403 : vector<1x1x128x128xbf16> to vector<128x128xbf16>
    %cst_442 = arith.constant dense<0.000000e+00> : vector<16x128xf32>
    %405 = tpu.matmul %394, %404, %cst_442 {dimension_numbers = #tpu.dot_dimension_numbers<[1], [0], [0], [1], [0, 0, 1, 1], [], []>} : vector<16x128xbf16>, vector<128x128xbf16>, vector<16x128xf32> -> vector<16x128xf32>
    %406 = arith.addf %393, %405 : vector<16x128xf32>
    %c20 = arith.constant 20 : index
    %c0_443 = arith.constant 0 : index
    %407 = vector.load %arg14[%c20, %c0_443] : memref<288x128xbf16, #tpu.memory_space<vmem>>, vector<16x128xbf16>
    %c2_444 = arith.constant 2 : index
    %c6_445 = arith.constant 6 : index
    %c0_446 = arith.constant 0 : index
    %c0_447 = arith.constant 0 : index
    %408 = vector.load %arg2[%c2_444, %c6_445, %c0_446, %c0_447] : memref<3x9x128x128xbf16, #tpu.memory_space<vmem>>, vector<1x1x128x128xbf16>
    %409 = vector.shape_cast %408 : vector<1x1x128x128xbf16> to vector<128x128xbf16>
    %cst_448 = arith.constant dense<0.000000e+00> : vector<16x128xf32>
    %410 = tpu.matmul %407, %409, %cst_448 {dimension_numbers = #tpu.dot_dimension_numbers<[1], [0], [0], [1], [0, 0, 1, 1], [], []>} : vector<16x128xbf16>, vector<128x128xbf16>, vector<16x128xf32> -> vector<16x128xf32>
    %411 = arith.addf %398, %410 : vector<16x128xf32>
    %c2_449 = arith.constant 2 : index
    %c7_450 = arith.constant 7 : index
    %c0_451 = arith.constant 0 : index
    %c0_452 = arith.constant 0 : index
    %412 = vector.load %arg2[%c2_449, %c7_450, %c0_451, %c0_452] : memref<3x9x128x128xbf16, #tpu.memory_space<vmem>>, vector<1x1x128x128xbf16>
    %413 = vector.shape_cast %412 : vector<1x1x128x128xbf16> to vector<128x128xbf16>
    %cst_453 = arith.constant dense<0.000000e+00> : vector<16x128xf32>
    %414 = tpu.matmul %407, %413, %cst_453 {dimension_numbers = #tpu.dot_dimension_numbers<[1], [0], [0], [1], [0, 0, 1, 1], [], []>} : vector<16x128xbf16>, vector<128x128xbf16>, vector<16x128xf32> -> vector<16x128xf32>
    %415 = arith.addf %402, %414 : vector<16x128xf32>
    %c2_454 = arith.constant 2 : index
    %c8_455 = arith.constant 8 : index
    %c0_456 = arith.constant 0 : index
    %c0_457 = arith.constant 0 : index
    %416 = vector.load %arg2[%c2_454, %c8_455, %c0_456, %c0_457] : memref<3x9x128x128xbf16, #tpu.memory_space<vmem>>, vector<1x1x128x128xbf16>
    %417 = vector.shape_cast %416 : vector<1x1x128x128xbf16> to vector<128x128xbf16>
    %cst_458 = arith.constant dense<0.000000e+00> : vector<16x128xf32>
    %418 = tpu.matmul %407, %417, %cst_458 {dimension_numbers = #tpu.dot_dimension_numbers<[1], [0], [0], [1], [0, 0, 1, 1], [], []>} : vector<16x128xbf16>, vector<128x128xbf16>, vector<16x128xf32> -> vector<16x128xf32>
    %419 = arith.addf %406, %418 : vector<16x128xf32>
    %c1_i32_459 = arith.constant 1 : i32
    %420 = tpu.dynamic_rotate %411 by %c1_i32_459 dim 0 : vector<16x128xf32>, i32 -> vector<16x128xf32>
    %421 = arith.mulf %420, %372 : vector<16x128xf32>
    %422 = arith.addf %415, %421 : vector<16x128xf32>
    %c15_i32 = arith.constant 15 : i32
    %423 = tpu.dynamic_rotate %419 by %c15_i32 dim 0 : vector<16x128xf32>, i32 -> vector<16x128xf32>
    %424 = arith.mulf %423, %374 : vector<16x128xf32>
    %425 = arith.addf %422, %424 : vector<16x128xf32>
    %cst_460 = arith.constant 0.000000e+00 : f32
    %426 = vector.broadcast %cst_460 : f32 to vector<16x128xf32>
    %427 = arith.maximumf %425, %426 : vector<16x128xf32>
    %c0_461 = arith.constant 0 : index
    %c0_462 = arith.constant 0 : index
    %c0_463 = arith.constant 0 : index
    %428 = vector.load %arg9[%c0_461, %c0_462, %c0_463] : memref<4x4x16xf32, #tpu.memory_space<vmem>>, vector<1x4x16xf32>
    %429 = vector.shape_cast %428 : vector<1x4x16xf32> to vector<4x16xf32>
    %cst_464 = arith.constant dense<0.000000e+00> : vector<4x128xf32>
    %430 = tpu.matmul %429, %427, %cst_464 {dimension_numbers = #tpu.dot_dimension_numbers<[1], [0], [0], [1], [0, 0, 1, 1], [], []>} : vector<4x16xf32>, vector<16x128xf32>, vector<4x128xf32> -> vector<4x128xf32>
    %c1_465 = arith.constant 1 : index
    %c0_466 = arith.constant 0 : index
    %c0_467 = arith.constant 0 : index
    %431 = vector.load %arg9[%c1_465, %c0_466, %c0_467] : memref<4x4x16xf32, #tpu.memory_space<vmem>>, vector<1x4x16xf32>
    %432 = vector.shape_cast %431 : vector<1x4x16xf32> to vector<4x16xf32>
    %cst_468 = arith.constant dense<0.000000e+00> : vector<4x128xf32>
    %433 = tpu.matmul %432, %427, %cst_468 {dimension_numbers = #tpu.dot_dimension_numbers<[1], [0], [0], [1], [0, 0, 1, 1], [], []>} : vector<4x16xf32>, vector<16x128xf32>, vector<4x128xf32> -> vector<4x128xf32>
    %434 = arith.maximumf %430, %433 : vector<4x128xf32>
    %c2_469 = arith.constant 2 : index
    %c0_470 = arith.constant 0 : index
    %c0_471 = arith.constant 0 : index
    %435 = vector.load %arg9[%c2_469, %c0_470, %c0_471] : memref<4x4x16xf32, #tpu.memory_space<vmem>>, vector<1x4x16xf32>
    %436 = vector.shape_cast %435 : vector<1x4x16xf32> to vector<4x16xf32>
    %cst_472 = arith.constant dense<0.000000e+00> : vector<4x128xf32>
    %437 = tpu.matmul %436, %427, %cst_472 {dimension_numbers = #tpu.dot_dimension_numbers<[1], [0], [0], [1], [0, 0, 1, 1], [], []>} : vector<4x16xf32>, vector<16x128xf32>, vector<4x128xf32> -> vector<4x128xf32>
    %438 = arith.maximumf %434, %437 : vector<4x128xf32>
    %c3_473 = arith.constant 3 : index
    %c0_474 = arith.constant 0 : index
    %c0_475 = arith.constant 0 : index
    %439 = vector.load %arg9[%c3_473, %c0_474, %c0_475] : memref<4x4x16xf32, #tpu.memory_space<vmem>>, vector<1x4x16xf32>
    %440 = vector.shape_cast %439 : vector<1x4x16xf32> to vector<4x16xf32>
    %cst_476 = arith.constant dense<0.000000e+00> : vector<4x128xf32>
    %441 = tpu.matmul %440, %427, %cst_476 {dimension_numbers = #tpu.dot_dimension_numbers<[1], [0], [0], [1], [0, 0, 1, 1], [], []>} : vector<4x16xf32>, vector<16x128xf32>, vector<4x128xf32> -> vector<4x128xf32>
    %442 = arith.maximumf %438, %441 : vector<4x128xf32>
    %443 = arith.truncf %442 : vector<4x128xf32> to vector<4x128xbf16>
    %c0_477 = arith.constant 0 : index
    %c0_478 = arith.constant 0 : index
    %444 = vector.load %arg15[%c0_477, %c0_478] : memref<64x128xbf16, #tpu.memory_space<vmem>>, vector<4x128xbf16>
    tpu.vector_store %arg15[%c0_477, %c0_478], %443 {strides = array<i32>} : memref<64x128xbf16, #tpu.memory_space<vmem>>, vector<4x128xbf16>,
    %c0_479 = arith.constant 0 : index
    %c0_480 = arith.constant 0 : index
    %445 = vector.load %arg15[%c0_479, %c0_480] : memref<64x128xbf16, #tpu.memory_space<vmem>>, vector<4x128xbf16>
    %c0_481 = arith.constant 0 : index
    %c0_482 = arith.constant 0 : index
    %c0_483 = arith.constant 0 : index
    %446 = vector.load %arg4[%c0_481, %c0_482, %c0_483] : memref<3x128x512xbf16, #tpu.memory_space<vmem>>, vector<1x128x512xbf16>
    %447 = vector.shape_cast %446 : vector<1x128x512xbf16> to vector<128x512xbf16>
    %cst_484 = arith.constant dense<0.000000e+00> : vector<4x512xf32>
    %448 = tpu.matmul %445, %447, %cst_484 {dimension_numbers = #tpu.dot_dimension_numbers<[1], [0], [0], [1], [0, 0, 1, 1], [], []>} : vector<4x128xbf16>, vector<128x512xbf16>, vector<4x512xf32> -> vector<4x512xf32>
    %c0_485 = arith.constant 0 : index
    %c0_486 = arith.constant 0 : index
    %c0_487 = arith.constant 0 : index
    %449 = vector.load %arg5[%c0_485, %c0_486, %c0_487] : memref<3x1x128xf32, #tpu.memory_space<vmem>>, vector<1x1x128xf32>
    %450 = vector.shape_cast %449 : vector<1x1x128xf32> to vector<1x128xf32>
    %451 = vector.shape_cast %450 : vector<1x128xf32> to vector<1x128xf32>
    %452 = vector.broadcast %451 : vector<1x128xf32> to vector<16x128xf32>
    %c0_488 = arith.constant 0 : index
    %c0_489 = arith.constant 0 : index
    %c0_490 = arith.constant 0 : index
    %453 = vector.load %arg10[%c0_488, %c0_489, %c0_490] : memref<4x16x4xf32, #tpu.memory_space<vmem>>, vector<1x16x4xf32>
    %454 = vector.shape_cast %453 : vector<1x16x4xf32> to vector<16x4xf32>
    %455 = vector.extract_strided_slice %448 {offsets = [0, 0], sizes = [4, 128], strides = [1, 1]} : vector<4x512xf32> to vector<4x128xf32>
    %cst_491 = arith.constant dense<0.000000e+00> : vector<16x128xf32>
    %456 = tpu.matmul %454, %455, %cst_491 {dimension_numbers = #tpu.dot_dimension_numbers<[1], [0], [0], [1], [0, 0, 1, 1], [], []>} : vector<16x4xf32>, vector<4x128xf32>, vector<16x128xf32> -> vector<16x128xf32>
    %457 = arith.addf %452, %456 : vector<16x128xf32>
    %c1_492 = arith.constant 1 : index
    %c0_493 = arith.constant 0 : index
    %c0_494 = arith.constant 0 : index
    %458 = vector.load %arg10[%c1_492, %c0_493, %c0_494] : memref<4x16x4xf32, #tpu.memory_space<vmem>>, vector<1x16x4xf32>
    %459 = vector.shape_cast %458 : vector<1x16x4xf32> to vector<16x4xf32>
    %460 = vector.extract_strided_slice %448 {offsets = [0, 128], sizes = [4, 128], strides = [1, 1]} : vector<4x512xf32> to vector<4x128xf32>
    %cst_495 = arith.constant dense<0.000000e+00> : vector<16x128xf32>
    %461 = tpu.matmul %459, %460, %cst_495 {dimension_numbers = #tpu.dot_dimension_numbers<[1], [0], [0], [1], [0, 0, 1, 1], [], []>} : vector<16x4xf32>, vector<4x128xf32>, vector<16x128xf32> -> vector<16x128xf32>
    %462 = arith.addf %457, %461 : vector<16x128xf32>
    %c2_496 = arith.constant 2 : index
    %c0_497 = arith.constant 0 : index
    %c0_498 = arith.constant 0 : index
    %463 = vector.load %arg10[%c2_496, %c0_497, %c0_498] : memref<4x16x4xf32, #tpu.memory_space<vmem>>, vector<1x16x4xf32>
    %464 = vector.shape_cast %463 : vector<1x16x4xf32> to vector<16x4xf32>
    %465 = vector.extract_strided_slice %448 {offsets = [0, 256], sizes = [4, 128], strides = [1, 1]} : vector<4x512xf32> to vector<4x128xf32>
    %cst_499 = arith.constant dense<0.000000e+00> : vector<16x128xf32>
    %466 = tpu.matmul %464, %465, %cst_499 {dimension_numbers = #tpu.dot_dimension_numbers<[1], [0], [0], [1], [0, 0, 1, 1], [], []>} : vector<16x4xf32>, vector<4x128xf32>, vector<16x128xf32> -> vector<16x128xf32>
    %467 = arith.addf %462, %466 : vector<16x128xf32>
    %c3_500 = arith.constant 3 : index
    %c0_501 = arith.constant 0 : index
    %c0_502 = arith.constant 0 : index
    %468 = vector.load %arg10[%c3_500, %c0_501, %c0_502] : memref<4x16x4xf32, #tpu.memory_space<vmem>>, vector<1x16x4xf32>
    %469 = vector.shape_cast %468 : vector<1x16x4xf32> to vector<16x4xf32>
    %470 = vector.extract_strided_slice %448 {offsets = [0, 384], sizes = [4, 128], strides = [1, 1]} : vector<4x512xf32> to vector<4x128xf32>
    %cst_503 = arith.constant dense<0.000000e+00> : vector<16x128xf32>
    %471 = tpu.matmul %469, %470, %cst_503 {dimension_numbers = #tpu.dot_dimension_numbers<[1], [0], [0], [1], [0, 0, 1, 1], [], []>} : vector<16x4xf32>, vector<4x128xf32>, vector<16x128xf32> -> vector<16x128xf32>
    %472 = arith.addf %467, %471 : vector<16x128xf32>
    %cst_504 = arith.constant 0.000000e+00 : f32
    %473 = vector.broadcast %cst_504 : f32 to vector<16x128xf32>
    %474 = arith.maximumf %472, %473 : vector<16x128xf32>
    %475 = arith.truncf %474 : vector<16x128xf32> to vector<16x128xbf16>
    %c1_505 = arith.constant 1 : index
    %c0_506 = arith.constant 0 : index
    %c0_507 = arith.constant 0 : index
    %476 = vector.load %arg4[%c1_505, %c0_506, %c0_507] : memref<3x128x512xbf16, #tpu.memory_space<vmem>>, vector<1x128x512xbf16>
    %477 = vector.shape_cast %476 : vector<1x128x512xbf16> to vector<128x512xbf16>
    %cst_508 = arith.constant dense<0.000000e+00> : vector<16x512xf32>
    %478 = tpu.matmul %475, %477, %cst_508 {dimension_numbers = #tpu.dot_dimension_numbers<[1], [0], [0], [1], [0, 0, 1, 1], [], []>} : vector<16x128xbf16>, vector<128x512xbf16>, vector<16x512xf32> -> vector<16x512xf32>
    %c1_509 = arith.constant 1 : index
    %c0_510 = arith.constant 0 : index
    %c0_511 = arith.constant 0 : index
    %479 = vector.load %arg5[%c1_509, %c0_510, %c0_511] : memref<3x1x128xf32, #tpu.memory_space<vmem>>, vector<1x1x128xf32>
    %480 = vector.shape_cast %479 : vector<1x1x128xf32> to vector<1x128xf32>
    %481 = vector.shape_cast %480 : vector<1x128xf32> to vector<1x128xf32>
    %482 = vector.broadcast %481 : vector<1x128xf32> to vector<64x128xf32>
    %c0_512 = arith.constant 0 : index
    %c0_513 = arith.constant 0 : index
    %c0_514 = arith.constant 0 : index
    %483 = vector.load %arg11[%c0_512, %c0_513, %c0_514] : memref<4x64x16xf32, #tpu.memory_space<vmem>>, vector<1x64x16xf32>
    %484 = vector.shape_cast %483 : vector<1x64x16xf32> to vector<64x16xf32>
    %485 = vector.extract_strided_slice %478 {offsets = [0, 0], sizes = [16, 128], strides = [1, 1]} : vector<16x512xf32> to vector<16x128xf32>
    %cst_515 = arith.constant dense<0.000000e+00> : vector<64x128xf32>
    %486 = tpu.matmul %484, %485, %cst_515 {dimension_numbers = #tpu.dot_dimension_numbers<[1], [0], [0], [1], [0, 0, 1, 1], [], []>} : vector<64x16xf32>, vector<16x128xf32>, vector<64x128xf32> -> vector<64x128xf32>
    %487 = arith.addf %482, %486 : vector<64x128xf32>
    %c1_516 = arith.constant 1 : index
    %c0_517 = arith.constant 0 : index
    %c0_518 = arith.constant 0 : index
    %488 = vector.load %arg11[%c1_516, %c0_517, %c0_518] : memref<4x64x16xf32, #tpu.memory_space<vmem>>, vector<1x64x16xf32>
    %489 = vector.shape_cast %488 : vector<1x64x16xf32> to vector<64x16xf32>
    %490 = vector.extract_strided_slice %478 {offsets = [0, 128], sizes = [16, 128], strides = [1, 1]} : vector<16x512xf32> to vector<16x128xf32>
    %cst_519 = arith.constant dense<0.000000e+00> : vector<64x128xf32>
    %491 = tpu.matmul %489, %490, %cst_519 {dimension_numbers = #tpu.dot_dimension_numbers<[1], [0], [0], [1], [0, 0, 1, 1], [], []>} : vector<64x16xf32>, vector<16x128xf32>, vector<64x128xf32> -> vector<64x128xf32>
    %492 = arith.addf %487, %491 : vector<64x128xf32>
    %c2_520 = arith.constant 2 : index
    %c0_521 = arith.constant 0 : index
    %c0_522 = arith.constant 0 : index
    %493 = vector.load %arg11[%c2_520, %c0_521, %c0_522] : memref<4x64x16xf32, #tpu.memory_space<vmem>>, vector<1x64x16xf32>
    %494 = vector.shape_cast %493 : vector<1x64x16xf32> to vector<64x16xf32>
    %495 = vector.extract_strided_slice %478 {offsets = [0, 256], sizes = [16, 128], strides = [1, 1]} : vector<16x512xf32> to vector<16x128xf32>
    %cst_523 = arith.constant dense<0.000000e+00> : vector<64x128xf32>
    %496 = tpu.matmul %494, %495, %cst_523 {dimension_numbers = #tpu.dot_dimension_numbers<[1], [0], [0], [1], [0, 0, 1, 1], [], []>} : vector<64x16xf32>, vector<16x128xf32>, vector<64x128xf32> -> vector<64x128xf32>
    %497 = arith.addf %492, %496 : vector<64x128xf32>
    %c3_524 = arith.constant 3 : index
    %c0_525 = arith.constant 0 : index
    %c0_526 = arith.constant 0 : index
    %498 = vector.load %arg11[%c3_524, %c0_525, %c0_526] : memref<4x64x16xf32, #tpu.memory_space<vmem>>, vector<1x64x16xf32>
    %499 = vector.shape_cast %498 : vector<1x64x16xf32> to vector<64x16xf32>
    %500 = vector.extract_strided_slice %478 {offsets = [0, 384], sizes = [16, 128], strides = [1, 1]} : vector<16x512xf32> to vector<16x128xf32>
    %cst_527 = arith.constant dense<0.000000e+00> : vector<64x128xf32>
    %501 = tpu.matmul %499, %500, %cst_527 {dimension_numbers = #tpu.dot_dimension_numbers<[1], [0], [0], [1], [0, 0, 1, 1], [], []>} : vector<64x16xf32>, vector<16x128xf32>, vector<64x128xf32> -> vector<64x128xf32>
    %502 = arith.addf %497, %501 : vector<64x128xf32>
    %cst_528 = arith.constant 0.000000e+00 : f32
    %503 = vector.broadcast %cst_528 : f32 to vector<64x128xf32>
    %504 = arith.maximumf %502, %503 : vector<64x128xf32>
    %505 = arith.truncf %504 : vector<64x128xf32> to vector<64x128xbf16>
    %c2_529 = arith.constant 2 : index
    %c0_530 = arith.constant 0 : index
    %c0_531 = arith.constant 0 : index
    %506 = vector.load %arg4[%c2_529, %c0_530, %c0_531] : memref<3x128x512xbf16, #tpu.memory_space<vmem>>, vector<1x128x512xbf16>
    %507 = vector.shape_cast %506 : vector<1x128x512xbf16> to vector<128x512xbf16>
    %cst_532 = arith.constant dense<0.000000e+00> : vector<64x512xf32>
    %508 = tpu.matmul %505, %507, %cst_532 {dimension_numbers = #tpu.dot_dimension_numbers<[1], [0], [0], [1], [0, 0, 1, 1], [], []>} : vector<64x128xbf16>, vector<128x512xbf16>, vector<64x512xf32> -> vector<64x512xf32>
    %c2_533 = arith.constant 2 : index
    %c0_534 = arith.constant 0 : index
    %c0_535 = arith.constant 0 : index
    %509 = vector.load %arg5[%c2_533, %c0_534, %c0_535] : memref<3x1x128xf32, #tpu.memory_space<vmem>>, vector<1x1x128xf32>
    %510 = vector.shape_cast %509 : vector<1x1x128xf32> to vector<1x128xf32>
    %511 = vector.shape_cast %510 : vector<1x128xf32> to vector<1x128xf32>
    %512 = vector.broadcast %511 : vector<1x128xf32> to vector<128x128xf32>
    %c0_536 = arith.constant 0 : index
    %c0_537 = arith.constant 0 : index
    %c0_538 = arith.constant 0 : index
    %513 = vector.load %arg12[%c0_536, %c0_537, %c0_538] : memref<4x256x64xf32, #tpu.memory_space<vmem>>, vector<1x128x64xf32>
    %514 = vector.shape_cast %513 : vector<1x128x64xf32> to vector<128x64xf32>
    %515 = vector.extract_strided_slice %508 {offsets = [0, 0], sizes = [64, 128], strides = [1, 1]} : vector<64x512xf32> to vector<64x128xf32>
    %cst_539 = arith.constant dense<0.000000e+00> : vector<128x128xf32>
    %516 = tpu.matmul %514, %515, %cst_539 {dimension_numbers = #tpu.dot_dimension_numbers<[1], [0], [0], [1], [0, 0, 1, 1], [], []>} : vector<128x64xf32>, vector<64x128xf32>, vector<128x128xf32> -> vector<128x128xf32>
    %517 = arith.addf %512, %516 : vector<128x128xf32>
    %c1_540 = arith.constant 1 : index
    %c0_541 = arith.constant 0 : index
    %c0_542 = arith.constant 0 : index
    %518 = vector.load %arg12[%c1_540, %c0_541, %c0_542] : memref<4x256x64xf32, #tpu.memory_space<vmem>>, vector<1x128x64xf32>
    %519 = vector.shape_cast %518 : vector<1x128x64xf32> to vector<128x64xf32>
    %520 = vector.extract_strided_slice %508 {offsets = [0, 128], sizes = [64, 128], strides = [1, 1]} : vector<64x512xf32> to vector<64x128xf32>
    %cst_543 = arith.constant dense<0.000000e+00> : vector<128x128xf32>
    %521 = tpu.matmul %519, %520, %cst_543 {dimension_numbers = #tpu.dot_dimension_numbers<[1], [0], [0], [1], [0, 0, 1, 1], [], []>} : vector<128x64xf32>, vector<64x128xf32>, vector<128x128xf32> -> vector<128x128xf32>
    %522 = arith.addf %517, %521 : vector<128x128xf32>
    %c2_544 = arith.constant 2 : index
    %c0_545 = arith.constant 0 : index
    %c0_546 = arith.constant 0 : index
    %523 = vector.load %arg12[%c2_544, %c0_545, %c0_546] : memref<4x256x64xf32, #tpu.memory_space<vmem>>, vector<1x128x64xf32>
    %524 = vector.shape_cast %523 : vector<1x128x64xf32> to vector<128x64xf32>
    %525 = vector.extract_strided_slice %508 {offsets = [0, 256], sizes = [64, 128], strides = [1, 1]} : vector<64x512xf32> to vector<64x128xf32>
    %cst_547 = arith.constant dense<0.000000e+00> : vector<128x128xf32>
    %526 = tpu.matmul %524, %525, %cst_547 {dimension_numbers = #tpu.dot_dimension_numbers<[1], [0], [0], [1], [0, 0, 1, 1], [], []>} : vector<128x64xf32>, vector<64x128xf32>, vector<128x128xf32> -> vector<128x128xf32>
    %527 = arith.addf %522, %526 : vector<128x128xf32>
    %c3_548 = arith.constant 3 : index
    %c0_549 = arith.constant 0 : index
    %c0_550 = arith.constant 0 : index
    %528 = vector.load %arg12[%c3_548, %c0_549, %c0_550] : memref<4x256x64xf32, #tpu.memory_space<vmem>>, vector<1x128x64xf32>
    %529 = vector.shape_cast %528 : vector<1x128x64xf32> to vector<128x64xf32>
    %530 = vector.extract_strided_slice %508 {offsets = [0, 384], sizes = [64, 128], strides = [1, 1]} : vector<64x512xf32> to vector<64x128xf32>
    %cst_551 = arith.constant dense<0.000000e+00> : vector<128x128xf32>
    %531 = tpu.matmul %529, %530, %cst_551 {dimension_numbers = #tpu.dot_dimension_numbers<[1], [0], [0], [1], [0, 0, 1, 1], [], []>} : vector<128x64xf32>, vector<64x128xf32>, vector<128x128xf32> -> vector<128x128xf32>
    %532 = arith.addf %527, %531 : vector<128x128xf32>
    %533 = arith.negf %532 : vector<128x128xf32>
    %534 = math.exp %533 : vector<128x128xf32>
    %cst_552 = arith.constant 1.000000e+00 : f32
    %535 = vector.broadcast %cst_552 : f32 to vector<128x128xf32>
    %536 = arith.addf %535, %534 : vector<128x128xf32>
    %537 = arith.divf %535, %536 : vector<128x128xf32>
    %c0_553 = arith.constant 0 : index
    %c0_554 = arith.constant 0 : index
    %c0_555 = arith.constant 0 : index
    %538 = vector.load %arg13[%c0_553, %c0_554, %c0_555] : memref<1x256x128xf32, #tpu.memory_space<vmem>>, vector<1x128x128xf32>
    %539 = vector.shape_cast %538 : vector<1x128x128xf32> to vector<128x128xf32>
    %540 = vector.shape_cast %537 : vector<128x128xf32> to vector<1x128x128xf32>
    tpu.vector_store %arg13[%c0_553, %c0_554, %c0_555], %540 {strides = array<i32>} : memref<1x256x128xf32, #tpu.memory_space<vmem>>, vector<1x128x128xf32>,
    %c2_556 = arith.constant 2 : index
    %c0_557 = arith.constant 0 : index
    %c0_558 = arith.constant 0 : index
    %541 = vector.load %arg5[%c2_556, %c0_557, %c0_558] : memref<3x1x128xf32, #tpu.memory_space<vmem>>, vector<1x1x128xf32>
    %542 = vector.shape_cast %541 : vector<1x1x128xf32> to vector<1x128xf32>
    %543 = vector.shape_cast %542 : vector<1x128xf32> to vector<1x128xf32>
    %544 = vector.broadcast %543 : vector<1x128xf32> to vector<128x128xf32>
    %c0_559 = arith.constant 0 : index
    %c128_560 = arith.constant 128 : index
    %c0_561 = arith.constant 0 : index
    %545 = vector.load %arg12[%c0_559, %c128_560, %c0_561] : memref<4x256x64xf32, #tpu.memory_space<vmem>>, vector<1x128x64xf32>
    %546 = vector.shape_cast %545 : vector<1x128x64xf32> to vector<128x64xf32>
    %547 = vector.extract_strided_slice %508 {offsets = [0, 0], sizes = [64, 128], strides = [1, 1]} : vector<64x512xf32> to vector<64x128xf32>
    %cst_562 = arith.constant dense<0.000000e+00> : vector<128x128xf32>
    %548 = tpu.matmul %546, %547, %cst_562 {dimension_numbers = #tpu.dot_dimension_numbers<[1], [0], [0], [1], [0, 0, 1, 1], [], []>} : vector<128x64xf32>, vector<64x128xf32>, vector<128x128xf32> -> vector<128x128xf32>
    %549 = arith.addf %544, %548 : vector<128x128xf32>
    %c1_563 = arith.constant 1 : index
    %c128_564 = arith.constant 128 : index
    %c0_565 = arith.constant 0 : index
    %550 = vector.load %arg12[%c1_563, %c128_564, %c0_565] : memref<4x256x64xf32, #tpu.memory_space<vmem>>, vector<1x128x64xf32>
    %551 = vector.shape_cast %550 : vector<1x128x64xf32> to vector<128x64xf32>
    %552 = vector.extract_strided_slice %508 {offsets = [0, 128], sizes = [64, 128], strides = [1, 1]} : vector<64x512xf32> to vector<64x128xf32>
    %cst_566 = arith.constant dense<0.000000e+00> : vector<128x128xf32>
    %553 = tpu.matmul %551, %552, %cst_566 {dimension_numbers = #tpu.dot_dimension_numbers<[1], [0], [0], [1], [0, 0, 1, 1], [], []>} : vector<128x64xf32>, vector<64x128xf32>, vector<128x128xf32> -> vector<128x128xf32>
    %554 = arith.addf %549, %553 : vector<128x128xf32>
    %c2_567 = arith.constant 2 : index
    %c128_568 = arith.constant 128 : index
    %c0_569 = arith.constant 0 : index
    %555 = vector.load %arg12[%c2_567, %c128_568, %c0_569] : memref<4x256x64xf32, #tpu.memory_space<vmem>>, vector<1x128x64xf32>
    %556 = vector.shape_cast %555 : vector<1x128x64xf32> to vector<128x64xf32>
    %557 = vector.extract_strided_slice %508 {offsets = [0, 256], sizes = [64, 128], strides = [1, 1]} : vector<64x512xf32> to vector<64x128xf32>
    %cst_570 = arith.constant dense<0.000000e+00> : vector<128x128xf32>
    %558 = tpu.matmul %556, %557, %cst_570 {dimension_numbers = #tpu.dot_dimension_numbers<[1], [0], [0], [1], [0, 0, 1, 1], [], []>} : vector<128x64xf32>, vector<64x128xf32>, vector<128x128xf32> -> vector<128x128xf32>
    %559 = arith.addf %554, %558 : vector<128x128xf32>
    %c3_571 = arith.constant 3 : index
    %c128_572 = arith.constant 128 : index
    %c0_573 = arith.constant 0 : index
    %560 = vector.load %arg12[%c3_571, %c128_572, %c0_573] : memref<4x256x64xf32, #tpu.memory_space<vmem>>, vector<1x128x64xf32>
    %561 = vector.shape_cast %560 : vector<1x128x64xf32> to vector<128x64xf32>
    %562 = vector.extract_strided_slice %508 {offsets = [0, 384], sizes = [64, 128], strides = [1, 1]} : vector<64x512xf32> to vector<64x128xf32>
    %cst_574 = arith.constant dense<0.000000e+00> : vector<128x128xf32>
    %563 = tpu.matmul %561, %562, %cst_574 {dimension_numbers = #tpu.dot_dimension_numbers<[1], [0], [0], [1], [0, 0, 1, 1], [], []>} : vector<128x64xf32>, vector<64x128xf32>, vector<128x128xf32> -> vector<128x128xf32>
    %564 = arith.addf %559, %563 : vector<128x128xf32>
    %565 = arith.negf %564 : vector<128x128xf32>
    %566 = math.exp %565 : vector<128x128xf32>
    %cst_575 = arith.constant 1.000000e+00 : f32
    %567 = vector.broadcast %cst_575 : f32 to vector<128x128xf32>
    %568 = arith.addf %567, %566 : vector<128x128xf32>
    %569 = arith.divf %567, %568 : vector<128x128xf32>
    %c0_576 = arith.constant 0 : index
    %c128_577 = arith.constant 128 : index
    %c0_578 = arith.constant 0 : index
    %570 = vector.load %arg13[%c0_576, %c128_577, %c0_578] : memref<1x256x128xf32, #tpu.memory_space<vmem>>, vector<1x128x128xf32>
    %571 = vector.shape_cast %570 : vector<1x128x128xf32> to vector<128x128xf32>
    %572 = vector.shape_cast %569 : vector<128x128xf32> to vector<1x128x128xf32>
    tpu.vector_store %arg13[%c0_576, %c128_577, %c0_578], %572 {strides = array<i32>} : memref<1x256x128xf32, #tpu.memory_space<vmem>>, vector<1x128x128xf32>,
    return
  }
  func.func @transform_0(%arg0: i32) -> (i32, i32, i32) {
    %c0_i32 = arith.constant 0 : i32
    %c0_i32_0 = arith.constant 0 : i32
    %c0_i32_1 = arith.constant 0 : i32
    return %arg0, %c0_i32, %c0_i32_0 : i32, i32, i32
  }
  func.func @transform_1(%arg0: i32) -> (i32, i32, i32, i32) {
    %c0_i32 = arith.constant 0 : i32
    %c0_i32_0 = arith.constant 0 : i32
    %c0_i32_1 = arith.constant 0 : i32
    %c0_i32_2 = arith.constant 0 : i32
    %c0_i32_3 = arith.constant 0 : i32
    return %c0_i32, %c0_i32_0, %c0_i32_1, %c0_i32_2 : i32, i32, i32, i32
  }
  func.func @transform_2(%arg0: i32) -> (i32, i32, i32) {
    %c0_i32 = arith.constant 0 : i32
    %c0_i32_0 = arith.constant 0 : i32
    %c0_i32_1 = arith.constant 0 : i32
    %c0_i32_2 = arith.constant 0 : i32
    return %c0_i32, %c0_i32_0, %c0_i32_1 : i32, i32, i32
  }
  func.func @transform_3(%arg0: i32) -> (i32, i32, i32) {
    %c0_i32 = arith.constant 0 : i32
    %c0_i32_0 = arith.constant 0 : i32
    %c0_i32_1 = arith.constant 0 : i32
    %c0_i32_2 = arith.constant 0 : i32
    return %c0_i32, %c0_i32_0, %c0_i32_1 : i32, i32, i32
  }
  func.func @transform_4(%arg0: i32) -> (i32, i32, i32) {
    %c0_i32 = arith.constant 0 : i32
    %c0_i32_0 = arith.constant 0 : i32
    %c0_i32_1 = arith.constant 0 : i32
    %c0_i32_2 = arith.constant 0 : i32
    return %c0_i32, %c0_i32_0, %c0_i32_1 : i32, i32, i32
  }
  func.func @transform_5(%arg0: i32) -> (i32, i32, i32, i32) {
    %c0_i32 = arith.constant 0 : i32
    %c0_i32_0 = arith.constant 0 : i32
    %c0_i32_1 = arith.constant 0 : i32
    %c0_i32_2 = arith.constant 0 : i32
    %c0_i32_3 = arith.constant 0 : i32
    return %c0_i32, %c0_i32_0, %c0_i32_1, %c0_i32_2 : i32, i32, i32, i32
  }
  func.func @transform_6(%arg0: i32) -> (i32, i32, i32) {
    %c0_i32 = arith.constant 0 : i32
    %c0_i32_0 = arith.constant 0 : i32
    %c0_i32_1 = arith.constant 0 : i32
    %c0_i32_2 = arith.constant 0 : i32
    return %c0_i32, %c0_i32_0, %c0_i32_1 : i32, i32, i32
  }
  func.func @transform_7(%arg0: i32) -> (i32, i32, i32) {
    %c0_i32 = arith.constant 0 : i32
    %c0_i32_0 = arith.constant 0 : i32
    %c0_i32_1 = arith.constant 0 : i32
    %c0_i32_2 = arith.constant 0 : i32
    return %c0_i32, %c0_i32_0, %c0_i32_1 : i32, i32, i32
  }
  func.func @transform_8(%arg0: i32) -> (i32, i32, i32) {
    %c0_i32 = arith.constant 0 : i32
    %c0_i32_0 = arith.constant 0 : i32
    %c0_i32_1 = arith.constant 0 : i32
    %c0_i32_2 = arith.constant 0 : i32
    return %c0_i32, %c0_i32_0, %c0_i32_1 : i32, i32, i32
  }
  func.func @transform_9(%arg0: i32) -> (i32, i32, i32) {
    %c0_i32 = arith.constant 0 : i32
    %c0_i32_0 = arith.constant 0 : i32
    %c0_i32_1 = arith.constant 0 : i32
    %c0_i32_2 = arith.constant 0 : i32
    return %c0_i32, %c0_i32_0, %c0_i32_1 : i32, i32, i32
  }
  func.func @transform_10(%arg0: i32) -> (i32, i32, i32) {
    %c0_i32 = arith.constant 0 : i32
    %c0_i32_0 = arith.constant 0 : i32
    %c0_i32_1 = arith.constant 0 : i32
    %c0_i32_2 = arith.constant 0 : i32
    return %c0_i32, %c0_i32_0, %c0_i32_1 : i32, i32, i32
  }
  func.func @transform_11(%arg0: i32) -> (i32, i32, i32) {
    %c0_i32 = arith.constant 0 : i32
    %c0_i32_0 = arith.constant 0 : i32
    %c0_i32_1 = arith.constant 0 : i32
    %c0_i32_2 = arith.constant 0 : i32
    return %c0_i32, %c0_i32_0, %c0_i32_1 : i32, i32, i32
  }
  func.func @transform_12(%arg0: i32) -> (i32, i32, i32) {
    %c0_i32 = arith.constant 0 : i32
    %c0_i32_0 = arith.constant 0 : i32
    %c0_i32_1 = arith.constant 0 : i32
    return %arg0, %c0_i32, %c0_i32_0 : i32, i32, i32
  }
}

</mosaic_0001>

<bundles_post_ra>
// kernel: squeeze.1
= control target key start
LH: loop header
LB: loop body
LE: loop exit
PB: predicated region body
PF: predicated region fallthrough
CT: control target
= control target key end

     0   :  { %s139_s0 = inlined_call_operand.vmem [shape: f32[2,256], index: 0, kind: input, shape index: {}]   ;;  %s140_s1 = inlined_call_operand.hbm [shape: f32[2,16,16], index: 1, kind: output, shape index: {}]  }
   0x1   :  { %v72_v0 = vld [vmem:[%s139_s0 + $0x2] sm:$0x3]  ;;  %v10_v1 = vld [vmem:[%s139_s0] sm:$0x3] }
   0x2   :  { %9 = vst [vmem:[#allocation2 + $0x8] sm:$0x3] %v72_v0  ;;  %11 = vst [vmem:[#allocation2] sm:$0x3] %v10_v1 }
   0x3   :  { %2 = vsyncpa [#allocation1], 0  ;;  %vm13_vm0 = vcmask 130048   ;;  %s103_s0 = smov 112   ;;  %s104_s10 = smov 80  }
   0x4   :  { %s105_s11 = smov 96   ;;  %s106_s12 = smov 64  }
   0x5   :  { %s107_s13 = smov 48   ;;  %s108_s14 = smov 32  }
   0x6   :  { %s109_s15 = smov 16   ;;  %s110_s16 = smov [#allocation0]  }
   0x7   :  { %s66_s17 = sshll.u32 %s110_s16, 4  ;;  %s67_s17 = int_to_ptr.vmem [resolvable:$true] %s66_s17 }
   0x8   :  { %s81_s18 = scalar_lea.vmem %s67_s17, 512  ;;  %p86_p1 = scmp.lt.s32.totalorder %s67_s17, %s67_s17 }
   0x9   :  { %v20_v2 = vld.sshfl [vmem:[#allocation2] sm:$0xff pattern:$0x99999180]   ;;  %p82_p0 = scmp.ne.s32.totalorder %s67_s17, %s81_s18  ;;  %p87_p2 = scmp.lt.s32.totalorder %s81_s18, %s81_s18 }
   0xa   :  { %v12_v3 = vld [vmem:[#allocation2] sm:$0x3]   ;;  %21 = vrot.lane.b32.xlu0 %v20_v2, %s103_s0  ;;  %33 = vrot.lane.b32.xlu1 %v20_v2, %s104_s10  ;;  %v16_v4 = vld [vmem:[#allocation2 + $0x8] sm:$0x3]  }
   0xb   :  { %14 = vst.msk [vmem:[#allocation0] ss:$16 sm:$0x3] %vm13_vm0, %v12_v3   ;;  %19 = vst.msk [vmem:[#allocation0 + $0x8] ss:$16 sm:$0x3] %vm13_vm0, %v16_v4   ;;  %p88_p3 = por %p87_p2, %p86_p1 }
   0xd   :  { %p89_p4 = pnand %p88_p3, %p82_p0 }
   0xe   :  { %27 = vrot.lane.b32.xlu0 %v20_v2, %s105_s11  ;;  %39 = vrot.lane.b32.xlu1 %v20_v2, %s106_s12 }
  0x12   :  { %45 = vrot.lane.b32.xlu0 %v20_v2, %s107_s13  ;;  %51 = vrot.lane.b32.xlu1 %v20_v2, %s108_s14 }
  0x16   :  { %57 = vrot.lane.b32.xlu0 %v20_v2, %s109_s15 }
  0x7c   :  { %v22_v5 = vpop.permute.xlu0 %21   ;;  %v34_v6 = vpop.permute.xlu1 %33  }
  0x7d   :  { %25 = vst.msk [vmem:[#allocation0 + $0x1] ss:$8 sm:$0xf] %vm13_vm0, %v22_v5   ;;  %37 = vst.msk [vmem:[#allocation0 + $0x3] ss:$8 sm:$0xf] %vm13_vm0, %v34_v6  }
  0x80   :  { %v28_v7 = vpop.permute.xlu0 %27   ;;  %v40_v8 = vpop.permute.xlu1 %39  }
  0x81   :  { %31 = vst.msk [vmem:[#allocation0 + $0x2] ss:$8 sm:$0xf] %vm13_vm0, %v28_v7   ;;  %43 = vst.msk [vmem:[#allocation0 + $0x4] ss:$8 sm:$0xf] %vm13_vm0, %v40_v8  }
  0x84   :  { %v46_v9 = vpop.permute.xlu0 %45   ;;  %v52_v10 = vpop.permute.xlu1 %51  }
  0x85   :  { %49 = vst.msk [vmem:[#allocation0 + $0x5] ss:$8 sm:$0xf] %vm13_vm0, %v46_v9   ;;  %55 = vst.msk [vmem:[#allocation0 + $0x6] ss:$8 sm:$0xf] %vm13_vm0, %v52_v10  }
  0x88   :  { %v58_v11 = vpop.permute.xlu0 %57  }
  0x89   :  { %61 = vst.msk [vmem:[#allocation0 + $0x7] ss:$8 sm:$0xf] %vm13_vm0, %v58_v11  }
  0x8a   :  { %92 = shalt.err (!%p89_p4)
}
  0x8b   :  { %69 = dma.vmem_to_hbm [thread:$0]  %s67_s17, 512, %s140_s1, [#allocation1]  }
  0x8c   :  { %101 = dma.done.wait [#allocation1], 512  }
  0x8d   :  { %102 = vsyncadd [#allocation1], 4294966784 }
  0x8e   :  { %71 = vsyncpa [#allocation1], 1 }

// kernel: flood_cnn_forward.1
= control target key start
LH: loop header
LB: loop body
LE: loop exit
PB: predicated region body
PF: predicated region fallthrough
CT: control target
= control target key end

     0   :  { %17 = vsyncpa [#allocation5], 0  ;;  %s20539_s21 = smov 0   ;;  %s25167_s0 = inlined_call_operand.vmem [shape: bf16[2,256,128], index: 0, kind: input, shape index: {}]   ;;  %s25168_s1 = inlined_call_operand.vmem [shape: bf16[3,9,128,128], index: 1, kind: input, shape index: {}]   ;;  %s25169_s2 = inlined_call_operand.vmem [shape: f32[3,1,128], index: 2, kind: input, shape index: {}]   ;;  %s25170_s3 = inlined_call_operand.vmem [shape: bf16[3,128,512], index: 3, kind: input, shape index: {}]   ;;  %s25171_s4 = inlined_call_operand.vmem [shape: f32[3,1,128], index: 4, kind: input, shape index: {}]   ;;  %s25172_s5 = inlined_call_operand.hbm [shape: f32[3,2,64,128], index: 5, kind: input, shape index: {}]   ;;  %s25173_s6 = inlined_call_operand.vmem [shape: f32[4,16,64], index: 6, kind: input, shape index: {}]   ;;  %s25174_s7 = inlined_call_operand.vmem [shape: f32[4,16,64], index: 7, kind: input, shape index: {}]   ;;  %s25175_s8 = inlined_call_operand.vmem [shape: f32[4,4,16], index: 8, kind: input, shape index: {}]   ;;  %s25176_s9 = inlined_call_operand.vmem [shape: f32[4,16,4], index: 9, kind: input, shape index: {}]   ;;  %s25177_s10 = inlined_call_operand.vmem [shape: f32[4,64,16], index: 10, kind: input, shape index: {}]   ;;  %s25178_s11 = inlined_call_operand.vmem [shape: f32[4,256,64], index: 11, kind: input, shape index: {}]   ;;  %s25179_s12 = inlined_call_operand.vmem [shape: f32[2,256,128], index: 12, kind: output, shape index: {}]  }
   0x1 LB: > { %s20545_s22 = sadd.s32 4294967295, %s20466_s21   ;;  %p14500_p0 = scmp.ge.s32.totalorder %s20466_s21, 1  ;;  %s20466_s21 = sphi %s20539_s21, %s23_s21  }
   0x2   : > { %p311_p1 = scmp.lt.s32.totalorder %s20466_s21, 3  ;;  %s20468_s23 = smov [#allocation4]  }
   0x3   : > { %s335_s24 = sshll.u32 %s20468_s23, 4  ;;  %p19594_p3 = scmp.eq.s32.totalorder %s20545_s22, 0  ;;  %s336_s24 = int_to_ptr.vmem [resolvable:$true] %s335_s24 }
   0x4   : > { %p20549_p2 = pnand %p14500_p0, %p311_p1  ;;  %s20441_s26 = scalar_lea.vmem %s336_s24, 6144 }
   0x5   : > { %p20442_p7 = scmp.ne.s32.totalorder %s336_s24, %s20441_s26  ;;  %p20449_p10 = scmp.lt.s32.totalorder %s336_s24, %s336_s24 }
   0x6   : > { %p19590_p4 = pneg %p20549_p2  ;;  %p20450_p11 = scmp.lt.s32.totalorder %s20441_s26, %s20441_s26 }
   0x8   : > { %p19591_p5 = pnand %p19594_p3, %p19590_p4  ;;  %p20451_p12 = por %p20450_p11, %p20449_p10 }
   0xa   : > { %p20432_p6 = pneg %p19591_p5 }
   0xc   : > { %p20444_p8 = pnand %p20442_p7, %p20432_p6 }
   0xe   : > { %p20445_p9 = pneg %p20444_p8 }
  0x10   : > { %p20452_p13 = pnand %p20451_p12, %p20445_p9 }
  0x12   : > { %20455 = shalt.err (!%p20452_p13)
}
  0x13   : > { %s20469_s27 = smov 128   ;;  %s20470_s28 = smov 8  }
  0x14   : > { %19593 = dma.hbm_to_vmem [thread:$0]  (!%p19591_p5), %s25172_s5, 6144, %s336_s24, [#allocation5], %s20469_s27, %s20469_s27, %s20470_s28  }
  0x15   : > { %377 = sbr.rel (%p20549_p2) target bundleno = 4437 (0x1155), region = 68 }
  0x1a   : > { %20461 = dma.done.wait (%p19594_p3), [#allocation5], 6144  }
  0x1b   : > { %20463 = vsyncadd (%p19594_p3), [#allocation5], 4294961152  ;;  %v25182_v0 = vmov 0   ;;  %v19610_v1 = vld [vmem:[%s25168_s1 + $0x78] sm:$0xff]   ;;  %v19612_v3 = vld [vmem:[%s25168_s1 + $0x70] sm:$0xff]   ;;  %p419_p0 = scmp.lt.s32.totalorder %s20545_s22, 1 }
  0x1c   : > { %430 = vst [vmem:[#allocation2] sm:$0xf] %v25182_v0  ;;  %431 = vst [vmem:[#allocation2 + $0x4] sm:$0xf] %v25182_v0  ;;  %v19611_v2 = vld [vmem:[%s25168_s1 + $0xf8] sm:$0xff]   ;;  %17514 = vmatprep.subr.bf16.mxu0 %v19610_v1  ;;  %v19613_v4 = vld [vmem:[%s25168_s1 + $0xf0] sm:$0xff]  }
  0x1d   : > { %432 = vst [vmem:[#allocation2 + $0x88] sm:$0xf] %v25182_v0  ;;  %433 = vst [vmem:[#allocation2 + $0x8c] sm:$0xf] %v25182_v0  ;;  %17538 = vmatprep.subr.bf16.mxu1 %v19611_v2  ;;  %17515 = vmatpush3.bf16.msra.mxu0 %v19610_v1  ;;  %v19614_v5 = vld [vmem:[%s25168_s1 + $0x68] sm:$0xff]   ;;  %s25252_s22 = smov (!%p419_p0, %s20545_s22), 1 }
  0x1e   : > { %17539 = vmatpush3.bf16.msra.mxu1 %v19611_v2  ;;  %17516 = vmatprep.subr.bf16.mxu0 %v19612_v3  ;;  %v19615_v6 = vld [vmem:[%s25168_s1 + $0xe8] sm:$0xff]   ;;  %v19616_v7 = vld [vmem:[%s25168_s1 + $0x60] sm:$0xff]   ;;  %s16397_s13 = sshll.u32 %s25252_s22, 7  ;;  %v19618_v9 = vld [vmem:[%s25168_s1 + $0x58] sm:$0xff]   ;;  %vm1905_vm0 = vcmask 523264   ;;  %vm20473_vm3 = vmmov 0  }
  0x1f   : > { %17540 = vmatprep.subr.bf16.mxu1 %v19613_v4  ;;  %v19617_v8 = vld [vmem:[%s25168_s1 + $0xe0] sm:$0xff]   ;;  %v19619_v10 = vld [vmem:[%s25168_s1 + $0xd8] sm:$0xff]   ;;  %v19620_v11 = vld [vmem:[%s25168_s1 + $0x50] sm:$0xff]   ;;  %s20612_s24 = scalar_lea.vmem %s25167_s0, %s16397_s13  ;;  %vm9248_vm4 = vcmask 1045504   ;;  %vm10222_vm5 = vcmask 130048   ;;  %vm10810_vm6 = vcmask 31744  }
  0x20   : > { %v19621_v12 = vld [vmem:[%s25168_s1 + $0xd0] sm:$0xff]   ;;  %v434_v14 = vld [vmem:[%s20612_s24] sm:$0xff]   ;;  %v436_v15 = vld [vmem:[%s20612_s24 + $0x8] sm:$0xff]   ;;  %vm10817_vm7 = vcmask 1043456   ;;  %s16398_s26 = sshll.u32 %s25252_s22, 8 }
  0x21   : > { %17517 = vmatpush3.bf16.msra.mxu0 %v19612_v3  ;;  %466 = vst [vmem:[#allocation2 + $0x8] sm:$0xff] %v434_v14   ;;  %v19622_v16 = vld [vmem:[%s25168_s1 + $0x48] sm:$0xff]   ;;  %468 = vst [vmem:[#allocation2 + $0x10] sm:$0xff] %v436_v15   ;;  %v19624_v18 = vld [vmem:[%s25168_s1 + $0x40] sm:$0xff]   ;;  %s25017_s29 = scalar_lea.vmem %s25179_s12, %s16398_s26 }
  0x22   : > { %17541 = vmatpush3.bf16.msra.mxu1 %v19613_v4  ;;  %17518 = vmatprep.subr.bf16.mxu0 %v19614_v5  ;;  %v19623_v17 = vld [vmem:[%s25168_s1 + $0xc8] sm:$0xff]   ;;  %v19625_v19 = vld [vmem:[%s25168_s1 + $0xc0] sm:$0xff]   ;;  %v19629_v21 = vld [vmem:[%s25168_s1 + $0x38] sm:$0xff]  }
  0x23   : > { %17542 = vmatprep.subr.bf16.mxu1 %v19615_v6  ;;  %v20617_v13 = vld [vmem:[#allocation2] sm:$0xff]   ;;  %v19630_v22 = vld [vmem:[%s25168_s1 + $0x138] sm:$0xff]   ;;  %v19632_v24 = vld [vmem:[%s25168_s1 + $0x30] sm:$0xff]  }
  0x24   : > { %7406 = vst [vmem:[#allocation2] sm:$0xf] %v25182_v0  ;;  %7407 = vst [vmem:[#allocation2 + $0x4] sm:$0xf] %v25182_v0  ;;  %17530 = vmatprep.mubr.bf16.mxu0 %v20617_v13  ;;  %v438_v26 = vld [vmem:[%s20612_s24 + $0x10] sm:$0xff]   ;;  %v440_v29 = vld [vmem:[%s20612_s24 + $0x18] sm:$0xff]  }
  0x25   : > { %17519 = vmatpush3.bf16.msra.mxu0 %v19614_v5  ;;  %9181 = vst [vmem:[#allocation2] sm:$0xf] %v25182_v0  ;;  %v19633_v27 = vld [vmem:[%s25168_s1 + $0x130] sm:$0xff]   ;;  %470 = vst [vmem:[#allocation2 + $0x18] sm:$0xff] %v438_v26   ;;  %v19634_v30 = vld [vmem:[%s25168_s1 + $0x28] sm:$0xff]  }
  0x26   : > { %17543 = vmatpush3.bf16.msra.mxu1 %v19615_v6  ;;  %17520 = vmatprep.subr.bf16.mxu0 %v19616_v7  ;;  %472 = vst [vmem:[#allocation2 + $0x20] sm:$0xff] %v440_v29   ;;  %v19635_v31 = vld [vmem:[%s25168_s1 + $0x128] sm:$0xff]   ;;  %v19636_v32 = vld [vmem:[%s25168_s1 + $0x20] sm:$0xff]   ;;  %v19638_v37 = vld [vmem:[%s25168_s1 + $0x18] sm:$0xff]  }
  0x27   : > { %17544 = vmatprep.subr.bf16.mxu1 %v19617_v8  ;;  %v19637_v35 = vld [vmem:[%s25168_s1 + $0x120] sm:$0xff]   ;;  %v19639_v38 = vld [vmem:[%s25168_s1 + $0x118] sm:$0xff]   ;;  %v19642_v39 = vld [vmem:[%s25168_s1 + $0x10] sm:$0xff]  }
  0x28   : > { %v20637_v20 = vld [vmem:[#allocation2 + $0x8] sm:$0xff]   ;;  %v20651_v25 = vld [vmem:[#allocation2 + $0x10] sm:$0xff]   ;;  %v19648_v43 = vld [vmem:[%s25168_s1] sm:$0xff]  }
  0x29   : > { %17521 = vmatpush3.bf16.msra.mxu0 %v19616_v7  ;;  %17554 = vmatprep.mubr.bf16.mxu1 %v20637_v20  ;;  %v20646_v23 = vld [vmem:[#allocation2 + $0x8] sm:$0xff]   ;;  %v20657_v28 = vld [vmem:[#allocation2 + $0x10] sm:$0xff]   ;;  %v19649_v44 = vld [vmem:[%s25168_s1 + $0x100] sm:$0xff]  }
  0x2a   : > { %17545 = vmatpush3.bf16.msra.mxu1 %v19617_v8  ;;  %17522 = vmatprep.subr.bf16.mxu0 %v19618_v9  ;;  %v19643_v40 = vld [vmem:[%s25168_s1 + $0x110] sm:$0xff]   ;;  %v19646_v41 = vld [vmem:[%s25168_s1 + $0x8] sm:$0xff]   ;;  %v19650_v45 = vld [vmem:[%s25168_s1 + $0x178] sm:$0xff]  }
  0x2b   : > { %17546 = vmatprep.subr.bf16.mxu1 %v19619_v10  ;;  %v19647_v42 = vld [vmem:[%s25168_s1 + $0x108] sm:$0xff]   ;;  %v19651_v46 = vld [vmem:[%s25168_s1 + $0xb8] sm:$0xff]   ;;  %v19652_v47 = vld [vmem:[%s25168_s1 + $0x170] sm:$0xff]  }
  0x2c   : > { %v20672_v33 = vld [vmem:[#allocation2 + $0x18] sm:$0xff]   ;;  %v19653_v48 = vld [vmem:[%s25168_s1 + $0xb0] sm:$0xff]   ;;  %v19654_v49 = vld [vmem:[%s25168_s1 + $0x168] sm:$0xff]  }
  0x2d   : > { %17523 = vmatpush3.bf16.msra.mxu0 %v19618_v9  ;;  %v20674_v34 = vld [vmem:[#allocation2 + $0x18] sm:$0xff]   ;;  %v20681_v36 = vld [vmem:[#allocation2 + $0x20] sm:$0xff]   ;;  %v19655_v50 = vld [vmem:[%s25168_s1 + $0xa8] sm:$0xff]  }
  0x2e   : > { %17547 = vmatpush3.bf16.msra.mxu1 %v19619_v10  ;;  %17524 = vmatprep.subr.bf16.mxu0 %v19620_v11  ;;  %v19656_v51 = vld [vmem:[%s25168_s1 + $0x160] sm:$0xff]   ;;  %v19658_v53 = vld [vmem:[%s25168_s1 + $0x158] sm:$0xff]   ;;  %v19660_v56 = vld [vmem:[%s25168_s1 + $0x150] sm:$0xff]  }
  0x2f   : > { %17548 = vmatprep.subr.bf16.mxu1 %v19621_v12  ;;  %v19657_v52 = vld [vmem:[%s25168_s1 + $0xa0] sm:$0xff]   ;;  %v19659_v54 = vld [vmem:[%s25168_s1 + $0x98] sm:$0xff]   ;;  %v19661_v57 = vld [vmem:[%s25168_s1 + $0x90] sm:$0xff]  }
  0x30   : > { %v442_v55 = vld [vmem:[%s20612_s24 + $0x20] sm:$0xff]   ;;  %v19662_v58 = vld [vmem:[%s25168_s1 + $0x148] sm:$0xff]   ;;  %v19666_v62 = vld [vmem:[%s25168_s1 + $0x1b8] sm:$0xff]  }
  0x31   : > { %17525 = vmatpush3.bf16.msra.mxu0 %v19620_v11  ;;  %474 = vst [vmem:[#allocation2 + $0x28] sm:$0xff] %v442_v55   ;;  %v19663_v59 = vld [vmem:[%s25168_s1 + $0x88] sm:$0xff]   ;;  %v19664_v60 = vld [vmem:[%s25168_s1 + $0x140] sm:$0xff]   ;;  %v19667_v63 = vld [vmem:[%s25168_s1 + $0x1f8] sm:$0xff]  }
  0x32   : > { %17549 = vmatpush3.bf16.msra.mxu1 %v19621_v12  ;;  %17526 = vmatprep.subr.bf16.mxu0 %v19622_v16  ;;  %v19665_v61 = vld [vmem:[%s25168_s1 + $0x80] sm:$0xff]   ;;  %v19668_v1 = vld [vmem:[%s25168_s1 + $0x1b0] sm:$0xff]   ;;  %v19670_v3 = vld [vmem:[%s25168_s1 + $0x1a8] sm:$0xff]  }
  0x33   : > { %17550 = vmatprep.subr.bf16.mxu1 %v19623_v17  ;;  %v19669_v2 = vld [vmem:[%s25168_s1 + $0x1f0] sm:$0xff]   ;;  %v19671_v4 = vld [vmem:[%s25168_s1 + $0x1e8] sm:$0xff]   ;;  %v19672_v5 = vld [vmem:[%s25168_s1 + $0x1a0] sm:$0xff]  }
  0x34   : > { %v19673_v6 = vld [vmem:[%s25168_s1 + $0x1e0] sm:$0xff]   ;;  %v19682_v7 = vld [vmem:[#allocation2 + $0x10] sm:$0xff]   ;;  %v19674_v8 = vld [vmem:[%s25168_s1 + $0x198] sm:$0xff]  }
  0x35   : > { %17527 = vmatpush3.bf16.msra.mxu0 %v19622_v16  ;;  %v19675_v9 = vld [vmem:[%s25168_s1 + $0x1d8] sm:$0xff]   ;;  %v19676_v10 = vld [vmem:[%s25168_s1 + $0x190] sm:$0xff]   ;;  %v19678_v12 = vld [vmem:[%s25168_s1 + $0x188] sm:$0xff]  }
  0x36   : > { %17551 = vmatpush3.bf16.msra.mxu1 %v19623_v17  ;;  %17528 = vmatprep.subr.bf16.mxu0 %v19624_v18  ;;  %v19677_v11 = vld [vmem:[%s25168_s1 + $0x1d0] sm:$0xff]   ;;  %v19680_v14 = vld [vmem:[%s25168_s1 + $0x180] sm:$0xff]   ;;  %v19684_v16 = vld [vmem:[%s25168_s1 + $0x238] sm:$0xff]  }
  0x37   : > { %17552 = vmatprep.subr.bf16.mxu1 %v19625_v19  ;;  %v19681_v15 = vld [vmem:[%s25168_s1 + $0x1c0] sm:$0xff]   ;;  %v19683_v17 = vld [vmem:[#allocation2 + $0x18] sm:$0xff]  }
  0x38   : > { %v19693_v26 = vld [vmem:[%s25168_s1 + $0x200] sm:$0xff]  }
  0x39   : > { %17529 = vmatpush3.bf16.msra.mxu0 %v19624_v18  ;;  %v19685_v18 = vld [vmem:[%s25168_s1 + $0x230] sm:$0xff]  }
  0x3a   : > { %17553 = vmatpush3.bf16.msra.mxu1 %v19625_v19  ;;  %17562 = vmatprep.subr.bf16.mxu0 %v19629_v21  ;;  %v19686_v19 = vld [vmem:[#allocation2 + $0x20] sm:$0xff]  }
  0x3b   : > { %17586 = vmatprep.subr.bf16.mxu1 %v19630_v22 }
  0x3c   : > { %17531 = vmatmul.mubr.bf16.vlgmr.msra.gmra.mxu0 %v20646_v23 }
  0x3d   : > { %17555 = vmatmul.mubr.bf16.vlgmr.msra.gmra.mxu1 %v20651_v25  ;;  %17563 = vmatpush3.bf16.msra.mxu0 %v19629_v21  ;;  %v19687_v21 = vld [vmem:[#allocation2 + $0x28] sm:$0xff]  }
  0x3e   : > { %17587 = vmatpush3.bf16.msra.mxu1 %v19630_v22  ;;  %17564 = vmatprep.subr.bf16.mxu0 %v19632_v24  ;;  %v19689_v22 = vld [vmem:[%s25168_s1 + $0x220] sm:$0xff]  }
  0x3f   : > { %17588 = vmatprep.subr.bf16.mxu1 %v19633_v27  ;;  %17534 = vmatprep.mubr.bf16.mxu0 %v20657_v28 }
  0x40   : > { %17558 = vmatprep.mubr.bf16.mxu1 %v20674_v34 }
  0x41   : > { %17565 = vmatpush3.bf16.msra.mxu0 %v19632_v24  ;;  %v19691_v24 = vld [vmem:[%s25168_s1 + $0x210] sm:$0xff]  }
  0x42   : > { %17589 = vmatpush3.bf16.msra.mxu1 %v19633_v27  ;;  %17566 = vmatprep.subr.bf16.mxu0 %v19634_v30 }
  0x43   : > { %17590 = vmatprep.subr.bf16.mxu1 %v19635_v31 }
  0x44   : > { %17535 = vmatmul.mubr.bf16.gmra.mxu0 %v20672_v33 }
  0x45   : > { %17567 = vmatpush3.bf16.msra.mxu0 %v19634_v30  ;;  %17578 = vmatprep.mubr.bf16.mxu0 %v20617_v13 }
  0x46   : > { %17591 = vmatpush3.bf16.msra.mxu1 %v19635_v31  ;;  %17568 = vmatprep.subr.bf16.mxu0 %v19636_v32 }
  0x47   : > { %17592 = vmatprep.subr.bf16.mxu1 %v19637_v35  ;;  %17559 = vmatmul.mubr.bf16.gmra.mxu1 %v20681_v36 }
  0x48   : > { %17602 = vmatprep.mubr.bf16.mxu1 %v20637_v20 }
  0x49   : > { %17569 = vmatpush3.bf16.msra.mxu0 %v19636_v32 }
  0x4a   : > { %17593 = vmatpush3.bf16.msra.mxu1 %v19637_v35  ;;  %17570 = vmatprep.subr.bf16.mxu0 %v19638_v37 }
  0x4b   : > { %17594 = vmatprep.subr.bf16.mxu1 %v19639_v38 }
  0x4d   : > { %17571 = vmatpush3.bf16.msra.mxu0 %v19638_v37 }
  0x4e   : > { %17595 = vmatpush3.bf16.msra.mxu1 %v19639_v38  ;;  %17572 = vmatprep.subr.bf16.mxu0 %v19642_v39 }
  0x4f   : > { %17596 = vmatprep.subr.bf16.mxu1 %v19643_v40 }
  0x51   : > { %17573 = vmatpush3.bf16.msra.mxu0 %v19642_v39 }
  0x52   : > { %17597 = vmatpush3.bf16.msra.mxu1 %v19643_v40  ;;  %17574 = vmatprep.subr.bf16.mxu0 %v19646_v41 }
  0x53   : > { %17598 = vmatprep.subr.bf16.mxu1 %v19647_v42 }
  0x55   : > { %17575 = vmatpush3.bf16.msra.mxu0 %v19646_v41 }
  0x56   : > { %17599 = vmatpush3.bf16.msra.mxu1 %v19647_v42  ;;  %17576 = vmatprep.subr.bf16.mxu0 %v19648_v43 }
  0x57   : > { %17600 = vmatprep.subr.bf16.mxu1 %v19649_v44 }
  0x59   : > { %17577 = vmatpush3.bf16.msra.mxu0 %v19648_v43 }
  0x5a   : > { %17601 = vmatpush3.bf16.msra.mxu1 %v19649_v44  ;;  %17610 = vmatprep.subr.bf16.mxu0 %v19650_v45  ;;  %v14728_v44 = vld [vmem:[%s25173_s6 + $0x20] sm:$0xff] }
  0x5b   : > { %17634 = vmatprep.subr.bf16.mxu1 %v19651_v46 }
  0x5c   : > { %17579 = vmatmul.mubr.bf16.vlgmr.msra.gmra.mxu0 %v20646_v23 }
  0x5d   : > { %17603 = vmatmul.mubr.bf16.vlgmr.msra.gmra.mxu1 %v20651_v25  ;;  %17611 = vmatpush3.bf16.msra.mxu0 %v19650_v45  ;;  %v1903_v45 = vld [vmem:[%s25173_s6] sm:$0xff] }
  0x5e   : > { %17635 = vmatpush3.bf16.msra.mxu1 %v19651_v46  ;;  %17612 = vmatprep.subr.bf16.mxu0 %v19652_v47 }
  0x5f   : > { %17636 = vmatprep.subr.bf16.mxu1 %v19653_v48  ;;  %17606 = vmatprep.mubr.bf16.mxu1 %v20674_v34 }
  0x60   : > { %17582 = vmatprep.mubr.bf16.mxu0 %v20657_v28 }
  0x61   : > { %17613 = vmatpush3.bf16.msra.mxu0 %v19652_v47 }
  0x62   : > { %17637 = vmatpush3.bf16.msra.mxu1 %v19653_v48  ;;  %17614 = vmatprep.subr.bf16.mxu0 %v19654_v49 }
  0x63   : > { %17638 = vmatprep.subr.bf16.mxu1 %v19655_v50 }
  0x64   : > { %17583 = vmatmul.mubr.bf16.gmra.mxu0 %v20672_v33 }
  0x65   : > { %17607 = vmatmul.mubr.bf16.gmra.mxu1 %v20681_v36  ;;  %17615 = vmatpush3.bf16.msra.mxu0 %v19654_v49 }
  0x66   : > { %17639 = vmatpush3.bf16.msra.mxu1 %v19655_v50  ;;  %17616 = vmatprep.subr.bf16.mxu0 %v19656_v51 }
  0x67   : > { %17640 = vmatprep.subr.bf16.mxu1 %v19657_v52  ;;  %17626 = vmatprep.mubr.bf16.mxu0 %v20637_v20  ;;  %v19688_v20 = vld [vmem:[%s25168_s1 + $0x228] sm:$0xff]  }
  0x68   : > { %17650 = vmatprep.mubr.bf16.mxu1 %v20617_v13  ;;  %v19679_v13 = vld [vmem:[%s25168_s1 + $0x1c8] sm:$0xff]  }
  0x69   : > { %17617 = vmatpush3.bf16.msra.mxu0 %v19656_v51 }
  0x6a   : > { %17641 = vmatpush3.bf16.msra.mxu1 %v19657_v52  ;;  %17618 = vmatprep.subr.bf16.mxu0 %v19658_v53 }
  0x6b   : > { %17642 = vmatprep.subr.bf16.mxu1 %v19659_v54 }
  0x6d   : > { %17619 = vmatpush3.bf16.msra.mxu0 %v19658_v53 }
  0x6e   : > { %17643 = vmatpush3.bf16.msra.mxu1 %v19659_v54  ;;  %17620 = vmatprep.subr.bf16.mxu0 %v19660_v56 }
  0x6f   : > { %17644 = vmatprep.subr.bf16.mxu1 %v19661_v57 }
  0x71   : > { %17621 = vmatpush3.bf16.msra.mxu0 %v19660_v56 }
  0x72   : > { %17645 = vmatpush3.bf16.msra.mxu1 %v19661_v57  ;;  %17622 = vmatprep.subr.bf16.mxu0 %v19662_v58 }
  0x73   : > { %17646 = vmatprep.subr.bf16.mxu1 %v19663_v59 }
  0x75   : > { %17623 = vmatpush3.bf16.msra.mxu0 %v19662_v58 }
  0x76   : > { %17647 = vmatpush3.bf16.msra.mxu1 %v19663_v59  ;;  %17624 = vmatprep.subr.bf16.mxu0 %v19664_v60 }
  0x77   : > { %17648 = vmatprep.subr.bf16.mxu1 %v19665_v61 }
  0x79   : > { %17625 = vmatpush3.bf16.msra.mxu0 %v19664_v60 }
  0x7a   : > { %17649 = vmatpush3.bf16.msra.mxu1 %v19665_v61  ;;  %17658 = vmatprep.subr.bf16.mxu0 %v19666_v62 }
  0x7b   : > { %17682 = vmatprep.subr.bf16.mxu1 %v19667_v63 }
  0x7c   : > { %17627 = vmatmul.mubr.bf16.vlgmr.msra.gmra.mxu0 %v20651_v25  ;;  %v19692_v25 = vld [vmem:[%s25168_s1 + $0x208] sm:$0xff]  }
  0x7d   : > { %17651 = vmatmul.mubr.bf16.vlgmr.msra.gmra.mxu1 %v20646_v23  ;;  %17659 = vmatpush3.bf16.msra.mxu0 %v19666_v62  ;;  %v19690_v23 = vld [vmem:[%s25168_s1 + $0x218] sm:$0xff]  }
  0x7e   : > { %17683 = vmatpush3.bf16.msra.mxu1 %v19667_v63  ;;  %17660 = vmatprep.subr.bf16.mxu0 %v19668_v1 }
  0x7f   : > { %17684 = vmatprep.subr.bf16.mxu1 %v19669_v2  ;;  %17630 = vmatprep.mubr.bf16.mxu0 %v20674_v34 }
  0x80   : > { %17654 = vmatprep.mubr.bf16.mxu1 %v20657_v28 }
  0x81   : > { %17661 = vmatpush3.bf16.msra.mxu0 %v19668_v1 }
  0x82   : > { %17685 = vmatpush3.bf16.msra.mxu1 %v19669_v2  ;;  %17662 = vmatprep.subr.bf16.mxu0 %v19670_v3 }
  0x83   : > { %17686 = vmatprep.subr.bf16.mxu1 %v19671_v4 }
  0x84   : > { %17631 = vmatmul.mubr.bf16.gmra.mxu0 %v20681_v36 }
  0x85   : > { %17663 = vmatpush3.bf16.msra.mxu0 %v19670_v3  ;;  %17655 = vmatmul.mubr.bf16.gmra.mxu1 %v20672_v33 }
  0x86   : > { %17687 = vmatpush3.bf16.msra.mxu1 %v19671_v4  ;;  %17664 = vmatprep.subr.bf16.mxu0 %v19672_v5 }
  0x87   : > { %17688 = vmatprep.subr.bf16.mxu1 %v19673_v6  ;;  %17674 = vmatprep.mubr.bf16.mxu0 %v19682_v7 }
  0x88   : > { %17698 = vmatprep.mubr.bf16.mxu1 %v19682_v7 }
  0x89   : > { %17665 = vmatpush3.bf16.msra.mxu0 %v19672_v5 }
  0x8a   : > { %17689 = vmatpush3.bf16.msra.mxu1 %v19673_v6  ;;  %17666 = vmatprep.subr.bf16.mxu0 %v19674_v8 }
  0x8b   : > { %17690 = vmatprep.subr.bf16.mxu1 %v19675_v9 }
  0x8d   : > { %17667 = vmatpush3.bf16.msra.mxu0 %v19674_v8 }
  0x8e   : > { %17691 = vmatpush3.bf16.msra.mxu1 %v19675_v9  ;;  %17668 = vmatprep.subr.bf16.mxu0 %v19676_v10  ;;  %v446_v9 = vld [vmem:[%s20612_s24 + $0x30] sm:$0xff]  }
  0x8f   : > { %17692 = vmatprep.subr.bf16.mxu1 %v19677_v11  ;;  %478 = vst [vmem:[#allocation2 + $0x38] sm:$0xff] %v446_v9  }
  0x91   : > { %17669 = vmatpush3.bf16.msra.mxu0 %v19676_v10 }
  0x92   : > { %17693 = vmatpush3.bf16.msra.mxu1 %v19677_v11  ;;  %17670 = vmatprep.subr.bf16.mxu0 %v19678_v12 }
  0x93   : > { %17694 = vmatprep.subr.bf16.mxu1 %v19679_v13 }
  0x95   : > { %17671 = vmatpush3.bf16.msra.mxu0 %v19678_v12 }
  0x96   : > { %17695 = vmatpush3.bf16.msra.mxu1 %v19679_v13  ;;  %17672 = vmatprep.subr.bf16.mxu0 %v19680_v14 }
  0x97   : > { %17696 = vmatprep.subr.bf16.mxu1 %v19681_v15 }
  0x99   : > { %17673 = vmatpush3.bf16.msra.mxu0 %v19680_v14  ;;  %v1835_v14 = vlaneseq }
  0x9a   : > { %17697 = vmatpush3.bf16.msra.mxu1 %v19681_v15  ;;  %17706 = vmatprep.subr.bf16.mxu0 %v19684_v16 }
  0x9c   : > { %17675 = vmatmul.mubr.bf16.vlgmr.msra.gmra.mxu0 %v19683_v17 }
  0x9d   : > { %17699 = vmatmul.mubr.bf16.vlgmr.msra.gmra.mxu1 %v19683_v17  ;;  %17707 = vmatpush3.bf16.msra.mxu0 %v19684_v16 }
  0x9e   : > { %17708 = vmatprep.subr.bf16.mxu0 %v19685_v18  ;;  %17678 = vmatprep.mubr.bf16.mxu0 %v19686_v19 }
  0x9f   : > { %17702 = vmatprep.mubr.bf16.mxu1 %v19686_v19 }
  0xa1   : > { %17709 = vmatpush3.bf16.msra.mxu0 %v19685_v18  ;;  %v20935_v18 = vshrl.u32 %v1835_v14, 7 }
  0xa2   : > { %17710 = vmatprep.subr.bf16.mxu0 %v19688_v20 }
  0xa3   : > { %vm1837_vm1 = vcmp.lt.s32.totalorder %v20935_v18, 1  ;;  %vm1870_vm2 = vcmp.lt.s32.totalorder %v20935_v18, 7  ;;  %v15892_v18 = vld [vmem:[%s25175_s8 + $0x4] sm:$0xf] }
  0xa4   : > { %17679 = vmatmul.mubr.bf16.gmra.mxu0 %v19687_v21 }
  0xa5   : > { %17703 = vmatmul.mubr.bf16.gmra.mxu1 %v19687_v21  ;;  %17711 = vmatpush3.bf16.msra.mxu0 %v19688_v20 }
  0xa6   : > { %17712 = vmatprep.subr.bf16.mxu0 %v19689_v22  ;;  %17722 = vmatprep.mubr.bf16.mxu0 %v19682_v7  ;;  %v444_v7 = vld [vmem:[%s20612_s24 + $0x28] sm:$0xff]  }
  0xa7   : > { %17746 = vmatprep.mubr.msk.f32.mxu1 %vm1905_vm0, %v1903_v45  ;;  %476 = vst [vmem:[#allocation2 + $0x30] sm:$0xff] %v444_v7   ;;  %v501_v7 = vld [vmem:[#allocation4 + $0x18] sm:$0xff] }
  0xa9   : > { %17713 = vmatpush3.bf16.msra.mxu0 %v19689_v22 }
  0xaa   : > { %17714 = vmatprep.subr.bf16.mxu0 %v19690_v23 }
  0xad   : > { %17715 = vmatpush3.bf16.msra.mxu0 %v19690_v23 }
  0xae   : > { %17716 = vmatprep.subr.bf16.mxu0 %v19691_v24 }
  0xb1   : > { %17717 = vmatpush3.bf16.msra.mxu0 %v19691_v24 }
  0xb2   : > { %17718 = vmatprep.subr.bf16.mxu0 %v19692_v25 }
  0xb5   : > { %17719 = vmatpush3.bf16.msra.mxu0 %v19692_v25  ;;  %v20940_v25 = vld [vmem:[%s25169_s2] ss:$0 sm:$0xff] }
  0xb6   : > { %17720 = vmatprep.subr.bf16.mxu0 %v19693_v26 }
  0xb9   : > { %17721 = vmatpush3.bf16.msra.mxu0 %v19693_v26 }
  0xbc   : > { %17723 = vmatmul.mubr.bf16.vlgmr.msra.gmra.mxu0 %v19683_v17 }
  0xbd   : > { %17726 = vmatprep.mubr.bf16.mxu0 %v19686_v19 }
  0xc4   : > { %17727 = vmatmul.mubr.bf16.gmra.mxu0 %v19687_v21 }
  0xc5   : > { %17784 = vmatprep.mubr.msk.f32.mxu0 %vm1905_vm0, %v14728_v44 }
  0xfc   : > { %v20847_v29 = vpop.f32.mrf.mxu0 }
  0xfd   : > { %v17556_v27 = vpop.f32.mrf.mxu1 }
  0xfe   : > { %v20849_v31 = vpop.f32.mrf.mxu0 }
  0xff   : > { %v20845_v28 = vpop.f32.mrf.mxu1 }
 0x100   : > { %v20853_v33 = vpop.f32.mrf.mxu0 }
 0x101   : > { %v17557_v30 = vpop.f32.mrf.mxu1 }
 0x102   : > { %v20857_v35 = vpop.f32.mrf.mxu0 }
 0x103   : > { %v20851_v32 = vpop.f32.mrf.mxu1 }
 0x104   : > { %v20859_v36 = vpop.f32.mrf.mxu0 }
 0x106   : > { %v20863_v38 = vpop.f32.mrf.mxu0 }
 0x107   : > { %v20855_v34 = vpop.f32.mrf.mxu1 }
 0x108   : > { %v20867_v40 = vpop.f32.mrf.mxu0 }
 0x109   : > { %v20861_v37 = vpop.f32.mrf.mxu1 }
 0x10a   : > { %v20871_v42 = vpop.f32.mrf.mxu0 }
 0x10b   : > { %v20865_v39 = vpop.f32.mrf.mxu1 }
 0x10d   : > { %v20869_v41 = vpop.f32.mrf.mxu1 }
 0x11c   : > { %v17580_v46 = vpop.f32.mrf.mxu0 }
 0x11d   : > { %v20873_v43 = vpop.f32.mrf.mxu1  ;;  %v978_v19 = vadd.f32 %v17580_v46, %v17556_v27  ;;  %v703_v27 = vadd.f32 %v20853_v33, %v20940_v25 }
 0x11e   : > { %v969_v48 = vpop.f32.mrf.mxu0 }
 0x11f   : > { %v20883_v47 = vpop.f32.mrf.mxu1  ;;  %v970_v33 = vadd.f32 %v969_v48, %v20845_v28 }
 0x120   : > { %v17581_v50 = vpop.f32.mrf.mxu0 }
 0x121   : > { %v17605_v49 = vpop.f32.mrf.mxu1  ;;  %v981_v22 = vadd.f32 %v17581_v50, %v17557_v30 }
 0x122   : > { %v972_v52 = vpop.f32.mrf.mxu0 }
 0x123   : > { %v20885_v51 = vpop.f32.mrf.mxu1  ;;  %v973_v44 = vadd.f32 %v972_v52, %v20851_v32  ;;  %v702_v32 = vadd.f32 %v20847_v29, %v20940_v25  ;;  %v1133_v52 = vadd.f32 %v17605_v49, %v703_v27 }
 0x124   : > { %25198 = vst [vmem:[#allocation7_spill] sm:$0xff] %v20885_v51  ;;  %v20887_v53 = vpop.f32.mrf.mxu0 }
 0x125   : > { %v20889_v54 = vpop.f32.mrf.mxu1 }
 0x126   : > { %v20891_v55 = vpop.f32.mrf.mxu0 }
 0x127   : > { %v20893_v56 = vpop.f32.mrf.mxu1 }
 0x128   : > { %v17585_v57 = vpop.f32.mrf.mxu0 }
 0x129   : > { %v20895_v58 = vpop.f32.mrf.mxu1  ;;  %v997_v27 = vadd.f32 %v17585_v57, %v20865_v39 }
 0x12a   : > { %v20897_v59 = vpop.f32.mrf.mxu0 }
 0x12b   : > { %v20899_v60 = vpop.f32.mrf.mxu1 }
 0x13c   : > { %v20901_v61 = vpop.f32.mrf.mxu0 }
 0x13d   : > { %v20903_v62 = vpop.f32.mrf.mxu1 }
 0x13e   : > { %v20905_v63 = vpop.f32.mrf.mxu0 }
 0x13f   : > { %v20907_v1 = vpop.f32.mrf.mxu1 }
 0x140   : > { %v20909_v2 = vpop.f32.mrf.mxu0 }
 0x141   : > { %v20911_v3 = vpop.f32.mrf.mxu1 }
 0x142   : > { %v20913_v4 = vpop.f32.mrf.mxu0 }
 0x143   : > { %v20915_v5 = vpop.f32.mrf.mxu1 }
 0x144   : > { %v20917_v6 = vpop.f32.mrf.mxu0 }
 0x145   : > { %v20920_v8 = vpop.f32.mrf.mxu1 }
 0x146   : > { %v20923_v10 = vpop.f32.mrf.mxu0 }
 0x147   : > { %v20925_v11 = vpop.f32.mrf.mxu1 }
 0x148   : > { %v20927_v12 = vpop.f32.mrf.mxu0 }
 0x149   : > { %v20929_v13 = vpop.f32.mrf.mxu1 }
 0x14a   : > { %v20931_v15 = vpop.f32.mrf.mxu0 }
 0x14b   : > { %v20933_v16 = vpop.f32.mrf.mxu1 }
 0x15c   : > { %v17676_v17 = vpop.f32.mrf.mxu0 }
 0x15d   : > { %v17700_v20 = vpop.f32.mrf.mxu1  ;;  %v1545_v23 = vadd.f32 %v17676_v17, %v978_v19  ;;  %v20951_v17 = vld [vmem:[#allocation2 + $0x28] sm:$0xff]  }
 0x15e   : > { %v1512_v21 = vpop.f32.mrf.mxu0  ;;  %25200 = vst [vmem:[#allocation9_spill] sm:$0xff] %v20951_v17  ;;  %v20953_v19 = vld [vmem:[#allocation2 + $0x28] sm:$0xff]  }
 0x15f   : > { %v1650_v24 = vpop.f32.mrf.mxu1  ;;  %v1829_v30 = vrot.slane %v1545_v23, 7  ;;  %25201 = vst [vmem:[#allocation10_spill] sm:$0xff] %v20953_v19  ;;  %7408 = vst [vmem:[#allocation2 + $0x28] sm:$0xf] %v25182_v0  ;;  %v20967_v17 = vadd.f32 %v1512_v21, %v970_v33 }
 0x160   : > { %v17677_v26 = vpop.f32.mrf.mxu0  ;;  %7409 = vst [vmem:[#allocation2 + $0x2c] sm:$0xf] %v25182_v0 }
 0x161   : > { %v20943_v45 = vadd.f32 %v17677_v26, %v981_v22  ;;  %v17701_v9 = vpop.f32.mrf.mxu1  ;;  %v500_v22 = vld [vmem:[#allocation4 + $0x10] sm:$0xff]  ;;  %v1827_v39 = vrot.slane %v20967_v17, 7 }
 0x162   : > { %v1515_v46 = vpop.f32.mrf.mxu0  ;;  %v1684_v19 = vadd.f32 %v17701_v9, %v1133_v52 }
 0x163   : > { %25199 = vst [vmem:[#allocation8_spill] sm:$0xff] %v20943_v45  ;;  %v25184_v50 = vrot.slane %v20943_v45, 7  ;;  %v20949_v14 = vadd.f32 %v1515_v46, %v973_v44  ;;  %v1132_v46 = vadd.f32 %v20873_v43, %v702_v32  ;;  %v498_v45 = vld [vmem:[#allocation4] sm:$0xff]  ;;  %v448_v32 = vld [vmem:[%s20612_s24 + $0x38] sm:$0xff]  }
 0x164   : > { %v17680_v26 = vpop.f32.mrf.mxu0  ;;  %480 = vst [vmem:[#allocation2 + $0x40] sm:$0xff] %v448_v32  }
 0x165   : > { %v1842_v23 = vsel %vm1837_vm1, %v1829_v30, %v25184_v50  ;;  %v1828_v44 = vrot.slane %v20949_v14, 7  ;;  %v1683_v48 = vadd.f32 %v17700_v20, %v1132_v46 }
 0x166   : > { %v1849_v29 = vmul.f32 %v1842_v23, %v501_v7  ;;  %v1528_v49 = vpop.f32.mrf.mxu0  ;;  %v700_v7 = vadd.f32 %v20940_v25, %v20849_v31 }
 0x167   : > { %v1843_v28 = vsel %vm1837_vm1, %v1828_v44, %v1829_v30 }
 0x168   : > { %v20973_v0 = vadd.f32 %v1849_v29, %v1684_v19  ;;  %v1848_v50 = vmul.f32 %v1843_v28, %v500_v22  ;;  %v17681_v51 = vpop.f32.mrf.mxu0  ;;  %v1130_v21 = vadd.f32 %v20883_v47, %v700_v7  ;;  %v989_v47 = vadd.f32 %v20897_v59, %v20869_v41  ;;  %v505_v7 = vld [vmem:[#allocation4 + $0x38] sm:$0xff] }
 0x169   : > { %v1550_v43 = vadd.f32 %v17681_v51, %v997_v27  ;;  %v20988_v51 = vpop.f32.mrf.mxu1  ;;  %v706_v27 = vadd.f32 %v20859_v36, %v20940_v25  ;;  %v707_v41 = vadd.f32 %v20867_v40, %v20940_v25  ;;  %v1351_v40 = vadd.f32 %v20907_v1, %v20905_v63 }
 0x16a   : > { %v20977_v9 = vadd.f32 %v1848_v50, %v1683_v48  ;;  %v1681_v30 = vadd.f32 %v1650_v24, %v1130_v21  ;;  %v1531_v31 = vpop.f32.mrf.mxu0  ;;  %v994_v50 = vadd.f32 %v20887_v53, %v20855_v34  ;;  %v986_v24 = vadd.f32 %v20891_v55, %v20861_v37 }
 0x16b   : > { %v1834_v57 = vrot.slane %v1550_v43, 7  ;;  %v17704_v23 = vpop.f32.mrf.mxu1  ;;  %v704_v34 = vadd.f32 %v20940_v25, %v20863_v38  ;;  %v705_v53 = vadd.f32 %v20940_v25, %v20871_v42  ;;  %v21008_v37 = vadd.f32 %v20940_v25, %v20857_v35 }
 0x16c   : > { %v1549_v33 = vadd.f32 %v17680_v26, %v994_v50  ;;  %v1547_v48 = vadd.f32 %v1528_v49, %v986_v24  ;;  %v1136_v36 = vadd.f32 %v20889_v54, %v706_v27  ;;  %v1137_v49 = vadd.f32 %v20895_v58, %v707_v41 }
 0x16d   : > { %v1845_v20 = vsel %vm1837_vm1, %v1834_v57, %v1827_v39  ;;  %v20998_v43 = vpop.f32.mrf.mxu1  ;;  %v21012_v26 = vadd.f32 %v20893_v56, %v704_v34  ;;  %v1135_v38 = vadd.f32 %v20899_v60, %v705_v53  ;;  %v1375_v35 = vadd.f32 %v20920_v8, %v20917_v6 }
 0x16e   : > { %v1846_v19 = vmul.f32 %v1845_v20, %v498_v45  ;;  %v1548_v45 = vadd.f32 %v1531_v31, %v989_v47  ;;  %v1833_v28 = vrot.slane %v1549_v33, 7  ;;  %v1367_v54 = vadd.f32 %v20925_v11, %v20923_v10  ;;  %v502_v10 = vld [vmem:[#allocation4 + $0x20] sm:$0xff]  ;;  %v504_v11 = vld [vmem:[#allocation4 + $0x30] sm:$0xff]  ;;  %v514_v33 = vld [vmem:[#allocation4 + $0x78] sm:$0xff] }
 0x16f   : > { %v1831_v25 = vrot.slane %v1547_v48, 7  ;;  %v17705_v56 = vpop.f32.mrf.mxu1  ;;  %v1359_v60 = vadd.f32 %v20903_v62, %v20901_v61  ;;  %v1362_v63 = vadd.f32 %v20911_v3, %v20909_v2  ;;  %v1354_v1 = vadd.f32 %v20915_v5, %v20913_v4  ;;  %v503_v4 = vld [vmem:[#allocation4 + $0x28] sm:$0xff]  ;;  %v513_v47 = vld [vmem:[#allocation4 + $0x70] sm:$0xff] }
 0x170   : > { %v20986_v52 = vadd.f32 %v1846_v19, %v1681_v30  ;;  %v1832_v55 = vrot.slane %v1548_v45, 7  ;;  %v1838_v58 = vsel %vm1837_vm1, %v1833_v28, %v1834_v57  ;;  %v1378_v8 = vadd.f32 %v20929_v13, %v20927_v12  ;;  %v25202_v19 = vld [vmem:[#allocation8_spill] sm:$0xff] }
 0x171   : > { %v1370_v61 = vadd.f32 %v20933_v16, %v20931_v15  ;;  %v1687_v62 = vadd.f32 %v17704_v23, %v1136_v36  ;;  %v1688_v2 = vadd.f32 %v17705_v56, %v1137_v49  ;;  %v1853_v3 = vmul.f32 %v1838_v58, %v505_v7  ;;  %v1669_v13 = vpop.f32.mrf.mxu1  ;;  %v499_v56 = vld [vmem:[#allocation4 + $0x8] sm:$0xff] }
 0x172   : > { %v1839_v57 = vsel %vm1837_vm1, %v1832_v55, %v1833_v28  ;;  %v25203_v32 = vrot.slane %v25202_v19, 7  ;;  %v1840_v31 = vsel %vm1837_vm1, %v1831_v25, %v1832_v55  ;;  %v1686_v36 = vadd.f32 %v1669_v13, %v1135_v38  ;;  %v512_v55 = vld [vmem:[#allocation4 + $0x68] sm:$0xff] }
 0x173   : > { %v1852_v24 = vmul.f32 %v1839_v57, %v504_v11  ;;  %v1861_v53 = vadd.f32 %v1853_v3, %v1688_v2  ;;  %v1851_v49 = vmul.f32 %v1840_v31, %v503_v4  ;;  %v1844_v57 = vsel %vm1837_vm1, %v1827_v39, %v1828_v44  ;;  %v508_v4 = vld [vmem:[#allocation4 + $0x48] sm:$0xff]  ;;  %v507_v44 = vld [vmem:[#allocation4 + $0x40] sm:$0xff] }
 0x174   : > { %v1841_v12 = vsel %vm1837_vm1, %v25203_v32, %v1831_v25 }
 0x175   : > { %v1850_v41 = vmul.f32 %v1841_v12, %v502_v10 }
 0x17c   : > { %v17724_v22 = vpop.f32.mrf.mxu0 }
 0x17d   : > { %v1821_v15 = vadd.f32 %v17724_v22, %v1359_v60  ;;  %v510_v60 = vld [vmem:[#allocation4 + $0x58] sm:$0xff] }
 0x17e   : > { %v1788_v46 = vpop.f32.mrf.mxu0 }
 0x17f   : > { %v21031_v21 = vadd.f32 %v1788_v46, %v1351_v40  ;;  %v511_v40 = vld [vmem:[#allocation4 + $0x60] sm:$0xff] }
 0x180   : > { %v17725_v29 = vpop.f32.mrf.mxu0 }
 0x181   : > { %v1822_v50 = vadd.f32 %v17725_v29, %v1362_v63  ;;  %v1862_v16 = vrot.slane %v21031_v21, 1  ;;  %v1685_v21 = vadd.f32 %v20998_v43, %v21012_v26  ;;  %v25204_v43 = vld [vmem:[#allocation7_spill] sm:$0xff] }
 0x182   : > { %v1791_v59 = vpop.f32.mrf.mxu0  ;;  %v1131_v26 = vadd.f32 %v25204_v43, %v21008_v37  ;;  %v21271_v43 = vld [vmem:[#allocation2 + $0x30] sm:$0xff]  }
 0x183   : > { %v1820_v23 = vadd.f32 %v1791_v59, %v1354_v1  ;;  %v1865_v29 = vrot.slane %v1822_v50, 1  ;;  %v1860_v59 = vadd.f32 %v1852_v24, %v1687_v62  ;;  %v1858_v62 = vadd.f32 %v1850_v41, %v1685_v21  ;;  %v450_v41 = vld [vmem:[%s20612_s24 + $0x40] sm:$0xff]  }
 0x184   : > { %v17728_v42 = vpop.f32.mrf.mxu0  ;;  %v1682_v37 = vadd.f32 %v20988_v51, %v1131_v26  ;;  %482 = vst [vmem:[#allocation2 + $0x48] sm:$0xff] %v450_v41   ;;  %v19711_v21 = vld [vmem:[%s25168_s1 + $0x20] sm:$0xff]   ;;  %v19727_v26 = vld [vmem:[%s25168_s1 + $0x170] sm:$0xff]   ;;  %v19754_v41 = vld [vmem:[%s25168_s1 + $0x88] sm:$0xff]  }
 0x185   : > { %v1825_v20 = vadd.f32 %v17728_v42, %v1375_v35  ;;  %v1864_v35 = vrot.slane %v1821_v15, 1  ;;  %v1863_v58 = vrot.slane %v1820_v23, 1  ;;  %v19694_v23 = vld [vmem:[%s25168_s1 + $0x78] sm:$0xff]  }
 0x186   : > { %v1804_v6 = vpop.f32.mrf.mxu0 }
 0x187   : > { %v1823_v30 = vadd.f32 %v1804_v6, %v1367_v54  ;;  %v1868_v27 = vrot.slane %v1825_v20, 1  ;;  %v509_v6 = vld [vmem:[#allocation4 + $0x50] sm:$0xff]  ;;  %v1859_v20 = vadd.f32 %v1851_v49, %v1686_v36  ;;  %v1876_v14 = vsel %vm1870_vm2, %v1863_v58, %v1864_v35  ;;  %v19698_v49 = vld [vmem:[%s25168_s1 + $0x58] sm:$0xff]  }
 0x188   : > { %v17729_v5 = vpop.f32.mrf.mxu0  ;;  %v1877_v12 = vsel %vm1870_vm2, %v1862_v16, %v1863_v58  ;;  %v1880_v13 = vmul.f32 %v1876_v14, %v508_v4  ;;  %v19697_v36 = vld [vmem:[%s25168_s1 + $0x60] sm:$0xff]   ;;  %v19726_v4 = vld [vmem:[%s25168_s1 + $0x130] sm:$0xff]   ;;  %v21279_v14 = vld [vmem:[#allocation2 + $0x38] sm:$0xff]  }
 0x189   : > { %v1826_v46 = vadd.f32 %v17729_v5, %v1378_v8  ;;  %v1866_v28 = vrot.slane %v1823_v30, 1  ;;  %v1875_v30 = vsel %vm1870_vm2, %v1864_v35, %v1865_v29  ;;  %v1847_v5 = vmul.f32 %v1844_v57, %v499_v56  ;;  %v19704_v35 = vld [vmem:[%s25168_s1 + $0xf8] sm:$0xff]   ;;  %v21219_v56 = vld [vmem:[#allocation2 + $0x30] sm:$0xff]   ;;  %v25205_v58 = vld [vmem:[#allocation9_spill] sm:$0xff] }
 0x18a   : > { %v1807_v45 = vpop.f32.mrf.mxu0  ;;  %v1881_v19 = vmul.f32 %v1875_v30, %v509_v6  ;;  %v19710_v6 = vld [vmem:[%s25168_s1 + $0xe0] sm:$0xff]   ;;  %v19716_v57 = vld [vmem:[%s25168_s1 + $0xd0] sm:$0xff]   ;;  %v19718_v30 = vld [vmem:[%s25168_s1 + $0xc8] sm:$0xff]  }
 0x18b   : > { %v1869_v48 = vrot.slane %v1826_v46, 1  ;;  %v1824_v34 = vadd.f32 %v1807_v45, %v1370_v61  ;;  %v1874_v38 = vsel %vm1870_vm2, %v1865_v29, %v1866_v28  ;;  %v1879_v46 = vmul.f32 %v1877_v12, %v507_v44  ;;  %v14732_v29 = vld [vmem:[%s25173_s6 + $0x30] sm:$0xff]  ;;  %v19731_v44 = vld [vmem:[%s25168_s1 + $0x160] sm:$0xff]   ;;  %v19732_v12 = vld [vmem:[%s25168_s1 + $0x118] sm:$0xff]  }
 0x18c   : > { %v1882_v2 = vmul.f32 %v1874_v38, %v510_v60  ;;  %v19709_v60 = vld [vmem:[%s25168_s1 + $0x28] sm:$0xff]  }
 0x18d   : > { %v1871_v7 = vsel %vm1870_vm2, %v1868_v27, %v1869_v48  ;;  %v1878_v22 = vsel %vm1870_vm2, %v1869_v48, %v1862_v16  ;;  %v1867_v42 = vrot.slane %v1824_v34, 1  ;;  %v1887_v15 = vadd.f32 %v1879_v46, %v20986_v52  ;;  %v14729_v52 = vld [vmem:[%s25173_s6 + $0x28] sm:$0xff]  ;;  %v14724_v48 = vld [vmem:[%s25173_s6 + $0x10] sm:$0xff]  ;;  %v21141_v34 = vld [vmem:[#allocation2 + $0x20] sm:$0xff]  }
 0x18e   : > { %v1885_v54 = vmul.f32 %v1871_v7, %v513_v47  ;;  %v1886_v25 = vmul.f32 %v1878_v22, %v514_v33  ;;  %v1890_v31 = vadd.f32 %v1882_v2, %v20973_v0  ;;  %v1855_v47 = vadd.f32 %v1847_v5, %v1682_v37  ;;  %v19700_v7 = vld [vmem:[%s25168_s1 + $0x48] sm:$0xff]   ;;  %v19701_v22 = vld [vmem:[%s25168_s1 + $0x40] sm:$0xff]   ;;  %v19725_v2 = vld [vmem:[%s25168_s1 + $0x178] sm:$0xff]  }
 0x18f   : > { %v1872_v63 = vsel %vm1870_vm2, %v1867_v42, %v1868_v27  ;;  %v1873_v1 = vsel %vm1870_vm2, %v1866_v28, %v1867_v42  ;;  %v1889_v33 = vadd.f32 %v1881_v19, %v20977_v9  ;;  %v21120_v45 = vmax.f32 %v1887_v15, 0.0  ;;  %v1904_v27 = vld [vmem:[%s25173_s6 + $0x8] sm:$0xff]  ;;  %v19695_v28 = vld [vmem:[%s25168_s1 + $0x70] sm:$0xff]   ;;  %v19705_v42 = vld [vmem:[%s25168_s1 + $0x38] sm:$0xff]  }
 0x190   : > { %v1893_v8 = vadd.f32 %v1885_v54, %v1860_v59  ;;  %v1894_v10 = vadd.f32 %v1886_v25, %v1861_v53  ;;  %v1883_v11 = vmul.f32 %v1873_v1, %v511_v40  ;;  %v1884_v61 = vmul.f32 %v1872_v63, %v512_v55  ;;  %v19696_v53 = vld [vmem:[%s25168_s1 + $0x68] sm:$0xff]   ;;  %v14725_v40 = vld [vmem:[%s25173_s6 + $0x18] sm:$0xff]  ;;  %v19699_v55 = vld [vmem:[%s25168_s1 + $0x50] sm:$0xff]  }
 0x191   : > { %v1888_v0 = vadd.f32 %v1880_v13, %v1855_v47  ;;  %v21095_v51 = vmax.f32 %v1890_v31, 0.0  ;;  %v21101_v9 = vmax.f32 %v1889_v33, 0.0  ;;  %v14733_v59 = vld [vmem:[%s25173_s6 + $0x38] sm:$0xff]  ;;  %v19707_v54 = vld [vmem:[%s25168_s1 + $0x30] sm:$0xff]   ;;  %v19708_v38 = vld [vmem:[%s25168_s1 + $0xe8] sm:$0xff]  }
 0x192   : > { %v21066_v3 = vmax.f32 %v1894_v10, 0.0  ;;  %v1892_v17 = vadd.f32 %v1884_v61, %v1859_v20  ;;  %v21072_v39 = vmax.f32 %v1893_v8, 0.0  ;;  %v1891_v32 = vadd.f32 %v1883_v11, %v1858_v62  ;;  %v19706_v25 = vld [vmem:[%s25168_s1 + $0xf0] sm:$0xff]   ;;  %v21230_v63 = vld [vmem:[#allocation2 + $0x38] sm:$0xff]   ;;  %v25206_v1 = vld [vmem:[#allocation10_spill] sm:$0xff] }
 0x193   : > { %v21108_v16 = vmax.f32 %v1888_v0, 0.0  ;;  %v19713_v8 = vld [vmem:[%s25168_s1 + $0x18] sm:$0xff]   ;;  %v19717_v11 = vld [vmem:[%s25168_s1 + $0x10] sm:$0xff]   ;;  %v19719_v20 = vld [vmem:[%s25168_s1 + $0x8] sm:$0xff]  }
 0x194   : > { %17730 = vmatprep.subr.mxu1 %v21066_v3  ;;  %17768 = vmatprep.subr.mxu0 %v21066_v3  ;;  %v21082_v50 = vmax.f32 %v1892_v17, 0.0  ;;  %v21089_v24 = vmax.f32 %v1891_v32, 0.0  ;;  %v19712_v10 = vld [vmem:[%s25168_s1 + $0xd8] sm:$0xff]   ;;  %v19721_v61 = vld [vmem:[%s25168_s1] sm:$0xff]   ;;  %v19729_v17 = vld [vmem:[%s25168_s1 + $0x168] sm:$0xff]  }
 0x195   : > { %17731 = vmatpush3.msra.mxu1 %v21066_v3  ;;  %17769 = vmatpush3.msra.mxu0 %v21066_v3  ;;  %v19720_v62 = vld [vmem:[%s25168_s1 + $0xc0] sm:$0xff]   ;;  %v19728_v5 = vld [vmem:[%s25168_s1 + $0x128] sm:$0xff]   ;;  %v19733_v32 = vld [vmem:[%s25168_s1 + $0x158] sm:$0xff]  }
 0x196   : > { %17732 = vmatprep.subr.mxu1 %v21072_v39  ;;  %17770 = vmatprep.subr.mxu0 %v21072_v39  ;;  %v21291_v19 = vld [vmem:[#allocation2 + $0x40] sm:$0xff]   ;;  %v19737_v37 = vld [vmem:[%s25168_s1 + $0x150] sm:$0xff]   ;;  %v19739_v31 = vld [vmem:[%s25168_s1 + $0x148] sm:$0xff]  }
 0x197   : > { %17733 = vmatpush3.msra.mxu1 %v21072_v39  ;;  %17771 = vmatpush3.msra.mxu0 %v21072_v39  ;;  %v19736_v13 = vld [vmem:[%s25168_s1 + $0x110] sm:$0xff]   ;;  %v19741_v47 = vld [vmem:[%s25168_s1 + $0x140] sm:$0xff]   ;;  %v19743_v46 = vld [vmem:[%s25168_s1 + $0x1b8] sm:$0xff]  }
 0x198   : > { %17734 = vmatprep.subr.mxu1 %v21082_v50  ;;  %17772 = vmatprep.subr.mxu0 %v21082_v50  ;;  %v19740_v33 = vld [vmem:[%s25168_s1 + $0x100] sm:$0xff]   ;;  %v19745_v0 = vld [vmem:[%s25168_s1 + $0x1b0] sm:$0xff]   ;;  %v19746_v15 = vld [vmem:[%s25168_s1 + $0xa8] sm:$0xff]  }
 0x199   : > { %17735 = vmatpush3.msra.mxu1 %v21082_v50  ;;  %17773 = vmatpush3.msra.mxu0 %v21082_v50 }
 0x19a   : > { %17736 = vmatprep.subr.mxu1 %v21089_v24  ;;  %17774 = vmatprep.subr.mxu0 %v21089_v24 }
 0x19b   : > { %17737 = vmatpush3.msra.mxu1 %v21089_v24  ;;  %17775 = vmatpush3.msra.mxu0 %v21089_v24 }
 0x19c   : > { %17738 = vmatprep.subr.mxu1 %v21095_v51  ;;  %17776 = vmatprep.subr.mxu0 %v21095_v51 }
 0x19d   : > { %17739 = vmatpush3.msra.mxu1 %v21095_v51  ;;  %17777 = vmatpush3.msra.mxu0 %v21095_v51 }
 0x19e   : > { %17740 = vmatprep.subr.mxu1 %v21101_v9  ;;  %17778 = vmatprep.subr.mxu0 %v21101_v9 }
 0x19f   : > { %17741 = vmatpush3.msra.mxu1 %v21101_v9  ;;  %17779 = vmatpush3.msra.mxu0 %v21101_v9 }
 0x1a0   : > { %17742 = vmatprep.subr.mxu1 %v21108_v16  ;;  %17780 = vmatprep.subr.mxu0 %v21108_v16 }
 0x1a1   : > { %17743 = vmatpush3.msra.mxu1 %v21108_v16  ;;  %17781 = vmatpush3.msra.mxu0 %v21108_v16 }
 0x1a2   : > { %17744 = vmatprep.subr.mxu1 %v21120_v45  ;;  %17782 = vmatprep.subr.mxu0 %v21120_v45 }
 0x1a3   : > { %17745 = vmatpush3.msra.mxu1 %v21120_v45  ;;  %17783 = vmatpush3.msra.mxu0 %v21120_v45 }
 0x1a4   : > { %17749 = vmatprep.subr.mxu1 %v21066_v3  ;;  %17785 = vmatmul.mubr.msk.f32.vlgmr.msra.gmra.mxu0 %vm1905_vm0, %v14729_v52  ;;  %v19748_v52 = vld [vmem:[%s25168_s1 + $0xa0] sm:$0xff]  }
 0x1a5   : > { %17806 = vmatprep.subr.bf16.mxu0 %v19694_v23  ;;  %17747 = vmatmul.mubr.msk.f32.vlgmr.msra.gmra.mxu1 %vm1905_vm0, %v1904_v27  ;;  %v19750_v27 = vld [vmem:[%s25168_s1 + $0x98] sm:$0xff]  }
 0x1a6   : > { %17750 = vmatpush3.msra.mxu1 %v21066_v3  ;;  %17807 = vmatpush3.bf16.msra.mxu0 %v19694_v23  ;;  %v21356_v23 = vld [vmem:[#allocation2 + $0x30] sm:$0xff]  }
 0x1a7   : > { %17751 = vmatprep.subr.mxu1 %v21072_v39  ;;  %17808 = vmatprep.subr.bf16.mxu0 %v19695_v28 }
 0x1a8   : > { %17752 = vmatpush3.msra.mxu1 %v21072_v39  ;;  %17765 = vmatprep.mubr.msk.f32.mxu1 %vm1905_vm0, %v14724_v48  ;;  %v19752_v48 = vld [vmem:[%s25168_s1 + $0x90] sm:$0xff]  }
 0x1a9   : > { %17753 = vmatprep.subr.mxu1 %v21082_v50  ;;  %17822 = vmatprep.mubr.bf16.mxu0 %v21141_v34 }
 0x1aa   : > { %17754 = vmatpush3.msra.mxu1 %v21082_v50  ;;  %17809 = vmatpush3.bf16.msra.mxu0 %v19695_v28  ;;  %v19753_v28 = vld [vmem:[%s25168_s1 + $0x190] sm:$0xff]  }
 0x1ab   : > { %17755 = vmatprep.subr.mxu1 %v21089_v24  ;;  %17810 = vmatprep.subr.bf16.mxu0 %v19696_v53 }
 0x1ac   : > { %17756 = vmatpush3.msra.mxu1 %v21089_v24 }
 0x1ad   : > { %17757 = vmatprep.subr.mxu1 %v21095_v51 }
 0x1ae   : > { %17758 = vmatpush3.msra.mxu1 %v21095_v51  ;;  %17811 = vmatpush3.bf16.msra.mxu0 %v19696_v53  ;;  %v19757_v53 = vld [vmem:[%s25168_s1 + $0x180] sm:$0xff]  }
 0x1af   : > { %17759 = vmatprep.subr.mxu1 %v21101_v9  ;;  %17812 = vmatprep.subr.bf16.mxu0 %v19697_v36 }
 0x1b0   : > { %17760 = vmatpush3.msra.mxu1 %v21101_v9 }
 0x1b1   : > { %17761 = vmatprep.subr.mxu1 %v21108_v16 }
 0x1b2   : > { %17762 = vmatpush3.msra.mxu1 %v21108_v16  ;;  %17813 = vmatpush3.bf16.msra.mxu0 %v19697_v36  ;;  %v19756_v36 = vld [vmem:[%s25168_s1 + $0x80] sm:$0xff]  }
 0x1b3   : > { %17763 = vmatprep.subr.mxu1 %v21120_v45  ;;  %17814 = vmatprep.subr.bf16.mxu0 %v19698_v49 }
 0x1b4   : > { %17764 = vmatpush3.msra.mxu1 %v21120_v45 }
 0x1b5   : > { %17766 = vmatmul.mubr.msk.f32.vlgmr.msra.gmra.mxu1 %vm1905_vm0, %v14725_v40  ;;  %17787 = vmatprep.subr.mxu1 %v21066_v3  ;;  %v19760_v40 = vld [vmem:[%s25168_s1 + $0x1f8] sm:$0xff]  }
 0x1b6   : > { %17788 = vmatpush3.msra.mxu1 %v21066_v3  ;;  %17815 = vmatpush3.bf16.msra.mxu0 %v19698_v49  ;;  %v19724_v3 = vld [vmem:[%s25168_s1 + $0x138] sm:$0xff]  }
 0x1b7   : > { %17789 = vmatprep.subr.mxu1 %v21072_v39  ;;  %17816 = vmatprep.subr.bf16.mxu0 %v19699_v55  ;;  %v19761_v49 = vld [vmem:[%s25168_s1 + $0x238] sm:$0xff]  }
 0x1b8   : > { %17790 = vmatpush3.msra.mxu1 %v21072_v39  ;;  %17803 = vmatprep.mubr.msk.f32.mxu1 %vm1905_vm0, %v14732_v29  ;;  %v19730_v39 = vld [vmem:[%s25168_s1 + $0x120] sm:$0xff]   ;;  %v19763_v29 = vld [vmem:[%s25168_s1 + $0x230] sm:$0xff]  }
 0x1b9   : > { %17791 = vmatprep.subr.mxu1 %v21082_v50 }
 0x1ba   : > { %17792 = vmatpush3.msra.mxu1 %v21082_v50  ;;  %17817 = vmatpush3.bf16.msra.mxu0 %v19699_v55  ;;  %v19738_v50 = vld [vmem:[%s25168_s1 + $0x108] sm:$0xff]   ;;  %v19759_v55 = vld [vmem:[#allocation2 + $0x38] sm:$0xff]  }
 0x1bb   : > { %17793 = vmatprep.subr.mxu1 %v21089_v24  ;;  %17818 = vmatprep.subr.bf16.mxu0 %v19700_v7 }
 0x1bc   : > { %17794 = vmatpush3.msra.mxu1 %v21089_v24  ;;  %v19742_v24 = vld [vmem:[%s25168_s1 + $0xb8] sm:$0xff]  }
 0x1bd   : > { %17795 = vmatprep.subr.mxu1 %v21095_v51 }
 0x1be   : > { %17796 = vmatpush3.msra.mxu1 %v21095_v51  ;;  %17819 = vmatpush3.bf16.msra.mxu0 %v19700_v7  ;;  %v19744_v51 = vld [vmem:[%s25168_s1 + $0xb0] sm:$0xff]  }
 0x1bf   : > { %17797 = vmatprep.subr.mxu1 %v21101_v9  ;;  %17820 = vmatprep.subr.bf16.mxu0 %v19701_v22  ;;  %v19762_v7 = vld [vmem:[%s25168_s1 + $0x1f0] sm:$0xff]  }
 0x1c0   : > { %17798 = vmatpush3.msra.mxu1 %v21101_v9  ;;  %v19747_v9 = vld [vmem:[%s25168_s1 + $0x1a8] sm:$0xff]  }
 0x1c1   : > { %17799 = vmatprep.subr.mxu1 %v21108_v16 }
 0x1c2   : > { %17800 = vmatpush3.msra.mxu1 %v21108_v16  ;;  %17821 = vmatpush3.bf16.msra.mxu0 %v19701_v22  ;;  %v19749_v16 = vld [vmem:[%s25168_s1 + $0x1a0] sm:$0xff]  }
 0x1c3   : > { %17801 = vmatprep.subr.mxu1 %v21120_v45  ;;  %17854 = vmatprep.subr.bf16.mxu0 %v19705_v42  ;;  %v19764_v22 = vld [vmem:[#allocation2 + $0x40] sm:$0xff]  }
 0x1c4   : > { %17802 = vmatpush3.msra.mxu1 %v21120_v45  ;;  %v19751_v45 = vld [vmem:[%s25168_s1 + $0x198] sm:$0xff]  }
 0x1c5   : > { %17804 = vmatmul.mubr.msk.f32.vlgmr.msra.gmra.mxu1 %vm1905_vm0, %v14733_v59  ;;  %17823 = vmatmul.mubr.bf16.vlgmr.msra.gmra.mxu0 %v25205_v58  ;;  %v19766_v59 = vld [vmem:[%s25168_s1 + $0x1e8] sm:$0xff]  }
 0x1c6   : > { %17830 = vmatprep.subr.bf16.mxu1 %v19704_v35  ;;  %17855 = vmatpush3.bf16.msra.mxu0 %v19705_v42  ;;  %v19767_v42 = vld [vmem:[%s25168_s1 + $0x228] sm:$0xff]  }
 0x1c7   : > { %17831 = vmatpush3.bf16.msra.mxu1 %v19704_v35  ;;  %17856 = vmatprep.subr.bf16.mxu0 %v19707_v54  ;;  %v19765_v35 = vld [vmem:[#allocation2 + $0x48] sm:$0xff]  }
 0x1c8   : > { %17832 = vmatprep.subr.bf16.mxu1 %v19706_v25  ;;  %17826 = vmatprep.mubr.bf16.mxu0 %v21219_v56 }
 0x1c9   : > { %17846 = vmatprep.mubr.bf16.mxu1 %v25206_v1 }
 0x1ca   : > { %17857 = vmatpush3.bf16.msra.mxu0 %v19707_v54  ;;  %v19769_v54 = vld [vmem:[%s25168_s1 + $0x220] sm:$0xff]  }
 0x1cb   : > { %17833 = vmatpush3.bf16.msra.mxu1 %v19706_v25  ;;  %17858 = vmatprep.subr.bf16.mxu0 %v19709_v60  ;;  %v19768_v25 = vld [vmem:[%s25168_s1 + $0x1e0] sm:$0xff]  }
 0x1cc   : > { %17834 = vmatprep.subr.bf16.mxu1 %v19708_v38 }
 0x1cd   : > { %17827 = vmatmul.mubr.bf16.gmra.mxu0 %v21230_v63 }
 0x1ce   : > { %17859 = vmatpush3.bf16.msra.mxu0 %v19709_v60  ;;  %17870 = vmatprep.mubr.bf16.mxu0 %v21141_v34  ;;  %v19773_v60 = vld [vmem:[%s25168_s1 + $0x210] sm:$0xff]  }
 0x1cf   : > { %17835 = vmatpush3.bf16.msra.mxu1 %v19708_v38  ;;  %17860 = vmatprep.subr.bf16.mxu0 %v19711_v21  ;;  %v19772_v38 = vld [vmem:[%s25168_s1 + $0x1d0] sm:$0xff]  }
 0x1d0   : > { %17836 = vmatprep.subr.bf16.mxu1 %v19710_v6 }
 0x1d2   : > { %17861 = vmatpush3.bf16.msra.mxu0 %v19711_v21  ;;  %v19777_v21 = vld [vmem:[%s25168_s1 + $0x200] sm:$0xff]  }
 0x1d3   : > { %17837 = vmatpush3.bf16.msra.mxu1 %v19710_v6  ;;  %17862 = vmatprep.subr.bf16.mxu0 %v19713_v8  ;;  %v19776_v6 = vld [vmem:[%s25168_s1 + $0x1c0] sm:$0xff]  }
 0x1d4   : > { %17838 = vmatprep.subr.bf16.mxu1 %v19712_v10 }
 0x1d6   : > { %17863 = vmatpush3.bf16.msra.mxu0 %v19713_v8 }
 0x1d7   : > { %17839 = vmatpush3.bf16.msra.mxu1 %v19712_v10  ;;  %17864 = vmatprep.subr.bf16.mxu0 %v19717_v11 }
 0x1d8   : > { %17840 = vmatprep.subr.bf16.mxu1 %v19716_v57 }
 0x1da   : > { %17865 = vmatpush3.bf16.msra.mxu0 %v19717_v11 }
 0x1db   : > { %17841 = vmatpush3.bf16.msra.mxu1 %v19716_v57  ;;  %17866 = vmatprep.subr.bf16.mxu0 %v19719_v20 }
 0x1dc   : > { %17842 = vmatprep.subr.bf16.mxu1 %v19718_v30 }
 0x1de   : > { %17867 = vmatpush3.bf16.msra.mxu0 %v19719_v20 }
 0x1df   : > { %17843 = vmatpush3.bf16.msra.mxu1 %v19718_v30  ;;  %17868 = vmatprep.subr.bf16.mxu0 %v19721_v61 }
 0x1e0   : > { %17844 = vmatprep.subr.bf16.mxu1 %v19720_v62 }
 0x1e2   : > { %17869 = vmatpush3.bf16.msra.mxu0 %v19721_v61 }
 0x1e3   : > { %17845 = vmatpush3.bf16.msra.mxu1 %v19720_v62  ;;  %17902 = vmatprep.subr.bf16.mxu0 %v19725_v2 }
 0x1e4   : > { %17878 = vmatprep.subr.bf16.mxu1 %v19724_v3 }
 0x1e5   : > { %17871 = vmatmul.mubr.bf16.vlgmr.msra.gmra.mxu0 %v25205_v58 }
 0x1e6   : > { %17847 = vmatmul.mubr.bf16.vlgmr.msra.gmra.mxu1 %v21271_v43  ;;  %17903 = vmatpush3.bf16.msra.mxu0 %v19725_v2 }
 0x1e7   : > { %17879 = vmatpush3.bf16.msra.mxu1 %v19724_v3  ;;  %17904 = vmatprep.subr.bf16.mxu0 %v19727_v26 }
 0x1e8   : > { %17880 = vmatprep.subr.bf16.mxu1 %v19726_v4  ;;  %17850 = vmatprep.mubr.bf16.mxu1 %v21279_v14 }
 0x1e9   : > { %17874 = vmatprep.mubr.bf16.mxu0 %v21219_v56 }
 0x1ea   : > { %17905 = vmatpush3.bf16.msra.mxu0 %v19727_v26 }
 0x1eb   : > { %17881 = vmatpush3.bf16.msra.mxu1 %v19726_v4  ;;  %17906 = vmatprep.subr.bf16.mxu0 %v19729_v17 }
 0x1ec   : > { %17882 = vmatprep.subr.bf16.mxu1 %v19728_v5 }
 0x1ed   : > { %17875 = vmatmul.mubr.bf16.gmra.mxu0 %v21230_v63 }
 0x1ee   : > { %17907 = vmatpush3.bf16.msra.mxu0 %v19729_v17  ;;  %17851 = vmatmul.mubr.bf16.gmra.mxu1 %v21291_v19 }
 0x1ef   : > { %17883 = vmatpush3.bf16.msra.mxu1 %v19728_v5  ;;  %17908 = vmatprep.subr.bf16.mxu0 %v19731_v44 }
 0x1f0   : > { %17884 = vmatprep.subr.bf16.mxu1 %v19730_v39  ;;  %17894 = vmatprep.mubr.bf16.mxu1 %v25206_v1 }
 0x1f1   : > { %17918 = vmatprep.mubr.bf16.mxu0 %v25206_v1  ;;  %v19774_v1 = vld [vmem:[%s25168_s1 + $0x1c8] sm:$0xff]  }
 0x1f2   : > { %17909 = vmatpush3.bf16.msra.mxu0 %v19731_v44 }
 0x1f3   : > { %17885 = vmatpush3.bf16.msra.mxu1 %v19730_v39  ;;  %17910 = vmatprep.subr.bf16.mxu0 %v19733_v32 }
 0x1f4   : > { %17886 = vmatprep.subr.bf16.mxu1 %v19732_v12 }
 0x1f6   : > { %17911 = vmatpush3.bf16.msra.mxu0 %v19733_v32 }
 0x1f7   : > { %17887 = vmatpush3.bf16.msra.mxu1 %v19732_v12  ;;  %17912 = vmatprep.subr.bf16.mxu0 %v19737_v37 }
 0x1f8   : > { %17888 = vmatprep.subr.bf16.mxu1 %v19736_v13 }
 0x1fa   : > { %17913 = vmatpush3.bf16.msra.mxu0 %v19737_v37  ;;  %v25208_v37 = vmov 0  }
 0x1fb   : > { %17889 = vmatpush3.bf16.msra.mxu1 %v19736_v13  ;;  %17914 = vmatprep.subr.bf16.mxu0 %v19739_v31 }
 0x1fc   : > { %17890 = vmatprep.subr.bf16.mxu1 %v19738_v50 }
 0x1fe   : > { %17915 = vmatpush3.bf16.msra.mxu0 %v19739_v31 }
 0x1ff   : > { %17891 = vmatpush3.bf16.msra.mxu1 %v19738_v50  ;;  %17916 = vmatprep.subr.bf16.mxu0 %v19741_v47 }
 0x200   : > { %17892 = vmatprep.subr.bf16.mxu1 %v19740_v33 }
 0x202   : > { %17917 = vmatpush3.bf16.msra.mxu0 %v19741_v47 }
 0x203   : > { %17893 = vmatpush3.bf16.msra.mxu1 %v19740_v33  ;;  %17950 = vmatprep.subr.bf16.mxu0 %v19743_v46 }
 0x204   : > { %17926 = vmatprep.subr.bf16.mxu1 %v19742_v24 }
 0x205   : > { %17919 = vmatmul.mubr.bf16.vlgmr.msra.gmra.mxu0 %v21271_v43 }
 0x206   : > { %17895 = vmatmul.mubr.bf16.vlgmr.msra.gmra.mxu1 %v21271_v43  ;;  %17951 = vmatpush3.bf16.msra.mxu0 %v19743_v46  ;;  %v14956_v46 = vld [vmem:[%s25173_s6 + $0x20] sm:$0xff] }
 0x207   : > { %17927 = vmatpush3.bf16.msra.mxu1 %v19742_v24  ;;  %17952 = vmatprep.subr.bf16.mxu0 %v19745_v0  ;;  %v3624_v24 = vld [vmem:[%s25173_s6] sm:$0xff] }
 0x208   : > { %17928 = vmatprep.subr.bf16.mxu1 %v19744_v51  ;;  %17898 = vmatprep.mubr.bf16.mxu1 %v21279_v14 }
 0x209   : > { %17922 = vmatprep.mubr.bf16.mxu0 %v21279_v14 }
 0x20a   : > { %17953 = vmatpush3.bf16.msra.mxu0 %v19745_v0 }
 0x20b   : > { %17929 = vmatpush3.bf16.msra.mxu1 %v19744_v51  ;;  %17954 = vmatprep.subr.bf16.mxu0 %v19747_v9 }
 0x20c   : > { %17930 = vmatprep.subr.bf16.mxu1 %v19746_v15 }
 0x20d   : > { %17923 = vmatmul.mubr.bf16.gmra.mxu0 %v21291_v19 }
 0x20e   : > { %17899 = vmatmul.mubr.bf16.gmra.mxu1 %v21291_v19  ;;  %17955 = vmatpush3.bf16.msra.mxu0 %v19747_v9 }
 0x20f   : > { %17931 = vmatpush3.bf16.msra.mxu1 %v19746_v15  ;;  %17956 = vmatprep.subr.bf16.mxu0 %v19749_v16 }
 0x210   : > { %17932 = vmatprep.subr.bf16.mxu1 %v19748_v52  ;;  %17942 = vmatprep.mubr.bf16.mxu1 %v21141_v34  ;;  %v19755_v34 = vld [vmem:[%s25168_s1 + $0x188] sm:$0xff]  }
 0x211   : > { %17966 = vmatprep.mubr.bf16.mxu0 %v21356_v23 }
 0x212   : > { %17957 = vmatpush3.bf16.msra.mxu0 %v19749_v16 }
 0x213   : > { %17933 = vmatpush3.bf16.msra.mxu1 %v19748_v52  ;;  %17958 = vmatprep.subr.bf16.mxu0 %v19751_v45 }
 0x214   : > { %17934 = vmatprep.subr.bf16.mxu1 %v19750_v27 }
 0x216   : > { %17959 = vmatpush3.bf16.msra.mxu0 %v19751_v45 }
 0x217   : > { %17935 = vmatpush3.bf16.msra.mxu1 %v19750_v27  ;;  %17960 = vmatprep.subr.bf16.mxu0 %v19753_v28 }
 0x218   : > { %17936 = vmatprep.subr.bf16.mxu1 %v19752_v48 }
 0x21a   : > { %17961 = vmatpush3.bf16.msra.mxu0 %v19753_v28 }
 0x21b   : > { %17937 = vmatpush3.bf16.msra.mxu1 %v19752_v48  ;;  %17962 = vmatprep.subr.bf16.mxu0 %v19755_v34 }
 0x21c   : > { %17938 = vmatprep.subr.bf16.mxu1 %v19754_v41 }
 0x21e   : > { %17963 = vmatpush3.bf16.msra.mxu0 %v19755_v34 }
 0x21f   : > { %17939 = vmatpush3.bf16.msra.mxu1 %v19754_v41  ;;  %17964 = vmatprep.subr.bf16.mxu0 %v19757_v53 }
 0x220   : > { %17940 = vmatprep.subr.bf16.mxu1 %v19756_v36 }
 0x222   : > { %17965 = vmatpush3.bf16.msra.mxu0 %v19757_v53 }
 0x223   : > { %17941 = vmatpush3.bf16.msra.mxu1 %v19756_v36  ;;  %17998 = vmatprep.subr.bf16.mxu0 %v19761_v49 }
 0x224   : > { %17974 = vmatprep.subr.bf16.mxu1 %v19760_v40 }
 0x225   : > { %17967 = vmatmul.mubr.bf16.vlgmr.msra.gmra.mxu0 %v19759_v55 }
 0x226   : > { %17943 = vmatmul.mubr.bf16.vlgmr.msra.gmra.mxu1 %v25205_v58  ;;  %17999 = vmatpush3.bf16.msra.mxu0 %v19761_v49  ;;  %v19770_v58 = vld [vmem:[%s25168_s1 + $0x1d8] sm:$0xff]  }
 0x227   : > { %17975 = vmatpush3.bf16.msra.mxu1 %v19760_v40  ;;  %18000 = vmatprep.subr.bf16.mxu0 %v19763_v29 }
 0x228   : > { %17976 = vmatprep.subr.bf16.mxu1 %v19762_v7  ;;  %17946 = vmatprep.mubr.bf16.mxu1 %v21219_v56  ;;  %v19771_v56 = vld [vmem:[%s25168_s1 + $0x218] sm:$0xff]  }
 0x229   : > { %17970 = vmatprep.mubr.bf16.mxu0 %v19764_v22 }
 0x22a   : > { %18001 = vmatpush3.bf16.msra.mxu0 %v19763_v29 }
 0x22b   : > { %17977 = vmatpush3.bf16.msra.mxu1 %v19762_v7  ;;  %18002 = vmatprep.subr.bf16.mxu0 %v19767_v42 }
 0x22c   : > { %17978 = vmatprep.subr.bf16.mxu1 %v19766_v59 }
 0x22d   : > { %17971 = vmatmul.mubr.bf16.gmra.mxu0 %v19765_v35 }
 0x22e   : > { %17947 = vmatmul.mubr.bf16.gmra.mxu1 %v21230_v63  ;;  %18003 = vmatpush3.bf16.msra.mxu0 %v19767_v42  ;;  %v19775_v63 = vld [vmem:[%s25168_s1 + $0x208] sm:$0xff]  }
 0x22f   : > { %17979 = vmatpush3.bf16.msra.mxu1 %v19766_v59  ;;  %18004 = vmatprep.subr.bf16.mxu0 %v19769_v54 }
 0x230   : > { %17980 = vmatprep.subr.bf16.mxu1 %v19768_v25  ;;  %17990 = vmatprep.mubr.bf16.mxu1 %v21356_v23 }
 0x231   : > { %18014 = vmatprep.mubr.bf16.mxu0 %v21356_v23 }
 0x232   : > { %18005 = vmatpush3.bf16.msra.mxu0 %v19769_v54 }
 0x233   : > { %17981 = vmatpush3.bf16.msra.mxu1 %v19768_v25  ;;  %18006 = vmatprep.subr.bf16.mxu0 %v19771_v56  ;;  %v452_v25 = vld [vmem:[%s20612_s24 + $0x48] sm:$0xff]  }
 0x234   : > { %17982 = vmatprep.subr.bf16.mxu1 %v19770_v58  ;;  %484 = vst [vmem:[#allocation2 + $0x50] sm:$0xff] %v452_v25  }
 0x236   : > { %18007 = vmatpush3.bf16.msra.mxu0 %v19771_v56  ;;  %v454_v56 = vld [vmem:[%s20612_s24 + $0x50] sm:$0xff]  }
 0x237   : > { %17983 = vmatpush3.bf16.msra.mxu1 %v19770_v58  ;;  %18008 = vmatprep.subr.bf16.mxu0 %v19773_v60  ;;  %486 = vst [vmem:[#allocation2 + $0x58] sm:$0xff] %v454_v56  }
 0x238   : > { %17984 = vmatprep.subr.bf16.mxu1 %v19772_v38 }
 0x23a   : > { %18009 = vmatpush3.bf16.msra.mxu0 %v19773_v60 }
 0x23b   : > { %17985 = vmatpush3.bf16.msra.mxu1 %v19772_v38  ;;  %18010 = vmatprep.subr.bf16.mxu0 %v19775_v63 }
 0x23c   : > { %17986 = vmatprep.subr.bf16.mxu1 %v19774_v1 }
 0x23e   : > { %18011 = vmatpush3.bf16.msra.mxu0 %v19775_v63 }
 0x23f   : > { %17987 = vmatpush3.bf16.msra.mxu1 %v19774_v1  ;;  %18012 = vmatprep.subr.bf16.mxu0 %v19777_v21 }
 0x240   : > { %17988 = vmatprep.subr.bf16.mxu1 %v19776_v6 }
 0x242   : > { %18013 = vmatpush3.bf16.msra.mxu0 %v19777_v21 }
 0x243   : > { %17989 = vmatpush3.bf16.msra.mxu1 %v19776_v6 }
 0x245   : > { %18015 = vmatmul.mubr.bf16.vlgmr.msra.gmra.mxu0 %v19759_v55 }
 0x246   : > { %17991 = vmatmul.mubr.bf16.vlgmr.msra.gmra.mxu1 %v19759_v55  ;;  %18018 = vmatprep.mubr.bf16.mxu0 %v19764_v22 }
 0x247   : > { %17994 = vmatprep.mubr.bf16.mxu1 %v19764_v22 }
 0x24d   : > { %18019 = vmatmul.mubr.bf16.gmra.mxu0 %v19765_v35 }
 0x24e   : > { %17995 = vmatmul.mubr.bf16.gmra.mxu1 %v19765_v35  ;;  %18076 = vmatprep.mubr.msk.f32.mxu0 %vm1905_vm0, %v14956_v46 }
 0x24f   : > { %18038 = vmatprep.mubr.msk.f32.mxu1 %vm1905_vm0, %v3624_v24 }
 0x264   : > { %v17786_v20 = vpop.f32.mrf.mxu0 }
 0x265   : > { %v17748_v8 = vpop.f32.mrf.mxu1 }
 0x266   : > { %v2148_v62 = vpop.f32.mrf.mxu0 }
 0x267   : > { %v1978_v10 = vpop.f32.mrf.mxu1 }
 0x275   : > { %v17767_v11 = vpop.f32.mrf.mxu1 }
 0x276   : > { %v2072_v30 = vmax.f32 %v17748_v8, %v17767_v11 }
 0x277   : > { %v2062_v57 = vpop.f32.mrf.mxu1 }
 0x278   : > { %v2071_v61 = vmax.f32 %v1978_v10, %v2062_v57  ;;  %v2158_v3 = vmax.f32 %v2072_v30, %v17786_v20 }
 0x27a   : > { %v2157_v43 = vmax.f32 %v2071_v61, %v2148_v62 }
 0x285   : > { %v17805_v2 = vpop.f32.mrf.mxu1  ;;  %v21438_v5 = vpop.f32.mrf.mxu0 }
 0x286   : > { %v2244_v4 = vmax.f32 %v2158_v3, %v17805_v2 }
 0x287   : > { %v2234_v26 = vpop.f32.mrf.mxu1  ;;  %v21440_v39 = vpop.f32.mrf.mxu0 }
 0x288   : > { %v2243_v14 = vmax.f32 %v2157_v43, %v2234_v26  ;;  %v456_v26 = vld [vmem:[%s20612_s24 + $0x58] sm:$0xff]  }
 0x289   : > { %v21442_v32 = vpop.f32.mrf.mxu0  ;;  %488 = vst [vmem:[#allocation2 + $0x60] sm:$0xff] %v456_v26  }
 0x28a   : > { %v16412_v17 = vpack.c.bf16 %v2244_v4, %v2243_v14 }
 0x28b   : > { %v21447_v13 = vpop.f32.mrf.mxu0 }
 0x28c   : > { %16413 = vst [vmem:[#allocation3] sm:$0xff] %v16412_v17  }
 0x28d   : > { %v21449_v31 = vpop.f32.mrf.mxu0 }
 0x28f   : > { %v21451_v50 = vpop.f32.mrf.mxu0 }
 0x291   : > { %v21453_v47 = vpop.f32.mrf.mxu0 }
 0x293   : > { %v7410_v19 = vld [vmem:[#allocation3] sm:$0xf]  ;;  %v7411_v44 = vld [vmem:[#allocation3 + $0x4] sm:$0xf]  ;;  %v21455_v33 = vpop.f32.mrf.mxu0 }
 0x294   : > { %7419 = vst [vmem:[#allocation2 + $0xc] sm:$0xf] %v7411_v44  ;;  %7418 = vst [vmem:[#allocation2 + $0x8] sm:$0xf] %v7410_v19 }
 0x29b   : > { %v21444_v12 = vld [vmem:[#allocation2 + $0x4] sm:$0xff]  }
 0x29c   : > { %25207 = vst [vmem:[#allocation8_spill] sm:$0xff] %v21444_v12  ;;  %9182 = vst [vmem:[#allocation2 + $0x4] sm:$0xf] %v25208_v37 }
 0x2a5   : > { %v17872_v0 = vpop.f32.mrf.mxu0 }
 0x2a6   : > { %v17848_v51 = vpop.f32.mrf.mxu1 }
 0x2a7   : > { %v2699_v9 = vpop.f32.mrf.mxu0  ;;  %v2708_v17 = vadd.f32 %v17872_v0, %v17848_v51  ;;  %v20379_v51 = vld [vmem:[%s25169_s2] ss:$0 sm:$0xff] }
 0x2a8   : > { %v2586_v15 = vpop.f32.mrf.mxu1 }
 0x2a9   : > { %v17873_v16 = vpop.f32.mrf.mxu0  ;;  %v2700_v56 = vadd.f32 %v2699_v9, %v2586_v15 }
 0x2aa   : > { %v17849_v52 = vpop.f32.mrf.mxu1 }
 0x2ab   : > { %v2702_v23 = vpop.f32.mrf.mxu0  ;;  %v2711_v12 = vadd.f32 %v17873_v16, %v17849_v52  ;;  %v2432_v52 = vadd.f32 %v20379_v51, %v21440_v39 }
 0x2ac   : > { %v2589_v45 = vpop.f32.mrf.mxu1 }
 0x2ad   : > { %v21465_v27 = vpop.f32.mrf.mxu0  ;;  %v2703_v4 = vadd.f32 %v2702_v23, %v2589_v45  ;;  %v2434_v45 = vadd.f32 %v20379_v51, %v21438_v5 }
 0x2ae   : > { %v21467_v28 = vpop.f32.mrf.mxu1 }
 0x2af   : > { %v21469_v48 = vpop.f32.mrf.mxu0  ;;  %v2724_v5 = vadd.f32 %v21465_v27, %v21467_v28 }
 0x2b0   : > { %v21471_v34 = vpop.f32.mrf.mxu1 }
 0x2b1   : > { %v17877_v41 = vpop.f32.mrf.mxu0  ;;  %v2716_v39 = vadd.f32 %v21469_v48, %v21471_v34  ;;  %v20381_v48 = vld [vmem:[#allocation4] sm:$0xff] }
 0x2b2   : > { %v17853_v53 = vpop.f32.mrf.mxu1 }
 0x2b3   : > { %v21473_v36 = vpop.f32.mrf.mxu0  ;;  %v2727_v19 = vadd.f32 %v17877_v41, %v17853_v53 }
 0x2b4   : > { %v2605_v49 = vpop.f32.mrf.mxu1 }
 0x2c5   : > { %v21475_v40 = vpop.f32.mrf.mxu0 }
 0x2c6   : > { %v17896_v55 = vpop.f32.mrf.mxu1 }
 0x2c7   : > { %v21477_v29 = vpop.f32.mrf.mxu0  ;;  %v2861_v53 = vadd.f32 %v17896_v55, %v2434_v45 }
 0x2c8   : > { %v2828_v7 = vpop.f32.mrf.mxu1 }
 0x2c9   : > { %v21479_v22 = vpop.f32.mrf.mxu0  ;;  %v2859_v55 = vadd.f32 %v2828_v7, %v2432_v52 }
 0x2ca   : > { %v21481_v42 = vpop.f32.mrf.mxu1 }
 0x2cb   : > { %v21483_v59 = vpop.f32.mrf.mxu0 }
 0x2cc   : > { %v21485_v35 = vpop.f32.mrf.mxu1 }
 0x2cd   : > { %25209 = vst [vmem:[#allocation7_spill] sm:$0xff] %v21485_v35  ;;  %v21487_v54 = vpop.f32.mrf.mxu0 }
 0x2ce   : > { %v21491_v58 = vpop.f32.mrf.mxu1 }
 0x2cf   : > { %v21493_v60 = vpop.f32.mrf.mxu0 }
 0x2d0   : > { %v21495_v38 = vpop.f32.mrf.mxu1 }
 0x2d1   : > { %v21497_v63 = vpop.f32.mrf.mxu0 }
 0x2d2   : > { %v21499_v1 = vpop.f32.mrf.mxu1 }
 0x2d3   : > { %v21501_v21 = vpop.f32.mrf.mxu0 }
 0x2d4   : > { %25210 = vst [vmem:[#allocation9_spill] sm:$0xff] %v21501_v21  ;;  %v21503_v8 = vpop.f32.mrf.mxu1 }
 0x2e5   : > { %v17968_v6 = vpop.f32.mrf.mxu0 }
 0x2e6   : > { %v21505_v11 = vpop.f32.mrf.mxu1  ;;  %v3272_v24 = vadd.f32 %v17968_v6, %v2708_v17  ;;  %v20380_v17 = vld [vmem:[#allocation4 + $0x10] sm:$0xff] }
 0x2e7   : > { %v3239_v10 = vpop.f32.mrf.mxu0 }
 0x2e8   : > { %v21507_v20 = vpop.f32.mrf.mxu1  ;;  %v21522_v37 = vadd.f32 %v3239_v10, %v2700_v56  ;;  %v3554_v23 = vrot.slane %v3272_v24, 7  ;;  %v2435_v10 = vadd.f32 %v20379_v51, %v21442_v32 }
 0x2e9   : > { %v17969_v57 = vpop.f32.mrf.mxu0 }
 0x2ea   : > { %v21509_v61 = vpop.f32.mrf.mxu1  ;;  %v21524_v35 = vadd.f32 %v17969_v57, %v2711_v12  ;;  %v25187_v9 = vrot.slane %v21522_v37, 7  ;;  %v2719_v57 = vadd.f32 %v21473_v36, %v2605_v49  ;;  %v2862_v27 = vadd.f32 %v21481_v42, %v2435_v10  ;;  %v20382_v10 = vld [vmem:[#allocation4 + $0x18] sm:$0xff] }
 0x2eb   : > { %v3242_v30 = vpop.f32.mrf.mxu0  ;;  %v2438_v42 = vadd.f32 %v20379_v51, %v21449_v31 }
 0x2ec   : > { %v21511_v2 = vpop.f32.mrf.mxu1  ;;  %v21516_v44 = vadd.f32 %v3242_v30, %v2703_v4  ;;  %v3555_v15 = vrot.slane %v21524_v35, 7 }
 0x2ed   : > { %v17972_v62 = vpop.f32.mrf.mxu0 }
 0x2ee   : > { %v21513_v43 = vpop.f32.mrf.mxu1  ;;  %v3553_v21 = vrot.slane %v21516_v44, 7  ;;  %v3276_v28 = vadd.f32 %v17972_v62, %v2724_v5  ;;  %v3564_v24 = vsel %vm1837_vm1, %v3554_v23, %v3555_v15  ;;  %v2436_v62 = vadd.f32 %v20379_v51, %v21451_v50 }
 0x2ef   : > { %v3255_v3 = vpop.f32.mrf.mxu0  ;;  %v3571_v5 = vmul.f32 %v20382_v10, %v3564_v24  ;;  %v3079_v50 = vadd.f32 %v21507_v20, %v21477_v29  ;;  %v3090_v29 = vadd.f32 %v21509_v61, %v21479_v22  ;;  %v3082_v20 = vadd.f32 %v21511_v2, %v21483_v59 }
 0x2f0   : > { %v21518_v46 = vpop.f32.mrf.mxu1  ;;  %v3565_v16 = vsel %vm1837_vm1, %v3553_v21, %v3554_v23  ;;  %v3274_v56 = vadd.f32 %v3255_v3, %v2716_v39 }
 0x2f1   : > { %v17973_v14 = vpop.f32.mrf.mxu0  ;;  %v3570_v32 = vmul.f32 %v20380_v17, %v3565_v16  ;;  %v21563_v16 = vadd.f32 %v20379_v51, %v21447_v13  ;;  %v2863_v13 = vadd.f32 %v21495_v38, %v2436_v62  ;;  %v3103_v38 = vadd.f32 %v21513_v43, %v21487_v54 }
 0x2f2   : > { %v21520_v25 = vadd.f32 %v17973_v14, %v2727_v19  ;;  %v21527_v26 = vpop.f32.mrf.mxu1 }
 0x2f3   : > { %v3258_v41 = vpop.f32.mrf.mxu0  ;;  %v3106_v54 = vadd.f32 %v21527_v26, %v21497_v63  ;;  %v20383_v63 = vld [vmem:[#allocation4 + $0x38] sm:$0xff] }
 0x2f4   : > { %v3559_v0 = vrot.slane %v21520_v25, 7  ;;  %v21536_v12 = vpop.f32.mrf.mxu1  ;;  %v3275_v36 = vadd.f32 %v3258_v41, %v2719_v57  ;;  %v2439_v41 = vadd.f32 %v20379_v51, %v21453_v47  ;;  %v3558_v47 = vrot.slane %v3276_v28, 7  ;;  %v25211_v25 = vld [vmem:[#allocation9_spill] sm:$0xff] }
 0x2f6   : > { %v3567_v30 = vsel %vm1837_vm1, %v3559_v0, %v25187_v9  ;;  %v3557_v31 = vrot.slane %v3275_v36, 7 }
 0x2f7   : > { %v3568_v34 = vmul.f32 %v20381_v48, %v3567_v30  ;;  %v2865_v30 = vadd.f32 %v21491_v58, %v2438_v42  ;;  %v3087_v58 = vadd.f32 %v21505_v11, %v21475_v40  ;;  %v3560_v40 = vsel %vm1837_vm1, %v3558_v47, %v3559_v0 }
 0x2f8   : > { %v3098_v0 = vadd.f32 %v21536_v12, %v25211_v25  ;;  %v3575_v26 = vmul.f32 %v20383_v63, %v3560_v40 }
 0x305   : > { %v18016_v6 = vpop.f32.mrf.mxu0 }
 0x306   : > { %v17992_v4 = vpop.f32.mrf.mxu1  ;;  %v3546_v61 = vadd.f32 %v18016_v6, %v3087_v58 }
 0x307   : > { %v3409_v14 = vadd.f32 %v17992_v4, %v2861_v53  ;;  %v3513_v19 = vpop.f32.mrf.mxu0  ;;  %v2437_v53 = vadd.f32 %v20379_v51, %v21455_v33  ;;  %v2866_v4 = vadd.f32 %v21499_v1, %v2439_v41  ;;  %v3556_v33 = vrot.slane %v3274_v56, 7 }
 0x308   : > { %v3376_v49 = vpop.f32.mrf.mxu1  ;;  %v3095_v1 = vadd.f32 %v21518_v46, %v21493_v60  ;;  %v21591_v17 = vadd.f32 %v3513_v19, %v3079_v50  ;;  %v3561_v60 = vsel %vm1837_vm1, %v3557_v31, %v3558_v47  ;;  %v3586_v12 = vrot.slane %v3546_v61, 1  ;;  %v20387_v47 = vld [vmem:[#allocation4 + $0x78] sm:$0xff] }
 0x309   : > { %v21560_v45 = vadd.f32 %v3570_v32, %v3409_v14  ;;  %v3407_v9 = vadd.f32 %v3376_v49, %v2859_v55  ;;  %v18017_v7 = vpop.f32.mrf.mxu0  ;;  %v2864_v55 = vadd.f32 %v21503_v8, %v2437_v53  ;;  %v3563_v2 = vsel %vm1837_vm1, %v3555_v15, %v3556_v33  ;;  %v20384_v49 = vld [vmem:[#allocation4 + $0x30] sm:$0xff]  ;;  %v20391_v61 = vld [vmem:[#allocation4 + $0x58] sm:$0xff] }
 0x30a   : > { %v17993_v52 = vpop.f32.mrf.mxu1  ;;  %v3547_v43 = vadd.f32 %v18017_v7, %v3090_v29  ;;  %v3562_v28 = vsel %vm1837_vm1, %v3556_v33, %v3557_v31  ;;  %v3584_v6 = vrot.slane %v21591_v17, 1  ;;  %v3574_v24 = vmul.f32 %v20384_v49, %v3561_v60  ;;  %v20386_v31 = vld [vmem:[#allocation4 + $0x70] sm:$0xff] }
 0x30b   : > { %v21569_v23 = vadd.f32 %v3568_v34, %v3407_v9  ;;  %v3410_v3 = vadd.f32 %v17993_v52, %v2862_v27  ;;  %v3516_v57 = vpop.f32.mrf.mxu0  ;;  %v20385_v52 = vld [vmem:[#allocation4 + $0x28] sm:$0xff] }
 0x30c   : > { %v21574_v39 = vpop.f32.mrf.mxu1  ;;  %v3545_v36 = vadd.f32 %v3516_v57, %v3082_v20  ;;  %v3587_v62 = vrot.slane %v3547_v43, 1  ;;  %v3573_v53 = vmul.f32 %v20385_v52, %v3562_v28  ;;  %v20394_v28 = vld [vmem:[#allocation4 + $0x48] sm:$0xff]  ;;  %v14952_v52 = vld [vmem:[%s25173_s6 + $0x10] sm:$0xff] }
 0x30d   : > { %v21578_v51 = vadd.f32 %v3571_v5, %v3410_v3  ;;  %v18020_v9 = vpop.f32.mrf.mxu0 }
 0x30e   : > { %v17996_v14 = vpop.f32.mrf.mxu1  ;;  %v3550_v8 = vadd.f32 %v18020_v9, %v3103_v38  ;;  %v3585_v9 = vrot.slane %v3545_v36, 1 }
 0x30f   : > { %v3529_v32 = vpop.f32.mrf.mxu0  ;;  %v3413_v59 = vadd.f32 %v17996_v14, %v2865_v30  ;;  %v20388_v14 = vld [vmem:[#allocation4 + $0x20] sm:$0xff] }
 0x310   : > { %v3392_v11 = vpop.f32.mrf.mxu1  ;;  %v3548_v22 = vadd.f32 %v3529_v32, %v3095_v1  ;;  %v3590_v48 = vrot.slane %v3550_v8, 1  ;;  %v3572_v29 = vmul.f32 %v20388_v14, %v3563_v2  ;;  %v3596_v32 = vsel %vm1870_vm2, %v3586_v12, %v3587_v62  ;;  %v25212_v8 = vld [vmem:[#allocation7_spill] sm:$0xff] }
 0x311   : > { %v18021_v46 = vpop.f32.mrf.mxu0  ;;  %v3582_v41 = vadd.f32 %v3574_v24, %v3413_v59  ;;  %v3411_v30 = vadd.f32 %v3392_v11, %v2863_v13  ;;  %v20389_v13 = vld [vmem:[#allocation4 + $0x60] sm:$0xff]  ;;  %v2860_v11 = vadd.f32 %v25212_v8, %v21563_v16  ;;  %v25213_v2 = vrot.slane %v21522_v37, 7 }
 0x312   : > { %v17997_v19 = vpop.f32.mrf.mxu1  ;;  %v3551_v27 = vadd.f32 %v18021_v46, %v3106_v54  ;;  %v3588_v15 = vrot.slane %v3548_v22, 1  ;;  %v20390_v54 = vld [vmem:[#allocation4 + $0x68] sm:$0xff]  ;;  %v3597_v25 = vsel %vm1870_vm2, %v3585_v9, %v3586_v12  ;;  %v3598_v37 = vsel %vm1870_vm2, %v3584_v6, %v3585_v9  ;;  %v21766_v9 = vld [vmem:[#allocation2 + $0x48] sm:$0xff]   ;;  %v19790_v14 = vld [vmem:[%s25168_s1 + $0xf0] sm:$0xff]  }
 0x313   : > { %v3414_v35 = vadd.f32 %v17997_v19, %v2866_v4  ;;  %v3532_v56 = vpop.f32.mrf.mxu0  ;;  %v3580_v22 = vadd.f32 %v3572_v29, %v3411_v30  ;;  %v3566_v46 = vsel %vm1837_vm1, %v25213_v2, %v3553_v21  ;;  %v20392_v19 = vld [vmem:[#allocation4 + $0x50] sm:$0xff]  ;;  %v3408_v16 = vadd.f32 %v21574_v39, %v2860_v11  ;;  %v20393_v21 = vld [vmem:[#allocation4 + $0x8] sm:$0xff]  ;;  %v21783_v29 = vld [vmem:[#allocation2 + $0x50] sm:$0xff]  }
 0x314   : > { %v3591_v34 = vrot.slane %v3551_v27, 1  ;;  %v3395_v7 = vpop.f32.mrf.mxu1  ;;  %v3549_v42 = vadd.f32 %v3532_v56, %v3098_v0  ;;  %v3595_v58 = vsel %vm1870_vm2, %v3587_v62, %v3588_v15  ;;  %v3602_v63 = vmul.f32 %v20392_v19, %v3596_v32  ;;  %v19778_v12 = vld [vmem:[%s25168_s1 + $0x78] sm:$0xff]   ;;  %v3625_v62 = vld [vmem:[%s25173_s6 + $0x8] sm:$0xff]  ;;  %v19795_v32 = vld [vmem:[%s25168_s1 + $0x20] sm:$0xff]  }
 0x315   : > { %v3412_v5 = vadd.f32 %v3395_v7, %v2864_v55  ;;  %v3583_v4 = vadd.f32 %v3575_v26, %v3414_v35  ;;  %v3603_v43 = vmul.f32 %v20391_v61, %v3595_v58  ;;  %v3569_v44 = vmul.f32 %v20393_v21, %v3566_v46  ;;  %v20395_v35 = vld [vmem:[#allocation4 + $0x40] sm:$0xff]  ;;  %v14953_v30 = vld [vmem:[%s25173_s6 + $0x18] sm:$0xff]  ;;  %v19802_v61 = vld [vmem:[%s25168_s1 + $0xc8] sm:$0xff]  }
 0x316   : > { %v3592_v3 = vsel %vm1870_vm2, %v3590_v48, %v3591_v34  ;;  %v3599_v10 = vsel %vm1870_vm2, %v3591_v34, %v3584_v6  ;;  %v3589_v57 = vrot.slane %v3549_v42, 1  ;;  %v3601_v36 = vmul.f32 %v20394_v28, %v3597_v25  ;;  %v14961_v58 = vld [vmem:[%s25173_s6 + $0x38] sm:$0xff]  ;;  %v19801_v8 = vld [vmem:[%s25168_s1 + $0x10] sm:$0xff]   ;;  %v19814_v21 = vld [vmem:[%s25168_s1 + $0x120] sm:$0xff]  }
 0x317   : > { %v3606_v50 = vmul.f32 %v20386_v31, %v3592_v3  ;;  %v3607_v33 = vmul.f32 %v20387_v47, %v3599_v10  ;;  %v3581_v40 = vadd.f32 %v3573_v53, %v3412_v5  ;;  %v3611_v39 = vadd.f32 %v3603_v43, %v21578_v51  ;;  %v21704_v53 = vld [vmem:[#allocation2 + $0x40] sm:$0xff]   ;;  %v19780_v10 = vld [vmem:[%s25168_s1 + $0x68] sm:$0xff]   ;;  %v14960_v31 = vld [vmem:[%s25173_s6 + $0x30] sm:$0xff] }
 0x318   : > { %v3593_v38 = vsel %vm1870_vm2, %v3589_v57, %v3590_v48  ;;  %v3594_v1 = vsel %vm1870_vm2, %v3588_v15, %v3589_v57  ;;  %v3610_v6 = vadd.f32 %v3602_v63, %v21560_v45  ;;  %v3577_v24 = vadd.f32 %v3569_v44, %v3408_v16  ;;  %v458_v3 = vld [vmem:[%s20612_s24 + $0x60] sm:$0xff]   ;;  %v19782_v57 = vld [vmem:[%s25168_s1 + $0x58] sm:$0xff]   ;;  %v19800_v11 = vld [vmem:[%s25168_s1 + $0xd0] sm:$0xff]  }
 0x319   : > { %v3614_v55 = vadd.f32 %v3606_v50, %v3582_v41  ;;  %v3615_v20 = vadd.f32 %v3607_v33, %v3583_v4  ;;  %v3604_v17 = vmul.f32 %v20389_v13, %v3594_v1  ;;  %v3605_v60 = vmul.f32 %v20390_v54, %v3593_v38  ;;  %v19779_v41 = vld [vmem:[%s25168_s1 + $0x70] sm:$0xff]   ;;  %490 = vst [vmem:[#allocation2 + $0x68] sm:$0xff] %v458_v3   ;;  %v19781_v5 = vld [vmem:[%s25168_s1 + $0x60] sm:$0xff]   ;;  %v19784_v50 = vld [vmem:[%s25168_s1 + $0x48] sm:$0xff]  }
 0x31a   : > { %v3600_v56 = vmul.f32 %v20395_v35, %v3598_v37  ;;  %v3609_v51 = vadd.f32 %v3601_v36, %v3577_v24  ;;  %v21657_v15 = vmax.f32 %v3611_v39, 0.0  ;;  %v21663_v45 = vmax.f32 %v3610_v6, 0.0  ;;  %v19783_v4 = vld [vmem:[%s25168_s1 + $0x50] sm:$0xff]   ;;  %v19785_v47 = vld [vmem:[%s25168_s1 + $0x40] sm:$0xff]   ;;  %v19789_v33 = vld [vmem:[%s25168_s1 + $0x38] sm:$0xff]  }
 0x31b   : > { %v21624_v59 = vmax.f32 %v3615_v20, 0.0  ;;  %v3613_v0 = vadd.f32 %v3605_v60, %v3581_v40  ;;  %v21635_v26 = vmax.f32 %v3614_v55, 0.0  ;;  %v3612_v27 = vadd.f32 %v3604_v17, %v3580_v22  ;;  %v19788_v38 = vld [vmem:[%s25168_s1 + $0xf8] sm:$0xff]   ;;  %v19791_v1 = vld [vmem:[%s25168_s1 + $0x30] sm:$0xff]   ;;  %v21787_v55 = vld [vmem:[#allocation2 + $0x48] sm:$0xff]  }
 0x31c   : > { %v3608_v34 = vadd.f32 %v3600_v56, %v21569_v23  ;;  %v21670_v7 = vmax.f32 %v3609_v51, 0.0  ;;  %v14957_v23 = vld [vmem:[%s25173_s6 + $0x28] sm:$0xff]  ;;  %v21796_v17 = vld [vmem:[#allocation2 + $0x58] sm:$0xff]   ;;  %v19794_v40 = vld [vmem:[%s25168_s1 + $0xe0] sm:$0xff]  }
 0x31d   : > { %18022 = vmatprep.subr.mxu1 %v21624_v59  ;;  %18060 = vmatprep.subr.mxu0 %v21624_v59  ;;  %v21644_v49 = vmax.f32 %v3613_v0, 0.0  ;;  %v21651_v48 = vmax.f32 %v3612_v27, 0.0  ;;  %v19793_v20 = vld [vmem:[%s25168_s1 + $0x28] sm:$0xff]   ;;  %v19797_v54 = vld [vmem:[%s25168_s1 + $0x18] sm:$0xff]   ;;  %v19805_v43 = vld [vmem:[%s25168_s1] sm:$0xff]  }
 0x31e   : > { %18023 = vmatpush3.msra.mxu1 %v21624_v59  ;;  %18061 = vmatpush3.msra.mxu0 %v21624_v59  ;;  %v21676_v42 = vmax.f32 %v3608_v34, 0.0  ;;  %v19792_v13 = vld [vmem:[%s25168_s1 + $0xe8] sm:$0xff]   ;;  %v19796_v60 = vld [vmem:[%s25168_s1 + $0xd8] sm:$0xff]   ;;  %v21837_v25 = vld [vmem:[#allocation2 + $0x50] sm:$0xff]  }
 0x31f   : > { %18024 = vmatprep.subr.mxu1 %v21635_v26  ;;  %18062 = vmatprep.subr.mxu0 %v21635_v26  ;;  %v19803_v22 = vld [vmem:[%s25168_s1 + $0x8] sm:$0xff]   ;;  %v19809_v2 = vld [vmem:[%s25168_s1 + $0x178] sm:$0xff]   ;;  %v19811_v0 = vld [vmem:[%s25168_s1 + $0x170] sm:$0xff]  }
 0x320   : > { %18025 = vmatpush3.msra.mxu1 %v21635_v26  ;;  %18063 = vmatpush3.msra.mxu0 %v21635_v26  ;;  %v19808_v46 = vld [vmem:[%s25168_s1 + $0x138] sm:$0xff]   ;;  %v19810_v19 = vld [vmem:[%s25168_s1 + $0x130] sm:$0xff]   ;;  %v19813_v16 = vld [vmem:[%s25168_s1 + $0x168] sm:$0xff]  }
 0x321   : > { %18026 = vmatprep.subr.mxu1 %v21644_v49  ;;  %18064 = vmatprep.subr.mxu0 %v21644_v49  ;;  %v21845_v63 = vld [vmem:[#allocation2 + $0x58] sm:$0xff]   ;;  %v21857_v27 = vld [vmem:[#allocation2 + $0x60] sm:$0xff]   ;;  %v19821_v36 = vld [vmem:[%s25168_s1 + $0x150] sm:$0xff]  }
 0x322   : > { %18027 = vmatpush3.msra.mxu1 %v21644_v49  ;;  %18065 = vmatpush3.msra.mxu0 %v21644_v49  ;;  %v19815_v37 = vld [vmem:[%s25168_s1 + $0x160] sm:$0xff]   ;;  %v19817_v44 = vld [vmem:[%s25168_s1 + $0x158] sm:$0xff]   ;;  %v19820_v39 = vld [vmem:[%s25168_s1 + $0x110] sm:$0xff]  }
 0x323   : > { %18028 = vmatprep.subr.mxu1 %v21651_v48  ;;  %18066 = vmatprep.subr.mxu0 %v21651_v48  ;;  %v19816_v28 = vld [vmem:[%s25168_s1 + $0x118] sm:$0xff]   ;;  %v19822_v6 = vld [vmem:[%s25168_s1 + $0x108] sm:$0xff]   ;;  %v19825_v24 = vld [vmem:[%s25168_s1 + $0x140] sm:$0xff]  }
 0x324   : > { %18029 = vmatpush3.msra.mxu1 %v21651_v48  ;;  %18067 = vmatpush3.msra.mxu0 %v21651_v48  ;;  %v19824_v35 = vld [vmem:[%s25168_s1 + $0x100] sm:$0xff]   ;;  %v19827_v56 = vld [vmem:[%s25168_s1 + $0x1b8] sm:$0xff]   ;;  %v19829_v51 = vld [vmem:[%s25168_s1 + $0x1b0] sm:$0xff]  }
 0x325   : > { %18030 = vmatprep.subr.mxu1 %v21657_v15  ;;  %18068 = vmatprep.subr.mxu0 %v21657_v15  ;;  %v19830_v34 = vld [vmem:[%s25168_s1 + $0xa8] sm:$0xff]  }
 0x326   : > { %18031 = vmatpush3.msra.mxu1 %v21657_v15  ;;  %18069 = vmatpush3.msra.mxu0 %v21657_v15  ;;  %v19838_v3 = vld [vmem:[%s25168_s1 + $0x88] sm:$0xff]  }
 0x327   : > { %18032 = vmatprep.subr.mxu1 %v21663_v45  ;;  %18070 = vmatprep.subr.mxu0 %v21663_v45 }
 0x328   : > { %18033 = vmatpush3.msra.mxu1 %v21663_v45  ;;  %18071 = vmatpush3.msra.mxu0 %v21663_v45 }
 0x329   : > { %18034 = vmatprep.subr.mxu1 %v21670_v7  ;;  %18072 = vmatprep.subr.mxu0 %v21670_v7 }
 0x32a   : > { %18035 = vmatpush3.msra.mxu1 %v21670_v7  ;;  %18073 = vmatpush3.msra.mxu0 %v21670_v7 }
 0x32b   : > { %18036 = vmatprep.subr.mxu1 %v21676_v42  ;;  %18074 = vmatprep.subr.mxu0 %v21676_v42 }
 0x32c   : > { %18037 = vmatpush3.msra.mxu1 %v21676_v42  ;;  %18075 = vmatpush3.msra.mxu0 %v21676_v42 }
 0x32d   : > { %18041 = vmatprep.subr.mxu1 %v21624_v59  ;;  %18077 = vmatmul.mubr.msk.f32.vlgmr.msra.gmra.mxu0 %vm1905_vm0, %v14957_v23  ;;  %v21922_v23 = vld [vmem:[#allocation2 + $0x50] sm:$0xff]  }
 0x32e   : > { %18098 = vmatprep.subr.bf16.mxu0 %v19778_v12  ;;  %18039 = vmatmul.mubr.msk.f32.vlgmr.msra.gmra.mxu1 %vm1905_vm0, %v3625_v62  ;;  %v19834_v62 = vld [vmem:[%s25168_s1 + $0x98] sm:$0xff]  }
 0x32f   : > { %18042 = vmatpush3.msra.mxu1 %v21624_v59  ;;  %18099 = vmatpush3.bf16.msra.mxu0 %v19778_v12  ;;  %v19835_v12 = vld [vmem:[%s25168_s1 + $0x198] sm:$0xff]  }
 0x330   : > { %18043 = vmatprep.subr.mxu1 %v21635_v26  ;;  %18100 = vmatprep.subr.bf16.mxu0 %v19779_v41 }
 0x331   : > { %18044 = vmatpush3.msra.mxu1 %v21635_v26  ;;  %18057 = vmatprep.mubr.msk.f32.mxu1 %vm1905_vm0, %v14952_v52  ;;  %v19836_v52 = vld [vmem:[%s25168_s1 + $0x90] sm:$0xff]  }
 0x332   : > { %18045 = vmatprep.subr.mxu1 %v21644_v49  ;;  %18114 = vmatprep.mubr.bf16.mxu0 %v21704_v53 }
 0x333   : > { %18046 = vmatpush3.msra.mxu1 %v21644_v49  ;;  %18101 = vmatpush3.bf16.msra.mxu0 %v19779_v41  ;;  %v19837_v41 = vld [vmem:[%s25168_s1 + $0x190] sm:$0xff]  }
 0x334   : > { %18047 = vmatprep.subr.mxu1 %v21651_v48  ;;  %18102 = vmatprep.subr.bf16.mxu0 %v19780_v10 }
 0x335   : > { %18048 = vmatpush3.msra.mxu1 %v21651_v48 }
 0x336   : > { %18049 = vmatprep.subr.mxu1 %v21657_v15 }
 0x337   : > { %18050 = vmatpush3.msra.mxu1 %v21657_v15  ;;  %18103 = vmatpush3.bf16.msra.mxu0 %v19780_v10  ;;  %v19841_v10 = vld [vmem:[%s25168_s1 + $0x180] sm:$0xff]  }
 0x338   : > { %18051 = vmatprep.subr.mxu1 %v21663_v45  ;;  %18104 = vmatprep.subr.bf16.mxu0 %v19781_v5 }
 0x339   : > { %18052 = vmatpush3.msra.mxu1 %v21663_v45 }
 0x33a   : > { %18053 = vmatprep.subr.mxu1 %v21670_v7 }
 0x33b   : > { %18054 = vmatpush3.msra.mxu1 %v21670_v7  ;;  %18105 = vmatpush3.bf16.msra.mxu0 %v19781_v5  ;;  %v19840_v5 = vld [vmem:[%s25168_s1 + $0x80] sm:$0xff]  }
 0x33c   : > { %18055 = vmatprep.subr.mxu1 %v21676_v42  ;;  %18106 = vmatprep.subr.bf16.mxu0 %v19782_v57 }
 0x33d   : > { %18056 = vmatpush3.msra.mxu1 %v21676_v42 }
 0x33e   : > { %18058 = vmatmul.mubr.msk.f32.vlgmr.msra.gmra.mxu1 %vm1905_vm0, %v14953_v30  ;;  %18079 = vmatprep.subr.mxu1 %v21624_v59  ;;  %v19844_v30 = vld [vmem:[%s25168_s1 + $0x1f8] sm:$0xff]  }
 0x33f   : > { %18080 = vmatpush3.msra.mxu1 %v21624_v59  ;;  %18107 = vmatpush3.bf16.msra.mxu0 %v19782_v57  ;;  %v19804_v59 = vld [vmem:[%s25168_s1 + $0xc0] sm:$0xff]   ;;  %v19845_v57 = vld [vmem:[%s25168_s1 + $0x238] sm:$0xff]  }
 0x340   : > { %18081 = vmatprep.subr.mxu1 %v21635_v26  ;;  %18108 = vmatprep.subr.bf16.mxu0 %v19783_v4 }
 0x341   : > { %18082 = vmatpush3.msra.mxu1 %v21635_v26  ;;  %18095 = vmatprep.mubr.msk.f32.mxu1 %vm1905_vm0, %v14960_v31  ;;  %v19812_v26 = vld [vmem:[%s25168_s1 + $0x128] sm:$0xff]   ;;  %v19847_v31 = vld [vmem:[%s25168_s1 + $0x230] sm:$0xff]  }
 0x342   : > { %18083 = vmatprep.subr.mxu1 %v21644_v49 }
 0x343   : > { %18084 = vmatpush3.msra.mxu1 %v21644_v49  ;;  %18109 = vmatpush3.bf16.msra.mxu0 %v19783_v4  ;;  %v19823_v49 = vld [vmem:[%s25168_s1 + $0x148] sm:$0xff]   ;;  %v19843_v4 = vld [vmem:[#allocation2 + $0x58] sm:$0xff]  }
 0x344   : > { %18085 = vmatprep.subr.mxu1 %v21651_v48  ;;  %18110 = vmatprep.subr.bf16.mxu0 %v19784_v50 }
 0x345   : > { %18086 = vmatpush3.msra.mxu1 %v21651_v48  ;;  %v19826_v48 = vld [vmem:[%s25168_s1 + $0xb8] sm:$0xff]  }
 0x346   : > { %18087 = vmatprep.subr.mxu1 %v21657_v15 }
 0x347   : > { %18088 = vmatpush3.msra.mxu1 %v21657_v15  ;;  %18111 = vmatpush3.bf16.msra.mxu0 %v19784_v50  ;;  %v19828_v15 = vld [vmem:[%s25168_s1 + $0xb0] sm:$0xff]  }
 0x348   : > { %18089 = vmatprep.subr.mxu1 %v21663_v45  ;;  %18112 = vmatprep.subr.bf16.mxu0 %v19785_v47  ;;  %v19846_v50 = vld [vmem:[%s25168_s1 + $0x1f0] sm:$0xff]  }
 0x349   : > { %18090 = vmatpush3.msra.mxu1 %v21663_v45  ;;  %v19831_v45 = vld [vmem:[%s25168_s1 + $0x1a8] sm:$0xff]  }
 0x34a   : > { %18091 = vmatprep.subr.mxu1 %v21670_v7 }
 0x34b   : > { %18092 = vmatpush3.msra.mxu1 %v21670_v7  ;;  %18113 = vmatpush3.bf16.msra.mxu0 %v19785_v47  ;;  %v19833_v7 = vld [vmem:[%s25168_s1 + $0x1a0] sm:$0xff]  }
 0x34c   : > { %18093 = vmatprep.subr.mxu1 %v21676_v42  ;;  %18146 = vmatprep.subr.bf16.mxu0 %v19789_v33  ;;  %v19848_v47 = vld [vmem:[#allocation2 + $0x60] sm:$0xff]  }
 0x34d   : > { %18094 = vmatpush3.msra.mxu1 %v21676_v42  ;;  %v19832_v42 = vld [vmem:[%s25168_s1 + $0xa0] sm:$0xff]  }
 0x34e   : > { %18096 = vmatmul.mubr.msk.f32.vlgmr.msra.gmra.mxu1 %vm1905_vm0, %v14961_v58  ;;  %18115 = vmatmul.mubr.bf16.vlgmr.msra.gmra.mxu0 %v21766_v9  ;;  %v19850_v58 = vld [vmem:[%s25168_s1 + $0x1e8] sm:$0xff]  }
 0x34f   : > { %18122 = vmatprep.subr.bf16.mxu1 %v19788_v38  ;;  %18147 = vmatpush3.bf16.msra.mxu0 %v19789_v33  ;;  %v19851_v33 = vld [vmem:[%s25168_s1 + $0x228] sm:$0xff]  }
 0x350   : > { %18123 = vmatpush3.bf16.msra.mxu1 %v19788_v38  ;;  %18148 = vmatprep.subr.bf16.mxu0 %v19791_v1  ;;  %v19849_v38 = vld [vmem:[#allocation2 + $0x68] sm:$0xff]  }
 0x351   : > { %18124 = vmatprep.subr.bf16.mxu1 %v19790_v14  ;;  %18118 = vmatprep.mubr.bf16.mxu0 %v21783_v29 }
 0x352   : > { %18138 = vmatprep.mubr.bf16.mxu1 %v21787_v55 }
 0x353   : > { %18149 = vmatpush3.bf16.msra.mxu0 %v19791_v1  ;;  %v19852_v1 = vld [vmem:[%s25168_s1 + $0x1e0] sm:$0xff]  }
 0x354   : > { %18125 = vmatpush3.bf16.msra.mxu1 %v19790_v14  ;;  %18150 = vmatprep.subr.bf16.mxu0 %v19793_v20  ;;  %v19855_v14 = vld [vmem:[%s25168_s1 + $0x218] sm:$0xff]  }
 0x355   : > { %18126 = vmatprep.subr.bf16.mxu1 %v19792_v13 }
 0x356   : > { %18119 = vmatmul.mubr.bf16.gmra.mxu0 %v21796_v17 }
 0x357   : > { %18151 = vmatpush3.bf16.msra.mxu0 %v19793_v20  ;;  %18162 = vmatprep.mubr.bf16.mxu0 %v21704_v53  ;;  %v19856_v20 = vld [vmem:[%s25168_s1 + $0x1d0] sm:$0xff]  }
 0x358   : > { %18127 = vmatpush3.bf16.msra.mxu1 %v19792_v13  ;;  %18152 = vmatprep.subr.bf16.mxu0 %v19795_v32  ;;  %v19859_v13 = vld [vmem:[%s25168_s1 + $0x208] sm:$0xff]  }
 0x359   : > { %18128 = vmatprep.subr.bf16.mxu1 %v19794_v40 }
 0x35b   : > { %18153 = vmatpush3.bf16.msra.mxu0 %v19795_v32  ;;  %v19861_v32 = vld [vmem:[%s25168_s1 + $0x200] sm:$0xff]  }
 0x35c   : > { %18129 = vmatpush3.bf16.msra.mxu1 %v19794_v40  ;;  %18154 = vmatprep.subr.bf16.mxu0 %v19797_v54  ;;  %v19860_v40 = vld [vmem:[%s25168_s1 + $0x1c0] sm:$0xff]  }
 0x35d   : > { %18130 = vmatprep.subr.bf16.mxu1 %v19796_v60 }
 0x35f   : > { %18155 = vmatpush3.bf16.msra.mxu0 %v19797_v54 }
 0x360   : > { %18131 = vmatpush3.bf16.msra.mxu1 %v19796_v60  ;;  %18156 = vmatprep.subr.bf16.mxu0 %v19801_v8 }
 0x361   : > { %18132 = vmatprep.subr.bf16.mxu1 %v19800_v11 }
 0x363   : > { %18157 = vmatpush3.bf16.msra.mxu0 %v19801_v8 }
 0x364   : > { %18133 = vmatpush3.bf16.msra.mxu1 %v19800_v11  ;;  %18158 = vmatprep.subr.bf16.mxu0 %v19803_v22 }
 0x365   : > { %18134 = vmatprep.subr.bf16.mxu1 %v19802_v61 }
 0x367   : > { %18159 = vmatpush3.bf16.msra.mxu0 %v19803_v22 }
 0x368   : > { %18135 = vmatpush3.bf16.msra.mxu1 %v19802_v61  ;;  %18160 = vmatprep.subr.bf16.mxu0 %v19805_v43 }
 0x369   : > { %18136 = vmatprep.subr.bf16.mxu1 %v19804_v59 }
 0x36b   : > { %18161 = vmatpush3.bf16.msra.mxu0 %v19805_v43 }
 0x36c   : > { %18137 = vmatpush3.bf16.msra.mxu1 %v19804_v59  ;;  %18194 = vmatprep.subr.bf16.mxu0 %v19809_v2 }
 0x36d   : > { %18170 = vmatprep.subr.bf16.mxu1 %v19808_v46 }
 0x36e   : > { %18163 = vmatmul.mubr.bf16.vlgmr.msra.gmra.mxu0 %v21766_v9 }
 0x36f   : > { %18139 = vmatmul.mubr.bf16.vlgmr.msra.gmra.mxu1 %v21837_v25  ;;  %18195 = vmatpush3.bf16.msra.mxu0 %v19809_v2 }
 0x370   : > { %18171 = vmatpush3.bf16.msra.mxu1 %v19808_v46  ;;  %18196 = vmatprep.subr.bf16.mxu0 %v19811_v0 }
 0x371   : > { %18172 = vmatprep.subr.bf16.mxu1 %v19810_v19  ;;  %18142 = vmatprep.mubr.bf16.mxu1 %v21845_v63 }
 0x372   : > { %18166 = vmatprep.mubr.bf16.mxu0 %v21783_v29 }
 0x373   : > { %18197 = vmatpush3.bf16.msra.mxu0 %v19811_v0 }
 0x374   : > { %18173 = vmatpush3.bf16.msra.mxu1 %v19810_v19  ;;  %18198 = vmatprep.subr.bf16.mxu0 %v19813_v16 }
 0x375   : > { %18174 = vmatprep.subr.bf16.mxu1 %v19812_v26 }
 0x376   : > { %18167 = vmatmul.mubr.bf16.gmra.mxu0 %v21796_v17 }
 0x377   : > { %18199 = vmatpush3.bf16.msra.mxu0 %v19813_v16  ;;  %18143 = vmatmul.mubr.bf16.gmra.mxu1 %v21857_v27 }
 0x378   : > { %18175 = vmatpush3.bf16.msra.mxu1 %v19812_v26  ;;  %18200 = vmatprep.subr.bf16.mxu0 %v19815_v37 }
 0x379   : > { %18176 = vmatprep.subr.bf16.mxu1 %v19814_v21  ;;  %18186 = vmatprep.mubr.bf16.mxu1 %v21787_v55 }
 0x37a   : > { %18210 = vmatprep.mubr.bf16.mxu0 %v21787_v55  ;;  %v19857_v55 = vld [vmem:[%s25168_s1 + $0x210] sm:$0xff]  }
 0x37b   : > { %18201 = vmatpush3.bf16.msra.mxu0 %v19815_v37 }
 0x37c   : > { %18177 = vmatpush3.bf16.msra.mxu1 %v19814_v21  ;;  %18202 = vmatprep.subr.bf16.mxu0 %v19817_v44 }
 0x37d   : > { %18178 = vmatprep.subr.bf16.mxu1 %v19816_v28 }
 0x37f   : > { %18203 = vmatpush3.bf16.msra.mxu0 %v19817_v44 }
 0x380   : > { %18179 = vmatpush3.bf16.msra.mxu1 %v19816_v28  ;;  %18204 = vmatprep.subr.bf16.mxu0 %v19821_v36 }
 0x381   : > { %18180 = vmatprep.subr.bf16.mxu1 %v19820_v39 }
 0x383   : > { %18205 = vmatpush3.bf16.msra.mxu0 %v19821_v36 }
 0x384   : > { %18181 = vmatpush3.bf16.msra.mxu1 %v19820_v39  ;;  %18206 = vmatprep.subr.bf16.mxu0 %v19823_v49 }
 0x385   : > { %18182 = vmatprep.subr.bf16.mxu1 %v19822_v6 }
 0x387   : > { %18207 = vmatpush3.bf16.msra.mxu0 %v19823_v49  ;;  %v25217_v49 = vmov 0  }
 0x388   : > { %18183 = vmatpush3.bf16.msra.mxu1 %v19822_v6  ;;  %18208 = vmatprep.subr.bf16.mxu0 %v19825_v24 }
 0x389   : > { %18184 = vmatprep.subr.bf16.mxu1 %v19824_v35 }
 0x38b   : > { %18209 = vmatpush3.bf16.msra.mxu0 %v19825_v24 }
 0x38c   : > { %18185 = vmatpush3.bf16.msra.mxu1 %v19824_v35  ;;  %18242 = vmatprep.subr.bf16.mxu0 %v19827_v56 }
 0x38d   : > { %18218 = vmatprep.subr.bf16.mxu1 %v19826_v48 }
 0x38e   : > { %18211 = vmatmul.mubr.bf16.vlgmr.msra.gmra.mxu0 %v21837_v25 }
 0x38f   : > { %18187 = vmatmul.mubr.bf16.vlgmr.msra.gmra.mxu1 %v21837_v25  ;;  %18243 = vmatpush3.bf16.msra.mxu0 %v19827_v56 }
 0x390   : > { %18219 = vmatpush3.bf16.msra.mxu1 %v19826_v48  ;;  %18244 = vmatprep.subr.bf16.mxu0 %v19829_v51  ;;  %v15184_v48 = vld [vmem:[%s25173_s6 + $0x20] sm:$0xff] }
 0x391   : > { %18220 = vmatprep.subr.bf16.mxu1 %v19828_v15  ;;  %18190 = vmatprep.mubr.bf16.mxu1 %v21845_v63 }
 0x392   : > { %18214 = vmatprep.mubr.bf16.mxu0 %v21845_v63 }
 0x393   : > { %18245 = vmatpush3.bf16.msra.mxu0 %v19829_v51  ;;  %v5341_v51 = vld [vmem:[%s25173_s6] sm:$0xff] }
 0x394   : > { %18221 = vmatpush3.bf16.msra.mxu1 %v19828_v15  ;;  %18246 = vmatprep.subr.bf16.mxu0 %v19831_v45 }
 0x395   : > { %18222 = vmatprep.subr.bf16.mxu1 %v19830_v34 }
 0x396   : > { %18215 = vmatmul.mubr.bf16.gmra.mxu0 %v21857_v27 }
 0x397   : > { %18191 = vmatmul.mubr.bf16.gmra.mxu1 %v21857_v27  ;;  %18247 = vmatpush3.bf16.msra.mxu0 %v19831_v45 }
 0x398   : > { %18223 = vmatpush3.bf16.msra.mxu1 %v19830_v34  ;;  %18248 = vmatprep.subr.bf16.mxu0 %v19833_v7 }
 0x399   : > { %18224 = vmatprep.subr.bf16.mxu1 %v19832_v42  ;;  %18234 = vmatprep.mubr.bf16.mxu1 %v21704_v53  ;;  %v19839_v53 = vld [vmem:[%s25168_s1 + $0x188] sm:$0xff]  }
 0x39a   : > { %18258 = vmatprep.mubr.bf16.mxu0 %v21922_v23 }
 0x39b   : > { %18249 = vmatpush3.bf16.msra.mxu0 %v19833_v7 }
 0x39c   : > { %18225 = vmatpush3.bf16.msra.mxu1 %v19832_v42  ;;  %18250 = vmatprep.subr.bf16.mxu0 %v19835_v12 }
 0x39d   : > { %18226 = vmatprep.subr.bf16.mxu1 %v19834_v62 }
 0x39f   : > { %18251 = vmatpush3.bf16.msra.mxu0 %v19835_v12 }
 0x3a0   : > { %18227 = vmatpush3.bf16.msra.mxu1 %v19834_v62  ;;  %18252 = vmatprep.subr.bf16.mxu0 %v19837_v41 }
 0x3a1   : > { %18228 = vmatprep.subr.bf16.mxu1 %v19836_v52 }
 0x3a3   : > { %18253 = vmatpush3.bf16.msra.mxu0 %v19837_v41 }
 0x3a4   : > { %18229 = vmatpush3.bf16.msra.mxu1 %v19836_v52  ;;  %18254 = vmatprep.subr.bf16.mxu0 %v19839_v53 }
 0x3a5   : > { %18230 = vmatprep.subr.bf16.mxu1 %v19838_v3 }
 0x3a7   : > { %18255 = vmatpush3.bf16.msra.mxu0 %v19839_v53 }
 0x3a8   : > { %18231 = vmatpush3.bf16.msra.mxu1 %v19838_v3  ;;  %18256 = vmatprep.subr.bf16.mxu0 %v19841_v10 }
 0x3a9   : > { %18232 = vmatprep.subr.bf16.mxu1 %v19840_v5 }
 0x3ab   : > { %18257 = vmatpush3.bf16.msra.mxu0 %v19841_v10 }
 0x3ac   : > { %18233 = vmatpush3.bf16.msra.mxu1 %v19840_v5  ;;  %18290 = vmatprep.subr.bf16.mxu0 %v19845_v57 }
 0x3ad   : > { %18266 = vmatprep.subr.bf16.mxu1 %v19844_v30 }
 0x3ae   : > { %18259 = vmatmul.mubr.bf16.vlgmr.msra.gmra.mxu0 %v19843_v4 }
 0x3af   : > { %18235 = vmatmul.mubr.bf16.vlgmr.msra.gmra.mxu1 %v21766_v9  ;;  %18291 = vmatpush3.bf16.msra.mxu0 %v19845_v57  ;;  %v19853_v9 = vld [vmem:[%s25168_s1 + $0x220] sm:$0xff]  }
 0x3b0   : > { %18267 = vmatpush3.bf16.msra.mxu1 %v19844_v30  ;;  %18292 = vmatprep.subr.bf16.mxu0 %v19847_v31 }
 0x3b1   : > { %18268 = vmatprep.subr.bf16.mxu1 %v19846_v50  ;;  %18238 = vmatprep.mubr.bf16.mxu1 %v21783_v29  ;;  %v19854_v29 = vld [vmem:[%s25168_s1 + $0x1d8] sm:$0xff]  }
 0x3b2   : > { %18262 = vmatprep.mubr.bf16.mxu0 %v19848_v47 }
 0x3b3   : > { %18293 = vmatpush3.bf16.msra.mxu0 %v19847_v31 }
 0x3b4   : > { %18269 = vmatpush3.bf16.msra.mxu1 %v19846_v50  ;;  %18294 = vmatprep.subr.bf16.mxu0 %v19851_v33 }
 0x3b5   : > { %18270 = vmatprep.subr.bf16.mxu1 %v19850_v58 }
 0x3b6   : > { %18263 = vmatmul.mubr.bf16.gmra.mxu0 %v19849_v38 }
 0x3b7   : > { %18239 = vmatmul.mubr.bf16.gmra.mxu1 %v21796_v17  ;;  %18295 = vmatpush3.bf16.msra.mxu0 %v19851_v33  ;;  %v19858_v17 = vld [vmem:[%s25168_s1 + $0x1c8] sm:$0xff]  }
 0x3b8   : > { %18271 = vmatpush3.bf16.msra.mxu1 %v19850_v58  ;;  %18296 = vmatprep.subr.bf16.mxu0 %v19853_v9 }
 0x3b9   : > { %18272 = vmatprep.subr.bf16.mxu1 %v19852_v1  ;;  %18282 = vmatprep.mubr.bf16.mxu1 %v21922_v23 }
 0x3ba   : > { %18306 = vmatprep.mubr.bf16.mxu0 %v21922_v23 }
 0x3bb   : > { %18297 = vmatpush3.bf16.msra.mxu0 %v19853_v9 }
 0x3bc   : > { %18273 = vmatpush3.bf16.msra.mxu1 %v19852_v1  ;;  %18298 = vmatprep.subr.bf16.mxu0 %v19855_v14 }
 0x3bd   : > { %18274 = vmatprep.subr.bf16.mxu1 %v19854_v29 }
 0x3bf   : > { %18299 = vmatpush3.bf16.msra.mxu0 %v19855_v14  ;;  %v460_v14 = vld [vmem:[%s20612_s24 + $0x68] sm:$0xff]  }
 0x3c0   : > { %18275 = vmatpush3.bf16.msra.mxu1 %v19854_v29  ;;  %18300 = vmatprep.subr.bf16.mxu0 %v19857_v55  ;;  %492 = vst [vmem:[#allocation2 + $0x70] sm:$0xff] %v460_v14   ;;  %v462_v29 = vld [vmem:[%s20612_s24 + $0x70] sm:$0xff]  }
 0x3c1   : > { %18276 = vmatprep.subr.bf16.mxu1 %v19856_v20  ;;  %494 = vst [vmem:[#allocation2 + $0x78] sm:$0xff] %v462_v29  }
 0x3c3   : > { %18301 = vmatpush3.bf16.msra.mxu0 %v19857_v55 }
 0x3c4   : > { %18277 = vmatpush3.bf16.msra.mxu1 %v19856_v20  ;;  %18302 = vmatprep.subr.bf16.mxu0 %v19859_v13 }
 0x3c5   : > { %18278 = vmatprep.subr.bf16.mxu1 %v19858_v17 }
 0x3c7   : > { %18303 = vmatpush3.bf16.msra.mxu0 %v19859_v13 }
 0x3c8   : > { %18279 = vmatpush3.bf16.msra.mxu1 %v19858_v17  ;;  %18304 = vmatprep.subr.bf16.mxu0 %v19861_v32 }
 0x3c9   : > { %18280 = vmatprep.subr.bf16.mxu1 %v19860_v40 }
 0x3cb   : > { %18305 = vmatpush3.bf16.msra.mxu0 %v19861_v32 }
 0x3cc   : > { %18281 = vmatpush3.bf16.msra.mxu1 %v19860_v40 }
 0x3ce   : > { %18307 = vmatmul.mubr.bf16.vlgmr.msra.gmra.mxu0 %v19843_v4 }
 0x3cf   : > { %18283 = vmatmul.mubr.bf16.vlgmr.msra.gmra.mxu1 %v19843_v4  ;;  %18310 = vmatprep.mubr.bf16.mxu0 %v19848_v47 }
 0x3d0   : > { %18286 = vmatprep.mubr.bf16.mxu1 %v19848_v47 }
 0x3d6   : > { %18311 = vmatmul.mubr.bf16.gmra.mxu0 %v19849_v38 }
 0x3d7   : > { %18287 = vmatmul.mubr.bf16.gmra.mxu1 %v19849_v38  ;;  %18368 = vmatprep.mubr.msk.f32.mxu0 %vm1905_vm0, %v15184_v48 }
 0x3d8   : > { %18330 = vmatprep.mubr.msk.f32.mxu1 %vm1905_vm0, %v5341_v51 }
 0x3ed   : > { %v18078_v22 = vpop.f32.mrf.mxu0 }
 0x3ee   : > { %v18040_v54 = vpop.f32.mrf.mxu1 }
 0x3ef   : > { %v3866_v59 = vpop.f32.mrf.mxu0 }
 0x3f0   : > { %v3698_v60 = vpop.f32.mrf.mxu1 }
 0x3fe   : > { %v18059_v8 = vpop.f32.mrf.mxu1 }
 0x3ff   : > { %v3791_v61 = vmax.f32 %v18040_v54, %v18059_v8 }
 0x400   : > { %v3781_v11 = vpop.f32.mrf.mxu1 }
 0x401   : > { %v3790_v43 = vmax.f32 %v3698_v60, %v3781_v11  ;;  %v3876_v46 = vmax.f32 %v3791_v61, %v18078_v22 }
 0x403   : > { %v3875_v25 = vmax.f32 %v3790_v43, %v3866_v59 }
 0x40e   : > { %v18097_v2 = vpop.f32.mrf.mxu1  ;;  %v22004_v26 = vpop.f32.mrf.mxu0 }
 0x40f   : > { %v3961_v19 = vmax.f32 %v3876_v46, %v18097_v2 }
 0x410   : > { %v3951_v0 = vpop.f32.mrf.mxu1  ;;  %v22006_v37 = vpop.f32.mrf.mxu0 }
 0x411   : > { %v3960_v63 = vmax.f32 %v3875_v25, %v3951_v0 }
 0x412   : > { %v22008_v21 = vpop.f32.mrf.mxu0 }
 0x413   : > { %v16417_v16 = vpack.c.bf16 %v3961_v19, %v3960_v63  ;;  %v464_v19 = vld [vmem:[%s20612_s24 + $0x78] sm:$0xff]  }
 0x414   : > { %v22014_v36 = vpop.f32.mrf.mxu0  ;;  %496 = vst [vmem:[#allocation2 + $0x80] sm:$0xff] %v464_v19  }
 0x415   : > { %16434 = vst [vmem:[#allocation3 + $0x8] sm:$0xff] %v16417_v16  }
 0x416   : > { %v22019_v6 = vpop.f32.mrf.mxu0 }
 0x418   : > { %v22021_v24 = vpop.f32.mrf.mxu0 }
 0x41a   : > { %v22023_v35 = vpop.f32.mrf.mxu0 }
 0x41c   : > { %v7412_v27 = vld [vmem:[#allocation3 + $0x8] sm:$0xff]   ;;  %v22025_v56 = vpop.f32.mrf.mxu0 }
 0x41d   : > { %7420 = vst [vmem:[#allocation2 + $0x10] sm:$0xff] %v7412_v27  }
 0x424   : > { %v22010_v44 = vld [vmem:[#allocation2 + $0xc] sm:$0xff]  }
 0x425   : > { %25214 = vst [vmem:[#allocation10_spill] sm:$0xff] %v22010_v44  ;;  %v22012_v28 = vld [vmem:[#allocation2 + $0x10] sm:$0xff]  }
 0x426   : > { %25215 = vst [vmem:[#allocation9_spill] sm:$0xff] %v22012_v28  ;;  %v22016_v39 = vld [vmem:[#allocation2 + $0xc] sm:$0xff]  }
 0x427   : > { %25216 = vst [vmem:[#allocation7_spill] sm:$0xff] %v22016_v39  ;;  %9183 = vst [vmem:[#allocation2 + $0x10] sm:$0xf] %v25217_v49 }
 0x42e   : > { %v18164_v15 = vpop.f32.mrf.mxu0 }
 0x42f   : > { %v18140_v45 = vpop.f32.mrf.mxu1 }
 0x430   : > { %v4416_v34 = vpop.f32.mrf.mxu0  ;;  %v4425_v27 = vadd.f32 %v18164_v15, %v18140_v45  ;;  %v20396_v45 = vld [vmem:[%s25169_s2] ss:$0 sm:$0xff] }
 0x431   : > { %v4303_v7 = vpop.f32.mrf.mxu1 }
 0x432   : > { %v18165_v42 = vpop.f32.mrf.mxu0  ;;  %v4417_v29 = vadd.f32 %v4416_v34, %v4303_v7  ;;  %v4151_v34 = vadd.f32 %v20396_v45, %v22004_v26 }
 0x433   : > { %v18141_v23 = vpop.f32.mrf.mxu1 }
 0x434   : > { %v4419_v12 = vpop.f32.mrf.mxu0  ;;  %v4428_v39 = vadd.f32 %v18165_v42, %v18141_v23 }
 0x435   : > { %v4306_v62 = vpop.f32.mrf.mxu1 }
 0x436   : > { %v22035_v41 = vpop.f32.mrf.mxu0  ;;  %v4420_v63 = vadd.f32 %v4419_v12, %v4306_v62  ;;  %v4149_v62 = vadd.f32 %v20396_v45, %v22006_v37 }
 0x437   : > { %v22037_v52 = vpop.f32.mrf.mxu1 }
 0x438   : > { %v22039_v53 = vpop.f32.mrf.mxu0  ;;  %v4441_v26 = vadd.f32 %v22035_v41, %v22037_v52 }
 0x439   : > { %v22041_v3 = vpop.f32.mrf.mxu1 }
 0x43a   : > { %v18169_v10 = vpop.f32.mrf.mxu0  ;;  %v4433_v37 = vadd.f32 %v22039_v53, %v22041_v3  ;;  %v20398_v53 = vld [vmem:[#allocation4] sm:$0xff] }
 0x43b   : > { %v18145_v5 = vpop.f32.mrf.mxu1 }
 0x43c   : > { %v22043_v57 = vpop.f32.mrf.mxu0  ;;  %v4444_v48 = vadd.f32 %v18169_v10, %v18145_v5 }
 0x43d   : > { %v4322_v30 = vpop.f32.mrf.mxu1 }
 0x44e   : > { %v22045_v4 = vpop.f32.mrf.mxu0 }
 0x44f   : > { %v18188_v31 = vpop.f32.mrf.mxu1 }
 0x450   : > { %v22047_v50 = vpop.f32.mrf.mxu0  ;;  %v4578_v10 = vadd.f32 %v18188_v31, %v4151_v34 }
 0x451   : > { %v4545_v47 = vpop.f32.mrf.mxu1 }
 0x452   : > { %v22049_v33 = vpop.f32.mrf.mxu0  ;;  %v4576_v31 = vadd.f32 %v4545_v47, %v4149_v62 }
 0x453   : > { %v22051_v58 = vpop.f32.mrf.mxu1 }
 0x454   : > { %v22053_v38 = vpop.f32.mrf.mxu0 }
 0x455   : > { %v22055_v9 = vpop.f32.mrf.mxu1 }
 0x456   : > { %25218 = vst [vmem:[#allocation11_spill] sm:$0xff] %v22055_v9  ;;  %v22057_v1 = vpop.f32.mrf.mxu0 }
 0x457   : > { %v22061_v55 = vpop.f32.mrf.mxu1 }
 0x458   : > { %v22063_v20 = vpop.f32.mrf.mxu0 }
 0x459   : > { %v22065_v13 = vpop.f32.mrf.mxu1 }
 0x45a   : > { %v22067_v17 = vpop.f32.mrf.mxu0 }
 0x45b   : > { %v22069_v32 = vpop.f32.mrf.mxu1 }
 0x45c   : > { %v22071_v40 = vpop.f32.mrf.mxu0 }
 0x45d   : > { %25219 = vst [vmem:[#allocation12_spill] sm:$0xff] %v22071_v40  ;;  %v22073_v60 = vpop.f32.mrf.mxu1 }
 0x46e   : > { %v18260_v54 = vpop.f32.mrf.mxu0 }
 0x46f   : > { %v22075_v11 = vpop.f32.mrf.mxu1  ;;  %v4989_v28 = vadd.f32 %v18260_v54, %v4425_v27  ;;  %v4152_v54 = vadd.f32 %v20396_v45, %v22008_v21 }
 0x470   : > { %v4956_v8 = vpop.f32.mrf.mxu0 }
 0x471   : > { %v22077_v61 = vpop.f32.mrf.mxu1  ;;  %v22092_v49 = vadd.f32 %v4956_v8, %v4417_v29  ;;  %v5271_v12 = vrot.slane %v4989_v28, 7  ;;  %v4436_v8 = vadd.f32 %v22043_v57, %v4322_v30  ;;  %v4579_v41 = vadd.f32 %v22051_v58, %v4152_v54  ;;  %v20399_v54 = vld [vmem:[#allocation4 + $0x18] sm:$0xff] }
 0x472   : > { %v18261_v22 = vpop.f32.mrf.mxu0  ;;  %v4155_v58 = vadd.f32 %v20396_v45, %v22019_v6 }
 0x473   : > { %v22079_v59 = vpop.f32.mrf.mxu1  ;;  %v22094_v9 = vadd.f32 %v18261_v22, %v4428_v39  ;;  %v25191_v42 = vrot.slane %v22092_v49, 7 }
 0x474   : > { %v4959_v43 = vpop.f32.mrf.mxu0 }
 0x475   : > { %v22081_v46 = vpop.f32.mrf.mxu1  ;;  %v22086_v51 = vadd.f32 %v4959_v43, %v4420_v63  ;;  %v5272_v23 = vrot.slane %v22094_v9, 7 }
 0x476   : > { %v18264_v2 = vpop.f32.mrf.mxu0 }
 0x477   : > { %v22083_v0 = vpop.f32.mrf.mxu1  ;;  %v5270_v40 = vrot.slane %v22086_v51, 7  ;;  %v4993_v52 = vadd.f32 %v18264_v2, %v4441_v26  ;;  %v4153_v2 = vadd.f32 %v20396_v45, %v22021_v24  ;;  %v4796_v24 = vadd.f32 %v22077_v61, %v22047_v50 }
 0x478   : > { %v4972_v25 = vpop.f32.mrf.mxu0  ;;  %v4807_v50 = vadd.f32 %v22079_v59, %v22049_v33  ;;  %v4799_v61 = vadd.f32 %v22081_v46, %v22053_v38 }
 0x479   : > { %v22088_v14 = vpop.f32.mrf.mxu1  ;;  %v5282_v28 = vsel %vm1837_vm1, %v5270_v40, %v5271_v12  ;;  %v4991_v29 = vadd.f32 %v4972_v25, %v4433_v37 }
 0x47a   : > { %v18265_v16 = vpop.f32.mrf.mxu0 }
 0x47b   : > { %v22090_v44 = vadd.f32 %v18265_v16, %v4444_v48  ;;  %v22097_v19 = vpop.f32.mrf.mxu1  ;;  %v20397_v16 = vld [vmem:[#allocation4 + $0x10] sm:$0xff]  ;;  %v5281_v48 = vsel %vm1837_vm1, %v5271_v12, %v5272_v23 }
 0x47c   : > { %v4975_v7 = vpop.f32.mrf.mxu0  ;;  %v5287_v21 = vmul.f32 %v20397_v16, %v5282_v28  ;;  %v22133_v28 = vadd.f32 %v20396_v45, %v22014_v36  ;;  %v5288_v26 = vmul.f32 %v20399_v54, %v5281_v48  ;;  %v4580_v36 = vadd.f32 %v22065_v13, %v4153_v2 }
 0x47d   : > { %v5276_v15 = vrot.slane %v22090_v44, 7  ;;  %v22106_v39 = vpop.f32.mrf.mxu1  ;;  %v4992_v57 = vadd.f32 %v4975_v7, %v4436_v8  ;;  %v4156_v7 = vadd.f32 %v20396_v45, %v22023_v35  ;;  %v5275_v35 = vrot.slane %v4993_v52, 7 }
 0x47e   : > { %v4820_v13 = vadd.f32 %v22083_v0, %v22057_v1  ;;  %v4823_v1 = vadd.f32 %v22097_v19, %v22067_v17 }
 0x47f   : > { %v5284_v22 = vsel %vm1837_vm1, %v5276_v15, %v25191_v42  ;;  %v5274_v6 = vrot.slane %v4992_v57, 7 }
 0x480   : > { %v5285_v3 = vmul.f32 %v20398_v53, %v5284_v22  ;;  %v4582_v22 = vadd.f32 %v22061_v55, %v4155_v58  ;;  %v4804_v55 = vadd.f32 %v22075_v11, %v22045_v4  ;;  %v5277_v4 = vsel %vm1837_vm1, %v5275_v35, %v5276_v15 }
 0x48e   : > { %v18308_v5 = vpop.f32.mrf.mxu0 }
 0x48f   : > { %v18284_v43 = vpop.f32.mrf.mxu1  ;;  %v5263_v59 = vadd.f32 %v18308_v5, %v4804_v55 }
 0x490   : > { %v5126_v63 = vadd.f32 %v18284_v43, %v4578_v10  ;;  %v5230_v27 = vpop.f32.mrf.mxu0  ;;  %v4154_v10 = vadd.f32 %v20396_v45, %v22025_v56  ;;  %v4583_v43 = vadd.f32 %v22069_v32, %v4156_v7  ;;  %v5273_v56 = vrot.slane %v4991_v29, 7 }
 0x491   : > { %v5093_v30 = vpop.f32.mrf.mxu1  ;;  %v4812_v32 = vadd.f32 %v22088_v14, %v22063_v20  ;;  %v22161_v16 = vadd.f32 %v5230_v27, %v4796_v24  ;;  %v5278_v20 = vsel %vm1837_vm1, %v5274_v6, %v5275_v35  ;;  %v25220_v14 = vld [vmem:[#allocation12_spill] sm:$0xff]  ;;  %v20400_v27 = vld [vmem:[#allocation4 + $0x38] sm:$0xff] }
 0x492   : > { %v22130_v34 = vadd.f32 %v5287_v21, %v5126_v63  ;;  %v5124_v42 = vadd.f32 %v5093_v30, %v4576_v31  ;;  %v18309_v47 = vpop.f32.mrf.mxu0  ;;  %v4581_v31 = vadd.f32 %v22073_v60, %v4154_v10  ;;  %v5280_v44 = vsel %vm1837_vm1, %v5272_v23, %v5273_v56  ;;  %v20401_v30 = vld [vmem:[#allocation4 + $0x30] sm:$0xff]  ;;  %v20404_v35 = vld [vmem:[#allocation4 + $0x78] sm:$0xff] }
 0x493   : > { %v18285_v62 = vpop.f32.mrf.mxu1  ;;  %v5264_v0 = vadd.f32 %v18309_v47, %v4807_v50  ;;  %v4815_v15 = vadd.f32 %v22106_v39, %v25220_v14  ;;  %v5279_v17 = vsel %vm1837_vm1, %v5273_v56, %v5274_v6  ;;  %v5301_v5 = vrot.slane %v22161_v16, 1  ;;  %v20403_v6 = vld [vmem:[#allocation4 + $0x70] sm:$0xff] }
 0x494   : > { %v22139_v12 = vadd.f32 %v5285_v3, %v5124_v42  ;;  %v5127_v25 = vadd.f32 %v18285_v62, %v4579_v41  ;;  %v5233_v8 = vpop.f32.mrf.mxu0  ;;  %v5292_v41 = vmul.f32 %v20400_v27, %v5277_v4  ;;  %v5291_v48 = vmul.f32 %v20401_v30, %v5278_v20  ;;  %v20402_v62 = vld [vmem:[#allocation4 + $0x28] sm:$0xff] }
 0x495   : > { %v22144_v37 = vpop.f32.mrf.mxu1  ;;  %v5262_v57 = vadd.f32 %v5233_v8, %v4799_v61  ;;  %v5303_v39 = vrot.slane %v5263_v59, 1  ;;  %v5304_v2 = vrot.slane %v5264_v0, 1  ;;  %v5290_v10 = vmul.f32 %v20402_v62, %v5279_v17  ;;  %v20408_v59 = vld [vmem:[#allocation4 + $0x58] sm:$0xff]  ;;  %v20409_v17 = vld [vmem:[#allocation4 + $0x50] sm:$0xff]  ;;  %v15180_v62 = vld [vmem:[%s25173_s6 + $0x10] sm:$0xff] }
 0x496   : > { %v22148_v45 = vadd.f32 %v5288_v26, %v5127_v25  ;;  %v18312_v42 = vpop.f32.mrf.mxu0 }
 0x497   : > { %v18288_v63 = vpop.f32.mrf.mxu1  ;;  %v5267_v60 = vadd.f32 %v18312_v42, %v4820_v13  ;;  %v5302_v42 = vrot.slane %v5262_v57, 1 }
 0x498   : > { %v5246_v21 = vpop.f32.mrf.mxu0  ;;  %v5130_v38 = vadd.f32 %v18288_v63, %v4582_v22  ;;  %v20405_v63 = vld [vmem:[#allocation4 + $0x20] sm:$0xff] }
 0x499   : > { %v5109_v11 = vpop.f32.mrf.mxu1  ;;  %v5265_v33 = vadd.f32 %v5246_v21, %v4812_v32  ;;  %v5307_v53 = vrot.slane %v5267_v60, 1  ;;  %v5289_v50 = vmul.f32 %v20405_v63, %v5280_v44  ;;  %v5313_v21 = vsel %vm1870_vm2, %v5303_v39, %v5304_v2  ;;  %v25221_v60 = vld [vmem:[#allocation11_spill] sm:$0xff] }
 0x49a   : > { %v18313_v46 = vpop.f32.mrf.mxu0  ;;  %v5299_v7 = vadd.f32 %v5291_v48, %v5130_v38  ;;  %v5128_v22 = vadd.f32 %v5109_v11, %v4580_v36  ;;  %v20406_v36 = vld [vmem:[#allocation4 + $0x60] sm:$0xff]  ;;  %v4577_v11 = vadd.f32 %v25221_v60, %v22133_v28  ;;  %v25222_v44 = vrot.slane %v22092_v49, 7 }
 0x49b   : > { %v18289_v19 = vpop.f32.mrf.mxu1  ;;  %v5268_v52 = vadd.f32 %v18313_v46, %v4823_v1  ;;  %v5305_v23 = vrot.slane %v5265_v33, 1  ;;  %v20407_v1 = vld [vmem:[#allocation4 + $0x68] sm:$0xff]  ;;  %v5314_v14 = vsel %vm1870_vm2, %v5302_v42, %v5303_v39  ;;  %v5315_v49 = vsel %vm1870_vm2, %v5301_v5, %v5302_v42  ;;  %v22352_v63 = vld [vmem:[#allocation2 + $0x70] sm:$0xff]  }
 0x49c   : > { %v5131_v9 = vadd.f32 %v18289_v19, %v4583_v43  ;;  %v5249_v29 = vpop.f32.mrf.mxu0  ;;  %v5297_v33 = vadd.f32 %v5289_v50, %v5128_v22  ;;  %v5283_v46 = vsel %vm1837_vm1, %v25222_v44, %v5270_v40  ;;  %v5319_v19 = vmul.f32 %v20409_v17, %v5313_v21  ;;  %v20410_v40 = vld [vmem:[#allocation4 + $0x8] sm:$0xff]  ;;  %v19867_v22 = vld [vmem:[%s25168_s1 + $0x50] sm:$0xff]   ;;  %v22356_v50 = vld [vmem:[#allocation2 + $0x68] sm:$0xff]  }
 0x49d   : > { %v5308_v3 = vrot.slane %v5268_v52, 1  ;;  %v5112_v47 = vpop.f32.mrf.mxu1  ;;  %v5266_v58 = vadd.f32 %v5249_v29, %v4815_v15  ;;  %v5312_v55 = vsel %vm1870_vm2, %v5304_v2, %v5305_v23  ;;  %v5125_v28 = vadd.f32 %v22144_v37, %v4577_v11  ;;  %v20411_v52 = vld [vmem:[#allocation4 + $0x48] sm:$0xff]  ;;  %v5342_v2 = vld [vmem:[%s25173_s6 + $0x8] sm:$0xff]  ;;  %v19878_v21 = vld [vmem:[%s25168_s1 + $0xe0] sm:$0xff]  }
 0x49e   : > { %v5129_v26 = vadd.f32 %v5112_v47, %v4581_v31  ;;  %v5300_v43 = vadd.f32 %v5292_v41, %v5131_v9  ;;  %v5320_v0 = vmul.f32 %v20408_v59, %v5312_v55  ;;  %v5286_v51 = vmul.f32 %v20410_v40, %v5283_v46  ;;  %v20412_v9 = vld [vmem:[#allocation4 + $0x40] sm:$0xff]  ;;  %v19862_v39 = vld [vmem:[%s25168_s1 + $0x78] sm:$0xff]   ;;  %v19887_v11 = vld [vmem:[%s25168_s1 + $0x8] sm:$0xff]  }
 0x49f   : > { %v5309_v25 = vsel %vm1870_vm2, %v5307_v53, %v5308_v3  ;;  %v5316_v54 = vsel %vm1870_vm2, %v5308_v3, %v5301_v5  ;;  %v5306_v8 = vrot.slane %v5266_v58, 1  ;;  %v5318_v57 = vmul.f32 %v20411_v52, %v5314_v14  ;;  %v15189_v42 = vld [vmem:[%s25173_s6 + $0x38] sm:$0xff]  ;;  %v19884_v60 = vld [vmem:[%s25168_s1 + $0xd0] sm:$0xff]   ;;  %v19889_v59 = vld [vmem:[%s25168_s1] sm:$0xff]  }
 0x4a0   : > { %v5323_v24 = vmul.f32 %v20403_v6, %v5309_v25  ;;  %v5324_v56 = vmul.f32 %v20404_v35, %v5316_v54  ;;  %v5298_v4 = vadd.f32 %v5290_v10, %v5129_v26  ;;  %v5328_v37 = vadd.f32 %v5320_v0, %v22148_v45  ;;  %v22274_v10 = vld [vmem:[#allocation2 + $0x60] sm:$0xff]   ;;  %v19864_v25 = vld [vmem:[%s25168_s1 + $0x68] sm:$0xff]   ;;  %v19866_v26 = vld [vmem:[%s25168_s1 + $0x58] sm:$0xff]  }
 0x4a1   : > { %v5310_v13 = vsel %vm1870_vm2, %v5306_v8, %v5307_v53  ;;  %v5311_v32 = vsel %vm1870_vm2, %v5305_v23, %v5306_v8  ;;  %v5327_v5 = vadd.f32 %v5319_v19, %v22130_v34  ;;  %v5294_v48 = vadd.f32 %v5286_v51, %v5125_v28  ;;  %v19865_v54 = vld [vmem:[%s25168_s1 + $0x60] sm:$0xff]   ;;  %v15181_v8 = vld [vmem:[%s25173_s6 + $0x18] sm:$0xff]  ;;  %v19868_v6 = vld [vmem:[%s25168_s1 + $0x48] sm:$0xff]  }
 0x4a2   : > { %v5331_v31 = vadd.f32 %v5323_v24, %v5299_v7  ;;  %v5332_v61 = vadd.f32 %v5324_v56, %v5300_v43  ;;  %v5321_v16 = vmul.f32 %v20406_v36, %v5311_v32  ;;  %v5322_v20 = vmul.f32 %v20407_v1, %v5310_v13  ;;  %v19863_v7 = vld [vmem:[%s25168_s1 + $0x70] sm:$0xff]   ;;  %v19869_v24 = vld [vmem:[%s25168_s1 + $0x40] sm:$0xff]   ;;  %v19873_v35 = vld [vmem:[%s25168_s1 + $0x38] sm:$0xff]  }
 0x4a3   : > { %v5317_v29 = vmul.f32 %v20412_v9, %v5315_v49  ;;  %v5326_v45 = vadd.f32 %v5318_v57, %v5294_v48  ;;  %v22227_v23 = vmax.f32 %v5328_v37, 0.0  ;;  %v22233_v34 = vmax.f32 %v5327_v5, 0.0  ;;  %v15188_v43 = vld [vmem:[%s25173_s6 + $0x30] sm:$0xff]  ;;  %v22335_v56 = vld [vmem:[#allocation2 + $0x68] sm:$0xff]   ;;  %v19872_v55 = vld [vmem:[%s25168_s1 + $0xf8] sm:$0xff]  }
 0x4a4   : > { %v22194_v38 = vmax.f32 %v5332_v61, 0.0  ;;  %v5330_v15 = vadd.f32 %v5322_v20, %v5298_v4  ;;  %v22205_v27 = vmax.f32 %v5331_v31, 0.0  ;;  %v5329_v41 = vadd.f32 %v5321_v16, %v5297_v33  ;;  %v19875_v13 = vld [vmem:[%s25168_s1 + $0x30] sm:$0xff]   ;;  %v19877_v31 = vld [vmem:[%s25168_s1 + $0x28] sm:$0xff]   ;;  %v22365_v36 = vld [vmem:[#allocation2 + $0x78] sm:$0xff]  }
 0x4a5   : > { %v5325_v3 = vadd.f32 %v5317_v29, %v22139_v12  ;;  %v22240_v47 = vmax.f32 %v5326_v45, 0.0  ;;  %v15185_v12 = vld [vmem:[%s25173_s6 + $0x28] sm:$0xff]  ;;  %v19874_v32 = vld [vmem:[%s25168_s1 + $0xf0] sm:$0xff]   ;;  %v19879_v16 = vld [vmem:[%s25168_s1 + $0x20] sm:$0xff]  }
 0x4a6   : > { %18314 = vmatprep.subr.mxu1 %v22194_v38  ;;  %18352 = vmatprep.subr.mxu0 %v22194_v38  ;;  %v22214_v30 = vmax.f32 %v5330_v15, 0.0  ;;  %v22221_v53 = vmax.f32 %v5329_v41, 0.0  ;;  %v19876_v61 = vld [vmem:[%s25168_s1 + $0xe8] sm:$0xff]   ;;  %v19881_v4 = vld [vmem:[%s25168_s1 + $0x18] sm:$0xff]   ;;  %v19885_v20 = vld [vmem:[%s25168_s1 + $0x10] sm:$0xff]  }
 0x4a7   : > { %18315 = vmatpush3.msra.mxu1 %v22194_v38  ;;  %18353 = vmatpush3.msra.mxu0 %v22194_v38  ;;  %v22246_v58 = vmax.f32 %v5325_v3, 0.0  ;;  %v19880_v1 = vld [vmem:[%s25168_s1 + $0xd8] sm:$0xff]   ;;  %v19886_v33 = vld [vmem:[%s25168_s1 + $0xc8] sm:$0xff]   ;;  %v19888_v0 = vld [vmem:[%s25168_s1 + $0xc0] sm:$0xff]  }
 0x4a8   : > { %18316 = vmatprep.subr.mxu1 %v22205_v27  ;;  %18354 = vmatprep.subr.mxu0 %v22205_v27  ;;  %v19892_v44 = vld [vmem:[%s25168_s1 + $0x138] sm:$0xff]   ;;  %v22406_v46 = vld [vmem:[#allocation2 + $0x70] sm:$0xff]   ;;  %v19897_v19 = vld [vmem:[%s25168_s1 + $0x168] sm:$0xff]  }
 0x4a9   : > { %18317 = vmatpush3.msra.mxu1 %v22205_v27  ;;  %18355 = vmatpush3.msra.mxu0 %v22205_v27  ;;  %v19895_v14 = vld [vmem:[%s25168_s1 + $0x170] sm:$0xff]   ;;  %v22414_v17 = vld [vmem:[#allocation2 + $0x78] sm:$0xff]   ;;  %v19896_v28 = vld [vmem:[%s25168_s1 + $0x128] sm:$0xff]  }
 0x4aa   : > { %18318 = vmatprep.subr.mxu1 %v22214_v30  ;;  %18356 = vmatprep.subr.mxu0 %v22214_v30  ;;  %v19894_v15 = vld [vmem:[%s25168_s1 + $0x130] sm:$0xff]   ;;  %v19899_v41 = vld [vmem:[%s25168_s1 + $0x160] sm:$0xff]   ;;  %v19901_v40 = vld [vmem:[%s25168_s1 + $0x158] sm:$0xff]  }
 0x4ab   : > { %18319 = vmatpush3.msra.mxu1 %v22214_v30  ;;  %18357 = vmatpush3.msra.mxu0 %v22214_v30  ;;  %v19898_v49 = vld [vmem:[%s25168_s1 + $0x120] sm:$0xff]   ;;  %v19900_v51 = vld [vmem:[%s25168_s1 + $0x118] sm:$0xff]   ;;  %v19905_v52 = vld [vmem:[%s25168_s1 + $0x150] sm:$0xff]  }
 0x4ac   : > { %18320 = vmatprep.subr.mxu1 %v22221_v53  ;;  %18358 = vmatprep.subr.mxu0 %v22221_v53  ;;  %v19904_v57 = vld [vmem:[%s25168_s1 + $0x110] sm:$0xff]   ;;  %v19907_v37 = vld [vmem:[%s25168_s1 + $0x148] sm:$0xff]   ;;  %v19909_v5 = vld [vmem:[%s25168_s1 + $0x140] sm:$0xff]  }
 0x4ad   : > { %18321 = vmatpush3.msra.mxu1 %v22221_v53  ;;  %18359 = vmatpush3.msra.mxu0 %v22221_v53  ;;  %v19908_v48 = vld [vmem:[%s25168_s1 + $0x100] sm:$0xff]   ;;  %v19911_v9 = vld [vmem:[%s25168_s1 + $0x1b8] sm:$0xff]   ;;  %v19912_v45 = vld [vmem:[%s25168_s1 + $0xb0] sm:$0xff]  }
 0x4ae   : > { %18322 = vmatprep.subr.mxu1 %v22227_v23  ;;  %18360 = vmatprep.subr.mxu0 %v22227_v23  ;;  %v19910_v29 = vld [vmem:[%s25168_s1 + $0xb8] sm:$0xff]   ;;  %v19917_v3 = vld [vmem:[%s25168_s1 + $0x1a0] sm:$0xff]  }
 0x4af   : > { %18323 = vmatpush3.msra.mxu1 %v22227_v23  ;;  %18361 = vmatpush3.msra.mxu0 %v22227_v23 }
 0x4b0   : > { %18324 = vmatprep.subr.mxu1 %v22233_v34  ;;  %18362 = vmatprep.subr.mxu0 %v22233_v34 }
 0x4b1   : > { %18325 = vmatpush3.msra.mxu1 %v22233_v34  ;;  %18363 = vmatpush3.msra.mxu0 %v22233_v34 }
 0x4b2   : > { %18326 = vmatprep.subr.mxu1 %v22240_v47  ;;  %18364 = vmatprep.subr.mxu0 %v22240_v47 }
 0x4b3   : > { %18327 = vmatpush3.msra.mxu1 %v22240_v47  ;;  %18365 = vmatpush3.msra.mxu0 %v22240_v47 }
 0x4b4   : > { %18328 = vmatprep.subr.mxu1 %v22246_v58  ;;  %18366 = vmatprep.subr.mxu0 %v22246_v58 }
 0x4b5   : > { %18329 = vmatpush3.msra.mxu1 %v22246_v58  ;;  %18367 = vmatpush3.msra.mxu0 %v22246_v58 }
 0x4b6   : > { %18333 = vmatprep.subr.mxu1 %v22194_v38  ;;  %18369 = vmatmul.mubr.msk.f32.vlgmr.msra.gmra.mxu0 %vm1905_vm0, %v15185_v12  ;;  %v19919_v12 = vld [vmem:[%s25168_s1 + $0x198] sm:$0xff]  }
 0x4b7   : > { %18390 = vmatprep.subr.bf16.mxu0 %v19862_v39  ;;  %18331 = vmatmul.mubr.msk.f32.vlgmr.msra.gmra.mxu1 %vm1905_vm0, %v5342_v2  ;;  %v19921_v2 = vld [vmem:[%s25168_s1 + $0x190] sm:$0xff]  }
 0x4b8   : > { %18334 = vmatpush3.msra.mxu1 %v22194_v38  ;;  %18391 = vmatpush3.bf16.msra.mxu0 %v19862_v39  ;;  %v19918_v39 = vld [vmem:[%s25168_s1 + $0x98] sm:$0xff]  }
 0x4b9   : > { %18335 = vmatprep.subr.mxu1 %v22205_v27  ;;  %18392 = vmatprep.subr.bf16.mxu0 %v19863_v7 }
 0x4ba   : > { %18336 = vmatpush3.msra.mxu1 %v22205_v27  ;;  %18349 = vmatprep.mubr.msk.f32.mxu1 %vm1905_vm0, %v15180_v62  ;;  %v19923_v62 = vld [vmem:[%s25168_s1 + $0x188] sm:$0xff]  }
 0x4bb   : > { %18337 = vmatprep.subr.mxu1 %v22214_v30  ;;  %18406 = vmatprep.mubr.bf16.mxu0 %v22274_v10 }
 0x4bc   : > { %18338 = vmatpush3.msra.mxu1 %v22214_v30  ;;  %18393 = vmatpush3.bf16.msra.mxu0 %v19863_v7  ;;  %v19920_v7 = vld [vmem:[%s25168_s1 + $0x90] sm:$0xff]  }
 0x4bd   : > { %18339 = vmatprep.subr.mxu1 %v22221_v53  ;;  %18394 = vmatprep.subr.bf16.mxu0 %v19864_v25 }
 0x4be   : > { %18340 = vmatpush3.msra.mxu1 %v22221_v53 }
 0x4bf   : > { %18341 = vmatprep.subr.mxu1 %v22227_v23 }
 0x4c0   : > { %18342 = vmatpush3.msra.mxu1 %v22227_v23  ;;  %18395 = vmatpush3.bf16.msra.mxu0 %v19864_v25  ;;  %v19925_v25 = vld [vmem:[%s25168_s1 + $0x180] sm:$0xff]  }
 0x4c1   : > { %18343 = vmatprep.subr.mxu1 %v22233_v34  ;;  %18396 = vmatprep.subr.bf16.mxu0 %v19865_v54 }
 0x4c2   : > { %18344 = vmatpush3.msra.mxu1 %v22233_v34 }
 0x4c3   : > { %18345 = vmatprep.subr.mxu1 %v22240_v47 }
 0x4c4   : > { %18346 = vmatpush3.msra.mxu1 %v22240_v47  ;;  %18397 = vmatpush3.bf16.msra.mxu0 %v19865_v54  ;;  %v19924_v54 = vld [vmem:[%s25168_s1 + $0x80] sm:$0xff]  }
 0x4c5   : > { %18347 = vmatprep.subr.mxu1 %v22246_v58  ;;  %18398 = vmatprep.subr.bf16.mxu0 %v19866_v26 }
 0x4c6   : > { %18348 = vmatpush3.msra.mxu1 %v22246_v58 }
 0x4c7   : > { %18350 = vmatmul.mubr.msk.f32.vlgmr.msra.gmra.mxu1 %vm1905_vm0, %v15181_v8  ;;  %18371 = vmatprep.subr.mxu1 %v22194_v38  ;;  %v19928_v8 = vld [vmem:[%s25168_s1 + $0x1f8] sm:$0xff]  }
 0x4c8   : > { %18372 = vmatpush3.msra.mxu1 %v22194_v38  ;;  %18399 = vmatpush3.bf16.msra.mxu0 %v19866_v26  ;;  %v19893_v38 = vld [vmem:[%s25168_s1 + $0x178] sm:$0xff]  }
 0x4c9   : > { %18373 = vmatprep.subr.mxu1 %v22205_v27  ;;  %18400 = vmatprep.subr.bf16.mxu0 %v19867_v22  ;;  %v19929_v26 = vld [vmem:[%s25168_s1 + $0x238] sm:$0xff]  }
 0x4ca   : > { %18374 = vmatpush3.msra.mxu1 %v22205_v27  ;;  %18387 = vmatprep.mubr.msk.f32.mxu1 %vm1905_vm0, %v15188_v43  ;;  %v22426_v27 = vld [vmem:[#allocation2 + $0x80] sm:$0xff]   ;;  %v19931_v43 = vld [vmem:[%s25168_s1 + $0x230] sm:$0xff]  }
 0x4cb   : > { %18375 = vmatprep.subr.mxu1 %v22214_v30 }
 0x4cc   : > { %18376 = vmatpush3.msra.mxu1 %v22214_v30  ;;  %18401 = vmatpush3.bf16.msra.mxu0 %v19867_v22  ;;  %v19906_v30 = vld [vmem:[%s25168_s1 + $0x108] sm:$0xff]   ;;  %v19927_v22 = vld [vmem:[#allocation2 + $0x78] sm:$0xff]  }
 0x4cd   : > { %18377 = vmatprep.subr.mxu1 %v22221_v53  ;;  %18402 = vmatprep.subr.bf16.mxu0 %v19868_v6 }
 0x4ce   : > { %18378 = vmatpush3.msra.mxu1 %v22221_v53  ;;  %v19913_v53 = vld [vmem:[%s25168_s1 + $0x1b0] sm:$0xff]  }
 0x4cf   : > { %18379 = vmatprep.subr.mxu1 %v22227_v23 }
 0x4d0   : > { %18380 = vmatpush3.msra.mxu1 %v22227_v23  ;;  %18403 = vmatpush3.bf16.msra.mxu0 %v19868_v6  ;;  %v19915_v23 = vld [vmem:[%s25168_s1 + $0x1a8] sm:$0xff]   ;;  %v19930_v6 = vld [vmem:[%s25168_s1 + $0x1f0] sm:$0xff]  }
 0x4d1   : > { %18381 = vmatprep.subr.mxu1 %v22233_v34  ;;  %18404 = vmatprep.subr.bf16.mxu0 %v19869_v24 }
 0x4d2   : > { %18382 = vmatpush3.msra.mxu1 %v22233_v34  ;;  %v19914_v34 = vld [vmem:[%s25168_s1 + $0xa8] sm:$0xff]  }
 0x4d3   : > { %18383 = vmatprep.subr.mxu1 %v22240_v47 }
 0x4d4   : > { %18384 = vmatpush3.msra.mxu1 %v22240_v47  ;;  %18405 = vmatpush3.bf16.msra.mxu0 %v19869_v24  ;;  %v19916_v47 = vld [vmem:[%s25168_s1 + $0xa0] sm:$0xff]  }
 0x4d5   : > { %18385 = vmatprep.subr.mxu1 %v22246_v58  ;;  %18438 = vmatprep.subr.bf16.mxu0 %v19873_v35  ;;  %v19932_v24 = vld [vmem:[#allocation2 + $0x80] sm:$0xff]  }
 0x4d6   : > { %18386 = vmatpush3.msra.mxu1 %v22246_v58  ;;  %v22491_v58 = vld [vmem:[#allocation2 + $0x70] sm:$0xff]  }
 0x4d7   : > { %18388 = vmatmul.mubr.msk.f32.vlgmr.msra.gmra.mxu1 %vm1905_vm0, %v15189_v42  ;;  %18407 = vmatmul.mubr.bf16.vlgmr.msra.gmra.mxu0 %v22335_v56  ;;  %v19934_v42 = vld [vmem:[%s25168_s1 + $0x1e8] sm:$0xff]  }
 0x4d8   : > { %18414 = vmatprep.subr.bf16.mxu1 %v19872_v55  ;;  %18439 = vmatpush3.bf16.msra.mxu0 %v19873_v35  ;;  %v19935_v35 = vld [vmem:[%s25168_s1 + $0x228] sm:$0xff]  }
 0x4d9   : > { %18415 = vmatpush3.bf16.msra.mxu1 %v19872_v55  ;;  %18440 = vmatprep.subr.bf16.mxu0 %v19875_v13  ;;  %v19933_v55 = vld [vmem:[#allocation2 + $0x88] sm:$0xff]  }
 0x4da   : > { %18416 = vmatprep.subr.bf16.mxu1 %v19874_v32  ;;  %18410 = vmatprep.mubr.bf16.mxu0 %v22352_v63 }
 0x4db   : > { %18430 = vmatprep.mubr.bf16.mxu1 %v22356_v50 }
 0x4dc   : > { %18441 = vmatpush3.bf16.msra.mxu0 %v19875_v13  ;;  %v19936_v13 = vld [vmem:[%s25168_s1 + $0x1e0] sm:$0xff]  }
 0x4dd   : > { %18417 = vmatpush3.bf16.msra.mxu1 %v19874_v32  ;;  %18442 = vmatprep.subr.bf16.mxu0 %v19877_v31  ;;  %v19939_v32 = vld [vmem:[%s25168_s1 + $0x218] sm:$0xff]  }
 0x4de   : > { %18418 = vmatprep.subr.bf16.mxu1 %v19876_v61 }
 0x4df   : > { %18411 = vmatmul.mubr.bf16.gmra.mxu0 %v22365_v36 }
 0x4e0   : > { %18443 = vmatpush3.bf16.msra.mxu0 %v19877_v31  ;;  %18454 = vmatprep.mubr.bf16.mxu0 %v22274_v10  ;;  %v19940_v31 = vld [vmem:[%s25168_s1 + $0x1d0] sm:$0xff]  }
 0x4e1   : > { %18419 = vmatpush3.bf16.msra.mxu1 %v19876_v61  ;;  %18444 = vmatprep.subr.bf16.mxu0 %v19879_v16  ;;  %v19943_v61 = vld [vmem:[%s25168_s1 + $0x208] sm:$0xff]  }
 0x4e2   : > { %18420 = vmatprep.subr.bf16.mxu1 %v19878_v21 }
 0x4e4   : > { %18445 = vmatpush3.bf16.msra.mxu0 %v19879_v16  ;;  %v19945_v16 = vld [vmem:[%s25168_s1 + $0x200] sm:$0xff]  }
 0x4e5   : > { %18421 = vmatpush3.bf16.msra.mxu1 %v19878_v21  ;;  %18446 = vmatprep.subr.bf16.mxu0 %v19881_v4  ;;  %v19944_v21 = vld [vmem:[%s25168_s1 + $0x1c0] sm:$0xff]  }
 0x4e6   : > { %18422 = vmatprep.subr.bf16.mxu1 %v19880_v1 }
 0x4e8   : > { %18447 = vmatpush3.bf16.msra.mxu0 %v19881_v4 }
 0x4e9   : > { %18423 = vmatpush3.bf16.msra.mxu1 %v19880_v1  ;;  %18448 = vmatprep.subr.bf16.mxu0 %v19885_v20 }
 0x4ea   : > { %18424 = vmatprep.subr.bf16.mxu1 %v19884_v60 }
 0x4ec   : > { %18449 = vmatpush3.bf16.msra.mxu0 %v19885_v20 }
 0x4ed   : > { %18425 = vmatpush3.bf16.msra.mxu1 %v19884_v60  ;;  %18450 = vmatprep.subr.bf16.mxu0 %v19887_v11 }
 0x4ee   : > { %18426 = vmatprep.subr.bf16.mxu1 %v19886_v33 }
 0x4f0   : > { %18451 = vmatpush3.bf16.msra.mxu0 %v19887_v11 }
 0x4f1   : > { %18427 = vmatpush3.bf16.msra.mxu1 %v19886_v33  ;;  %18452 = vmatprep.subr.bf16.mxu0 %v19889_v59 }
 0x4f2   : > { %18428 = vmatprep.subr.bf16.mxu1 %v19888_v0 }
 0x4f4   : > { %18453 = vmatpush3.bf16.msra.mxu0 %v19889_v59 }
 0x4f5   : > { %18429 = vmatpush3.bf16.msra.mxu1 %v19888_v0  ;;  %18486 = vmatprep.subr.bf16.mxu0 %v19893_v38 }
 0x4f6   : > { %18462 = vmatprep.subr.bf16.mxu1 %v19892_v44 }
 0x4f7   : > { %18455 = vmatmul.mubr.bf16.vlgmr.msra.gmra.mxu0 %v22335_v56 }
 0x4f8   : > { %18431 = vmatmul.mubr.bf16.vlgmr.msra.gmra.mxu1 %v22406_v46  ;;  %18487 = vmatpush3.bf16.msra.mxu0 %v19893_v38 }
 0x4f9   : > { %18463 = vmatpush3.bf16.msra.mxu1 %v19892_v44  ;;  %18488 = vmatprep.subr.bf16.mxu0 %v19895_v14 }
 0x4fa   : > { %18464 = vmatprep.subr.bf16.mxu1 %v19894_v15  ;;  %18434 = vmatprep.mubr.bf16.mxu1 %v22414_v17 }
 0x4fb   : > { %18458 = vmatprep.mubr.bf16.mxu0 %v22352_v63 }
 0x4fc   : > { %18489 = vmatpush3.bf16.msra.mxu0 %v19895_v14 }
 0x4fd   : > { %18465 = vmatpush3.bf16.msra.mxu1 %v19894_v15  ;;  %18490 = vmatprep.subr.bf16.mxu0 %v19897_v19 }
 0x4fe   : > { %18466 = vmatprep.subr.bf16.mxu1 %v19896_v28 }
 0x4ff   : > { %18459 = vmatmul.mubr.bf16.gmra.mxu0 %v22365_v36 }
 0x500   : > { %18491 = vmatpush3.bf16.msra.mxu0 %v19897_v19  ;;  %18435 = vmatmul.mubr.bf16.gmra.mxu1 %v22426_v27 }
 0x501   : > { %18467 = vmatpush3.bf16.msra.mxu1 %v19896_v28  ;;  %18492 = vmatprep.subr.bf16.mxu0 %v19899_v41 }
 0x502   : > { %18468 = vmatprep.subr.bf16.mxu1 %v19898_v49  ;;  %18478 = vmatprep.mubr.bf16.mxu1 %v22356_v50 }
 0x503   : > { %18502 = vmatprep.mubr.bf16.mxu0 %v22356_v50  ;;  %v19941_v50 = vld [vmem:[%s25168_s1 + $0x210] sm:$0xff]  }
 0x504   : > { %18493 = vmatpush3.bf16.msra.mxu0 %v19899_v41 }
 0x505   : > { %18469 = vmatpush3.bf16.msra.mxu1 %v19898_v49  ;;  %18494 = vmatprep.subr.bf16.mxu0 %v19901_v40 }
 0x506   : > { %18470 = vmatprep.subr.bf16.mxu1 %v19900_v51 }
 0x508   : > { %18495 = vmatpush3.bf16.msra.mxu0 %v19901_v40 }
 0x509   : > { %18471 = vmatpush3.bf16.msra.mxu1 %v19900_v51  ;;  %18496 = vmatprep.subr.bf16.mxu0 %v19905_v52 }
 0x50a   : > { %18472 = vmatprep.subr.bf16.mxu1 %v19904_v57 }
 0x50c   : > { %18497 = vmatpush3.bf16.msra.mxu0 %v19905_v52  ;;  %v25225_v52 = vmov 0  }
 0x50d   : > { %18473 = vmatpush3.bf16.msra.mxu1 %v19904_v57  ;;  %18498 = vmatprep.subr.bf16.mxu0 %v19907_v37 }
 0x50e   : > { %18474 = vmatprep.subr.bf16.mxu1 %v19906_v30 }
 0x510   : > { %18499 = vmatpush3.bf16.msra.mxu0 %v19907_v37 }
 0x511   : > { %18475 = vmatpush3.bf16.msra.mxu1 %v19906_v30  ;;  %18500 = vmatprep.subr.bf16.mxu0 %v19909_v5 }
 0x512   : > { %18476 = vmatprep.subr.bf16.mxu1 %v19908_v48 }
 0x514   : > { %18501 = vmatpush3.bf16.msra.mxu0 %v19909_v5 }
 0x515   : > { %18477 = vmatpush3.bf16.msra.mxu1 %v19908_v48  ;;  %18534 = vmatprep.subr.bf16.mxu0 %v19911_v9  ;;  %v7058_v48 = vld [vmem:[%s25173_s6] sm:$0xff] }
 0x516   : > { %18510 = vmatprep.subr.bf16.mxu1 %v19910_v29 }
 0x517   : > { %18503 = vmatmul.mubr.bf16.vlgmr.msra.gmra.mxu0 %v22406_v46 }
 0x518   : > { %18479 = vmatmul.mubr.bf16.vlgmr.msra.gmra.mxu1 %v22406_v46  ;;  %18535 = vmatpush3.bf16.msra.mxu0 %v19911_v9  ;;  %v15412_v9 = vld [vmem:[%s25173_s6 + $0x20] sm:$0xff] }
 0x519   : > { %18511 = vmatpush3.bf16.msra.mxu1 %v19910_v29  ;;  %18536 = vmatprep.subr.bf16.mxu0 %v19913_v53 }
 0x51a   : > { %18512 = vmatprep.subr.bf16.mxu1 %v19912_v45  ;;  %18482 = vmatprep.mubr.bf16.mxu1 %v22414_v17 }
 0x51b   : > { %18506 = vmatprep.mubr.bf16.mxu0 %v22414_v17 }
 0x51c   : > { %18537 = vmatpush3.bf16.msra.mxu0 %v19913_v53 }
 0x51d   : > { %18513 = vmatpush3.bf16.msra.mxu1 %v19912_v45  ;;  %18538 = vmatprep.subr.bf16.mxu0 %v19915_v23 }
 0x51e   : > { %18514 = vmatprep.subr.bf16.mxu1 %v19914_v34 }
 0x51f   : > { %18507 = vmatmul.mubr.bf16.gmra.mxu0 %v22426_v27 }
 0x520   : > { %18483 = vmatmul.mubr.bf16.gmra.mxu1 %v22426_v27  ;;  %18539 = vmatpush3.bf16.msra.mxu0 %v19915_v23 }
 0x521   : > { %18515 = vmatpush3.bf16.msra.mxu1 %v19914_v34  ;;  %18540 = vmatprep.subr.bf16.mxu0 %v19917_v3 }
 0x522   : > { %18516 = vmatprep.subr.bf16.mxu1 %v19916_v47  ;;  %18526 = vmatprep.mubr.bf16.mxu1 %v22274_v10  ;;  %v19922_v10 = vld [vmem:[%s25168_s1 + $0x88] sm:$0xff]  }
 0x523   : > { %18550 = vmatprep.mubr.bf16.mxu0 %v22491_v58 }
 0x524   : > { %18541 = vmatpush3.bf16.msra.mxu0 %v19917_v3 }
 0x525   : > { %18517 = vmatpush3.bf16.msra.mxu1 %v19916_v47  ;;  %18542 = vmatprep.subr.bf16.mxu0 %v19919_v12 }
 0x526   : > { %18518 = vmatprep.subr.bf16.mxu1 %v19918_v39 }
 0x528   : > { %18543 = vmatpush3.bf16.msra.mxu0 %v19919_v12 }
 0x529   : > { %18519 = vmatpush3.bf16.msra.mxu1 %v19918_v39  ;;  %18544 = vmatprep.subr.bf16.mxu0 %v19921_v2 }
 0x52a   : > { %18520 = vmatprep.subr.bf16.mxu1 %v19920_v7 }
 0x52c   : > { %18545 = vmatpush3.bf16.msra.mxu0 %v19921_v2 }
 0x52d   : > { %18521 = vmatpush3.bf16.msra.mxu1 %v19920_v7  ;;  %18546 = vmatprep.subr.bf16.mxu0 %v19923_v62 }
 0x52e   : > { %18522 = vmatprep.subr.bf16.mxu1 %v19922_v10 }
 0x530   : > { %18547 = vmatpush3.bf16.msra.mxu0 %v19923_v62 }
 0x531   : > { %18523 = vmatpush3.bf16.msra.mxu1 %v19922_v10  ;;  %18548 = vmatprep.subr.bf16.mxu0 %v19925_v25 }
 0x532   : > { %18524 = vmatprep.subr.bf16.mxu1 %v19924_v54 }
 0x534   : > { %18549 = vmatpush3.bf16.msra.mxu0 %v19925_v25 }
 0x535   : > { %18525 = vmatpush3.bf16.msra.mxu1 %v19924_v54  ;;  %18582 = vmatprep.subr.bf16.mxu0 %v19929_v26 }
 0x536   : > { %18558 = vmatprep.subr.bf16.mxu1 %v19928_v8 }
 0x537   : > { %18551 = vmatmul.mubr.bf16.vlgmr.msra.gmra.mxu0 %v19927_v22 }
 0x538   : > { %18527 = vmatmul.mubr.bf16.vlgmr.msra.gmra.mxu1 %v22335_v56  ;;  %18583 = vmatpush3.bf16.msra.mxu0 %v19929_v26  ;;  %v19937_v56 = vld [vmem:[%s25168_s1 + $0x220] sm:$0xff]  }
 0x539   : > { %18559 = vmatpush3.bf16.msra.mxu1 %v19928_v8  ;;  %18584 = vmatprep.subr.bf16.mxu0 %v19931_v43 }
 0x53a   : > { %18560 = vmatprep.subr.bf16.mxu1 %v19930_v6  ;;  %18530 = vmatprep.mubr.bf16.mxu1 %v22352_v63  ;;  %v19938_v63 = vld [vmem:[%s25168_s1 + $0x1d8] sm:$0xff]  }
 0x53b   : > { %18554 = vmatprep.mubr.bf16.mxu0 %v19932_v24 }
 0x53c   : > { %18585 = vmatpush3.bf16.msra.mxu0 %v19931_v43 }
 0x53d   : > { %18561 = vmatpush3.bf16.msra.mxu1 %v19930_v6  ;;  %18586 = vmatprep.subr.bf16.mxu0 %v19935_v35 }
 0x53e   : > { %18562 = vmatprep.subr.bf16.mxu1 %v19934_v42 }
 0x53f   : > { %18555 = vmatmul.mubr.bf16.gmra.mxu0 %v19933_v55 }
 0x540   : > { %18531 = vmatmul.mubr.bf16.gmra.mxu1 %v22365_v36  ;;  %18587 = vmatpush3.bf16.msra.mxu0 %v19935_v35  ;;  %v19942_v36 = vld [vmem:[%s25168_s1 + $0x1c8] sm:$0xff]  }
 0x541   : > { %18563 = vmatpush3.bf16.msra.mxu1 %v19934_v42  ;;  %18588 = vmatprep.subr.bf16.mxu0 %v19937_v56 }
 0x542   : > { %18564 = vmatprep.subr.bf16.mxu1 %v19936_v13  ;;  %18574 = vmatprep.mubr.bf16.mxu1 %v22491_v58 }
 0x543   : > { %18598 = vmatprep.mubr.bf16.mxu0 %v22491_v58 }
 0x544   : > { %18589 = vmatpush3.bf16.msra.mxu0 %v19937_v56 }
 0x545   : > { %18565 = vmatpush3.bf16.msra.mxu1 %v19936_v13  ;;  %18590 = vmatprep.subr.bf16.mxu0 %v19939_v32 }
 0x546   : > { %18566 = vmatprep.subr.bf16.mxu1 %v19938_v63 }
 0x548   : > { %18591 = vmatpush3.bf16.msra.mxu0 %v19939_v32 }
 0x549   : > { %18567 = vmatpush3.bf16.msra.mxu1 %v19938_v63  ;;  %18592 = vmatprep.subr.bf16.mxu0 %v19941_v50 }
 0x54a   : > { %18568 = vmatprep.subr.bf16.mxu1 %v19940_v31 }
 0x54c   : > { %18593 = vmatpush3.bf16.msra.mxu0 %v19941_v50 }
 0x54d   : > { %18569 = vmatpush3.bf16.msra.mxu1 %v19940_v31  ;;  %18594 = vmatprep.subr.bf16.mxu0 %v19943_v61 }
 0x54e   : > { %18570 = vmatprep.subr.bf16.mxu1 %v19942_v36 }
 0x550   : > { %18595 = vmatpush3.bf16.msra.mxu0 %v19943_v61 }
 0x551   : > { %18571 = vmatpush3.bf16.msra.mxu1 %v19942_v36  ;;  %18596 = vmatprep.subr.bf16.mxu0 %v19945_v16 }
 0x552   : > { %18572 = vmatprep.subr.bf16.mxu1 %v19944_v21 }
 0x554   : > { %18597 = vmatpush3.bf16.msra.mxu0 %v19945_v16 }
 0x555   : > { %18573 = vmatpush3.bf16.msra.mxu1 %v19944_v21 }
 0x557   : > { %18599 = vmatmul.mubr.bf16.vlgmr.msra.gmra.mxu0 %v19927_v22 }
 0x558   : > { %18575 = vmatmul.mubr.bf16.vlgmr.msra.gmra.mxu1 %v19927_v22  ;;  %18602 = vmatprep.mubr.bf16.mxu0 %v19932_v24 }
 0x559   : > { %18578 = vmatprep.mubr.bf16.mxu1 %v19932_v24 }
 0x55f   : > { %18603 = vmatmul.mubr.bf16.gmra.mxu0 %v19933_v55 }
 0x560   : > { %18579 = vmatmul.mubr.bf16.gmra.mxu1 %v19933_v55  ;;  %18660 = vmatprep.mubr.msk.f32.mxu0 %vm1905_vm0, %v15412_v9 }
 0x561   : > { %18622 = vmatprep.mubr.msk.f32.mxu1 %vm1905_vm0, %v7058_v48 }
 0x576   : > { %v18370_v11 = vpop.f32.mrf.mxu0 }
 0x577   : > { %v18332_v4 = vpop.f32.mrf.mxu1 }
 0x578   : > { %v5583_v0 = vpop.f32.mrf.mxu0 }
 0x579   : > { %v5415_v1 = vpop.f32.mrf.mxu1 }
 0x587   : > { %v18351_v20 = vpop.f32.mrf.mxu1 }
 0x588   : > { %v5508_v33 = vmax.f32 %v18332_v4, %v18351_v20 }
 0x589   : > { %v5498_v60 = vpop.f32.mrf.mxu1 }
 0x58a   : > { %v5507_v59 = vmax.f32 %v5415_v1, %v5498_v60  ;;  %v5593_v44 = vmax.f32 %v5508_v33, %v18370_v11 }
 0x58c   : > { %v5592_v46 = vmax.f32 %v5507_v59, %v5583_v0 }
 0x597   : > { %v18389_v38 = vpop.f32.mrf.mxu1  ;;  %v22573_v28 = vpop.f32.mrf.mxu0 }
 0x598   : > { %v5678_v15 = vmax.f32 %v5593_v44, %v18389_v38 }
 0x599   : > { %v5668_v14 = vpop.f32.mrf.mxu1  ;;  %v22575_v41 = vpop.f32.mrf.mxu0 }
 0x59a   : > { %v5677_v17 = vmax.f32 %v5592_v46, %v5668_v14 }
 0x59b   : > { %v22577_v49 = vpop.f32.mrf.mxu0 }
 0x59c   : > { %v16422_v19 = vpack.c.bf16 %v5678_v15, %v5677_v17 }
 0x59d   : > { %v22584_v57 = vpop.f32.mrf.mxu0 }
 0x59e   : > { %16435 = vst [vmem:[#allocation3 + $0x10] sm:$0xff] %v16422_v19  }
 0x59f   : > { %v22586_v37 = vpop.f32.mrf.mxu0 }
 0x5a1   : > { %v22588_v30 = vpop.f32.mrf.mxu0 }
 0x5a3   : > { %v22590_v5 = vpop.f32.mrf.mxu0 }
 0x5a5   : > { %v7414_v27 = vld [vmem:[#allocation3 + $0x10] sm:$0xff]   ;;  %v22598_v29 = vpop.f32.mrf.mxu0 }
 0x5a6   : > { %7422 = vst [vmem:[#allocation2 + $0x18] sm:$0xff] %v7414_v27  }
 0x5ad   : > { %v22579_v40 = vld [vmem:[#allocation2 + $0x14] sm:$0xff]  }
 0x5ae   : > { %25223 = vst [vmem:[#allocation12_spill] sm:$0xff] %v22579_v40  ;;  %v22581_v51 = vld [vmem:[#allocation2 + $0x14] sm:$0xff]  }
 0x5af   : > { %25224 = vst [vmem:[#allocation11_spill] sm:$0xff] %v22581_v51  ;;  %9184 = vst [vmem:[#allocation2 + $0x14] sm:$0xf] %v25225_v52 }
 0x5b7   : > { %v18456_v45 = vpop.f32.mrf.mxu0 }
 0x5b8   : > { %v18432_v53 = vpop.f32.mrf.mxu1 }
 0x5b9   : > { %v22604_v34 = vpop.f32.mrf.mxu0  ;;  %v6142_v46 = vadd.f32 %v18456_v45, %v18432_v53 }
 0x5ba   : > { %v22602_v23 = vpop.f32.mrf.mxu1 }
 0x5bb   : > { %v18457_v47 = vpop.f32.mrf.mxu0 }
 0x5bc   : > { %v18433_v3 = vpop.f32.mrf.mxu1 }
 0x5bd   : > { %v6136_v12 = vpop.f32.mrf.mxu0  ;;  %v6145_v17 = vadd.f32 %v18457_v47, %v18433_v3 }
 0x5be   : > { %v6023_v58 = vpop.f32.mrf.mxu1 }
 0x5bf   : > { %v18460_v2 = vpop.f32.mrf.mxu0  ;;  %v6137_v38 = vadd.f32 %v6136_v12, %v6023_v58  ;;  %v20413_v58 = vld [vmem:[%s25169_s2] ss:$0 sm:$0xff] }
 0x5c0   : > { %v18436_v39 = vpop.f32.mrf.mxu1  ;;  %v5868_v53 = vadd.f32 %v20413_v58, %v22573_v28  ;;  %v22665_v47 = vadd.f32 %v20413_v58, %v22575_v41  ;;  %v22669_v28 = vadd.f32 %v20413_v58, %v22584_v57  ;;  %v5872_v41 = vadd.f32 %v20413_v58, %v22586_v37 }
 0x5c1   : > { %v6149_v62 = vpop.f32.mrf.mxu0  ;;  %v5873_v37 = vadd.f32 %v20413_v58, %v22590_v5 }
 0x5c2   : > { %v6036_v7 = vpop.f32.mrf.mxu1 }
 0x5c3   : > { %v18461_v25 = vpop.f32.mrf.mxu0  ;;  %v6150_v40 = vadd.f32 %v6149_v62, %v6036_v7 }
 0x5c4   : > { %v18437_v10 = vpop.f32.mrf.mxu1 }
 0x5c5   : > { %v6152_v26 = vpop.f32.mrf.mxu0 }
 0x5c6   : > { %v6039_v54 = vpop.f32.mrf.mxu1 }
 0x5d7   : > { %v22606_v22 = vpop.f32.mrf.mxu0 }
 0x5d8   : > { %v18480_v8 = vpop.f32.mrf.mxu1 }
 0x5d9   : > { %v22610_v6 = vpop.f32.mrf.mxu0 }
 0x5da   : > { %v22608_v43 = vpop.f32.mrf.mxu1 }
 0x5db   : > { %25226 = vst [vmem:[#allocation13_spill] sm:$0xff] %v22608_v43  ;;  %v22612_v35 = vpop.f32.mrf.mxu0 }
 0x5dc   : > { %v18481_v24 = vpop.f32.mrf.mxu1 }
 0x5dd   : > { %v22616_v55 = vpop.f32.mrf.mxu0 }
 0x5de   : > { %v22614_v42 = vpop.f32.mrf.mxu1 }
 0x5df   : > { %25227 = vst [vmem:[#allocation14_spill] sm:$0xff] %v22614_v42  ;;  %v22618_v56 = vpop.f32.mrf.mxu0  ;;  %v20414_v42 = vld [vmem:[#allocation4 + $0x10] sm:$0xff] }
 0x5e0   : > { %v22620_v13 = vpop.f32.mrf.mxu1 }
 0x5e1   : > { %v22622_v32 = vpop.f32.mrf.mxu0 }
 0x5e2   : > { %v22624_v63 = vpop.f32.mrf.mxu1 }
 0x5e3   : > { %v22626_v50 = vpop.f32.mrf.mxu0 }
 0x5e4   : > { %v22628_v31 = vpop.f32.mrf.mxu1 }
 0x5e5   : > { %v22630_v61 = vpop.f32.mrf.mxu0 }
 0x5e6   : > { %v22632_v36 = vpop.f32.mrf.mxu1 }
 0x5f7   : > { %v18552_v16 = vpop.f32.mrf.mxu0 }
 0x5f8   : > { %v22634_v21 = vpop.f32.mrf.mxu1  ;;  %v6706_v19 = vadd.f32 %v18552_v16, %v6142_v46  ;;  %v6161_v16 = vadd.f32 %v18461_v25, %v18437_v10  ;;  %v5869_v46 = vadd.f32 %v20413_v58, %v22577_v49  ;;  %v6134_v10 = vadd.f32 %v22604_v34, %v22602_v23 }
 0x5f9   : > { %v6673_v4 = vpop.f32.mrf.mxu0  ;;  %v5871_v23 = vadd.f32 %v20413_v58, %v22598_v29 }
 0x5fa   : > { %v22636_v1 = vpop.f32.mrf.mxu1  ;;  %v6988_v51 = vrot.slane %v6706_v19, 7  ;;  %v6153_v19 = vadd.f32 %v6152_v26, %v6039_v54  ;;  %v22687_v34 = vadd.f32 %v6673_v4, %v6134_v10 }
 0x5fb   : > { %v18553_v20 = vpop.f32.mrf.mxu0  ;;  %v6513_v29 = vadd.f32 %v22636_v1, %v22610_v6 }
 0x5fc   : > { %v22638_v60 = vpop.f32.mrf.mxu1  ;;  %v22648_v48 = vadd.f32 %v18553_v20, %v6145_v17  ;;  %v6295_v20 = vadd.f32 %v18480_v8, %v5868_v53  ;;  %v6158_v17 = vadd.f32 %v18460_v2, %v18436_v39  ;;  %v6296_v2 = vadd.f32 %v18481_v24, %v5869_v46  ;;  %v20415_v24 = vld [vmem:[#allocation4 + $0x18] sm:$0xff] }
 0x5fd   : > { %v6676_v11 = vpop.f32.mrf.mxu0  ;;  %v5870_v8 = vadd.f32 %v20413_v58, %v22588_v30  ;;  %v6298_v30 = vadd.f32 %v22632_v36, %v5871_v23  ;;  %v6524_v6 = vadd.f32 %v22638_v60, %v22612_v35 }
 0x5fe   : > { %v22640_v33 = vpop.f32.mrf.mxu1  ;;  %v22644_v14 = vadd.f32 %v6676_v11, %v6137_v38  ;;  %v25230_v57 = vrot.slane %v22648_v48, 7 }
 0x5ff   : > { %v18556_v59 = vpop.f32.mrf.mxu0  ;;  %v6516_v1 = vadd.f32 %v22640_v33, %v22616_v55 }
 0x600   : > { %v22642_v0 = vpop.f32.mrf.mxu1  ;;  %25228 = vst [vmem:[#allocation15_spill] sm:$0xff] %v22644_v14  ;;  %v25195_v9 = vrot.slane %v22644_v14, 7  ;;  %v6998_v39 = vsel %vm1837_vm1, %v6988_v51, %v25230_v57  ;;  %v6710_v7 = vadd.f32 %v18556_v59, %v6158_v17  ;;  %v25231_v33 = vmov %v25230_v57 }
 0x601   : > { %v6689_v44 = vpop.f32.mrf.mxu0  ;;  %v7005_v59 = vmul.f32 %v20415_v24, %v6998_v39  ;;  %v20417_v39 = vld [vmem:[#allocation4 + $0x30] sm:$0xff] }
 0x602   : > { %v22646_v15 = vpop.f32.mrf.mxu1  ;;  %v6999_v3 = vsel %vm1837_vm1, %v25195_v9, %v6988_v51  ;;  %v6708_v62 = vadd.f32 %v6689_v44, %v6150_v40  ;;  %v6297_v44 = vadd.f32 %v22624_v63, %v5870_v8  ;;  %v6992_v4 = vrot.slane %v6710_v7, 7 }
 0x603   : > { %v18557_v27 = vpop.f32.mrf.mxu0  ;;  %v7004_v9 = vmul.f32 %v20414_v42, %v6999_v3  ;;  %v6986_v63 = vrot.slane %v22687_v34, 7  ;;  %v6529_v36 = vadd.f32 %v22646_v15, %v22622_v32 }
 0x604   : > { %v22651_v52 = vpop.f32.mrf.mxu1  ;;  %v22671_v43 = vadd.f32 %v18557_v27, %v6161_v16  ;;  %v6299_v27 = vadd.f32 %v22620_v13, %v5872_v41  ;;  %v6990_v13 = vrot.slane %v6708_v62, 7 }
 0x605   : > { %v6692_v45 = vpop.f32.mrf.mxu0 }
 0x606   : > { %v22658_v11 = vpop.f32.mrf.mxu1  ;;  %v6709_v25 = vadd.f32 %v6692_v45, %v6153_v19  ;;  %v6993_v53 = vrot.slane %v22671_v43, 7 }
 0x607   : > { %25229 = vst [vmem:[#allocation16_spill] sm:$0xff] %v22658_v11 }
 0x608   : > { %v6991_v5 = vrot.slane %v6709_v25, 7 }
 0x60a   : > { %v6995_v32 = vsel %vm1837_vm1, %v6991_v5, %v6992_v4  ;;  %v6996_v25 = vsel %vm1837_vm1, %v6990_v13, %v6991_v5 }
 0x60e   : > { %v25232_v17 = vld [vmem:[#allocation16_spill] sm:$0xff] }
 0x60f   : > { %v6532_v19 = vadd.f32 %v25232_v17, %v22630_v61  ;;  %v20424_v17 = vld [vmem:[#allocation4 + $0x58] sm:$0xff] }
 0x617   : > { %v18600_v38 = vpop.f32.mrf.mxu0 }
 0x618   : > { %v18576_v12 = vpop.f32.mrf.mxu1 }
 0x619   : > { %v6843_v14 = vadd.f32 %v18576_v12, %v6295_v20  ;;  %v6947_v11 = vpop.f32.mrf.mxu0  ;;  %v6521_v12 = vadd.f32 %v22634_v21, %v22606_v22  ;;  %v6994_v22 = vsel %vm1837_vm1, %v6992_v4, %v6993_v53 }
 0x61a   : > { %v22676_v49 = vpop.f32.mrf.mxu1  ;;  %v22711_v16 = vadd.f32 %v6947_v11, %v6513_v29  ;;  %v6997_v11 = vsel %vm1837_vm1, %v25231_v33, %v6990_v13  ;;  %v20419_v13 = vld [vmem:[#allocation4 + $0x70] sm:$0xff] }
 0x61b   : > { %v22682_v54 = vadd.f32 %v7004_v9, %v6843_v14  ;;  %v18601_v26 = vpop.f32.mrf.mxu0  ;;  %v6300_v14 = vadd.f32 %v22628_v31, %v5873_v37  ;;  %v6537_v31 = vadd.f32 %v22642_v0, %v22618_v56  ;;  %v6540_v56 = vadd.f32 %v22651_v52, %v22626_v50  ;;  %v20416_v52 = vld [vmem:[#allocation4 + $0x38] sm:$0xff] }
 0x61c   : > { %v18577_v42 = vpop.f32.mrf.mxu1  ;;  %v6980_v60 = vadd.f32 %v18600_v38, %v6521_v12  ;;  %v6981_v15 = vadd.f32 %v18601_v26, %v6524_v6  ;;  %v7009_v50 = vmul.f32 %v20416_v52, %v6994_v22  ;;  %v7018_v38 = vrot.slane %v22711_v16, 1  ;;  %v20420_v12 = vld [vmem:[#allocation4 + $0x78] sm:$0xff]  ;;  %v20421_v16 = vld [vmem:[#allocation4 + $0x20] sm:$0xff] }
 0x61d   : > { %v6844_v51 = vadd.f32 %v18577_v42, %v6296_v2  ;;  %v6950_v40 = vpop.f32.mrf.mxu0  ;;  %v7008_v2 = vmul.f32 %v20417_v39, %v6995_v32  ;;  %v25233_v32 = vld [vmem:[#allocation14_spill] sm:$0xff] }
 0x61e   : > { %v22694_v9 = vpop.f32.mrf.mxu1  ;;  %v6979_v57 = vadd.f32 %v6950_v40, %v6516_v1  ;;  %v7020_v61 = vrot.slane %v6980_v60, 1  ;;  %v7021_v42 = vrot.slane %v6981_v15, 1  ;;  %v20423_v60 = vld [vmem:[#allocation4 + $0x68] sm:$0xff] }
 0x61f   : > { %v22698_v58 = vadd.f32 %v7005_v59, %v6844_v51  ;;  %v18604_v45 = vpop.f32.mrf.mxu0  ;;  %v20418_v51 = vld [vmem:[#allocation4 + $0x28] sm:$0xff] }
 0x620   : > { %v18580_v3 = vpop.f32.mrf.mxu1  ;;  %v6984_v21 = vadd.f32 %v18604_v45, %v6537_v31  ;;  %v7007_v24 = vmul.f32 %v20418_v51, %v6996_v25 }
 0x621   : > { %v6963_v20 = vpop.f32.mrf.mxu0  ;;  %v6847_v55 = vadd.f32 %v18580_v3, %v6299_v27 }
 0x622   : > { %v6826_v0 = vpop.f32.mrf.mxu1  ;;  %v6982_v35 = vadd.f32 %v6963_v20, %v6529_v36  ;;  %v7024_v62 = vrot.slane %v6984_v21, 1  ;;  %v7019_v36 = vrot.slane %v6979_v57, 1  ;;  %v7006_v20 = vmul.f32 %v20421_v16, %v6997_v11  ;;  %v20425_v57 = vld [vmem:[#allocation4 + $0x50] sm:$0xff]  ;;  %v19953_v16 = vld [vmem:[%s25168_s1 + $0x288] sm:$0xff]  }
 0x623   : > { %v18605_v46 = vpop.f32.mrf.mxu0  ;;  %v7016_v27 = vadd.f32 %v7008_v2, %v6847_v55  ;;  %v6294_v21 = vadd.f32 %v25233_v32, %v22669_v28  ;;  %v25234_v55 = vld [vmem:[#allocation15_spill] sm:$0xff]  ;;  %v25236_v28 = vld [vmem:[#allocation13_spill] sm:$0xff]  ;;  %v22902_v32 = vld [vmem:[#allocation2 + $0x8] sm:$0xff]  }
 0x624   : > { %v18581_v41 = vpop.f32.mrf.mxu1  ;;  %v6985_v10 = vadd.f32 %v18605_v46, %v6540_v56  ;;  %v7022_v26 = vrot.slane %v6982_v35, 1  ;;  %v25235_v33 = vrot.slane %v25234_v55, 7  ;;  %v6293_v52 = vadd.f32 %v25236_v28, %v22665_v47  ;;  %v20426_v47 = vld [vmem:[#allocation4 + $0x8] sm:$0xff]  ;;  %v19964_v55 = vld [vmem:[%s25168_s1 + $0x308] sm:$0xff]   ;;  %v19971_v28 = vld [vmem:[%s25168_s1 + $0x370] sm:$0xff]  }
 0x625   : > { %v6848_v48 = vadd.f32 %v18581_v41, %v6300_v14  ;;  %v6966_v7 = vpop.f32.mrf.mxu0  ;;  %v6845_v14 = vadd.f32 %v6826_v0, %v6297_v44  ;;  %v20422_v44 = vld [vmem:[#allocation4 + $0x60] sm:$0xff]  ;;  %v7030_v0 = vsel %vm1870_vm2, %v7020_v61, %v7021_v42  ;;  %v6842_v2 = vadd.f32 %v22694_v9, %v6294_v21  ;;  %v25239_v21 = vld [vmem:[#allocation12_spill] sm:$0xff] }
 0x626   : > { %v7025_v8 = vrot.slane %v6985_v10, 1  ;;  %v6829_v37 = vpop.f32.mrf.mxu1  ;;  %v6983_v23 = vadd.f32 %v6966_v7, %v6532_v19  ;;  %v7029_v3 = vsel %vm1870_vm2, %v7021_v42, %v7022_v26  ;;  %v7000_v11 = vsel %vm1837_vm1, %v6986_v63, %v25235_v33  ;;  %v19965_v33 = vld [vmem:[%s25168_s1 + $0x300] sm:$0xff]  }
 0x627   : > { %v6846_v5 = vadd.f32 %v6829_v37, %v6298_v30  ;;  %v7017_v4 = vadd.f32 %v7009_v50, %v6848_v48  ;;  %v7014_v46 = vadd.f32 %v7006_v20, %v6845_v14  ;;  %v7037_v19 = vmul.f32 %v20424_v17, %v7029_v3  ;;  %v15413_v14 = vld [vmem:[%s25173_s6 + $0x28] sm:$0xff]  ;;  %v15409_v3 = vld [vmem:[%s25173_s6 + $0x18] sm:$0xff]  ;;  %v19954_v20 = vld [vmem:[%s25168_s1 + $0x280] sm:$0xff]  }
 0x628   : > { %v7026_v59 = vsel %vm1870_vm2, %v7024_v62, %v7025_v8  ;;  %v7033_v40 = vsel %vm1870_vm2, %v7025_v8, %v7018_v38  ;;  %v7023_v29 = vrot.slane %v6983_v23, 1  ;;  %v7001_v50 = vsel %vm1837_vm1, %v6993_v53, %v6986_v63  ;;  %v20427_v63 = vld [vmem:[#allocation4 + $0x48] sm:$0xff]  ;;  %v20428_v8 = vld [vmem:[#allocation4] sm:$0xff] }
 0x629   : > { %v7040_v45 = vmul.f32 %v20419_v13, %v7026_v59  ;;  %v7041_v31 = vmul.f32 %v20420_v12, %v7033_v40  ;;  %v7015_v35 = vadd.f32 %v7007_v24, %v6846_v5  ;;  %v7031_v10 = vsel %vm1870_vm2, %v7019_v36, %v7020_v61  ;;  %v7059_v5 = vld [vmem:[%s25173_s6 + $0x8] sm:$0xff]  ;;  %v15408_v13 = vld [vmem:[%s25173_s6 + $0x10] sm:$0xff]  ;;  %v19968_v17 = vld [vmem:[%s25168_s1 + $0x278] sm:$0xff]  }
 0x62a   : > { %v7027_v6 = vsel %vm1870_vm2, %v7023_v29, %v7024_v62  ;;  %v7028_v1 = vsel %vm1870_vm2, %v7022_v26, %v7023_v29  ;;  %v7036_v39 = vmul.f32 %v20425_v57, %v7030_v0  ;;  %v7003_v43 = vmul.f32 %v20426_v47, %v7000_v11  ;;  %v19946_v29 = vld [vmem:[%s25168_s1 + $0x2b8] sm:$0xff]   ;;  %v19949_v12 = vld [vmem:[%s25168_s1 + $0x2a8] sm:$0xff]  }
 0x62b   : > { %v7048_v30 = vadd.f32 %v7040_v45, %v7016_v27  ;;  %v7049_v22 = vadd.f32 %v7041_v31, %v7017_v4  ;;  %v7038_v56 = vmul.f32 %v20422_v44, %v7028_v1  ;;  %v7039_v15 = vmul.f32 %v20423_v60, %v7027_v6  ;;  %v19948_v4 = vld [vmem:[%s25168_s1 + $0x2b0] sm:$0xff]   ;;  %v25237_v45 = vld [vmem:[#allocation8_spill] sm:$0xff]  ;;  %v19950_v31 = vld [vmem:[%s25168_s1 + $0x2a0] sm:$0xff]  }
 0x62c   : > { %v7032_v34 = vsel %vm1870_vm2, %v7018_v38, %v7019_v36  ;;  %v6841_v53 = vadd.f32 %v22676_v49, %v6293_v52  ;;  %v7035_v9 = vmul.f32 %v20427_v63, %v7031_v10  ;;  %v7045_v62 = vadd.f32 %v7037_v19, %v22698_v58  ;;  %v20429_v49 = vld [vmem:[#allocation4 + $0x40] sm:$0xff]  ;;  %v19951_v36 = vld [vmem:[%s25168_s1 + $0x298] sm:$0xff]   ;;  %v19960_v0 = vld [vmem:[%s25168_s1 + $0x328] sm:$0xff]  }
 0x62d   : > { %v22750_v41 = vmax.f32 %v7049_v22, 0.0  ;;  %v7047_v25 = vadd.f32 %v7039_v15, %v7015_v35  ;;  %v22763_v48 = vmax.f32 %v7048_v30, 0.0  ;;  %v7046_v7 = vadd.f32 %v7038_v56, %v7014_v46  ;;  %v19952_v6 = vld [vmem:[%s25168_s1 + $0x290] sm:$0xff]   ;;  %v15417_v30 = vld [vmem:[%s25173_s6 + $0x38] sm:$0xff]  ;;  %v25238_v56 = vld [vmem:[#allocation10_spill] sm:$0xff] }
 0x62e   : > { %v7002_v37 = vmul.f32 %v20428_v8, %v7001_v50  ;;  %v7044_v38 = vadd.f32 %v7036_v39, %v22682_v54  ;;  %v7011_v23 = vadd.f32 %v7003_v43, %v6842_v2  ;;  %v7034_v61 = vmul.f32 %v20429_v49, %v7032_v34  ;;  %v15416_v1 = vld [vmem:[%s25173_s6 + $0x30] sm:$0xff]  ;;  %v19956_v22 = vld [vmem:[%s25168_s1 + $0x338] sm:$0xff]   ;;  %v19961_v35 = vld [vmem:[%s25168_s1 + $0x320] sm:$0xff]  }
 0x62f   : > { %18606 = vmatprep.subr.mxu1 %v22750_v41  ;;  %18644 = vmatprep.subr.mxu0 %v22750_v41  ;;  %v22773_v26 = vmax.f32 %v7047_v25, 0.0  ;;  %v22780_v42 = vmax.f32 %v7046_v7, 0.0  ;;  %v22786_v51 = vmax.f32 %v7045_v62, 0.0  ;;  %v19959_v44 = vld [vmem:[%s25168_s1 + $0x330] sm:$0xff]   ;;  %v19962_v60 = vld [vmem:[%s25168_s1 + $0x318] sm:$0xff]   ;;  %v25240_v46 = vld [vmem:[#allocation9_spill] sm:$0xff] }
 0x630   : > { %18607 = vmatpush3.msra.mxu1 %v22750_v41  ;;  %18645 = vmatpush3.msra.mxu0 %v22750_v41  ;;  %v7010_v58 = vadd.f32 %v7002_v37, %v6841_v53  ;;  %v7043_v27 = vadd.f32 %v7035_v9, %v7011_v23  ;;  %v22792_v54 = vmax.f32 %v7044_v38, 0.0  ;;  %v19963_v15 = vld [vmem:[%s25168_s1 + $0x310] sm:$0xff]   ;;  %v22924_v11 = vld [vmem:[#allocation2 + $0x18] sm:$0xff]   ;;  %v19972_v52 = vld [vmem:[%s25168_s1 + $0x268] sm:$0xff]  }
 0x631   : > { %18608 = vmatprep.subr.mxu1 %v22763_v48  ;;  %18646 = vmatprep.subr.mxu0 %v22763_v48  ;;  %v19969_v19 = vld [vmem:[%s25168_s1 + $0x378] sm:$0xff]   ;;  %v19973_v50 = vld [vmem:[%s25168_s1 + $0x368] sm:$0xff]   ;;  %v19974_v10 = vld [vmem:[%s25168_s1 + $0x260] sm:$0xff]  }
 0x632   : > { %18609 = vmatpush3.msra.mxu1 %v22763_v48  ;;  %18647 = vmatpush3.msra.mxu0 %v22763_v48  ;;  %v7042_v24 = vadd.f32 %v7034_v61, %v7010_v58  ;;  %v22798_v59 = vmax.f32 %v7043_v27, 0.0  ;;  %v19975_v25 = vld [vmem:[%s25168_s1 + $0x360] sm:$0xff]   ;;  %v19976_v57 = vld [vmem:[%s25168_s1 + $0x258] sm:$0xff]   ;;  %v19978_v2 = vld [vmem:[%s25168_s1 + $0x250] sm:$0xff]  }
 0x633   : > { %18610 = vmatprep.subr.mxu1 %v22773_v26  ;;  %18648 = vmatprep.subr.mxu0 %v22773_v26  ;;  %v19977_v39 = vld [vmem:[%s25168_s1 + $0x358] sm:$0xff]   ;;  %v19980_v7 = vld [vmem:[%s25168_s1 + $0x248] sm:$0xff]   ;;  %v19984_v43 = vld [vmem:[%s25168_s1 + $0x240] sm:$0xff]  }
 0x634   : > { %18611 = vmatpush3.msra.mxu1 %v22773_v26  ;;  %18649 = vmatpush3.msra.mxu0 %v22773_v26  ;;  %v22804_v40 = vmax.f32 %v7042_v24, 0.0  ;;  %v19981_v47 = vld [vmem:[%s25168_s1 + $0x348] sm:$0xff]   ;;  %v19985_v34 = vld [vmem:[%s25168_s1 + $0x340] sm:$0xff]   ;;  %v19986_v53 = vld [vmem:[%s25168_s1 + $0x3b8] sm:$0xff]  }
 0x635   : > { %18612 = vmatprep.subr.mxu1 %v22780_v42  ;;  %18650 = vmatprep.subr.mxu0 %v22780_v42  ;;  %v19987_v63 = vld [vmem:[%s25168_s1 + $0x2f8] sm:$0xff]  }
 0x636   : > { %18613 = vmatpush3.msra.mxu1 %v22780_v42  ;;  %18651 = vmatpush3.msra.mxu0 %v22780_v42 }
 0x637   : > { %18614 = vmatprep.subr.mxu1 %v22786_v51  ;;  %18652 = vmatprep.subr.mxu0 %v22786_v51 }
 0x638   : > { %18615 = vmatpush3.msra.mxu1 %v22786_v51  ;;  %18653 = vmatpush3.msra.mxu0 %v22786_v51 }
 0x639   : > { %18616 = vmatprep.subr.mxu1 %v22792_v54  ;;  %18654 = vmatprep.subr.mxu0 %v22792_v54 }
 0x63a   : > { %18617 = vmatpush3.msra.mxu1 %v22792_v54  ;;  %18655 = vmatpush3.msra.mxu0 %v22792_v54 }
 0x63b   : > { %18618 = vmatprep.subr.mxu1 %v22798_v59  ;;  %18656 = vmatprep.subr.mxu0 %v22798_v59 }
 0x63c   : > { %18619 = vmatpush3.msra.mxu1 %v22798_v59  ;;  %18657 = vmatpush3.msra.mxu0 %v22798_v59 }
 0x63d   : > { %18620 = vmatprep.subr.mxu1 %v22804_v40  ;;  %18658 = vmatprep.subr.mxu0 %v22804_v40 }
 0x63e   : > { %18621 = vmatpush3.msra.mxu1 %v22804_v40  ;;  %18659 = vmatpush3.msra.mxu0 %v22804_v40 }
 0x63f   : > { %18623 = vmatmul.mubr.msk.f32.vlgmr.msra.gmra.mxu1 %vm1905_vm0, %v7059_v5  ;;  %18625 = vmatprep.subr.mxu1 %v22750_v41 }
 0x640   : > { %18661 = vmatmul.mubr.msk.f32.vlgmr.msra.gmra.mxu0 %vm1905_vm0, %v15413_v14  ;;  %18682 = vmatprep.subr.bf16.mxu0 %v19946_v29  ;;  %v19989_v14 = vld [vmem:[%s25168_s1 + $0x2f0] sm:$0xff]  }
 0x641   : > { %18626 = vmatpush3.msra.mxu1 %v22750_v41  ;;  %18683 = vmatpush3.bf16.msra.mxu0 %v19946_v29  ;;  %v19988_v29 = vld [vmem:[%s25168_s1 + $0x3b0] sm:$0xff]  }
 0x642   : > { %18698 = vmatprep.mubr.bf16.mxu0 %v25237_v45  ;;  %18627 = vmatprep.subr.mxu1 %v22763_v48 }
 0x643   : > { %18628 = vmatpush3.msra.mxu1 %v22763_v48  ;;  %18684 = vmatprep.subr.bf16.mxu0 %v19948_v4 }
 0x644   : > { %18629 = vmatprep.subr.mxu1 %v22773_v26  ;;  %18641 = vmatprep.mubr.msk.f32.mxu1 %vm1905_vm0, %v15408_v13  ;;  %v19991_v13 = vld [vmem:[%s25168_s1 + $0x2e8] sm:$0xff]  }
 0x645   : > { %18630 = vmatpush3.msra.mxu1 %v22773_v26  ;;  %18685 = vmatpush3.bf16.msra.mxu0 %v19948_v4  ;;  %v19990_v4 = vld [vmem:[%s25168_s1 + $0x3a8] sm:$0xff]  }
 0x646   : > { %18631 = vmatprep.subr.mxu1 %v22780_v42  ;;  %18686 = vmatprep.subr.bf16.mxu0 %v19949_v12 }
 0x647   : > { %18632 = vmatpush3.msra.mxu1 %v22780_v42 }
 0x648   : > { %18633 = vmatprep.subr.mxu1 %v22786_v51 }
 0x649   : > { %18634 = vmatpush3.msra.mxu1 %v22786_v51  ;;  %18687 = vmatpush3.bf16.msra.mxu0 %v19949_v12  ;;  %v19992_v12 = vld [vmem:[%s25168_s1 + $0x3a0] sm:$0xff]  }
 0x64a   : > { %18635 = vmatprep.subr.mxu1 %v22792_v54  ;;  %18688 = vmatprep.subr.bf16.mxu0 %v19950_v31 }
 0x64b   : > { %18636 = vmatpush3.msra.mxu1 %v22792_v54 }
 0x64c   : > { %18637 = vmatprep.subr.mxu1 %v22798_v59 }
 0x64d   : > { %18638 = vmatpush3.msra.mxu1 %v22798_v59  ;;  %18689 = vmatpush3.bf16.msra.mxu0 %v19950_v31  ;;  %v19993_v31 = vld [vmem:[%s25168_s1 + $0x2e0] sm:$0xff]  }
 0x64e   : > { %18639 = vmatprep.subr.mxu1 %v22804_v40  ;;  %18690 = vmatprep.subr.bf16.mxu0 %v19951_v36 }
 0x64f   : > { %18640 = vmatpush3.msra.mxu1 %v22804_v40 }
 0x650   : > { %18642 = vmatmul.mubr.msk.f32.vlgmr.msra.gmra.mxu1 %vm1905_vm0, %v15409_v3  ;;  %18663 = vmatprep.subr.mxu1 %v22750_v41  ;;  %v19995_v3 = vld [vmem:[%s25168_s1 + $0x2d8] sm:$0xff]  }
 0x651   : > { %18664 = vmatpush3.msra.mxu1 %v22750_v41  ;;  %18691 = vmatpush3.bf16.msra.mxu0 %v19951_v36  ;;  %v19970_v41 = vld [vmem:[%s25168_s1 + $0x270] sm:$0xff]   ;;  %v19994_v36 = vld [vmem:[%s25168_s1 + $0x398] sm:$0xff]  }
 0x652   : > { %18665 = vmatprep.subr.mxu1 %v22763_v48  ;;  %18692 = vmatprep.subr.bf16.mxu0 %v19952_v6 }
 0x653   : > { %18666 = vmatpush3.msra.mxu1 %v22763_v48  ;;  %18679 = vmatprep.mubr.msk.f32.mxu1 %vm1905_vm0, %v15416_v1  ;;  %v19979_v48 = vld [vmem:[%s25168_s1 + $0x350] sm:$0xff]  }
 0x654   : > { %18667 = vmatprep.subr.mxu1 %v22773_v26  ;;  %v19997_v1 = vld [vmem:[%s25168_s1 + $0x2d0] sm:$0xff]  }
 0x655   : > { %18668 = vmatpush3.msra.mxu1 %v22773_v26  ;;  %18693 = vmatpush3.bf16.msra.mxu0 %v19952_v6  ;;  %v19996_v6 = vld [vmem:[%s25168_s1 + $0x390] sm:$0xff]  }
 0x656   : > { %18669 = vmatprep.subr.mxu1 %v22780_v42  ;;  %18694 = vmatprep.subr.bf16.mxu0 %v19953_v16 }
 0x657   : > { %18670 = vmatpush3.msra.mxu1 %v22780_v42 }
 0x658   : > { %18671 = vmatprep.subr.mxu1 %v22786_v51 }
 0x659   : > { %18672 = vmatpush3.msra.mxu1 %v22786_v51  ;;  %18695 = vmatpush3.bf16.msra.mxu0 %v19953_v16  ;;  %v19999_v16 = vld [vmem:[%s25168_s1 + $0x2c8] sm:$0xff]  }
 0x65a   : > { %18673 = vmatprep.subr.mxu1 %v22792_v54  ;;  %18696 = vmatprep.subr.bf16.mxu0 %v19954_v20 }
 0x65b   : > { %18674 = vmatpush3.msra.mxu1 %v22792_v54 }
 0x65c   : > { %18675 = vmatprep.subr.mxu1 %v22798_v59 }
 0x65d   : > { %18676 = vmatpush3.msra.mxu1 %v22798_v59  ;;  %18697 = vmatpush3.bf16.msra.mxu0 %v19954_v20  ;;  %v20000_v20 = vld [vmem:[%s25168_s1 + $0x380] sm:$0xff]  }
 0x65e   : > { %18677 = vmatprep.subr.mxu1 %v22804_v40  ;;  %18730 = vmatprep.subr.bf16.mxu0 %v19968_v17 }
 0x65f   : > { %18678 = vmatpush3.msra.mxu1 %v22804_v40 }
 0x660   : > { %18680 = vmatmul.mubr.msk.f32.vlgmr.msra.gmra.mxu1 %vm1905_vm0, %v15417_v30  ;;  %18699 = vmatmul.mubr.bf16.vlgmr.msra.gmra.mxu0 %v25238_v56  ;;  %v20001_v30 = vld [vmem:[%s25168_s1 + $0x2c0] sm:$0xff]  }
 0x661   : > { %18706 = vmatprep.subr.bf16.mxu1 %v19956_v22  ;;  %18702 = vmatprep.mubr.bf16.mxu0 %v25239_v21 }
 0x662   : > { %18707 = vmatpush3.bf16.msra.mxu1 %v19956_v22  ;;  %18722 = vmatprep.mubr.bf16.mxu1 %v22902_v32  ;;  %v20002_v22 = vld [vmem:[%s25168_s1 + $0x3f8] sm:$0xff]  }
 0x663   : > { %18708 = vmatprep.subr.bf16.mxu1 %v19959_v44  ;;  %18731 = vmatpush3.bf16.msra.mxu0 %v19968_v17  ;;  %v20015_v17 = vld [vmem:[%s25168_s1 + $0x3c8] sm:$0xff]  }
 0x664   : > { %18732 = vmatprep.subr.bf16.mxu0 %v19970_v41 }
 0x666   : > { %18709 = vmatpush3.bf16.msra.mxu1 %v19959_v44  ;;  %v20003_v44 = vld [vmem:[%s25168_s1 + $0x438] sm:$0xff]  }
 0x667   : > { %18710 = vmatprep.subr.bf16.mxu1 %v19960_v0  ;;  %18733 = vmatpush3.bf16.msra.mxu0 %v19970_v41  ;;  %v20017_v41 = vld [vmem:[%s25168_s1 + $0x3c0] sm:$0xff]  }
 0x668   : > { %18734 = vmatprep.subr.bf16.mxu0 %v19972_v52 }
 0x66a   : > { %18711 = vmatpush3.bf16.msra.mxu1 %v19960_v0  ;;  %v20005_v0 = vld [vmem:[%s25168_s1 + $0x430] sm:$0xff]  }
 0x66b   : > { %18712 = vmatprep.subr.bf16.mxu1 %v19961_v35  ;;  %18735 = vmatpush3.bf16.msra.mxu0 %v19972_v52  ;;  %v20020_v52 = vld [vmem:[%s25168_s1 + $0x478] sm:$0xff]  }
 0x66c   : > { %18736 = vmatprep.subr.bf16.mxu0 %v19974_v10 }
 0x66e   : > { %18713 = vmatpush3.bf16.msra.mxu1 %v19961_v35  ;;  %v20006_v35 = vld [vmem:[%s25168_s1 + $0x3e8] sm:$0xff]  }
 0x66f   : > { %18714 = vmatprep.subr.bf16.mxu1 %v19962_v60  ;;  %18737 = vmatpush3.bf16.msra.mxu0 %v19974_v10  ;;  %v20022_v10 = vld [vmem:[%s25168_s1 + $0x470] sm:$0xff]  }
 0x670   : > { %18738 = vmatprep.subr.bf16.mxu0 %v19976_v57 }
 0x672   : > { %18715 = vmatpush3.bf16.msra.mxu1 %v19962_v60  ;;  %v20007_v60 = vld [vmem:[%s25168_s1 + $0x428] sm:$0xff]  }
 0x673   : > { %18716 = vmatprep.subr.bf16.mxu1 %v19963_v15  ;;  %18739 = vmatpush3.bf16.msra.mxu0 %v19976_v57  ;;  %v20024_v57 = vld [vmem:[%s25168_s1 + $0x468] sm:$0xff]  }
 0x674   : > { %18740 = vmatprep.subr.bf16.mxu0 %v19978_v2 }
 0x676   : > { %18717 = vmatpush3.bf16.msra.mxu1 %v19963_v15  ;;  %v25241_v15 = vld [vmem:[#allocation7_spill] sm:$0xff] }
 0x677   : > { %18718 = vmatprep.subr.bf16.mxu1 %v19964_v55  ;;  %18741 = vmatpush3.bf16.msra.mxu0 %v19978_v2  ;;  %v20025_v2 = vld [vmem:[%s25168_s1 + $0x460] sm:$0xff]  }
 0x678   : > { %18742 = vmatprep.subr.bf16.mxu0 %v19980_v7 }
 0x67a   : > { %18719 = vmatpush3.bf16.msra.mxu1 %v19964_v55  ;;  %v20011_v55 = vld [vmem:[%s25168_s1 + $0x3d8] sm:$0xff]  }
 0x67b   : > { %18720 = vmatprep.subr.bf16.mxu1 %v19965_v33  ;;  %18743 = vmatpush3.bf16.msra.mxu0 %v19980_v7  ;;  %v20027_v7 = vld [vmem:[%s25168_s1 + $0x450] sm:$0xff]  }
 0x67c   : > { %18744 = vmatprep.subr.bf16.mxu0 %v19984_v43 }
 0x67e   : > { %18721 = vmatpush3.bf16.msra.mxu1 %v19965_v33  ;;  %v20012_v33 = vld [vmem:[%s25168_s1 + $0x418] sm:$0xff]  }
 0x67f   : > { %18754 = vmatprep.subr.bf16.mxu1 %v19969_v19  ;;  %18745 = vmatpush3.bf16.msra.mxu0 %v19984_v43  ;;  %v20029_v43 = vld [vmem:[%s25168_s1 + $0x440] sm:$0xff]  }
 0x680   : > { %18778 = vmatprep.subr.bf16.mxu0 %v19986_v53 }
 0x681   : > { %18723 = vmatmul.mubr.bf16.vlgmr.msra.gmra.mxu1 %v25240_v46 }
 0x682   : > { %18726 = vmatprep.mubr.bf16.mxu1 %v22924_v11  ;;  %18755 = vmatpush3.bf16.msra.mxu1 %v19969_v19  ;;  %v20016_v19 = vld [vmem:[%s25168_s1 + $0x408] sm:$0xff]  }
 0x683   : > { %18756 = vmatprep.subr.bf16.mxu1 %v19971_v28 }
 0x686   : > { %18757 = vmatpush3.bf16.msra.mxu1 %v19971_v28  ;;  %v20018_v28 = vld [vmem:[%s25168_s1 + $0x400] sm:$0xff]  }
 0x687   : > { %18758 = vmatprep.subr.bf16.mxu1 %v19973_v50 }
 0x68a   : > { %18759 = vmatpush3.bf16.msra.mxu1 %v19973_v50 }
 0x68b   : > { %18760 = vmatprep.subr.bf16.mxu1 %v19975_v25 }
 0x68e   : > { %18761 = vmatpush3.bf16.msra.mxu1 %v19975_v25  ;;  %v25242_v25 = vld [vmem:[#allocation11_spill] sm:$0xff] }
 0x68f   : > { %18762 = vmatprep.subr.bf16.mxu1 %v19977_v39 }
 0x692   : > { %18763 = vmatpush3.bf16.msra.mxu1 %v19977_v39 }
 0x693   : > { %18764 = vmatprep.subr.bf16.mxu1 %v19979_v48 }
 0x696   : > { %18765 = vmatpush3.bf16.msra.mxu1 %v19979_v48  ;;  %v20026_v48 = vld [vmem:[%s25168_s1 + $0x458] sm:$0xff]  }
 0x697   : > { %18766 = vmatprep.subr.bf16.mxu1 %v19981_v47 }
 0x69a   : > { %18767 = vmatpush3.bf16.msra.mxu1 %v19981_v47  ;;  %v20028_v47 = vld [vmem:[%s25168_s1 + $0x448] sm:$0xff]  }
 0x69b   : > { %18768 = vmatprep.subr.bf16.mxu1 %v19985_v34 }
 0x69e   : > { %18769 = vmatpush3.bf16.msra.mxu1 %v19985_v34 }
 0x69f   : > { %18802 = vmatprep.subr.bf16.mxu1 %v19987_v63 }
 0x6ff   : > { %v18624_v9 = vpop.f32.mrf.mxu1 }
 0x700   : > { %v18662_v37 = vpop.f32.mrf.mxu0 }
 0x701   : > { %v7132_v62 = vpop.f32.mrf.mxu1 }
 0x702   : > { %v7300_v49 = vpop.f32.mrf.mxu0 }
 0x710   : > { %v18643_v26 = vpop.f32.mrf.mxu1 }
 0x711   : > { %v7225_v38 = vmax.f32 %v18624_v9, %v18643_v26 }
 0x712   : > { %v7215_v8 = vpop.f32.mrf.mxu1 }
 0x713   : > { %v7224_v23 = vmax.f32 %v7132_v62, %v7215_v8  ;;  %v7310_v42 = vmax.f32 %v7225_v38, %v18662_v37 }
 0x715   : > { %v7309_v58 = vmax.f32 %v7224_v23, %v7300_v49 }
 0x720   : > { %v18681_v61 = vpop.f32.mrf.mxu1  ;;  %v23124_v34 = vpop.f32.mrf.mxu0 }
 0x721   : > { %v7395_v51 = vmax.f32 %v7310_v42, %v18681_v61 }
 0x722   : > { %v7385_v27 = vpop.f32.mrf.mxu1 }
 0x723   : > { %v7394_v54 = vmax.f32 %v7309_v58, %v7385_v27 }
 0x725   : > { %v16427_v24 = vpack.c.bf16 %v7395_v51, %v7394_v54 }
 0x727   : > { %16436 = vst [vmem:[#allocation3 + $0x18] sm:$0xff] %v16427_v24  }
 0x72e   : > { %v7416_v59 = vld [vmem:[#allocation3 + $0x18] sm:$0xff]  }
 0x72f   : > { %7424 = vst [vmem:[#allocation2 + $0x20] sm:$0xff] %v7416_v59  }
 0x736   : > { %v22982_v40 = vld [vmem:[#allocation2 + $0x1c] sm:$0xff]   ;;  %v20023_v39 = vld [vmem:[#allocation2 + $0x24] sm:$0xff]  }
 0x737   : > { %v22984_v5 = vld [vmem:[#allocation2 + $0x20] sm:$0xff]   ;;  %18703 = vmatmul.mubr.bf16.gmra.mxu0 %v22982_v40 }
 0x738   : > { %18727 = vmatmul.mubr.bf16.gmra.mxu1 %v22984_v5  ;;  %18746 = vmatprep.mubr.bf16.mxu0 %v25237_v45  ;;  %v20021_v50 = vld [vmem:[#allocation2 + $0x1c] sm:$0xff]  }
 0x739   : > { %18770 = vmatprep.mubr.bf16.mxu1 %v22902_v32 }
 0x73f   : > { %18747 = vmatmul.mubr.bf16.vlgmr.msra.gmra.mxu0 %v25238_v56 }
 0x740   : > { %18771 = vmatmul.mubr.bf16.vlgmr.msra.gmra.mxu1 %v25240_v46  ;;  %18779 = vmatpush3.bf16.msra.mxu0 %v19986_v53 }
 0x741   : > { %18803 = vmatpush3.bf16.msra.mxu1 %v19987_v63  ;;  %18750 = vmatprep.mubr.bf16.mxu0 %v25239_v21  ;;  %v18724_v53 = vpop.f32.mrf.mxu1  ;;  %v23126_v63 = vpop.f32.mrf.mxu0 }
 0x742   : > { %18774 = vmatprep.mubr.bf16.mxu1 %v22924_v11  ;;  %18780 = vmatprep.subr.bf16.mxu0 %v19988_v29 }
 0x743   : > { %18804 = vmatprep.subr.bf16.mxu1 %v19989_v14  ;;  %v23128_v9 = vpop.f32.mrf.mxu1  ;;  %v18701_v62 = vpop.f32.mrf.mxu0 }
 0x744   : > { %18781 = vmatpush3.bf16.msra.mxu0 %v19988_v29 }
 0x745   : > { %18805 = vmatpush3.bf16.msra.mxu1 %v19989_v14  ;;  %18782 = vmatprep.subr.bf16.mxu0 %v19990_v4  ;;  %v18725_v26 = vpop.f32.mrf.mxu1  ;;  %v23130_v8 = vpop.f32.mrf.mxu0 }
 0x746   : > { %18806 = vmatprep.subr.bf16.mxu1 %v19991_v13 }
 0x747   : > { %18751 = vmatmul.mubr.bf16.gmra.mxu0 %v22982_v40  ;;  %v7790_v37 = vpop.f32.mrf.mxu1 }
 0x748   : > { %18775 = vmatmul.mubr.bf16.gmra.mxu1 %v22984_v5  ;;  %18783 = vmatpush3.bf16.msra.mxu0 %v19990_v4 }
 0x749   : > { %18807 = vmatpush3.bf16.msra.mxu1 %v19991_v13  ;;  %18794 = vmatprep.mubr.bf16.mxu0 %v22902_v32  ;;  %v20004_v32 = vld [vmem:[%s25168_s1 + $0x3f0] sm:$0xff]  }
 0x74a   : > { %18818 = vmatprep.mubr.bf16.mxu1 %v25237_v45  ;;  %18784 = vmatprep.subr.bf16.mxu0 %v19992_v12  ;;  %v19998_v45 = vld [vmem:[%s25168_s1 + $0x388] sm:$0xff]  }
 0x74b   : > { %18808 = vmatprep.subr.bf16.mxu1 %v19993_v31 }
 0x74c   : > { %18785 = vmatpush3.bf16.msra.mxu0 %v19992_v12 }
 0x74d   : > { %18809 = vmatpush3.bf16.msra.mxu1 %v19993_v31  ;;  %18786 = vmatprep.subr.bf16.mxu0 %v19994_v36 }
 0x74e   : > { %18810 = vmatprep.subr.bf16.mxu1 %v19995_v3 }
 0x750   : > { %18787 = vmatpush3.bf16.msra.mxu0 %v19994_v36 }
 0x751   : > { %18811 = vmatpush3.bf16.msra.mxu1 %v19995_v3  ;;  %18788 = vmatprep.subr.bf16.mxu0 %v19996_v6 }
 0x752   : > { %18812 = vmatprep.subr.bf16.mxu1 %v19997_v1 }
 0x754   : > { %18789 = vmatpush3.bf16.msra.mxu0 %v19996_v6  ;;  %v15658_v6 = vld [vmem:[%s25174_s7 + $0x20] sm:$0xff] }
 0x755   : > { %18813 = vmatpush3.bf16.msra.mxu1 %v19997_v1  ;;  %18790 = vmatprep.subr.bf16.mxu0 %v19998_v45 }
 0x756   : > { %18814 = vmatprep.subr.bf16.mxu1 %v19999_v16 }
 0x758   : > { %18791 = vmatpush3.bf16.msra.mxu0 %v19998_v45 }
 0x759   : > { %18815 = vmatpush3.bf16.msra.mxu1 %v19999_v16  ;;  %18792 = vmatprep.subr.bf16.mxu0 %v20000_v20 }
 0x75a   : > { %18816 = vmatprep.subr.bf16.mxu1 %v20001_v30 }
 0x75c   : > { %18793 = vmatpush3.bf16.msra.mxu0 %v20000_v20 }
 0x75d   : > { %18817 = vmatpush3.bf16.msra.mxu1 %v20001_v30  ;;  %18826 = vmatprep.subr.bf16.mxu0 %v20002_v22 }
 0x75e   : > { %18850 = vmatprep.subr.bf16.mxu1 %v20003_v44 }
 0x75f   : > { %18795 = vmatmul.mubr.bf16.vlgmr.msra.gmra.mxu0 %v25240_v46  ;;  %v20014_v46 = vld [vmem:[%s25168_s1 + $0x410] sm:$0xff]  }
 0x760   : > { %18819 = vmatmul.mubr.bf16.vlgmr.msra.gmra.mxu1 %v25238_v56  ;;  %18798 = vmatprep.mubr.bf16.mxu0 %v22924_v11  ;;  %v20009_v56 = vld [vmem:[%s25168_s1 + $0x3e0] sm:$0xff]   ;;  %v20013_v11 = vld [vmem:[%s25168_s1 + $0x3d0] sm:$0xff]  }
 0x761   : > { %18822 = vmatprep.mubr.bf16.mxu1 %v25239_v21  ;;  %18827 = vmatpush3.bf16.msra.mxu0 %v20002_v22  ;;  %v20010_v21 = vld [vmem:[%s25168_s1 + $0x420] sm:$0xff]  }
 0x762   : > { %18851 = vmatpush3.bf16.msra.mxu1 %v20003_v44  ;;  %18828 = vmatprep.subr.bf16.mxu0 %v20004_v32 }
 0x763   : > { %18852 = vmatprep.subr.bf16.mxu1 %v20005_v0 }
 0x765   : > { %18829 = vmatpush3.bf16.msra.mxu0 %v20004_v32 }
 0x766   : > { %18853 = vmatpush3.bf16.msra.mxu1 %v20005_v0  ;;  %18830 = vmatprep.subr.bf16.mxu0 %v20006_v35 }
 0x767   : > { %18799 = vmatmul.mubr.bf16.gmra.mxu0 %v22984_v5  ;;  %18854 = vmatprep.subr.bf16.mxu1 %v20007_v60 }
 0x768   : > { %18823 = vmatmul.mubr.bf16.gmra.mxu1 %v22982_v40  ;;  %18842 = vmatprep.mubr.bf16.mxu0 %v25241_v15  ;;  %v8830_v40 = vld [vmem:[%s25174_s7] sm:$0xff] }
 0x769   : > { %18831 = vmatpush3.bf16.msra.mxu0 %v20006_v35  ;;  %18866 = vmatprep.mubr.bf16.mxu1 %v25241_v15 }
 0x76a   : > { %18855 = vmatpush3.bf16.msra.mxu1 %v20007_v60  ;;  %18832 = vmatprep.subr.bf16.mxu0 %v20009_v56 }
 0x76b   : > { %18856 = vmatprep.subr.bf16.mxu1 %v20010_v21 }
 0x76d   : > { %18833 = vmatpush3.bf16.msra.mxu0 %v20009_v56 }
 0x76e   : > { %18857 = vmatpush3.bf16.msra.mxu1 %v20010_v21  ;;  %18834 = vmatprep.subr.bf16.mxu0 %v20011_v55 }
 0x76f   : > { %18858 = vmatprep.subr.bf16.mxu1 %v20012_v33 }
 0x771   : > { %18835 = vmatpush3.bf16.msra.mxu0 %v20011_v55 }
 0x772   : > { %18859 = vmatpush3.bf16.msra.mxu1 %v20012_v33  ;;  %18836 = vmatprep.subr.bf16.mxu0 %v20013_v11 }
 0x773   : > { %18860 = vmatprep.subr.bf16.mxu1 %v20014_v46 }
 0x775   : > { %18837 = vmatpush3.bf16.msra.mxu0 %v20013_v11 }
 0x776   : > { %18861 = vmatpush3.bf16.msra.mxu1 %v20014_v46  ;;  %18838 = vmatprep.subr.bf16.mxu0 %v20015_v17 }
 0x777   : > { %18862 = vmatprep.subr.bf16.mxu1 %v20016_v19 }
 0x779   : > { %18839 = vmatpush3.bf16.msra.mxu0 %v20015_v17 }
 0x77a   : > { %18863 = vmatpush3.bf16.msra.mxu1 %v20016_v19  ;;  %18840 = vmatprep.subr.bf16.mxu0 %v20017_v41 }
 0x77b   : > { %18864 = vmatprep.subr.bf16.mxu1 %v20018_v28 }
 0x77d   : > { %18841 = vmatpush3.bf16.msra.mxu0 %v20017_v41 }
 0x77e   : > { %18865 = vmatpush3.bf16.msra.mxu1 %v20018_v28  ;;  %18874 = vmatprep.subr.bf16.mxu0 %v20020_v52 }
 0x780   : > { %18843 = vmatmul.mubr.bf16.vlgmr.msra.gmra.mxu0 %v25242_v25 }
 0x781   : > { %18867 = vmatmul.mubr.bf16.vlgmr.msra.gmra.mxu1 %v25242_v25  ;;  %18846 = vmatprep.mubr.bf16.mxu0 %v20021_v50 }
 0x782   : > { %18870 = vmatprep.mubr.bf16.mxu1 %v20021_v50  ;;  %18875 = vmatpush3.bf16.msra.mxu0 %v20020_v52 }
 0x783   : > { %18876 = vmatprep.subr.bf16.mxu0 %v20022_v10 }
 0x786   : > { %18877 = vmatpush3.bf16.msra.mxu0 %v20022_v10 }
 0x787   : > { %18878 = vmatprep.subr.bf16.mxu0 %v20024_v57 }
 0x788   : > { %18847 = vmatmul.mubr.bf16.gmra.mxu0 %v20023_v39 }
 0x789   : > { %18871 = vmatmul.mubr.bf16.gmra.mxu1 %v20023_v39  ;;  %18890 = vmatprep.mubr.bf16.mxu0 %v25241_v15 }
 0x78a   : > { %18879 = vmatpush3.bf16.msra.mxu0 %v20024_v57  ;;  %18914 = vmatprep.mubr.msk.f32.mxu1 %vm1905_vm0, %v8830_v40 }
 0x78b   : > { %18880 = vmatprep.subr.bf16.mxu0 %v20025_v2 }
 0x78e   : > { %18881 = vmatpush3.bf16.msra.mxu0 %v20025_v2  ;;  %v23211_v2 = vld [vmem:[%s25169_s2 + $0x1] ss:$0 sm:$0xff] }
 0x78f   : > { %18882 = vmatprep.subr.bf16.mxu0 %v20026_v48 }
 0x792   : > { %18883 = vmatpush3.bf16.msra.mxu0 %v20026_v48 }
 0x793   : > { %18884 = vmatprep.subr.bf16.mxu0 %v20027_v7 }
 0x796   : > { %18885 = vmatpush3.bf16.msra.mxu0 %v20027_v7 }
 0x797   : > { %18886 = vmatprep.subr.bf16.mxu0 %v20028_v47 }
 0x79a   : > { %18887 = vmatpush3.bf16.msra.mxu0 %v20028_v47  ;;  %v7634_v47 = vadd.f32 %v18701_v62, %v23211_v2 }
 0x79b   : > { %18888 = vmatprep.subr.bf16.mxu0 %v20029_v43 }
 0x79e   : > { %18889 = vmatpush3.bf16.msra.mxu0 %v20029_v43 }
 0x7a1   : > { %18891 = vmatmul.mubr.bf16.vlgmr.msra.gmra.mxu0 %v25242_v25 }
 0x7a2   : > { %18894 = vmatprep.mubr.bf16.mxu0 %v20021_v50 }
 0x7a9   : > { %18895 = vmatmul.mubr.bf16.gmra.mxu0 %v20023_v39 }
 0x7aa   : > { %18952 = vmatprep.mubr.msk.f32.mxu0 %vm1905_vm0, %v15658_v6  ;;  %v7633_v6 = vadd.f32 %v23124_v34, %v23211_v2 }
 0x7f7   : > { %v23132_v38 = vpop.f32.mrf.mxu0 }
 0x7f8   : > { %v23134_v23 = vpop.f32.mrf.mxu1 }
 0x7f9   : > { %v23136_v49 = vpop.f32.mrf.mxu0 }
 0x7fa   : > { %v23138_v61 = vpop.f32.mrf.mxu1 }
 0x7fb   : > { %v23140_v42 = vpop.f32.mrf.mxu0 }
 0x7fc   : > { %v23142_v58 = vpop.f32.mrf.mxu1 }
 0x7fd   : > { %v23144_v27 = vpop.f32.mrf.mxu0 }
 0x7fe   : > { %v23146_v51 = vpop.f32.mrf.mxu1 }
 0x7ff   : > { %v18748_v54 = vpop.f32.mrf.mxu0 }
 0x800   : > { %v18772_v24 = vpop.f32.mrf.mxu1  ;;  %v7909_v28 = vadd.f32 %v18748_v54, %v18724_v53  ;;  %v7430_v54 = vld [vmem:[#allocation4 + $0x98] sm:$0xff] }
 0x801   : > { %v23148_v59 = vpop.f32.mrf.mxu0 }
 0x802   : > { %v23153_v5 = vpop.f32.mrf.mxu1 }
 0x803   : > { %25243 = vst [vmem:[#allocation16_spill] sm:$0xff] %v23153_v5  ;;  %v18749_v29 = vpop.f32.mrf.mxu0 }
 0x804   : > { %v18773_v14 = vpop.f32.mrf.mxu1  ;;  %v7912_v10 = vadd.f32 %v18749_v29, %v18725_v26 }
 0x805   : > { %v7903_v4 = vpop.f32.mrf.mxu0 }
 0x806   : > { %v23156_v13 = vpop.f32.mrf.mxu1  ;;  %v7904_v48 = vadd.f32 %v7903_v4, %v7790_v37  ;;  %v7429_v4 = vld [vmem:[#allocation4 + $0x90] sm:$0xff] }
 0x807   : > { %25244 = vst [vmem:[#allocation14_spill] sm:$0xff] %v23156_v13  ;;  %v23158_v12 = vpop.f32.mrf.mxu0 }
 0x808   : > { %v23160_v31 = vpop.f32.mrf.mxu1 }
 0x809   : > { %v23162_v36 = vpop.f32.mrf.mxu0 }
 0x80a   : > { %v23164_v3 = vpop.f32.mrf.mxu1 }
 0x80b   : > { %v18753_v1 = vpop.f32.mrf.mxu0 }
 0x80c   : > { %v23170_v45 = vpop.f32.mrf.mxu1 }
 0x80d   : > { %v7919_v16 = vpop.f32.mrf.mxu0 }
 0x80e   : > { %v23172_v20 = vpop.f32.mrf.mxu1 }
 0x81f   : > { %v23174_v30 = vpop.f32.mrf.mxu0 }
 0x820   : > { %v23176_v22 = vpop.f32.mrf.mxu1 }
 0x821   : > { %v23178_v44 = vpop.f32.mrf.mxu0 }
 0x822   : > { %v23180_v32 = vpop.f32.mrf.mxu1 }
 0x823   : > { %v23182_v0 = vpop.f32.mrf.mxu0 }
 0x824   : > { %v23184_v35 = vpop.f32.mrf.mxu1 }
 0x825   : > { %v23186_v60 = vpop.f32.mrf.mxu0 }
 0x826   : > { %v23188_v56 = vpop.f32.mrf.mxu1 }
 0x827   : > { %v23190_v21 = vpop.f32.mrf.mxu0 }
 0x828   : > { %v23192_v15 = vpop.f32.mrf.mxu1 }
 0x829   : > { %v23194_v55 = vpop.f32.mrf.mxu0 }
 0x82a   : > { %v23196_v33 = vpop.f32.mrf.mxu1 }
 0x82b   : > { %v23198_v11 = vpop.f32.mrf.mxu0 }
 0x82c   : > { %v23200_v46 = vpop.f32.mrf.mxu1 }
 0x82d   : > { %v23202_v17 = vpop.f32.mrf.mxu0 }
 0x82e   : > { %v23204_v19 = vpop.f32.mrf.mxu1 }
 0x840   : > { %v18844_v41 = vpop.f32.mrf.mxu0 }
 0x841   : > { %v18868_v52 = vpop.f32.mrf.mxu1  ;;  %v8476_v25 = vadd.f32 %v18844_v41, %v7909_v28  ;;  %v8064_v41 = vadd.f32 %v18773_v14, %v7634_v47  ;;  %v8063_v28 = vadd.f32 %v18772_v24, %v7633_v6  ;;  %v7928_v24 = vadd.f32 %v18753_v1, %v23142_v58 }
 0x842   : > { %v8443_v50 = vpop.f32.mrf.mxu0  ;;  %v7635_v58 = vadd.f32 %v23211_v2, %v23136_v49 }
 0x843   : > { %v23206_v57 = vpop.f32.mrf.mxu1  ;;  %v8760_v40 = vrot.slane %v8476_v25, 7 }
 0x844   : > { %25245 = vst [vmem:[#allocation15_spill] sm:$0xff] %v23206_v57  ;;  %v18845_v39 = vpop.f32.mrf.mxu0 }
 0x845   : > { %v23213_v7 = vadd.f32 %v18845_v39, %v7912_v10  ;;  %v18869_v26 = vpop.f32.mrf.mxu1 }
 0x846   : > { %v8446_v43 = vpop.f32.mrf.mxu0  ;;  %v8615_v10 = vadd.f32 %v18869_v26, %v8064_v41  ;;  %v7925_v26 = vadd.f32 %v23158_v12, %v23134_v23  ;;  %v7638_v23 = vadd.f32 %v23140_v42, %v23211_v2  ;;  %v23263_v42 = vadd.f32 %v23164_v3, %v7635_v58 }
 0x847   : > { %v25196_v53 = vrot.slane %v23213_v7, 7  ;;  %v23217_v29 = vadd.f32 %v8446_v43, %v7904_v48  ;;  %v8614_v48 = vadd.f32 %v18868_v52, %v8063_v28  ;;  %v23234_v5 = vpop.f32.mrf.mxu1 }
 0x848   : > { %v18848_v47 = vpop.f32.mrf.mxu0 }
 0x849   : > { %v8770_v37 = vsel %vm1837_vm1, %v8760_v40, %v25196_v53  ;;  %v8759_v62 = vrot.slane %v23217_v29, 7  ;;  %v18872_v52 = vpop.f32.mrf.mxu1  ;;  %v7427_v29 = vld [vmem:[#allocation4 + $0x80] sm:$0xff] }
 0x84a   : > { %v8777_v25 = vmul.f32 %v8770_v37, %v7430_v54  ;;  %v8459_v57 = vpop.f32.mrf.mxu0  ;;  %v7917_v37 = vadd.f32 %v23162_v36, %v23138_v61  ;;  %v23255_v61 = vadd.f32 %v23211_v2, %v23130_v8  ;;  %v8290_v8 = vadd.f32 %v23176_v22, %v23174_v30 }
 0x84b   : > { %v8771_v39 = vsel %vm1837_vm1, %v8759_v62, %v8760_v40  ;;  %v7920_v40 = vadd.f32 %v7919_v16, %v23146_v51  ;;  %v23250_v12 = vpop.f32.mrf.mxu1  ;;  %v8068_v16 = vadd.f32 %v23170_v45, %v7638_v23  ;;  %v7434_v45 = vld [vmem:[#allocation4 + $0xb8] sm:$0xff]  ;;  %v8293_v30 = vadd.f32 %v23184_v35, %v23182_v0 }
 0x84c   : > { %v23230_v43 = vadd.f32 %v8777_v25, %v8615_v10  ;;  %v8776_v34 = vmul.f32 %v8771_v39, %v7429_v4  ;;  %v18849_v53 = vpop.f32.mrf.mxu0  ;;  %v8480_v4 = vadd.f32 %v18848_v47, %v7925_v26  ;;  %v7637_v10 = vadd.f32 %v23132_v38, %v23211_v2  ;;  %v7431_v26 = vld [vmem:[#allocation4 + $0xa0] sm:$0xff] }
 0x84d   : > { %v23240_v6 = vadd.f32 %v18849_v53, %v7928_v24  ;;  %v8478_v51 = vadd.f32 %v8459_v57, %v7917_v37  ;;  %v7901_v38 = vadd.f32 %v23148_v59, %v23128_v9  ;;  %v8306_v59 = vadd.f32 %v23192_v15, %v23190_v21 }
 0x84e   : > { %v23232_v14 = vadd.f32 %v8776_v34, %v8614_v48  ;;  %v8462_v13 = vpop.f32.mrf.mxu0  ;;  %v8067_v49 = vadd.f32 %v23160_v31, %v7637_v10  ;;  %v8764_v57 = vrot.slane %v8480_v4, 7  ;;  %v8298_v31 = vadd.f32 %v23196_v33, %v23194_v55  ;;  %v18873_v34 = vpop.f32.mrf.mxu1  ;;  %v7433_v55 = vld [vmem:[#allocation4 + $0xb0] sm:$0xff] }
 0x84f   : > { %v8479_v28 = vadd.f32 %v8462_v13, %v7920_v40  ;;  %v8765_v1 = vrot.slane %v23240_v6, 7  ;;  %v7636_v13 = vadd.f32 %v23211_v2, %v23144_v27  ;;  %v8282_v27 = vadd.f32 %v23180_v32, %v23178_v44  ;;  %v7432_v40 = vld [vmem:[#allocation4 + $0xa8] sm:$0xff] }
 0x850   : > { %v23271_v48 = vadd.f32 %v8443_v50, %v7901_v38  ;;  %v8762_v3 = vrot.slane %v8478_v51, 7  ;;  %v8285_v22 = vadd.f32 %v23188_v56, %v23186_v60  ;;  %v8309_v44 = vadd.f32 %v23200_v46, %v23198_v11 }
 0x851   : > { %v8763_v53 = vrot.slane %v8479_v28, 7  ;;  %v8066_v39 = vadd.f32 %v23172_v20, %v7636_v13  ;;  %v8766_v20 = vsel %vm1837_vm1, %v8764_v57, %v8765_v1  ;;  %v8301_v15 = vadd.f32 %v23204_v19, %v23202_v17  ;;  %v8600_v17 = vpop.f32.mrf.mxu1  ;;  %v7442_v13 = vld [vmem:[#allocation4 + $0xf0] sm:$0xff] }
 0x852   : > { %v8758_v0 = vrot.slane %v23271_v48, 7  ;;  %v8618_v35 = vadd.f32 %v18872_v52, %v8067_v49  ;;  %v8619_v24 = vadd.f32 %v18873_v34, %v8068_v16  ;;  %v8781_v60 = vmul.f32 %v8766_v20, %v7434_v45  ;;  %v7441_v45 = vld [vmem:[#allocation4 + $0xe8] sm:$0xff]  ;;  %v7439_v20 = vld [vmem:[#allocation4 + $0xd8] sm:$0xff] }
 0x853   : > { %v8767_v33 = vsel %vm1837_vm1, %v8763_v53, %v8764_v57  ;;  %v25246_v11 = vrot.slane %v23213_v7, 7  ;;  %v8768_v19 = vsel %vm1837_vm1, %v8762_v3, %v8763_v53  ;;  %v7443_v7 = vld [vmem:[#allocation4 + $0xf8] sm:$0xff]  ;;  %v7440_v53 = vld [vmem:[#allocation4 + $0xe0] sm:$0xff] }
 0x854   : > { %v8780_v4 = vmul.f32 %v8767_v33, %v7433_v55  ;;  %v8789_v57 = vadd.f32 %v8781_v60, %v8619_v24  ;;  %v8779_v48 = vmul.f32 %v8768_v19, %v7432_v40  ;;  %v7428_v55 = vld [vmem:[#allocation4 + $0x88] sm:$0xff]  ;;  %v8772_v33 = vsel %vm1837_vm1, %v8758_v0, %v8759_v62 }
 0x855   : > { %v8769_v46 = vsel %vm1837_vm1, %v25246_v11, %v8762_v3  ;;  %v7631_v60 = vadd.f32 %v23211_v2, %v23126_v63  ;;  %v8773_v62 = vsel %vm1837_vm1, %v8765_v1, %v8758_v0  ;;  %v8775_v19 = vmul.f32 %v8772_v33, %v7428_v55  ;;  %v20043_v55 = vld [vmem:[%s25168_s1 + $0x4c8] sm:$0xff]   ;;  %v20044_v33 = vld [vmem:[%s25168_s1 + $0x540] sm:$0xff]  }
 0x856   : > { %v8778_v16 = vmul.f32 %v8769_v46, %v7431_v26  ;;  %v25247_v26 = vld [vmem:[#allocation14_spill] sm:$0xff]  ;;  %v7437_v46 = vld [vmem:[#allocation4 + $0xc8] sm:$0xff]  ;;  %v8774_v0 = vmul.f32 %v8773_v62, %v7427_v29 }
 0x857   : > { %v8062_v11 = vadd.f32 %v25247_v26, %v23255_v61  ;;  %v25248_v61 = vld [vmem:[#allocation16_spill] sm:$0xff] }
 0x859   : > { %v8613_v6 = vadd.f32 %v23234_v5, %v8062_v11 }
 0x861   : > { %v18892_v54 = vpop.f32.mrf.mxu0 }
 0x862   : > { %v8752_v28 = vadd.f32 %v18892_v54, %v8290_v8  ;;  %v8788_v8 = vadd.f32 %v8780_v4, %v8618_v35  ;;  %v7436_v4 = vld [vmem:[#allocation4 + $0xc0] sm:$0xff] }
 0x863   : > { %v8719_v41 = vpop.f32.mrf.mxu0 }
 0x864   : > { %v23287_v32 = vadd.f32 %v8719_v41, %v8282_v27  ;;  %v8617_v27 = vadd.f32 %v8600_v17, %v8066_v39 }
 0x865   : > { %v18893_v25 = vpop.f32.mrf.mxu0 }
 0x866   : > { %v8753_v41 = vadd.f32 %v18893_v25, %v8293_v30  ;;  %v8790_v52 = vrot.slane %v23287_v32, 1 }
 0x867   : > { %v8722_v36 = vpop.f32.mrf.mxu0 }
 0x868   : > { %v8751_v10 = vadd.f32 %v8722_v36, %v8285_v22 }
 0x869   : > { %v18896_v9 = vpop.f32.mrf.mxu0 }
 0x86a   : > { %v8756_v50 = vadd.f32 %v18896_v9, %v8306_v59  ;;  %v8793_v9 = vrot.slane %v8753_v41, 1  ;;  %v8792_v59 = vrot.slane %v8752_v28, 1  ;;  %v8791_v34 = vrot.slane %v8751_v10, 1 }
 0x86b   : > { %v8735_v21 = vpop.f32.mrf.mxu0 }
 0x86c   : > { %v8754_v47 = vadd.f32 %v8735_v21, %v8298_v31  ;;  %v8796_v23 = vrot.slane %v8756_v50, 1  ;;  %v8787_v50 = vadd.f32 %v8779_v48, %v8617_v27  ;;  %v8802_v35 = vsel %vm1870_vm2, %v8792_v59, %v8793_v9  ;;  %v8831_v48 = vld [vmem:[%s25174_s7 + $0x8] sm:$0xff] }
 0x86d   : > { %v18897_v56 = vpop.f32.mrf.mxu0  ;;  %v8803_v40 = vsel %vm1870_vm2, %v8791_v34, %v8792_v59  ;;  %v8804_v1 = vsel %vm1870_vm2, %v8790_v52, %v8791_v34  ;;  %v20031_v59 = vld [vmem:[%s25168_s1 + $0x4f8] sm:$0xff]   ;;  %v20034_v34 = vld [vmem:[%s25168_s1 + $0x568] sm:$0xff]  }
 0x86e   : > { %v8757_v37 = vadd.f32 %v18897_v56, %v8309_v44  ;;  %v8794_v51 = vrot.slane %v8754_v47, 1  ;;  %v8616_v44 = vadd.f32 %v23250_v12, %v23263_v42  ;;  %v7438_v47 = vld [vmem:[#allocation4 + $0xd0] sm:$0xff]  ;;  %v8807_v28 = vmul.f32 %v8803_v40, %v7437_v46 }
 0x86f   : > { %v8738_v58 = vpop.f32.mrf.mxu0  ;;  %v8808_v63 = vmul.f32 %v8802_v35, %v7438_v47 }
 0x870   : > { %v8797_v38 = vrot.slane %v8757_v37, 1  ;;  %v8755_v49 = vadd.f32 %v8738_v58, %v8301_v15  ;;  %v8801_v39 = vsel %vm1870_vm2, %v8793_v9, %v8794_v51  ;;  %v8786_v56 = vadd.f32 %v8778_v16, %v8616_v44  ;;  %v15654_v9 = vld [vmem:[%s25174_s7 + $0x10] sm:$0xff]  ;;  %v20039_v44 = vld [vmem:[%s25168_s1 + $0x4d8] sm:$0xff]  }
 0x871   : > { %v8809_v12 = vmul.f32 %v8801_v39, %v7439_v20  ;;  %v8061_v37 = vadd.f32 %v25248_v61, %v7631_v60  ;;  %v20035_v20 = vld [vmem:[%s25168_s1 + $0x4e8] sm:$0xff]   ;;  %v20036_v39 = vld [vmem:[%s25168_s1 + $0x560] sm:$0xff]   ;;  %v20047_v61 = vld [vmem:[%s25168_s1 + $0x5b8] sm:$0xff]  }
 0x872   : > { %v8798_v25 = vsel %vm1870_vm2, %v8796_v23, %v8797_v38  ;;  %v8805_v54 = vsel %vm1870_vm2, %v8797_v38, %v8790_v52  ;;  %v8795_v36 = vrot.slane %v8755_v49, 1  ;;  %v8783_v52 = vadd.f32 %v8775_v19, %v8613_v6 }
 0x873   : > { %v8812_v31 = vmul.f32 %v8798_v25, %v7442_v13  ;;  %v8813_v3 = vmul.f32 %v8805_v54, %v7443_v7  ;;  %v8817_v10 = vadd.f32 %v8809_v12, %v23230_v43  ;;  %v8806_v13 = vmul.f32 %v8804_v1, %v7436_v4  ;;  %v15659_v25 = vld [vmem:[%s25174_s7 + $0x28] sm:$0xff]  ;;  %v15655_v54 = vld [vmem:[%s25174_s7 + $0x18] sm:$0xff] }
 0x874   : > { %v8799_v30 = vsel %vm1870_vm2, %v8795_v36, %v8796_v23  ;;  %v8800_v22 = vsel %vm1870_vm2, %v8794_v51, %v8795_v36  ;;  %v25249_v23 = vld [vmem:[#allocation15_spill] sm:$0xff]  ;;  %v8816_v51 = vadd.f32 %v8808_v63, %v23232_v14  ;;  %v8815_v38 = vadd.f32 %v8807_v28, %v8783_v52  ;;  %v15663_v36 = vld [vmem:[%s25174_s7 + $0x38] sm:$0xff] }
 0x875   : > { %v8820_v32 = vadd.f32 %v8812_v31, %v8788_v8  ;;  %v8821_v21 = vadd.f32 %v8813_v3, %v8789_v57  ;;  %v8810_v15 = vmul.f32 %v8800_v22, %v7440_v53  ;;  %v8811_v24 = vmul.f32 %v8799_v30, %v7441_v45  ;;  %v15662_v53 = vld [vmem:[%s25174_s7 + $0x30] sm:$0xff]  ;;  %v20030_v8 = vld [vmem:[%s25168_s1 + $0x578] sm:$0xff]   ;;  %v20037_v30 = vld [vmem:[%s25168_s1 + $0x4e0] sm:$0xff]  }
 0x876   : > { %v8612_v5 = vadd.f32 %v25249_v23, %v8061_v37  ;;  %v8825_v49 = vmax.f32 %v8817_v10, 0.0  ;;  %v8824_v14 = vmax.f32 %v8816_v51, 0.0  ;;  %v8823_v57 = vmax.f32 %v8815_v38, 0.0  ;;  %v20032_v3 = vld [vmem:[%s25168_s1 + $0x570] sm:$0xff]   ;;  %v20038_v22 = vld [vmem:[%s25168_s1 + $0x558] sm:$0xff]   ;;  %v20053_v51 = vld [vmem:[%s25168_s1 + $0x5a8] sm:$0xff]  }
 0x877   : > { %v23321_v42 = vmax.f32 %v8821_v21, 0.0  ;;  %v8819_v17 = vadd.f32 %v8811_v24, %v8787_v50  ;;  %v23331_v2 = vmax.f32 %v8820_v32, 0.0  ;;  %v8818_v41 = vadd.f32 %v8810_v15, %v8786_v56  ;;  %v20033_v45 = vld [vmem:[%s25168_s1 + $0x4f0] sm:$0xff]   ;;  %v20042_v15 = vld [vmem:[%s25168_s1 + $0x548] sm:$0xff]   ;;  %v20045_v50 = vld [vmem:[%s25168_s1 + $0x4c0] sm:$0xff]  }
 0x878   : > { %v8782_v43 = vadd.f32 %v8774_v0, %v8612_v5  ;;  %v20472_v31 = vmov 0.0   ;;  %v20040_v32 = vld [vmem:[%s25168_s1 + $0x550] sm:$0xff]   ;;  %v20057_v38 = vld [vmem:[%s25168_s1 + $0x598] sm:$0xff]  }
 0x879   : > { %18898 = vmatprep.subr.mxu1 %v23321_v42  ;;  %18936 = vmatprep.subr.mxu0 %v23321_v42  ;;  %v23342_v58 = vmax.f32 %v8819_v17, 0.0  ;;  %v23350_v7 = vmax.f32 %v8818_v41, 0.0  ;;  %v20041_v21 = vld [vmem:[%s25168_s1 + $0x4d0] sm:$0xff]   ;;  %v9203_v41 = vld [vmem:[#allocation2 + $0x4] sm:$0xc] }
 0x87a   : > { %18899 = vmatpush3.msra.mxu1 %v23321_v42  ;;  %18937 = vmatpush3.msra.mxu0 %v23321_v42  ;;  %v8814_v16 = vadd.f32 %v8806_v13, %v8782_v43  ;;  %v20051_v23 = vld [vmem:[%s25168_s1 + $0x5b0] sm:$0xff]   ;;  %v20054_v13 = vld [vmem:[%s25168_s1 + $0x4a8] sm:$0xff]   ;;  %v20056_v43 = vld [vmem:[%s25168_s1 + $0x4a0] sm:$0xff]  }
 0x87b   : > { %18900 = vmatprep.subr.mxu1 %v23331_v2  ;;  %18938 = vmatprep.subr.mxu0 %v23331_v2  ;;  %v20052_v52 = vld [vmem:[%s25168_s1 + $0x4b0] sm:$0xff]  }
 0x87c   : > { %18901 = vmatpush3.msra.mxu1 %v23331_v2  ;;  %18939 = vmatpush3.msra.mxu0 %v23331_v2  ;;  %v8822_v27 = vmax.f32 %v8814_v16, 0.0  ;;  %v20060_v16 = vld [vmem:[%s25168_s1 + $0x490] sm:$0xff]  }
 0x87d   : > { %18902 = vmatprep.subr.mxu1 %v23342_v58  ;;  %18940 = vmatprep.subr.mxu0 %v23342_v58 }
 0x87e   : > { %18903 = vmatpush3.msra.mxu1 %v23342_v58  ;;  %18941 = vmatpush3.msra.mxu0 %v23342_v58 }
 0x87f   : > { %18904 = vmatprep.subr.mxu1 %v23350_v7  ;;  %18942 = vmatprep.subr.mxu0 %v23350_v7 }
 0x880   : > { %18905 = vmatpush3.msra.mxu1 %v23350_v7  ;;  %18943 = vmatpush3.msra.mxu0 %v23350_v7 }
 0x881   : > { %18906 = vmatprep.subr.mxu1 %v8825_v49  ;;  %18944 = vmatprep.subr.mxu0 %v8825_v49 }
 0x882   : > { %18907 = vmatpush3.msra.mxu1 %v8825_v49  ;;  %18945 = vmatpush3.msra.mxu0 %v8825_v49 }
 0x883   : > { %18908 = vmatprep.subr.mxu1 %v8824_v14  ;;  %18946 = vmatprep.subr.mxu0 %v8824_v14 }
 0x884   : > { %18909 = vmatpush3.msra.mxu1 %v8824_v14  ;;  %18947 = vmatpush3.msra.mxu0 %v8824_v14 }
 0x885   : > { %18910 = vmatprep.subr.mxu1 %v8823_v57  ;;  %18948 = vmatprep.subr.mxu0 %v8823_v57 }
 0x886   : > { %18911 = vmatpush3.msra.mxu1 %v8823_v57  ;;  %18949 = vmatpush3.msra.mxu0 %v8823_v57 }
 0x887   : > { %18912 = vmatprep.subr.mxu1 %v8822_v27  ;;  %18950 = vmatprep.subr.mxu0 %v8822_v27 }
 0x888   : > { %18913 = vmatpush3.msra.mxu1 %v8822_v27  ;;  %18951 = vmatpush3.msra.mxu0 %v8822_v27 }
 0x889   : > { %18915 = vmatmul.mubr.msk.f32.vlgmr.msra.gmra.mxu1 %vm1905_vm0, %v8831_v48  ;;  %18917 = vmatprep.subr.mxu1 %v23321_v42  ;;  %v20063_v48 = vld [vmem:[%s25168_s1 + $0x580] sm:$0xff]  }
 0x88a   : > { %18918 = vmatpush3.msra.mxu1 %v23321_v42  ;;  %18933 = vmatprep.mubr.msk.f32.mxu1 %vm1905_vm0, %v15654_v9  ;;  %v20064_v9 = vld [vmem:[%s25168_s1 + $0x480] sm:$0xff]  }
 0x88b   : > { %18919 = vmatprep.subr.mxu1 %v23331_v2  ;;  %18953 = vmatmul.mubr.msk.f32.vlgmr.msra.gmra.mxu0 %vm1905_vm0, %v15659_v25  ;;  %v20065_v25 = vld [vmem:[%s25168_s1 + $0x538] sm:$0xff]  }
 0x88c   : > { %18920 = vmatpush3.msra.mxu1 %v23331_v2  ;;  %18974 = vmatprep.subr.bf16.mxu0 %v20472_v31 }
 0x88d   : > { %18921 = vmatprep.subr.mxu1 %v23342_v58  ;;  %18975 = vmatpush3.bf16.msra.mxu0 %v20031_v59  ;;  %v20070_v59 = vld [vmem:[%s25168_s1 + $0x5e8] sm:$0xff]  }
 0x88e   : > { %18922 = vmatpush3.msra.mxu1 %v23342_v58  ;;  %18976 = vmatprep.subr.bf16.mxu0 %v20472_v31 }
 0x88f   : > { %18923 = vmatprep.subr.mxu1 %v23350_v7  ;;  %18990 = vmatprep.mubr.msk.bf16.mxu0 %vm20473_vm3, %v20472_v31 }
 0x890   : > { %18924 = vmatpush3.msra.mxu1 %v23350_v7 }
 0x891   : > { %18925 = vmatprep.subr.mxu1 %v8825_v49  ;;  %18977 = vmatpush3.bf16.msra.mxu0 %v20033_v45  ;;  %v20072_v45 = vld [vmem:[%s25168_s1 + $0x5e0] sm:$0xff]  }
 0x892   : > { %18926 = vmatpush3.msra.mxu1 %v8825_v49  ;;  %18978 = vmatprep.subr.bf16.mxu0 %v20472_v31 }
 0x893   : > { %18927 = vmatprep.subr.mxu1 %v8824_v14 }
 0x894   : > { %18928 = vmatpush3.msra.mxu1 %v8824_v14 }
 0x895   : > { %18929 = vmatprep.subr.mxu1 %v8823_v57  ;;  %18979 = vmatpush3.bf16.msra.mxu0 %v20035_v20  ;;  %v20074_v20 = vld [vmem:[%s25168_s1 + $0x5d8] sm:$0xff]  }
 0x896   : > { %18930 = vmatpush3.msra.mxu1 %v8823_v57  ;;  %18980 = vmatprep.subr.bf16.mxu0 %v20472_v31 }
 0x897   : > { %18931 = vmatprep.subr.mxu1 %v8822_v27 }
 0x898   : > { %18932 = vmatpush3.msra.mxu1 %v8822_v27 }
 0x899   : > { %18934 = vmatmul.mubr.msk.f32.vlgmr.msra.gmra.mxu1 %vm1905_vm0, %v15655_v54  ;;  %18955 = vmatprep.subr.mxu1 %v23321_v42  ;;  %v20066_v54 = vld [vmem:[%s25168_s1 + $0x5f8] sm:$0xff]  }
 0x89a   : > { %18956 = vmatpush3.msra.mxu1 %v23321_v42  ;;  %18971 = vmatprep.mubr.msk.f32.mxu1 %vm1905_vm0, %v15662_v53  ;;  %v20067_v53 = vld [vmem:[%s25168_s1 + $0x530] sm:$0xff]  }
 0x89b   : > { %18957 = vmatprep.subr.mxu1 %v23331_v2  ;;  %18981 = vmatpush3.bf16.msra.mxu0 %v20037_v30  ;;  %v20076_v30 = vld [vmem:[%s25168_s1 + $0x5d0] sm:$0xff]  }
 0x89c   : > { %18958 = vmatpush3.msra.mxu1 %v23331_v2  ;;  %18982 = vmatprep.subr.bf16.mxu0 %v20472_v31 }
 0x89d   : > { %18959 = vmatprep.subr.mxu1 %v23342_v58 }
 0x89e   : > { %18960 = vmatpush3.msra.mxu1 %v23342_v58  ;;  %v20050_v58 = vld [vmem:[%s25168_s1 + $0x4b8] sm:$0xff]  }
 0x89f   : > { %18961 = vmatprep.subr.mxu1 %v23350_v7  ;;  %18983 = vmatpush3.bf16.msra.mxu0 %v20039_v44  ;;  %v20078_v44 = vld [vmem:[%s25168_s1 + $0x5c8] sm:$0xff]  }
 0x8a0   : > { %18962 = vmatpush3.msra.mxu1 %v23350_v7  ;;  %18984 = vmatprep.subr.bf16.mxu0 %v20472_v31  ;;  %v20055_v7 = vld [vmem:[%s25168_s1 + $0x5a0] sm:$0xff]  }
 0x8a1   : > { %18963 = vmatprep.subr.mxu1 %v8825_v49 }
 0x8a2   : > { %18964 = vmatpush3.msra.mxu1 %v8825_v49  ;;  %v20058_v49 = vld [vmem:[%s25168_s1 + $0x498] sm:$0xff]  }
 0x8a3   : > { %18965 = vmatprep.subr.mxu1 %v8824_v14  ;;  %18985 = vmatpush3.bf16.msra.mxu0 %v20041_v21  ;;  %v20080_v21 = vld [vmem:[%s25168_s1 + $0x5c0] sm:$0xff]  }
 0x8a4   : > { %18966 = vmatpush3.msra.mxu1 %v8824_v14  ;;  %18986 = vmatprep.subr.bf16.mxu0 %v20472_v31  ;;  %v20059_v14 = vld [vmem:[%s25168_s1 + $0x590] sm:$0xff]  }
 0x8a5   : > { %18967 = vmatprep.subr.mxu1 %v8823_v57 }
 0x8a6   : > { %18968 = vmatpush3.msra.mxu1 %v8823_v57  ;;  %v20061_v57 = vld [vmem:[%s25168_s1 + $0x588] sm:$0xff]  }
 0x8a7   : > { %18969 = vmatprep.subr.mxu1 %v8822_v27  ;;  %18987 = vmatpush3.bf16.msra.mxu0 %v20043_v55  ;;  %v20082_v55 = vld [vmem:[%s25168_s1 + $0x638] sm:$0xff]  }
 0x8a8   : > { %18970 = vmatpush3.msra.mxu1 %v8822_v27  ;;  %18988 = vmatprep.subr.bf16.mxu0 %v20472_v31  ;;  %v20062_v27 = vld [vmem:[%s25168_s1 + $0x488] sm:$0xff]  }
 0x8a9   : > { %18972 = vmatmul.mubr.msk.f32.vlgmr.msra.gmra.mxu1 %vm1905_vm0, %v15663_v36  ;;  %18994 = vmatprep.subr.bf16.mxu1 %v20472_v31  ;;  %v20068_v36 = vld [vmem:[%s25168_s1 + $0x5f0] sm:$0xff]  }
 0x8aa   : > { %18995 = vmatpush3.bf16.msra.mxu1 %v20030_v8  ;;  %19010 = vmatprep.mubr.msk.bf16.mxu1 %vm20473_vm3, %v20472_v31  ;;  %v20069_v8 = vld [vmem:[%s25168_s1 + $0x528] sm:$0xff]  }
 0x8ab   : > { %18996 = vmatprep.subr.bf16.mxu1 %v20472_v31  ;;  %18989 = vmatpush3.bf16.msra.mxu0 %v20045_v50  ;;  %v20084_v50 = vld [vmem:[%s25168_s1 + $0x630] sm:$0xff]  }
 0x8ac   : > { %19014 = vmatprep.subr.bf16.mxu0 %v20472_v31 }
 0x8ae   : > { %18997 = vmatpush3.bf16.msra.mxu1 %v20032_v3  ;;  %v20071_v3 = vld [vmem:[%s25168_s1 + $0x520] sm:$0xff]  }
 0x8af   : > { %18998 = vmatprep.subr.bf16.mxu1 %v20472_v31 }
 0x8b2   : > { %18999 = vmatpush3.bf16.msra.mxu1 %v20034_v34  ;;  %v20073_v34 = vld [vmem:[%s25168_s1 + $0x518] sm:$0xff]  }
 0x8b3   : > { %19000 = vmatprep.subr.bf16.mxu1 %v20472_v31 }
 0x8b6   : > { %19001 = vmatpush3.bf16.msra.mxu1 %v20036_v39  ;;  %v20075_v39 = vld [vmem:[%s25168_s1 + $0x510] sm:$0xff]  }
 0x8b7   : > { %19002 = vmatprep.subr.bf16.mxu1 %v20472_v31 }
 0x8ba   : > { %19003 = vmatpush3.bf16.msra.mxu1 %v20038_v22  ;;  %v20077_v22 = vld [vmem:[%s25168_s1 + $0x508] sm:$0xff]  }
 0x8bb   : > { %19004 = vmatprep.subr.bf16.mxu1 %v20472_v31 }
 0x8be   : > { %19005 = vmatpush3.bf16.msra.mxu1 %v20040_v32  ;;  %v20079_v32 = vld [vmem:[%s25168_s1 + $0x500] sm:$0xff]  }
 0x8bf   : > { %19006 = vmatprep.subr.bf16.mxu1 %v20472_v31 }
 0x8c2   : > { %19007 = vmatpush3.bf16.msra.mxu1 %v20042_v15  ;;  %v20081_v15 = vld [vmem:[%s25168_s1 + $0x678] sm:$0xff]  }
 0x8c3   : > { %19008 = vmatprep.subr.bf16.mxu1 %v20472_v31 }
 0x8c6   : > { %19009 = vmatpush3.bf16.msra.mxu1 %v20044_v33  ;;  %v20083_v33 = vld [vmem:[%s25168_s1 + $0x670] sm:$0xff]  }
 0x8c7   : > { %19034 = vmatprep.subr.bf16.mxu1 %v20472_v31 }
 0x949   : > { %v18916_v47 = vpop.f32.mrf.mxu1 }
 0x94b   : > { %v8904_v35 = vpop.f32.mrf.mxu1  ;;  %v18954_v56 = vpop.f32.mrf.mxu0 }
 0x94d   : > { %v9074_v26 = vpop.f32.mrf.mxu0 }
 0x959   : > { %v18935_v24 = vpop.f32.mrf.mxu1 }
 0x95a   : > { %v8998_v12 = vmax.f32 %v18916_v47, %v18935_v24  ;;  %v20085_v47 = vld [vmem:[%s25168_s1 + $0x668] sm:$0xff]   ;;  %v20087_v24 = vld [vmem:[%s25168_s1 + $0x660] sm:$0xff]  }
 0x95b   : > { %v8988_v60 = vpop.f32.mrf.mxu1 }
 0x95c   : > { %v8997_v42 = vmax.f32 %v8904_v35, %v8988_v60  ;;  %v9084_v29 = vmax.f32 %v8998_v12, %v18954_v56  ;;  %v20086_v35 = vld [vmem:[%s25168_s1 + $0x628] sm:$0xff]   ;;  %v20088_v60 = vld [vmem:[%s25168_s1 + $0x620] sm:$0xff]   ;;  %v20089_v56 = vld [vmem:[%s25168_s1 + $0x658] sm:$0xff]  }
 0x95d   : > { %v20090_v12 = vld [vmem:[%s25168_s1 + $0x618] sm:$0xff]  }
 0x95e   : > { %v9083_v62 = vmax.f32 %v8997_v42, %v9074_v26  ;;  %v20091_v42 = vld [vmem:[%s25168_s1 + $0x650] sm:$0xff]  }
 0x95f   : > { %v20092_v26 = vld [vmem:[%s25168_s1 + $0x610] sm:$0xff]  }
 0x969   : > { %v18973_v11 = vpop.f32.mrf.mxu1 }
 0x96a   : > { %v9170_v40 = vmax.f32 %v9084_v29, %v18973_v11  ;;  %v20093_v11 = vld [vmem:[%s25168_s1 + $0x648] sm:$0xff]  }
 0x96b   : > { %v9160_v46 = vpop.f32.mrf.mxu1 }
 0x96c   : > { %v9169_v17 = vmax.f32 %v9083_v62, %v9160_v46  ;;  %v20098_v62 = vld [vmem:[#allocation2 + $0x10] ss:$0 sps:$4 sm:$0x33]   ;;  %v20094_v46 = vld [vmem:[%s25168_s1 + $0x608] sm:$0xff]  }
 0x96e   : > { %v16432_v19 = vpack.c.bf16 %v9170_v40, %v9169_v17  ;;  %v20095_v40 = vld [vmem:[%s25168_s1 + $0x640] sm:$0xff]  }
 0x970   : > { %16433 = vst [vmem:[#allocation3] sm:$0xff] %v16432_v19   ;;  %v9893_v19 = vrot.slane %v20098_v62, 2 }
 0x977   : > { %v9185_v63 = vld [vmem:[#allocation3] sm:$0xf]  ;;  %v9186_v2 = vld [vmem:[#allocation3 + $0x4] sm:$0xf] }
 0x978   : > { %9187 = vst [vmem:[#allocation2 + $0x8] sm:$0xf] %v9185_v63  ;;  %9188 = vst [vmem:[#allocation2 + $0xc] sm:$0xf] %v9186_v2  ;;  %v20096_v63 = vld [vmem:[%s25168_s1 + $0x600] sm:$0xff]  }
 0x97f   : > { %v9204_v37 = vld [vmem:[#allocation2 + $0x8] sm:$0xf]  ;;  %v9361_v6 = vld [vmem:[#allocation2 + $0xc] sm:$0xf] }
 0x980   : > { %v23473_v4 = vcombine.low %v9204_v37, %v9361_v6  ;;  %v15702_v1 = vcombine.low %v9203_v41, %v9204_v37  ;;  %v20049_v0 = vld [vmem:[#allocation2 + $0xc] ss:$0 sps:$4 sm:$0x33]   ;;  %v20099_v41 = vld [vmem:[%s25168_s1 + $0x6b8] sm:$0xff]   ;;  %v20102_v6 = vld [vmem:[%s25168_s1 + $0x6a0] sm:$0xff]  }
 0x981   : > { %v9250_v10 = vrot.slane %v20049_v0, 2  ;;  %v20097_v29 = vld [vmem:[#allocation2 + $0x8] sm:$0xfc]  }
 0x982   : > { %19011 = vmatmul.mubr.bf16.vlgmr.msra.gmra.mxu1 %v23473_v4  ;;  %v9249_v28 = vrot.slane %v15702_v1, 2  ;;  %v9892_v17 = vrot.slane %v20097_v29, 2  ;;  %v20101_v37 = vld [vmem:[%s25168_s1 + $0x6a8] sm:$0xff]   ;;  %v20104_v1 = vld [vmem:[%s25168_s1 + $0x690] sm:$0xff]  }
 0x983   : > { %19035 = vmatpush3.bf16.msra.mxu1 %v20047_v61  ;;  %19050 = vmatprep.mubr.msk.bf16.mxu1 %vm20473_vm3, %v20472_v31  ;;  %v20100_v61 = vld [vmem:[%s25168_s1 + $0x6b0] sm:$0xff]   ;;  %v20105_v0 = vld [vmem:[%s25168_s1 + $0x688] sm:$0xff]  }
 0x984   : > { %v23485_v5 = vsel %vm9248_vm4, %v9249_v28, %v9250_v10  ;;  %19036 = vmatprep.subr.bf16.mxu1 %v20472_v31  ;;  %v9894_v2 = vsel %vm9248_vm4, %v9892_v17, %v9893_v19  ;;  %v20106_v28 = vld [vmem:[%s25168_s1 + $0x680] sm:$0xff]   ;;  %v25250_v10 = vmov 0  }
 0x985   : > { %18991 = vmatmul.mubr.bf16.vlgmr.msra.gmra.mxu0 %v23485_v5 }
 0x986   : > { %19015 = vmatpush3.bf16.msra.mxu0 %v20050_v58  ;;  %19030 = vmatprep.mubr.msk.bf16.mxu0 %vm20473_vm3, %v20472_v31 }
 0x987   : > { %19037 = vmatpush3.bf16.msra.mxu1 %v20051_v23  ;;  %19016 = vmatprep.subr.bf16.mxu0 %v20472_v31 }
 0x988   : > { %19038 = vmatprep.subr.bf16.mxu1 %v20472_v31 }
 0x98a   : > { %19017 = vmatpush3.bf16.msra.mxu0 %v20052_v52 }
 0x98b   : > { %19039 = vmatpush3.bf16.msra.mxu1 %v20053_v51  ;;  %19018 = vmatprep.subr.bf16.mxu0 %v20472_v31 }
 0x98c   : > { %19040 = vmatprep.subr.bf16.mxu1 %v20472_v31 }
 0x98e   : > { %19019 = vmatpush3.bf16.msra.mxu0 %v20054_v13 }
 0x98f   : > { %19041 = vmatpush3.bf16.msra.mxu1 %v20055_v7  ;;  %19020 = vmatprep.subr.bf16.mxu0 %v20472_v31 }
 0x990   : > { %19042 = vmatprep.subr.bf16.mxu1 %v20472_v31 }
 0x992   : > { %19021 = vmatpush3.bf16.msra.mxu0 %v20056_v43 }
 0x993   : > { %19043 = vmatpush3.bf16.msra.mxu1 %v20057_v38  ;;  %19022 = vmatprep.subr.bf16.mxu0 %v20472_v31  ;;  %v15669_v38 = vld [vmem:[%s25169_s2 + $0x2] ss:$0 sm:$0xff] }
 0x994   : > { %19044 = vmatprep.subr.bf16.mxu1 %v20472_v31 }
 0x996   : > { %19023 = vmatpush3.bf16.msra.mxu0 %v20058_v49 }
 0x997   : > { %19045 = vmatpush3.bf16.msra.mxu1 %v20059_v14  ;;  %19024 = vmatprep.subr.bf16.mxu0 %v20472_v31 }
 0x998   : > { %19046 = vmatprep.subr.bf16.mxu1 %v20472_v31 }
 0x99a   : > { %19025 = vmatpush3.bf16.msra.mxu0 %v20060_v16 }
 0x99b   : > { %19047 = vmatpush3.bf16.msra.mxu1 %v20061_v57  ;;  %19026 = vmatprep.subr.bf16.mxu0 %v20472_v31 }
 0x99c   : > { %19048 = vmatprep.subr.bf16.mxu1 %v20472_v31 }
 0x99e   : > { %19027 = vmatpush3.bf16.msra.mxu0 %v20062_v27  ;;  %v20110_v27 = vld [vmem:[%s25170_s3 + $0xe8] ss:$16 sps:$4 sm:$0xff]  }
 0x99f   : > { %19049 = vmatpush3.bf16.msra.mxu1 %v20063_v48  ;;  %19028 = vmatprep.subr.bf16.mxu0 %v20472_v31 }
 0x9a0   : > { %19074 = vmatprep.subr.bf16.mxu1 %v20472_v31 }
 0x9a2   : > { %19029 = vmatpush3.bf16.msra.mxu0 %v20064_v9  ;;  %19051 = vmatmul.mubr.bf16.vlgmr.msra.gmra.mxu1 %v23473_v4 }
 0x9a3   : > { %19075 = vmatpush3.bf16.msra.mxu1 %v20065_v25  ;;  %19054 = vmatprep.subr.bf16.mxu0 %v20472_v31  ;;  %v20112_v25 = vld [vmem:[%s25170_s3 + $0xec] ss:$16 sps:$4 sm:$0xff]  }
 0x9a4   : > { %19076 = vmatprep.subr.bf16.mxu1 %v20472_v31  ;;  %19090 = vmatprep.mubr.msk.bf16.mxu1 %vm20473_vm3, %v20472_v31 }
 0x9a5   : > { %19031 = vmatmul.mubr.bf16.vlgmr.msra.gmra.mxu0 %v23485_v5 }
 0x9a6   : > { %19055 = vmatpush3.bf16.msra.mxu0 %v20066_v54  ;;  %19070 = vmatprep.mubr.msk.bf16.mxu0 %vm20473_vm3, %v20472_v31 }
 0x9a7   : > { %19077 = vmatpush3.bf16.msra.mxu1 %v20067_v53  ;;  %19056 = vmatprep.subr.bf16.mxu0 %v20472_v31 }
 0x9a8   : > { %19078 = vmatprep.subr.bf16.mxu1 %v20472_v31 }
 0x9aa   : > { %19057 = vmatpush3.bf16.msra.mxu0 %v20068_v36  ;;  %v20118_v36 = vld [vmem:[%s25170_s3 + $0xcc] ss:$16 sps:$4 sm:$0xff]  }
 0x9ab   : > { %19079 = vmatpush3.bf16.msra.mxu1 %v20069_v8  ;;  %19058 = vmatprep.subr.bf16.mxu0 %v20472_v31 }
 0x9ac   : > { %19080 = vmatprep.subr.bf16.mxu1 %v20472_v31 }
 0x9ae   : > { %19059 = vmatpush3.bf16.msra.mxu0 %v20070_v59 }
 0x9af   : > { %19081 = vmatpush3.bf16.msra.mxu1 %v20071_v3  ;;  %19060 = vmatprep.subr.bf16.mxu0 %v20472_v31 }
 0x9b0   : > { %19082 = vmatprep.subr.bf16.mxu1 %v20472_v31 }
 0x9b2   : > { %19061 = vmatpush3.bf16.msra.mxu0 %v20072_v45  ;;  %v20116_v45 = vld [vmem:[%s25170_s3 + $0xc8] ss:$16 sps:$4 sm:$0xff]  }
 0x9b3   : > { %19083 = vmatpush3.bf16.msra.mxu1 %v20073_v34  ;;  %19062 = vmatprep.subr.bf16.mxu0 %v20472_v31 }
 0x9b4   : > { %19084 = vmatprep.subr.bf16.mxu1 %v20472_v31 }
 0x9b6   : > { %19063 = vmatpush3.bf16.msra.mxu0 %v20074_v20 }
 0x9b7   : > { %19085 = vmatpush3.bf16.msra.mxu1 %v20075_v39  ;;  %19064 = vmatprep.subr.bf16.mxu0 %v20472_v31 }
 0x9b8   : > { %19086 = vmatprep.subr.bf16.mxu1 %v20472_v31 }
 0x9ba   : > { %19065 = vmatpush3.bf16.msra.mxu0 %v20076_v30 }
 0x9bb   : > { %19087 = vmatpush3.bf16.msra.mxu1 %v20077_v22  ;;  %19066 = vmatprep.subr.bf16.mxu0 %v20472_v31 }
 0x9bc   : > { %19088 = vmatprep.subr.bf16.mxu1 %v20472_v31 }
 0x9be   : > { %19067 = vmatpush3.bf16.msra.mxu0 %v20078_v44 }
 0x9bf   : > { %19089 = vmatpush3.bf16.msra.mxu1 %v20079_v32  ;;  %19068 = vmatprep.subr.bf16.mxu0 %v20472_v31 }
 0x9c0   : > { %19114 = vmatprep.subr.bf16.mxu1 %v20472_v31 }
 0x9c2   : > { %19069 = vmatpush3.bf16.msra.mxu0 %v20080_v21  ;;  %19091 = vmatmul.mubr.bf16.vlgmr.msra.gmra.mxu1 %v23485_v5 }
 0x9c3   : > { %19115 = vmatpush3.bf16.msra.mxu1 %v20081_v15  ;;  %19094 = vmatprep.subr.bf16.mxu0 %v20472_v31 }
 0x9c4   : > { %19116 = vmatprep.subr.bf16.mxu1 %v20472_v31  ;;  %19130 = vmatprep.mubr.msk.bf16.mxu1 %vm20473_vm3, %v20472_v31 }
 0x9c5   : > { %19071 = vmatmul.mubr.bf16.vlgmr.msra.gmra.mxu0 %v23473_v4  ;;  %v20103_v4 = vld [vmem:[%s25168_s1 + $0x698] sm:$0xff]  }
 0x9c6   : > { %19095 = vmatpush3.bf16.msra.mxu0 %v20082_v55  ;;  %19110 = vmatprep.mubr.msk.bf16.mxu0 %vm20473_vm3, %v20472_v31 }
 0x9c7   : > { %19117 = vmatpush3.bf16.msra.mxu1 %v20083_v33  ;;  %19096 = vmatprep.subr.bf16.mxu0 %v20472_v31 }
 0x9c8   : > { %19118 = vmatprep.subr.bf16.mxu1 %v20472_v31 }
 0x9ca   : > { %19097 = vmatpush3.bf16.msra.mxu0 %v20084_v50 }
 0x9cb   : > { %19119 = vmatpush3.bf16.msra.mxu1 %v20085_v47  ;;  %19098 = vmatprep.subr.bf16.mxu0 %v20472_v31 }
 0x9cc   : > { %19120 = vmatprep.subr.bf16.mxu1 %v20472_v31 }
 0x9ce   : > { %19099 = vmatpush3.bf16.msra.mxu0 %v20086_v35 }
 0x9cf   : > { %19121 = vmatpush3.bf16.msra.mxu1 %v20087_v24  ;;  %19100 = vmatprep.subr.bf16.mxu0 %v20472_v31 }
 0x9d0   : > { %19122 = vmatprep.subr.bf16.mxu1 %v20472_v31 }
 0x9d2   : > { %19101 = vmatpush3.bf16.msra.mxu0 %v20088_v60 }
 0x9d3   : > { %19123 = vmatpush3.bf16.msra.mxu1 %v20089_v56  ;;  %19102 = vmatprep.subr.bf16.mxu0 %v20472_v31 }
 0x9d4   : > { %19124 = vmatprep.subr.bf16.mxu1 %v20472_v31 }
 0x9d6   : > { %19103 = vmatpush3.bf16.msra.mxu0 %v20090_v12 }
 0x9d7   : > { %19125 = vmatpush3.bf16.msra.mxu1 %v20091_v42  ;;  %19104 = vmatprep.subr.bf16.mxu0 %v20472_v31 }
 0x9d8   : > { %19126 = vmatprep.subr.bf16.mxu1 %v20472_v31 }
 0x9da   : > { %19105 = vmatpush3.bf16.msra.mxu0 %v20092_v26 }
 0x9db   : > { %19127 = vmatpush3.bf16.msra.mxu1 %v20093_v11  ;;  %19106 = vmatprep.subr.bf16.mxu0 %v20472_v31 }
 0x9dc   : > { %19128 = vmatprep.subr.bf16.mxu1 %v20472_v31 }
 0x9de   : > { %19107 = vmatpush3.bf16.msra.mxu0 %v20094_v46  ;;  %v9190_v46 = vld [vmem:[#allocation4 + $0x100] sm:$0xff] }
 0x9df   : > { %19129 = vmatpush3.bf16.msra.mxu1 %v20095_v40  ;;  %19108 = vmatprep.subr.bf16.mxu0 %v20472_v31  ;;  %v9191_v40 = vld [vmem:[#allocation4 + $0x108] sm:$0xff] }
 0x9e0   : > { %19154 = vmatprep.subr.mxu1 %v20472_v31 }
 0x9e2   : > { %19109 = vmatpush3.bf16.msra.mxu0 %v20096_v63  ;;  %19131 = vmatmul.mubr.bf16.vlgmr.msra.gmra.mxu1 %v9894_v2 }
 0x9e3   : > { %19134 = vmatprep.subr.bf16.mxu0 %v20472_v31  ;;  %19158 = vmatprep.mubr.msk.f32.mxu1 %vm20473_vm3, %v20472_v31 }
 0x9e5   : > { %19111 = vmatmul.mubr.bf16.vlgmr.msra.gmra.mxu0 %v9894_v2 }
 0x9e6   : > { %19135 = vmatpush3.bf16.msra.mxu0 %v20099_v41  ;;  %19150 = vmatprep.mubr.msk.bf16.mxu0 %vm20473_vm3, %v20472_v31 }
 0x9e7   : > { %19136 = vmatprep.subr.bf16.mxu0 %v20472_v31 }
 0x9ea   : > { %19137 = vmatpush3.bf16.msra.mxu0 %v20100_v61 }
 0x9eb   : > { %19138 = vmatprep.subr.bf16.mxu0 %v20472_v31 }
 0x9ee   : > { %19139 = vmatpush3.bf16.msra.mxu0 %v20101_v37 }
 0x9ef   : > { %19140 = vmatprep.subr.bf16.mxu0 %v20472_v31 }
 0x9f2   : > { %19141 = vmatpush3.bf16.msra.mxu0 %v20102_v6 }
 0x9f3   : > { %19142 = vmatprep.subr.bf16.mxu0 %v20472_v31 }
 0x9f6   : > { %19143 = vmatpush3.bf16.msra.mxu0 %v20103_v4 }
 0x9f7   : > { %19144 = vmatprep.subr.bf16.mxu0 %v20472_v31 }
 0x9fa   : > { %19145 = vmatpush3.bf16.msra.mxu0 %v20104_v1 }
 0x9fb   : > { %19146 = vmatprep.subr.bf16.mxu0 %v20472_v31 }
 0x9fe   : > { %19147 = vmatpush3.bf16.msra.mxu0 %v20105_v0 }
 0x9ff   : > { %19148 = vmatprep.subr.bf16.mxu0 %v20472_v31 }
 0xa02   : > { %19149 = vmatpush3.bf16.msra.mxu0 %v20106_v28 }
 0xa03   : > { %10760 = vmatprep.subr.bf16.mxu0 %v20112_v25  ;;  %v10221_v25 = vld [vmem:[%s25175_s8] sm:$0xf] }
 0xa05   : > { %19151 = vmatmul.mubr.bf16.vlgmr.msra.gmra.mxu0 %v9894_v2 }
 0xa06   : > { %10792 = vmatprep.mubr.bf16.mxu0 %v25250_v10  ;;  %10761 = vmatpush1.bf16.msra.mxu0 %v20110_v27 }
 0xa07   : > { %10762 = vmatprep.subr.bf16.mxu0 %v20118_v36  ;;  %v15896_v36 = vld [vmem:[%s25175_s8 + $0xc] sm:$0xf] }
 0xa0a   : > { %10763 = vmatpush1.bf16.msra.mxu0 %v20116_v45  ;;  %v20121_v45 = vld [vmem:[%s25170_s3 + $0xa4] ss:$16 sps:$4 sm:$0xff]  }
 0xa42   : > { %v9465_v58 = vpop.f32.mrf.mxu1 }
 0xa44   : > { %v19012_v23 = vpop.f32.mrf.mxu1 }
 0xa45   : > { %v9335_v5 = vpop.f32.mrf.mxu0 }
 0xa46   : > { %v9468_v52 = vpop.f32.mrf.mxu1  ;;  %v9342_v49 = vadd.f32 %v15669_v38, %v9335_v5 }
 0xa47   : > { %v18992_v51 = vpop.f32.mrf.mxu0 }
 0xa48   : > { %v19013_v13 = vpop.f32.mrf.mxu1 }
 0xa49   : > { %v9338_v7 = vpop.f32.mrf.mxu0  ;;  %v9193_v13 = vld [vmem:[#allocation4 + $0x140] sm:$0xff] }
 0xa4a   : > { %v9343_v48 = vadd.f32 %v15669_v38, %v9338_v7  ;;  %v9194_v7 = vld [vmem:[#allocation4 + $0x148] sm:$0xff] }
 0xa4b   : > { %v18993_v43 = vpop.f32.mrf.mxu0 }
 0xa62   : > { %v9660_v14 = vpop.f32.mrf.mxu1 }
 0xa63   : > { %v9667_v16 = vadd.f32 %v9660_v14, %v9342_v49 }
 0xa64   : > { %v19052_v57 = vpop.f32.mrf.mxu1 }
 0xa65   : > { %v9554_v9 = vpop.f32.mrf.mxu0 }
 0xa66   : > { %v9555_v54 = vadd.f32 %v9554_v9, %v9465_v58  ;;  %v9663_v53 = vpop.f32.mrf.mxu1 }
 0xa67   : > { %v9668_v8 = vadd.f32 %v9663_v53, %v9343_v48  ;;  %v19032_v59 = vpop.f32.mrf.mxu0  ;;  %v20109_v53 = vld [vmem:[%s25170_s3 + $0xe4] ss:$16 sps:$4 sm:$0xff]  }
 0xa68   : > { %v19053_v3 = vpop.f32.mrf.mxu1  ;;  %v20115_v59 = vld [vmem:[%s25170_s3 + $0xc4] ss:$16 sps:$4 sm:$0xff]  }
 0xa69   : > { %v9557_v34 = vpop.f32.mrf.mxu0  ;;  %v20113_v3 = vld [vmem:[%s25170_s3 + $0xc0] ss:$16 sps:$4 sm:$0xff]  }
 0xa6a   : > { %v9558_v20 = vadd.f32 %v9557_v34, %v9468_v52  ;;  %v20122_v34 = vld [vmem:[%s25170_s3 + $0xa8] ss:$16 sps:$4 sm:$0xff]  }
 0xa6b   : > { %v19033_v39 = vpop.f32.mrf.mxu0 }
 0xa6c   : > { %v20127_v39 = vld [vmem:[%s25170_s3 + $0x84] ss:$16 sps:$4 sm:$0xff]  }
 0xa82   : > { %v9857_v30 = vpop.f32.mrf.mxu1 }
 0xa84   : > { %v19092_v22 = vpop.f32.mrf.mxu1 }
 0xa85   : > { %v9768_v44 = vpop.f32.mrf.mxu0  ;;  %v20125_v22 = vld [vmem:[%s25170_s3 + $0x80] ss:$16 sps:$4 sm:$0xff]  }
 0xa86   : > { %v9858_v32 = vadd.f32 %v9857_v30, %v9768_v44  ;;  %v9860_v21 = vpop.f32.mrf.mxu1  ;;  %v20130_v30 = vld [vmem:[%s25170_s3 + $0x8c] ss:$16 sps:$4 sm:$0xff]   ;;  %v20128_v44 = vld [vmem:[%s25170_s3 + $0x88] ss:$16 sps:$4 sm:$0xff]  }
 0xa87   : > { %v19072_v15 = vpop.f32.mrf.mxu0 }
 0xa88   : > { %v19093_v55 = vpop.f32.mrf.mxu1  ;;  %v20131_v15 = vld [vmem:[%s25170_s3 + $0x60] ss:$16 sps:$4 sm:$0xff]  }
 0xa89   : > { %v9771_v33 = vpop.f32.mrf.mxu0  ;;  %v20134_v55 = vld [vmem:[%s25170_s3 + $0x68] ss:$16 sps:$4 sm:$0xff]  }
 0xa8a   : > { %v9861_v28 = vadd.f32 %v9860_v21, %v9771_v33  ;;  %v20136_v21 = vld [vmem:[%s25170_s3 + $0x6c] ss:$16 sps:$4 sm:$0xff]   ;;  %v20139_v33 = vld [vmem:[%s25170_s3 + $0x44] ss:$16 sps:$4 sm:$0xff]  }
 0xa8b   : > { %v19073_v50 = vpop.f32.mrf.mxu0 }
 0xa8c   : > { %v20142_v50 = vld [vmem:[%s25170_s3 + $0x4c] ss:$16 sps:$4 sm:$0xff]  }
 0xaa2   : > { %v10086_v47 = vpop.f32.mrf.mxu1 }
 0xaa3   : > { %v10093_v2 = vadd.f32 %v10086_v47, %v9667_v16  ;;  %v20137_v47 = vld [vmem:[%s25170_s3 + $0x40] ss:$16 sps:$4 sm:$0xff]  }
 0xaa4   : > { %v19132_v35 = vpop.f32.mrf.mxu1 }
 0xaa5   : > { %v9978_v24 = vpop.f32.mrf.mxu0  ;;  %v20140_v35 = vld [vmem:[%s25170_s3 + $0x48] ss:$16 sps:$4 sm:$0xff]  }
 0xaa6   : > { %v10089_v60 = vpop.f32.mrf.mxu1  ;;  %v9985_v12 = vadd.f32 %v9978_v24, %v9555_v54  ;;  %v15894_v54 = vld [vmem:[%s25175_s8 + $0x8] sm:$0xf]  ;;  %v20145_v24 = vld [vmem:[%s25170_s3 + $0x24] ss:$16 sps:$4 sm:$0xff]  }
 0xaa7   : > { %v19112_v56 = vpop.f32.mrf.mxu0  ;;  %v10094_v41 = vadd.f32 %v10089_v60, %v9668_v8  ;;  %v20107_v8 = vld [vmem:[%s25170_s3 + $0xe0] ss:$16 sps:$4 sm:$0xff]   ;;  %v20148_v60 = vld [vmem:[%s25170_s3 + $0x2c] ss:$16 sps:$4 sm:$0xff]  }
 0xaa8   : > { %v19133_v42 = vpop.f32.mrf.mxu1  ;;  %v10203_v62 = vrot.slane %v9985_v12, 7  ;;  %v20143_v56 = vld [vmem:[%s25170_s3 + $0x20] ss:$16 sps:$4 sm:$0xff]   ;;  %v20146_v12 = vld [vmem:[%s25170_s3 + $0x28] ss:$16 sps:$4 sm:$0xff]  }
 0xaa9   : > { %v9981_v26 = vpop.f32.mrf.mxu0  ;;  %v20151_v42 = vld [vmem:[%s25170_s3 + $0x4] ss:$16 sps:$4 sm:$0xff]  }
 0xaaa   : > { %v9986_v11 = vadd.f32 %v9981_v26, %v9558_v20  ;;  %v20124_v20 = vld [vmem:[%s25170_s3 + $0xac] ss:$16 sps:$4 sm:$0xff]  }
 0xaab   : > { %v19113_v29 = vpop.f32.mrf.mxu0  ;;  %10764 = vmatprep.subr.bf16.mxu0 %v20124_v20  ;;  %v20154_v26 = vld [vmem:[%s25170_s3 + $0xc] ss:$16 sps:$4 sm:$0xff]   ;;  %v20175_v20 = vld [vmem:[%s25170_s3 + $0x184] ss:$16 sps:$4 sm:$0xff]  }
 0xaac   : > { %v10204_v17 = vrot.slane %v9986_v11, 7  ;;  %10765 = vmatpush1.bf16.msra.mxu0 %v20122_v34  ;;  %v20149_v11 = vld [vmem:[%s25170_s3] ss:$16 sps:$4 sm:$0xff]   ;;  %v20152_v29 = vld [vmem:[%s25170_s3 + $0x8] ss:$16 sps:$4 sm:$0xff]  }
 0xaad   : > { %10766 = vmatprep.subr.bf16.mxu0 %v20130_v30  ;;  %v20167_v34 = vld [vmem:[%s25170_s3 + $0x1a0] ss:$16 sps:$4 sm:$0xff]  }
 0xaae   : > { %v10205_v19 = vsel %vm1837_vm1, %v10203_v62, %v10204_v17  ;;  %v10206_v63 = vsel %vm1837_vm1, %v10204_v17, %v10203_v62  ;;  %v20173_v30 = vld [vmem:[%s25170_s3 + $0x180] ss:$16 sps:$4 sm:$0xff]  }
 0xaaf   : > { %v10207_v61 = vmul.f32 %v10206_v63, %v9190_v46  ;;  %v10208_v37 = vmul.f32 %v10205_v19, %v9191_v40 }
 0xab0   : > { %10767 = vmatpush1.bf16.msra.mxu0 %v20128_v44  ;;  %v20184_v44 = vld [vmem:[%s25170_s3 + $0x16c] ss:$16 sps:$4 sm:$0xff]  }
 0xab1   : > { %v10209_v6 = vadd.f32 %v10207_v61, %v10093_v2  ;;  %v10210_v4 = vadd.f32 %v10208_v37, %v10094_v41  ;;  %10768 = vmatprep.subr.bf16.mxu0 %v20136_v21  ;;  %v20182_v21 = vld [vmem:[%s25170_s3 + $0x168] ss:$16 sps:$4 sm:$0xff]  }
 0xab4   : > { %10769 = vmatpush1.bf16.msra.mxu0 %v20134_v55  ;;  %v20190_v55 = vld [vmem:[%s25170_s3 + $0x14c] ss:$16 sps:$4 sm:$0xff]  }
 0xab5   : > { %10770 = vmatprep.subr.bf16.mxu0 %v20142_v50  ;;  %v20188_v50 = vld [vmem:[%s25170_s3 + $0x148] ss:$16 sps:$4 sm:$0xff]  }
 0xab8   : > { %10771 = vmatpush1.bf16.msra.mxu0 %v20140_v35  ;;  %v20196_v35 = vld [vmem:[%s25170_s3 + $0x12c] ss:$16 sps:$4 sm:$0xff]  }
 0xab9   : > { %10772 = vmatprep.subr.bf16.mxu0 %v20148_v60  ;;  %v20194_v60 = vld [vmem:[%s25170_s3 + $0x128] ss:$16 sps:$4 sm:$0xff]  }
 0xabc   : > { %10773 = vmatpush1.bf16.msra.mxu0 %v20146_v12  ;;  %v20202_v12 = vld [vmem:[%s25170_s3 + $0x10c] ss:$16 sps:$4 sm:$0xff]  }
 0xabd   : > { %10774 = vmatprep.subr.bf16.mxu0 %v20154_v26  ;;  %v20200_v26 = vld [vmem:[%s25170_s3 + $0x108] ss:$16 sps:$4 sm:$0xff]  }
 0xac0   : > { %10775 = vmatpush1.bf16.msra.mxu0 %v20152_v29  ;;  %v15930_v29 = vld [vmem:[%s25171_s4] ss:$0 sm:$0xff] }
 0xac5   : > { %v10194_v1 = vpop.f32.mrf.mxu0 }
 0xac6   : > { %v10201_v58 = vadd.f32 %v10194_v1, %v9858_v32  ;;  %v20133_v32 = vld [vmem:[%s25170_s3 + $0x64] ss:$16 sps:$4 sm:$0xff]  }
 0xac7   : > { %v19152_v0 = vpop.f32.mrf.mxu0 }
 0xac8   : > { %v10211_v51 = vrot.slane %v10201_v58, 1  ;;  %v10808_v0 = vld [vmem:[%s25176_s9] sm:$0xff] }
 0xac9   : > { %v10197_v23 = vpop.f32.mrf.mxu0 }
 0xaca   : > { %v10202_v5 = vadd.f32 %v10197_v23, %v9861_v28  ;;  %v15944_v28 = vld [vmem:[%s25176_s9 + $0x30] sm:$0xff] }
 0xacb   : > { %v19153_v52 = vpop.f32.mrf.mxu0 }
 0xacc   : > { %v10212_v43 = vrot.slane %v10202_v5, 1  ;;  %v10809_v5 = vld [vmem:[%s25176_s9 + $0x8] sm:$0xff] }
 0xace   : > { %v10213_v38 = vsel %vm1870_vm2, %v10211_v51, %v10212_v43  ;;  %v10214_v49 = vsel %vm1870_vm2, %v10212_v43, %v10211_v51  ;;  %v20160_v43 = vld [vmem:[%s25170_s3 + $0x1ec] ss:$16 sps:$4 sm:$0xff]  }
 0xacf   : > { %v10215_v14 = vmul.f32 %v10213_v38, %v9193_v13  ;;  %v10216_v16 = vmul.f32 %v10214_v49, %v9194_v7  ;;  %v15934_v13 = vld [vmem:[%s25176_s9 + $0x10] sm:$0xff]  ;;  %v15945_v7 = vld [vmem:[%s25176_s9 + $0x38] sm:$0xff] }
 0xad1   : > { %v10218_v57 = vadd.f32 %v10216_v16, %v10210_v4  ;;  %v10217_v27 = vadd.f32 %v10215_v14, %v10209_v6  ;;  %v15935_v14 = vld [vmem:[%s25176_s9 + $0x18] sm:$0xff]  ;;  %v15939_v16 = vld [vmem:[%s25176_s9 + $0x20] sm:$0xff] }
 0xad3   : > { %v10220_v48 = vmax.f32 %v10218_v57, 0.0  ;;  %v10219_v9 = vmax.f32 %v10217_v27, 0.0  ;;  %v20157_v57 = vld [vmem:[%s25170_s3 + $0x1e4] ss:$16 sps:$4 sm:$0xff]   ;;  %v20158_v27 = vld [vmem:[%s25170_s3 + $0x1e8] ss:$16 sps:$4 sm:$0xff]  }
 0xad5   : > { %19155 = vmatpush3.msra.mxu1 %v10220_v48 }
 0xad6   : > { %19156 = vmatprep.subr.mxu1 %v20472_v31 }
 0xad7   : > { %19157 = vmatpush3.msra.mxu1 %v10219_v9 }
 0xad8   : > { %19159 = vmatmul.mubr.msk.f32.vlgmr.msra.gmra.mxu1 %vm10222_vm5, %v10221_v25  ;;  %19161 = vmatprep.subr.mxu1 %v20472_v31  ;;  %v20166_v25 = vld [vmem:[%s25170_s3 + $0x1cc] ss:$16 sps:$4 sm:$0xff]  }
 0xad9   : > { %19162 = vmatpush3.msra.mxu1 %v10220_v48  ;;  %19165 = vmatprep.mubr.msk.f32.mxu1 %vm20473_vm3, %v20472_v31 }
 0xada   : > { %19163 = vmatprep.subr.mxu1 %v20472_v31 }
 0xadb   : > { %19164 = vmatpush3.msra.mxu1 %v10219_v9 }
 0xadc   : > { %19166 = vmatmul.mubr.msk.f32.vlgmr.msra.gmra.mxu1 %vm10222_vm5, %v15892_v18  ;;  %19168 = vmatprep.subr.mxu1 %v20472_v31  ;;  %v15940_v18 = vld [vmem:[%s25176_s9 + $0x28] sm:$0xff] }
 0xadd   : > { %19169 = vmatpush3.msra.mxu1 %v10220_v48  ;;  %19172 = vmatprep.mubr.msk.f32.mxu1 %vm20473_vm3, %v20472_v31 }
 0xade   : > { %19170 = vmatprep.subr.mxu1 %v20472_v31 }
 0xadf   : > { %19171 = vmatpush3.msra.mxu1 %v10219_v9 }
 0xae0   : > { %19173 = vmatmul.mubr.msk.f32.vlgmr.msra.gmra.mxu1 %vm10222_vm5, %v15894_v54  ;;  %19175 = vmatprep.subr.mxu1 %v20472_v31  ;;  %v20155_v54 = vld [vmem:[%s25170_s3 + $0x1e0] ss:$16 sps:$4 sm:$0xff]  }
 0xae1   : > { %19176 = vmatpush3.msra.mxu1 %v10220_v48  ;;  %19179 = vmatprep.mubr.msk.f32.mxu1 %vm20473_vm3, %v20472_v31 }
 0xae2   : > { %19177 = vmatprep.subr.mxu1 %v20472_v31  ;;  %v20119_v31 = vld [vmem:[%s25170_s3 + $0xa0] ss:$16 sps:$4 sm:$0xff]  }
 0xae3   : > { %19178 = vmatpush3.msra.mxu1 %v10219_v9 }
 0xae4   : > { %19180 = vmatmul.mubr.msk.f32.vlgmr.msra.gmra.mxu1 %vm10222_vm5, %v15896_v36  ;;  %10719 = vmatprep.subr.bf16.mxu1 %v20109_v53  ;;  %v20163_v53 = vld [vmem:[%s25170_s3 + $0x1c4] ss:$16 sps:$4 sm:$0xff]   ;;  %v20164_v36 = vld [vmem:[%s25170_s3 + $0x1c8] ss:$16 sps:$4 sm:$0xff]  }
 0xae5   : > { %10720 = vmatpush1.bf16.msra.mxu1 %v20107_v8  ;;  %10751 = vmatprep.mubr.bf16.mxu1 %v25250_v10  ;;  %v20172_v8 = vld [vmem:[%s25170_s3 + $0x1ac] ss:$16 sps:$4 sm:$0xff]  }
 0xae6   : > { %10721 = vmatprep.subr.bf16.mxu1 %v20115_v59  ;;  %v20161_v59 = vld [vmem:[%s25170_s3 + $0x1c0] ss:$16 sps:$4 sm:$0xff]  }
 0xae9   : > { %10722 = vmatpush1.bf16.msra.mxu1 %v20113_v3  ;;  %v20169_v3 = vld [vmem:[%s25170_s3 + $0x1a4] ss:$16 sps:$4 sm:$0xff]  }
 0xaea   : > { %10723 = vmatprep.subr.bf16.mxu1 %v20121_v45  ;;  %v20178_v45 = vld [vmem:[%s25170_s3 + $0x18c] ss:$16 sps:$4 sm:$0xff]  }
 0xaed   : > { %10724 = vmatpush1.bf16.msra.mxu1 %v20119_v31  ;;  %v20170_v31 = vld [vmem:[%s25170_s3 + $0x1a8] ss:$16 sps:$4 sm:$0xff]  }
 0xaee   : > { %10725 = vmatprep.subr.bf16.mxu1 %v20127_v39  ;;  %v20176_v39 = vld [vmem:[%s25170_s3 + $0x188] ss:$16 sps:$4 sm:$0xff]  }
 0xaf1   : > { %10726 = vmatpush1.bf16.msra.mxu1 %v20125_v22  ;;  %v20181_v22 = vld [vmem:[%s25170_s3 + $0x164] ss:$16 sps:$4 sm:$0xff]  }
 0xaf2   : > { %10727 = vmatprep.subr.bf16.mxu1 %v20133_v32  ;;  %v20179_v32 = vld [vmem:[%s25170_s3 + $0x160] ss:$16 sps:$4 sm:$0xff]  }
 0xaf5   : > { %10728 = vmatpush1.bf16.msra.mxu1 %v20131_v15  ;;  %v20187_v15 = vld [vmem:[%s25170_s3 + $0x144] ss:$16 sps:$4 sm:$0xff]  }
 0xaf6   : > { %10729 = vmatprep.subr.bf16.mxu1 %v20139_v33  ;;  %v20185_v33 = vld [vmem:[%s25170_s3 + $0x140] ss:$16 sps:$4 sm:$0xff]  }
 0xaf9   : > { %10730 = vmatpush1.bf16.msra.mxu1 %v20137_v47  ;;  %v20193_v47 = vld [vmem:[%s25170_s3 + $0x124] ss:$16 sps:$4 sm:$0xff]  }
 0xafa   : > { %10731 = vmatprep.subr.bf16.mxu1 %v20145_v24  ;;  %v20191_v24 = vld [vmem:[%s25170_s3 + $0x120] ss:$16 sps:$4 sm:$0xff]  }
 0xafd   : > { %10732 = vmatpush1.bf16.msra.mxu1 %v20143_v56  ;;  %v20199_v56 = vld [vmem:[%s25170_s3 + $0x104] ss:$16 sps:$4 sm:$0xff]  }
 0xafe   : > { %10733 = vmatprep.subr.bf16.mxu1 %v20151_v42  ;;  %v20197_v42 = vld [vmem:[%s25170_s3 + $0x100] ss:$16 sps:$4 sm:$0xff]  }
 0xb01   : > { %10734 = vmatpush1.bf16.msra.mxu1 %v20149_v11 }
 0xb98   : > { %v10292_v62 = vpop.f32.mrf.mxu1 }
 0xb9a   : > { %v19160_v46 = vpop.f32.mrf.mxu1 }
 0xb9c   : > { %v10367_v40 = vpop.f32.mrf.mxu1 }
 0xb9d   : > { %v10371_v63 = vmax.f32 %v10292_v62, %v10367_v40 }
 0xb9e   : > { %v19167_v17 = vpop.f32.mrf.mxu1 }
 0xba0   : > { %v10443_v19 = vpop.f32.mrf.mxu1 }
 0xba1   : > { %v10447_v41 = vmax.f32 %v10371_v63, %v10443_v19 }
 0xba2   : > { %v19174_v2 = vpop.f32.mrf.mxu1 }
 0xba4   : > { %v10519_v61 = vpop.f32.mrf.mxu1 }
 0xba5   : > { %v10523_v37 = vmax.f32 %v10447_v41, %v10519_v61 }
 0xba6   : > { %v19181_v6 = vpop.f32.mrf.mxu1 }
 0xba7   : > { %v10524_v4 = vpack.c.bf16 %v10523_v37, %v10523_v37 }
 0xba9   : > { %10525 = vst [vmem:[#allocation3] sm:$0x3] %v10524_v4 }
 0xbb0   : > { %v10526_v1 = vld [vmem:[#allocation3] sm:$0x3] }
 0xbb1   : > { %10752 = vmatmul.mubr.bf16.vlgmr.msra.gmra.mxu1 %v10526_v1  ;;  %10793 = vmatmul.mubr.bf16.vlgmr.msra.gmra.mxu0 %v10526_v1 }
 0xbb2   : > { %19184 = vmatprep.mubr.msk.f32.mxu1 %vm10810_vm6, %v10808_v0  ;;  %19199 = vmatprep.mubr.msk.f32.mxu0 %vm10810_vm6, %v15944_v28 }
 0xc71   : > { %v10753_v58 = vpop.f32.mrf.mxu1  ;;  %v10794_v23 = vpop.f32.mrf.mxu0 }
 0xc72   : > { %19182 = vmatprep.subr.msk.mxu1 %vm10817_vm7, %v10753_v58 }
 0xc73   : > { %v10755_v52 = vpop.f32.mrf.mxu1  ;;  %v10796_v51 = vpop.f32.mrf.mxu0  ;;  %19183 = vmatpush3.msk.msra.mxu1 %vm10817_vm7, %v10753_v58 }
 0xc74   : > { %19185 = vmatmul.mubr.msk.f32.vlgmr.msra.gmra.mxu1 %vm10810_vm6, %v10809_v5  ;;  %19187 = vmatprep.subr.msk.mxu1 %vm10817_vm7, %v10755_v52 }
 0xc75   : > { %19197 = vmatprep.subr.msk.mxu0 %vm10817_vm7, %v10796_v51  ;;  %v10757_v38 = vpop.f32.mrf.mxu1  ;;  %v10798_v49 = vpop.f32.mrf.mxu0  ;;  %19188 = vmatpush3.msk.msra.mxu1 %vm10817_vm7, %v10755_v52  ;;  %v11455_v52 = vld [vmem:[%s25177_s10] sm:$0xff] }
 0xc76   : > { %19198 = vmatpush3.msk.msra.mxu0 %vm10817_vm7, %v10796_v51  ;;  %19192 = vmatprep.subr.msk.mxu1 %vm10817_vm7, %v10794_v23  ;;  %v16023_v51 = vld [vmem:[%s25177_s10 + $0x40] sm:$0xff] }
 0xc77   : > { %v10758_v48 = vpop.f32.mrf.mxu1  ;;  %v10799_v9 = vpop.f32.mrf.mxu0  ;;  %19189 = vmatprep.mubr.msk.f32.mxu1 %vm10810_vm6, %v15934_v13  ;;  %19200 = vmatmul.mubr.msk.f32.vlgmr.msra.gmra.mxu0 %vm10810_vm6, %v15945_v7 }
 0xc78   : > { %19190 = vmatmul.mubr.msk.f32.vlgmr.msra.gmra.mxu1 %vm10810_vm6, %v15935_v14  ;;  %11404 = vmatprep.subr.bf16.mxu0 %v20160_v43  ;;  %v11457_v48 = vld [vmem:[%s25177_s10 + $0x10] sm:$0xff] }
 0xc79   : > { %19193 = vmatpush3.msk.msra.mxu1 %vm10817_vm7, %v10794_v23  ;;  %19194 = vmatprep.mubr.msk.f32.mxu1 %vm10810_vm6, %v15939_v16  ;;  %v11456_v16 = vld [vmem:[%s25177_s10 + $0x8] sm:$0xff] }
 0xc7a   : > { %11361 = vmatprep.subr.bf16.mxu1 %v20157_v57  ;;  %11405 = vmatpush1.bf16.msra.mxu0 %v20158_v27  ;;  %v16024_v27 = vld [vmem:[%s25177_s10 + $0x48] sm:$0xff] }
 0xc7b   : > { %11406 = vmatprep.subr.bf16.mxu0 %v20166_v25  ;;  %11436 = vmatprep.mubr.bf16.mxu0 %v25250_v10  ;;  %v11458_v25 = vld [vmem:[%s25177_s10 + $0x18] sm:$0xff] }
 0xc7c   : > { %19195 = vmatmul.mubr.msk.f32.vlgmr.msra.gmra.mxu1 %vm10810_vm6, %v15940_v18  ;;  %v16025_v18 = vld [vmem:[%s25177_s10 + $0x50] sm:$0xff] }
 0xc7d   : > { %11362 = vmatpush1.bf16.msra.mxu1 %v20155_v54  ;;  %11393 = vmatprep.mubr.bf16.mxu1 %v25250_v10  ;;  %v11459_v54 = vld [vmem:[%s25177_s10 + $0x20] sm:$0xff] }
 0xc7e   : > { %11363 = vmatprep.subr.bf16.mxu1 %v20163_v53  ;;  %11407 = vmatpush1.bf16.msra.mxu0 %v20164_v36  ;;  %v20205_v53 = vld [vmem:[%s25170_s3 + $0x2e4] ss:$16 sps:$4 sm:$0xff]   ;;  %v16026_v36 = vld [vmem:[%s25177_s10 + $0x58] sm:$0xff] }
 0xc7f   : > { %11408 = vmatprep.subr.bf16.mxu0 %v20172_v8  ;;  %v11460_v8 = vld [vmem:[%s25177_s10 + $0x28] sm:$0xff] }
 0xc81   : > { %11364 = vmatpush1.bf16.msra.mxu1 %v20161_v59  ;;  %v16027_v59 = vld [vmem:[%s25177_s10 + $0x60] sm:$0xff] }
 0xc82   : > { %11365 = vmatprep.subr.bf16.mxu1 %v20169_v3  ;;  %11409 = vmatpush1.bf16.msra.mxu0 %v20170_v31  ;;  %v20208_v3 = vld [vmem:[%s25170_s3 + $0x2ec] ss:$16 sps:$4 sm:$0xff]   ;;  %v11461_v31 = vld [vmem:[%s25177_s10 + $0x30] sm:$0xff] }
 0xc83   : > { %11410 = vmatprep.subr.bf16.mxu0 %v20178_v45  ;;  %v16028_v45 = vld [vmem:[%s25177_s10 + $0x68] sm:$0xff] }
 0xc85   : > { %11366 = vmatpush1.bf16.msra.mxu1 %v20167_v34  ;;  %v11462_v34 = vld [vmem:[%s25177_s10 + $0x38] sm:$0xff] }
 0xc86   : > { %11367 = vmatprep.subr.bf16.mxu1 %v20175_v20  ;;  %11411 = vmatpush1.bf16.msra.mxu0 %v20176_v39  ;;  %v16029_v20 = vld [vmem:[%s25177_s10 + $0x70] sm:$0xff]  ;;  %v16039_v39 = vld [vmem:[%s25177_s10 + $0x80] sm:$0xff] }
 0xc87   : > { %11412 = vmatprep.subr.bf16.mxu0 %v20184_v44  ;;  %v16055_v44 = vld [vmem:[%s25177_s10 + $0xc0] sm:$0xff] }
 0xc89   : > { %11368 = vmatpush1.bf16.msra.mxu1 %v20173_v30  ;;  %v16030_v30 = vld [vmem:[%s25177_s10 + $0x78] sm:$0xff] }
 0xc8a   : > { %11369 = vmatprep.subr.bf16.mxu1 %v20181_v22  ;;  %11413 = vmatpush1.bf16.msra.mxu0 %v20182_v21  ;;  %v16040_v22 = vld [vmem:[%s25177_s10 + $0x88] sm:$0xff]  ;;  %v16041_v21 = vld [vmem:[%s25177_s10 + $0x90] sm:$0xff] }
 0xc8b   : > { %11414 = vmatprep.subr.bf16.mxu0 %v20190_v55  ;;  %v16056_v55 = vld [vmem:[%s25177_s10 + $0xc8] sm:$0xff] }
 0xc8d   : > { %11370 = vmatpush1.bf16.msra.mxu1 %v20179_v32  ;;  %v20203_v32 = vld [vmem:[%s25170_s3 + $0x2e0] ss:$16 sps:$4 sm:$0xff]  }
 0xc8e   : > { %11371 = vmatprep.subr.bf16.mxu1 %v20187_v15  ;;  %11415 = vmatpush1.bf16.msra.mxu0 %v20188_v50  ;;  %v20211_v15 = vld [vmem:[%s25170_s3 + $0x2c4] ss:$16 sps:$4 sm:$0xff]  }
 0xc8f   : > { %11416 = vmatprep.subr.bf16.mxu0 %v20196_v35  ;;  %v16057_v50 = vld [vmem:[%s25177_s10 + $0xd0] sm:$0xff]  ;;  %v16043_v35 = vld [vmem:[%s25177_s10 + $0xa0] sm:$0xff] }
 0xc91   : > { %11372 = vmatpush1.bf16.msra.mxu1 %v20185_v33  ;;  %v16042_v33 = vld [vmem:[%s25177_s10 + $0x98] sm:$0xff] }
 0xc92   : > { %11373 = vmatprep.subr.bf16.mxu1 %v20193_v47  ;;  %11417 = vmatpush1.bf16.msra.mxu0 %v20194_v60  ;;  %v20206_v47 = vld [vmem:[%s25170_s3 + $0x2e8] ss:$16 sps:$4 sm:$0xff]   ;;  %v20214_v60 = vld [vmem:[%s25170_s3 + $0x2cc] ss:$16 sps:$4 sm:$0xff]  }
 0xc93   : > { %11418 = vmatprep.subr.bf16.mxu0 %v20202_v12  ;;  %v16044_v12 = vld [vmem:[%s25177_s10 + $0xa8] sm:$0xff] }
 0xc95   : > { %11374 = vmatpush1.bf16.msra.mxu1 %v20191_v24  ;;  %v20209_v24 = vld [vmem:[%s25170_s3 + $0x2c0] ss:$16 sps:$4 sm:$0xff]  }
 0xc96   : > { %11375 = vmatprep.subr.bf16.mxu1 %v20199_v56  ;;  %11419 = vmatpush1.bf16.msra.mxu0 %v20200_v26  ;;  %v16058_v56 = vld [vmem:[%s25177_s10 + $0xd8] sm:$0xff] }
 0xc97   : > { %v20212_v26 = vld [vmem:[%s25170_s3 + $0x2c8] ss:$16 sps:$4 sm:$0xff]  }
 0xc99   : > { %11376 = vmatpush1.bf16.msra.mxu1 %v20197_v42  ;;  %v16059_v42 = vld [vmem:[%s25177_s10 + $0xe0] sm:$0xff] }
 0xd34   : > { %v19186_v11 = vpop.f32.mrf.mxu1 }
 0xd35   : > { %v10897_v40 = vadd.f32 %v19186_v11, %v15930_v29  ;;  %v16045_v11 = vld [vmem:[%s25177_s10 + $0xb0] sm:$0xff] }
 0xd36   : > { %v10887_v62 = vpop.f32.mrf.mxu1 }
 0xd37   : > { %v10896_v19 = vadd.f32 %v15930_v29, %v10887_v62  ;;  %v19201_v41 = vpop.f32.mrf.mxu0  ;;  %v16060_v29 = vld [vmem:[%s25177_s10 + $0xe8] sm:$0xff]  ;;  %v16046_v62 = vld [vmem:[%s25177_s10 + $0xb8] sm:$0xff] }
 0xd38   : > { %v19191_v46 = vpop.f32.mrf.mxu1 }
 0xd39   : > { %v10986_v63 = vadd.f32 %v19191_v46, %v10897_v40  ;;  %v11154_v0 = vpop.f32.mrf.mxu0  ;;  %v16061_v46 = vld [vmem:[%s25177_s10 + $0xf0] sm:$0xff]  ;;  %v16062_v40 = vld [vmem:[%s25177_s10 + $0xf8] sm:$0xff] }
 0xd3a   : > { %v10976_v17 = vpop.f32.mrf.mxu1 }
 0xd3b   : > { %v10985_v61 = vadd.f32 %v10976_v17, %v10896_v19  ;;  %v20215_v17 = vld [vmem:[%s25170_s3 + $0x2a0] ss:$16 sps:$4 sm:$0xff]   ;;  %v20217_v19 = vld [vmem:[%s25170_s3 + $0x2a4] ss:$16 sps:$4 sm:$0xff]  }
 0xd3c   : > { %v19196_v2 = vpop.f32.mrf.mxu1 }
 0xd3d   : > { %v11075_v37 = vadd.f32 %v19196_v2, %v10986_v63  ;;  %v20218_v63 = vld [vmem:[%s25170_s3 + $0x2a8] ss:$16 sps:$4 sm:$0xff]   ;;  %v20220_v2 = vld [vmem:[%s25170_s3 + $0x2ac] ss:$16 sps:$4 sm:$0xff]  }
 0xd3e   : > { %v11065_v6 = vpop.f32.mrf.mxu1 }
 0xd3f   : > { %v11164_v4 = vadd.f32 %v19201_v41, %v11075_v37  ;;  %v11074_v1 = vadd.f32 %v11065_v6, %v10985_v61  ;;  %v20223_v41 = vld [vmem:[%s25170_s3 + $0x284] ss:$16 sps:$4 sm:$0xff]   ;;  %v20226_v61 = vld [vmem:[%s25170_s3 + $0x28c] ss:$16 sps:$4 sm:$0xff]   ;;  %v20221_v37 = vld [vmem:[%s25170_s3 + $0x280] ss:$16 sps:$4 sm:$0xff]  }
 0xd40   : > { %v20224_v6 = vld [vmem:[%s25170_s3 + $0x288] ss:$16 sps:$4 sm:$0xff]  }
 0xd41   : > { %v11163_v28 = vadd.f32 %v11154_v0, %v11074_v1  ;;  %v11166_v58 = vmax.f32 %v11164_v4, 0.0  ;;  %v20229_v4 = vld [vmem:[%s25170_s3 + $0x264] ss:$16 sps:$4 sm:$0xff]   ;;  %v20232_v1 = vld [vmem:[%s25170_s3 + $0x26c] ss:$16 sps:$4 sm:$0xff]  }
 0xd42   : > { %v20227_v0 = vld [vmem:[%s25170_s3 + $0x260] ss:$16 sps:$4 sm:$0xff]  }
 0xd43   : > { %v11165_v23 = vmax.f32 %v11163_v28, 0.0  ;;  %v20230_v28 = vld [vmem:[%s25170_s3 + $0x268] ss:$16 sps:$4 sm:$0xff]  }
 0xd45   : > { %v11167_v5 = vpack.c.bf16 %v11166_v58, %v11165_v23  ;;  %v20235_v58 = vld [vmem:[%s25170_s3 + $0x244] ss:$16 sps:$4 sm:$0xff]   ;;  %v20238_v23 = vld [vmem:[%s25170_s3 + $0x24c] ss:$16 sps:$4 sm:$0xff]  }
 0xd47   : > { %11394 = vmatmul.mubr.bf16.vlgmr.msra.gmra.mxu1 %v11167_v5  ;;  %11437 = vmatmul.mubr.bf16.vlgmr.msra.gmra.mxu0 %v11167_v5  ;;  %v20233_v5 = vld [vmem:[%s25170_s3 + $0x240] ss:$16 sps:$4 sm:$0xff]  }
 0xd48   : > { %19206 = vmatprep.mubr.msk.f32.mxu1 %vm10222_vm5, %v11455_v52  ;;  %19222 = vmatprep.mubr.msk.f32.mxu0 %vm10222_vm5, %v16023_v51  ;;  %v20236_v52 = vld [vmem:[%s25170_s3 + $0x248] ss:$16 sps:$4 sm:$0xff]   ;;  %v20241_v51 = vld [vmem:[%s25170_s3 + $0x224] ss:$16 sps:$4 sm:$0xff]  }
 0xe07   : > { %v11395_v13 = vpop.f32.mrf.mxu1  ;;  %v11438_v7 = vpop.f32.mrf.mxu0 }
 0xe09   : > { %v11397_v43 = vpop.f32.mrf.mxu1  ;;  %v11440_v38 = vpop.f32.mrf.mxu0 }
 0xe0b   : > { %v11399_v49 = vpop.f32.mrf.mxu1  ;;  %v11442_v57 = vpop.f32.mrf.mxu0 }
 0xe0c   : > { %19202 = vmatprep.subr.mxu1 %v11399_v49 }
 0xe0d   : > { %v11401_v14 = vpop.f32.mrf.mxu1  ;;  %19203 = vmatpush3.msra.mxu1 %v11399_v49  ;;  %v11444_v9 = vpop.f32.mrf.mxu0  ;;  %v20250_v49 = vld [vmem:[%s25170_s3 + $0x20c] ss:$16 sps:$4 sm:$0xff]  }
 0xe0e   : > { %19204 = vmatprep.subr.mxu1 %v11395_v13  ;;  %19218 = vmatprep.subr.mxu0 %v11401_v14 }
 0xe0f   : > { %19205 = vmatpush3.msra.mxu1 %v11395_v13  ;;  %19219 = vmatpush3.msra.mxu0 %v11401_v14  ;;  %v20244_v13 = vld [vmem:[%s25170_s3 + $0x22c] ss:$16 sps:$4 sm:$0xff]   ;;  %v20245_v14 = vld [vmem:[%s25170_s3 + $0x200] ss:$16 sps:$4 sm:$0xff]  }
 0xe10   : > { %19207 = vmatmul.mubr.msk.f32.vlgmr.msra.gmra.mxu1 %vm10222_vm5, %v11456_v16  ;;  %19220 = vmatprep.subr.mxu0 %v11397_v43  ;;  %v20248_v16 = vld [vmem:[%s25170_s3 + $0x208] ss:$16 sps:$4 sm:$0xff]  }
 0xe11   : > { %19234 = vmatprep.subr.mxu1 %v11442_v57  ;;  %19221 = vmatpush3.msra.mxu0 %v11397_v43  ;;  %v20242_v43 = vld [vmem:[%s25170_s3 + $0x228] ss:$16 sps:$4 sm:$0xff]  }
 0xe12   : > { %19235 = vmatpush3.msra.mxu1 %v11442_v57  ;;  %19223 = vmatmul.mubr.msk.f32.vlgmr.msra.gmra.mxu0 %vm10222_vm5, %v16024_v27 }
 0xe13   : > { %19236 = vmatprep.subr.mxu1 %v11438_v7  ;;  %19250 = vmatprep.subr.mxu0 %v11444_v9 }
 0xe14   : > { %19209 = vmatprep.mubr.msk.f32.mxu1 %vm10222_vm5, %v11457_v48  ;;  %19237 = vmatpush3.msra.mxu1 %v11438_v7  ;;  %v20239_v7 = vld [vmem:[%s25170_s3 + $0x220] ss:$16 sps:$4 sm:$0xff]  }
 0xe15   : > { %19251 = vmatpush3.msra.mxu0 %v11444_v9  ;;  %19210 = vmatmul.mubr.msk.f32.gmra.mxu1 %vm10222_vm5, %v11458_v25 }
 0xe16   : > { %19252 = vmatprep.subr.mxu0 %v11440_v38  ;;  %19225 = vmatprep.mubr.msk.f32.mxu0 %vm10222_vm5, %v16025_v18 }
 0xe17   : > { %19253 = vmatpush3.msra.mxu0 %v11440_v38  ;;  %19212 = vmatprep.mubr.msk.f32.mxu1 %vm10222_vm5, %v11459_v54  ;;  %v20247_v38 = vld [vmem:[%s25170_s3 + $0x204] ss:$16 sps:$4 sm:$0xff]  }
 0xe18   : > { %19226 = vmatmul.mubr.msk.f32.gmra.mxu0 %vm10222_vm5, %v16026_v36  ;;  %12243 = vmatprep.subr.bf16.mxu1 %v20205_v53  ;;  %v16014_v53 = vld [vmem:[%s25171_s4 + $0x1] ss:$0 sm:$0xff] }
 0xe19   : > { %19213 = vmatmul.mubr.msk.f32.gmra.mxu1 %vm10222_vm5, %v11460_v8  ;;  %19228 = vmatprep.mubr.msk.f32.mxu0 %vm10222_vm5, %v16027_v59 }
 0xe1a   : > { %19215 = vmatprep.mubr.msk.f32.mxu1 %vm10222_vm5, %v11461_v31  ;;  %12316 = vmatprep.subr.bf16.mxu0 %v20208_v3 }
 0xe1c   : > { %19229 = vmatmul.mubr.msk.f32.gmra.mxu0 %vm10222_vm5, %v16028_v45 }
 0xe1d   : > { %19216 = vmatmul.mubr.msk.f32.gmra.mxu1 %vm10222_vm5, %v11462_v34  ;;  %19231 = vmatprep.mubr.msk.f32.mxu0 %vm10222_vm5, %v16029_v20 }
 0xe1e   : > { %19238 = vmatprep.mubr.msk.f32.mxu1 %vm10222_vm5, %v16039_v39 }
 0xe20   : > { %19232 = vmatmul.mubr.msk.f32.gmra.mxu0 %vm10222_vm5, %v16030_v30 }
 0xe21   : > { %19239 = vmatmul.mubr.msk.f32.vlgmr.msra.gmra.mxu1 %vm10222_vm5, %v16040_v22  ;;  %19254 = vmatprep.mubr.msk.f32.mxu0 %vm10222_vm5, %v16055_v44 }
 0xe22   : > { %19241 = vmatprep.mubr.msk.f32.mxu1 %vm10222_vm5, %v16041_v21  ;;  %12244 = vmatpush1.bf16.msra.mxu1 %v20203_v32 }
 0xe23   : > { %12245 = vmatprep.subr.bf16.mxu1 %v20211_v15 }
 0xe24   : > { %19255 = vmatmul.mubr.msk.f32.vlgmr.msra.gmra.mxu0 %vm10222_vm5, %v16056_v55 }
 0xe25   : > { %19242 = vmatmul.mubr.msk.f32.gmra.mxu1 %vm10222_vm5, %v16042_v33  ;;  %19257 = vmatprep.mubr.msk.f32.mxu0 %vm10222_vm5, %v16057_v50 }
 0xe26   : > { %19244 = vmatprep.mubr.msk.f32.mxu1 %vm10222_vm5, %v16043_v35  ;;  %12317 = vmatpush1.bf16.msra.mxu0 %v20206_v47 }
 0xe27   : > { %12318 = vmatprep.subr.bf16.mxu0 %v20214_v60  ;;  %12246 = vmatpush1.bf16.msra.mxu1 %v20209_v24 }
 0xe28   : > { %19258 = vmatmul.mubr.msk.f32.gmra.mxu0 %vm10222_vm5, %v16058_v56  ;;  %12247 = vmatprep.subr.bf16.mxu1 %v20217_v19 }
 0xe29   : > { %19245 = vmatmul.mubr.msk.f32.gmra.mxu1 %vm10222_vm5, %v16044_v12  ;;  %19260 = vmatprep.mubr.msk.f32.mxu0 %vm10222_vm5, %v16059_v42 }
 0xe2a   : > { %19247 = vmatprep.mubr.msk.f32.mxu1 %vm10222_vm5, %v16045_v11  ;;  %12319 = vmatpush1.bf16.msra.mxu0 %v20212_v26 }
 0xe2b   : > { %12320 = vmatprep.subr.bf16.mxu0 %v20220_v2  ;;  %12248 = vmatpush1.bf16.msra.mxu1 %v20215_v17 }
 0xe2c   : > { %19261 = vmatmul.mubr.msk.f32.gmra.mxu0 %vm10222_vm5, %v16060_v29  ;;  %12249 = vmatprep.subr.bf16.mxu1 %v20223_v41 }
 0xe2d   : > { %19248 = vmatmul.mubr.msk.f32.gmra.mxu1 %vm10222_vm5, %v16046_v62  ;;  %19263 = vmatprep.mubr.msk.f32.mxu0 %vm10222_vm5, %v16061_v46 }
 0xe2e   : > { %12275 = vmatprep.mubr.bf16.mxu1 %v25250_v10  ;;  %12321 = vmatpush1.bf16.msra.mxu0 %v20218_v63 }
 0xe2f   : > { %12322 = vmatprep.subr.bf16.mxu0 %v20226_v61  ;;  %12250 = vmatpush1.bf16.msra.mxu1 %v20221_v37 }
 0xe30   : > { %19264 = vmatmul.mubr.msk.f32.gmra.mxu0 %vm10222_vm5, %v16062_v40  ;;  %12251 = vmatprep.subr.bf16.mxu1 %v20229_v4 }
 0xe31   : > { %12348 = vmatprep.mubr.bf16.mxu0 %v25250_v10 }
 0xe32   : > { %12323 = vmatpush1.bf16.msra.mxu0 %v20224_v6 }
 0xe33   : > { %12324 = vmatprep.subr.bf16.mxu0 %v20232_v1  ;;  %12252 = vmatpush1.bf16.msra.mxu1 %v20227_v0 }
 0xe34   : > { %12253 = vmatprep.subr.bf16.mxu1 %v20235_v58 }
 0xe36   : > { %12325 = vmatpush1.bf16.msra.mxu0 %v20230_v28 }
 0xe37   : > { %12326 = vmatprep.subr.bf16.mxu0 %v20238_v23  ;;  %12254 = vmatpush1.bf16.msra.mxu1 %v20233_v5 }
 0xe38   : > { %12255 = vmatprep.subr.bf16.mxu1 %v20241_v51 }
 0xe3a   : > { %12327 = vmatpush1.bf16.msra.mxu0 %v20236_v52 }
 0xe3b   : > { %12328 = vmatprep.subr.bf16.mxu0 %v20244_v13  ;;  %12256 = vmatpush1.bf16.msra.mxu1 %v20239_v7 }
 0xe3c   : > { %12257 = vmatprep.subr.bf16.mxu1 %v20247_v38 }
 0xe3e   : > { %12329 = vmatpush1.bf16.msra.mxu0 %v20242_v43 }
 0xe3f   : > { %12330 = vmatprep.subr.bf16.mxu0 %v20250_v49  ;;  %12258 = vmatpush1.bf16.msra.mxu1 %v20245_v14 }
 0xe42   : > { %12331 = vmatpush1.bf16.msra.mxu0 %v20248_v16 }
 0xed0   : > { %v19208_v57 = vpop.f32.mrf.mxu1 }
 0xed1   : > { %v11593_v3 = vadd.f32 %v19208_v57, %v16014_v53 }
 0xed2   : > { %v11553_v27 = vpop.f32.mrf.mxu1  ;;  %v19224_v48 = vpop.f32.mrf.mxu0 }
 0xed3   : > { %v11592_v34 = vadd.f32 %v16014_v53, %v11553_v27  ;;  %v11739_v30 = vadd.f32 %v19224_v48, %v11593_v3 }
 0xed4   : > { %v11699_v9 = vpop.f32.mrf.mxu0 }
 0xed5   : > { %v19211_v25 = vpop.f32.mrf.mxu1  ;;  %v11738_v32 = vadd.f32 %v11699_v9, %v11592_v34  ;;  %v12397_v34 = vld [vmem:[%s25178_s11] sm:$0xff] }
 0xed6   : > { %v11595_v33 = vadd.f32 %v19211_v25, %v16014_v53 }
 0xed7   : > { %v11563_v18 = vpop.f32.mrf.mxu1 }
 0xed8   : > { %v19227_v54 = vpop.f32.mrf.mxu0  ;;  %v11594_v21 = vadd.f32 %v16014_v53, %v11563_v18 }
 0xed9   : > { %v19214_v36 = vpop.f32.mrf.mxu1  ;;  %v11741_v42 = vadd.f32 %v19227_v54, %v11595_v33 }
 0xeda   : > { %v11709_v8 = vpop.f32.mrf.mxu0  ;;  %v11597_v41 = vadd.f32 %v19214_v36, %v16014_v53 }
 0xedb   : > { %v11573_v59 = vpop.f32.mrf.mxu1  ;;  %v11740_v56 = vadd.f32 %v11709_v8, %v11594_v21 }
 0xedc   : > { %v19230_v31 = vpop.f32.mrf.mxu0  ;;  %v11596_v46 = vadd.f32 %v16014_v53, %v11573_v59 }
 0xedd   : > { %v19217_v45 = vpop.f32.mrf.mxu1  ;;  %v11743_v28 = vadd.f32 %v19230_v31, %v11597_v41 }
 0xede   : > { %v11719_v20 = vpop.f32.mrf.mxu0  ;;  %v11599_v43 = vadd.f32 %v19217_v45, %v16014_v53 }
 0xedf   : > { %v11583_v39 = vpop.f32.mrf.mxu1  ;;  %v11742_v1 = vadd.f32 %v11719_v20, %v11596_v46  ;;  %v16153_v20 = vld [vmem:[%s25178_s11 + $0x100] sm:$0xff] }
 0xee0   : > { %v19233_v22 = vpop.f32.mrf.mxu0  ;;  %v11598_v51 = vadd.f32 %v16014_v53, %v11583_v39 }
 0xee1   : > { %v19240_v44 = vpop.f32.mrf.mxu1  ;;  %v11745_v48 = vadd.f32 %v19233_v22, %v11599_v43  ;;  %v12404_v43 = vld [vmem:[%s25178_s11 + $0x38] sm:$0xff] }
 0xee2   : > { %v11729_v15 = vpop.f32.mrf.mxu0  ;;  %v11885_v55 = vadd.f32 %v19240_v44, %v11739_v30 }
 0xee3   : > { %v11845_v50 = vpop.f32.mrf.mxu1  ;;  %v11744_v57 = vadd.f32 %v11729_v15, %v11598_v51  ;;  %v16157_v51 = vld [vmem:[%s25178_s11 + $0x120] sm:$0xff] }
 0xee4   : > { %v11884_v47 = vadd.f32 %v11845_v50, %v11738_v32  ;;  %v19256_v35 = vpop.f32.mrf.mxu0 }
 0xee5   : > { %v12031_v24 = vadd.f32 %v19256_v35, %v11885_v55  ;;  %v19243_v60 = vpop.f32.mrf.mxu1 }
 0xee6   : > { %v11991_v12 = vpop.f32.mrf.mxu0  ;;  %v11887_v17 = vadd.f32 %v19243_v60, %v11741_v42 }
 0xee7   : > { %v12030_v26 = vadd.f32 %v11991_v12, %v11884_v47  ;;  %v11855_v11 = vpop.f32.mrf.mxu1  ;;  %v12039_v40 = vmax.f32 %v12031_v24, 0.0 }
 0xee8   : > { %v11886_v29 = vadd.f32 %v11855_v11, %v11740_v56  ;;  %v19259_v62 = vpop.f32.mrf.mxu0 }
 0xee9   : > { %v12038_v19 = vmax.f32 %v12030_v26, 0.0  ;;  %v19246_v63 = vpop.f32.mrf.mxu1  ;;  %v12033_v0 = vadd.f32 %v19259_v62, %v11887_v17 }
 0xeea   : > { %v12001_v2 = vpop.f32.mrf.mxu0  ;;  %v11889_v7 = vadd.f32 %v19246_v63, %v11743_v28  ;;  %v12400_v28 = vld [vmem:[%s25178_s11 + $0x18] sm:$0xff] }
 0xeeb   : > { %v12046_v61 = vpack.c.bf16 %v12039_v40, %v12038_v19  ;;  %v12032_v37 = vadd.f32 %v12001_v2, %v11886_v29  ;;  %v11865_v6 = vpop.f32.mrf.mxu1  ;;  %v12041_v13 = vmax.f32 %v12033_v0, 0.0 }
 0xeec   : > { %v19262_v4 = vpop.f32.mrf.mxu0  ;;  %v11888_v23 = vadd.f32 %v11865_v6, %v11742_v1  ;;  %v12399_v1 = vld [vmem:[%s25178_s11 + $0x10] sm:$0xff] }
 0xeed   : > { %12276 = vmatmul.mubr.bf16.vlgmr.msra.gmra.mxu1 %v12046_v61  ;;  %12349 = vmatmul.mubr.bf16.vlgmr.msra.gmra.mxu0 %v12046_v61  ;;  %v12040_v58 = vmax.f32 %v12032_v37, 0.0  ;;  %v19249_v5 = vpop.f32.mrf.mxu1  ;;  %v12035_v27 = vadd.f32 %v19262_v4, %v11889_v7  ;;  %v12398_v37 = vld [vmem:[%s25178_s11 + $0x8] sm:$0xff]  ;;  %v12403_v7 = vld [vmem:[%s25178_s11 + $0x30] sm:$0xff] }
 0xeee   : > { %12285 = vmatprep.mubr.bf16.mxu1 %v25250_v10  ;;  %12358 = vmatprep.mubr.bf16.mxu0 %v25250_v10  ;;  %v12011_v52 = vpop.f32.mrf.mxu0  ;;  %v11891_v36 = vadd.f32 %v19249_v5, %v11745_v48  ;;  %v16154_v4 = vld [vmem:[%s25178_s11 + $0x108] sm:$0xff]  ;;  %v12401_v5 = vld [vmem:[%s25178_s11 + $0x20] sm:$0xff]  ;;  %v12407_v48 = vld [vmem:[%s25178_s11 + $0x50] sm:$0xff] }
 0xeef   : > { %v12047_v38 = vpack.c.bf16 %v12041_v13, %v12040_v58  ;;  %v12034_v49 = vadd.f32 %v12011_v52, %v11888_v23  ;;  %v11875_v14 = vpop.f32.mrf.mxu1  ;;  %v12043_v54 = vmax.f32 %v12035_v27, 0.0  ;;  %v16155_v58 = vld [vmem:[%s25178_s11 + $0x110] sm:$0xff]  ;;  %v16156_v23 = vld [vmem:[%s25178_s11 + $0x118] sm:$0xff]  ;;  %v12402_v52 = vld [vmem:[%s25178_s11 + $0x28] sm:$0xff] }
 0xef0   : > { %v19265_v16 = vpop.f32.mrf.mxu0  ;;  %v11890_v25 = vadd.f32 %v11875_v14, %v11744_v57  ;;  %v16158_v13 = vld [vmem:[%s25178_s11 + $0x128] sm:$0xff]  ;;  %v12405_v14 = vld [vmem:[%s25178_s11 + $0x40] sm:$0xff] }
 0xef1   : > { %v12042_v9 = vmax.f32 %v12034_v49, 0.0  ;;  %v12037_v59 = vadd.f32 %v19265_v16, %v11891_v36  ;;  %v16160_v49 = vld [vmem:[%s25178_s11 + $0x138] sm:$0xff]  ;;  %v12406_v16 = vld [vmem:[%s25178_s11 + $0x48] sm:$0xff]  ;;  %v16161_v57 = vld [vmem:[%s25178_s11 + $0x140] sm:$0xff] }
 0xef2   : > { %v12021_v18 = vpop.f32.mrf.mxu0  ;;  %v16162_v27 = vld [vmem:[%s25178_s11 + $0x148] sm:$0xff]  ;;  %v16165_v36 = vld [vmem:[%s25178_s11 + $0x160] sm:$0xff] }
 0xef3   : > { %v12048_v8 = vpack.c.bf16 %v12043_v54, %v12042_v9  ;;  %v12036_v53 = vadd.f32 %v12021_v18, %v11890_v25  ;;  %v12045_v31 = vmax.f32 %v12037_v59, 0.0  ;;  %v16163_v9 = vld [vmem:[%s25178_s11 + $0x150] sm:$0xff]  ;;  %v12408_v25 = vld [vmem:[%s25178_s11 + $0x58] sm:$0xff]  ;;  %v12409_v18 = vld [vmem:[%s25178_s11 + $0x60] sm:$0xff] }
 0xef4   : > { %v16164_v54 = vld [vmem:[%s25178_s11 + $0x158] sm:$0xff]  ;;  %v16166_v59 = vld [vmem:[%s25178_s11 + $0x168] sm:$0xff] }
 0xef5   : > { %12286 = vmatmul.mubr.bf16.gmra.mxu1 %v12047_v38  ;;  %12359 = vmatmul.mubr.bf16.gmra.mxu0 %v12047_v38  ;;  %v12044_v3 = vmax.f32 %v12036_v53, 0.0  ;;  %v16159_v38 = vld [vmem:[%s25178_s11 + $0x130] sm:$0xff] }
 0xef6   : > { %12295 = vmatprep.mubr.bf16.mxu1 %v25250_v10  ;;  %12368 = vmatprep.mubr.bf16.mxu0 %v25250_v10  ;;  %v12411_v53 = vld [vmem:[%s25178_s11 + $0x70] sm:$0xff] }
 0xef7   : > { %v12049_v45 = vpack.c.bf16 %v12045_v31, %v12044_v3  ;;  %v16167_v3 = vld [vmem:[%s25178_s11 + $0x170] sm:$0xff]  ;;  %v12412_v31 = vld [vmem:[%s25178_s11 + $0x78] sm:$0xff] }
 0xefd   : > { %12296 = vmatmul.mubr.bf16.gmra.mxu1 %v12048_v8  ;;  %12369 = vmatmul.mubr.bf16.gmra.mxu0 %v12048_v8  ;;  %v12410_v8 = vld [vmem:[%s25178_s11 + $0x68] sm:$0xff] }
 0xefe   : > { %12305 = vmatprep.mubr.bf16.mxu1 %v25250_v10  ;;  %12378 = vmatprep.mubr.bf16.mxu0 %v25250_v10 }
 0xf05   : > { %12306 = vmatmul.mubr.bf16.gmra.mxu1 %v12049_v45  ;;  %12379 = vmatmul.mubr.bf16.gmra.mxu0 %v12049_v45  ;;  %v16185_v45 = vld [vmem:[%s25178_s11 + $0x200] sm:$0xff] }
 0xf06   : > { %19282 = vmatprep.mubr.msk.f32.mxu1 %vm1905_vm0, %v12397_v34  ;;  %19322 = vmatprep.mubr.msk.f32.mxu0 %vm1905_vm0, %v16153_v20  ;;  %v16168_v34 = vld [vmem:[%s25178_s11 + $0x178] sm:$0xff]  ;;  %v16217_v20 = vld [vmem:[%s25178_s11 + $0x300] sm:$0xff] }
 0xfad   : > { %v24243_v39 = vpop.f32.mrf.mxu1  ;;  %v24245_v10 = vpop.f32.mrf.mxu0 }
 0xfaf   : > { %v24247_v30 = vpop.f32.mrf.mxu1  ;;  %v24249_v22 = vpop.f32.mrf.mxu0 }
 0xfb1   : > { %v24251_v44 = vpop.f32.mrf.mxu1  ;;  %v24253_v32 = vpop.f32.mrf.mxu0 }
 0xfb3   : > { %v24255_v21 = vpop.f32.mrf.mxu1  ;;  %v24257_v15 = vpop.f32.mrf.mxu0 }
 0xfb5   : > { %v24259_v55 = vpop.f32.mrf.mxu1  ;;  %v24261_v33 = vpop.f32.mrf.mxu0 }
 0xfb7   : > { %v24263_v50 = vpop.f32.mrf.mxu1  ;;  %v24265_v47 = vpop.f32.mrf.mxu0 }
 0xfb9   : > { %v24267_v35 = vpop.f32.mrf.mxu1  ;;  %v24269_v24 = vpop.f32.mrf.mxu0 }
 0xfbb   : > { %v24271_v60 = vpop.f32.mrf.mxu1  ;;  %v24273_v56 = vpop.f32.mrf.mxu0 }
 0xfbd   : > { %v24275_v12 = vpop.f32.mrf.mxu1  ;;  %v24279_v26 = vpop.f32.mrf.mxu0 }
 0xfbf   : > { %v24277_v42 = vpop.f32.mrf.mxu1  ;;  %v24285_v62 = vpop.f32.mrf.mxu0 }
 0xfc1   : > { %v24281_v11 = vpop.f32.mrf.mxu1  ;;  %v24291_v17 = vpop.f32.mrf.mxu0 }
 0xfc3   : > { %v24283_v29 = vpop.f32.mrf.mxu1  ;;  %v24299_v2 = vpop.f32.mrf.mxu0 }
 0xfc5   : > { %v24287_v46 = vpop.f32.mrf.mxu1  ;;  %v24309_v41 = vpop.f32.mrf.mxu0 }
 0xfc7   : > { %v24289_v40 = vpop.f32.mrf.mxu1  ;;  %v24319_v61 = vpop.f32.mrf.mxu0 }
 0xfc9   : > { %v24293_v19 = vpop.f32.mrf.mxu1  ;;  %v24332_v6 = vpop.f32.mrf.mxu0 }
 0xfca   : > { %19266 = vmatprep.subr.mxu1 %v24293_v19 }
 0xfcb   : > { %v24296_v63 = vpop.f32.mrf.mxu1  ;;  %19267 = vmatpush3.msra.mxu1 %v24293_v19  ;;  %v24348_v0 = vpop.f32.mrf.mxu0 }
 0xfcc   : > { %19268 = vmatprep.subr.mxu1 %v24287_v46  ;;  %19306 = vmatprep.subr.mxu0 %v24296_v63 }
 0xfcd   : > { %19269 = vmatpush3.msra.mxu1 %v24287_v46  ;;  %19307 = vmatpush3.msra.mxu0 %v24296_v63 }
 0xfce   : > { %19270 = vmatprep.subr.mxu1 %v24281_v11  ;;  %19308 = vmatprep.subr.mxu0 %v24289_v40 }
 0xfcf   : > { %19271 = vmatpush3.msra.mxu1 %v24281_v11  ;;  %19309 = vmatpush3.msra.mxu0 %v24289_v40 }
 0xfd0   : > { %19272 = vmatprep.subr.mxu1 %v24275_v12  ;;  %19310 = vmatprep.subr.mxu0 %v24283_v29 }
 0xfd1   : > { %19273 = vmatpush3.msra.mxu1 %v24275_v12  ;;  %19311 = vmatpush3.msra.mxu0 %v24283_v29 }
 0xfd2   : > { %19274 = vmatprep.subr.mxu1 %v24267_v35  ;;  %19312 = vmatprep.subr.mxu0 %v24277_v42 }
 0xfd3   : > { %19275 = vmatpush3.msra.mxu1 %v24267_v35  ;;  %19313 = vmatpush3.msra.mxu0 %v24277_v42 }
 0xfd4   : > { %19276 = vmatprep.subr.mxu1 %v24259_v55  ;;  %19314 = vmatprep.subr.mxu0 %v24271_v60 }
 0xfd5   : > { %19277 = vmatpush3.msra.mxu1 %v24259_v55  ;;  %19315 = vmatpush3.msra.mxu0 %v24271_v60 }
 0xfd6   : > { %19278 = vmatprep.subr.mxu1 %v24251_v44  ;;  %19316 = vmatprep.subr.mxu0 %v24263_v50 }
 0xfd7   : > { %19279 = vmatpush3.msra.mxu1 %v24251_v44  ;;  %19317 = vmatpush3.msra.mxu0 %v24263_v50 }
 0xfd8   : > { %19280 = vmatprep.subr.mxu1 %v24243_v39  ;;  %19318 = vmatprep.subr.mxu0 %v24255_v21 }
 0xfd9   : > { %19281 = vmatpush3.msra.mxu1 %v24243_v39  ;;  %19319 = vmatpush3.msra.mxu0 %v24255_v21 }
 0xfda   : > { %19283 = vmatmul.mubr.msk.f32.vlgmr.msra.gmra.mxu1 %vm1905_vm0, %v12398_v37  ;;  %19320 = vmatprep.subr.mxu0 %v24247_v30  ;;  %v16186_v37 = vld [vmem:[%s25178_s11 + $0x208] sm:$0xff] }
 0xfdb   : > { %19346 = vmatprep.subr.mxu1 %v24332_v6  ;;  %19321 = vmatpush3.msra.mxu0 %v24247_v30 }
 0xfdc   : > { %19347 = vmatpush3.msra.mxu1 %v24332_v6  ;;  %19323 = vmatmul.mubr.msk.f32.vlgmr.msra.gmra.mxu0 %vm1905_vm0, %v16154_v4  ;;  %v16187_v4 = vld [vmem:[%s25178_s11 + $0x210] sm:$0xff] }
 0xfdd   : > { %19348 = vmatprep.subr.mxu1 %v24309_v41  ;;  %19386 = vmatprep.subr.mxu0 %v24348_v0 }
 0xfde   : > { %19285 = vmatprep.mubr.msk.f32.mxu1 %vm1905_vm0, %v12399_v1  ;;  %19349 = vmatpush3.msra.mxu1 %v24309_v41  ;;  %v16218_v1 = vld [vmem:[%s25178_s11 + $0x308] sm:$0xff] }
 0xfdf   : > { %19387 = vmatpush3.msra.mxu0 %v24348_v0  ;;  %19286 = vmatmul.mubr.msk.f32.gmra.mxu1 %vm1905_vm0, %v12400_v28  ;;  %v16188_v28 = vld [vmem:[%s25178_s11 + $0x218] sm:$0xff] }
 0xfe0   : > { %19350 = vmatprep.subr.mxu1 %v24291_v17  ;;  %19388 = vmatprep.subr.mxu0 %v24319_v61 }
 0xfe1   : > { %19325 = vmatprep.mubr.msk.f32.mxu0 %vm1905_vm0, %v16155_v58  ;;  %19351 = vmatpush3.msra.mxu1 %v24291_v17  ;;  %v16219_v58 = vld [vmem:[%s25178_s11 + $0x310] sm:$0xff] }
 0xfe2   : > { %19389 = vmatpush3.msra.mxu0 %v24319_v61  ;;  %19352 = vmatprep.subr.mxu1 %v24279_v26 }
 0xfe3   : > { %19326 = vmatmul.mubr.msk.f32.gmra.mxu0 %vm1905_vm0, %v16156_v23  ;;  %19390 = vmatprep.subr.mxu0 %v24299_v2  ;;  %v16196_v23 = vld [vmem:[%s25178_s11 + $0x258] sm:$0xff] }
 0xfe4   : > { %19288 = vmatprep.mubr.msk.f32.mxu1 %vm1905_vm0, %v12401_v5  ;;  %19353 = vmatpush3.msra.mxu1 %v24279_v26  ;;  %v16228_v5 = vld [vmem:[%s25178_s11 + $0x358] sm:$0xff] }
 0xfe5   : > { %19391 = vmatpush3.msra.mxu0 %v24299_v2  ;;  %19289 = vmatmul.mubr.msk.f32.gmra.mxu1 %vm1905_vm0, %v12402_v52  ;;  %v16229_v52 = vld [vmem:[%s25178_s11 + $0x360] sm:$0xff] }
 0xfe6   : > { %19354 = vmatprep.subr.mxu1 %v24269_v24  ;;  %19392 = vmatprep.subr.mxu0 %v24285_v62 }
 0xfe7   : > { %19328 = vmatprep.mubr.msk.f32.mxu0 %vm1905_vm0, %v16157_v51  ;;  %19355 = vmatpush3.msra.mxu1 %v24269_v24  ;;  %v16198_v51 = vld [vmem:[%s25178_s11 + $0x268] sm:$0xff] }
 0xfe8   : > { %19393 = vmatpush3.msra.mxu0 %v24285_v62  ;;  %19356 = vmatprep.subr.mxu1 %v24261_v33 }
 0xfe9   : > { %19329 = vmatmul.mubr.msk.f32.gmra.mxu0 %vm1905_vm0, %v16158_v13  ;;  %19394 = vmatprep.subr.mxu0 %v24273_v56  ;;  %v16199_v13 = vld [vmem:[%s25178_s11 + $0x270] sm:$0xff] }
 0xfea   : > { %19291 = vmatprep.mubr.msk.f32.mxu1 %vm1905_vm0, %v12403_v7  ;;  %19357 = vmatpush3.msra.mxu1 %v24261_v33  ;;  %v16230_v7 = vld [vmem:[%s25178_s11 + $0x368] sm:$0xff] }
 0xfeb   : > { %19395 = vmatpush3.msra.mxu0 %v24273_v56  ;;  %19292 = vmatmul.mubr.msk.f32.gmra.mxu1 %vm1905_vm0, %v12404_v43  ;;  %v16231_v43 = vld [vmem:[%s25178_s11 + $0x370] sm:$0xff] }
 0xfec   : > { %19358 = vmatprep.subr.mxu1 %v24253_v32  ;;  %19396 = vmatprep.subr.mxu0 %v24265_v47 }
 0xfed   : > { %19331 = vmatprep.mubr.msk.f32.mxu0 %vm1905_vm0, %v16159_v38  ;;  %19359 = vmatpush3.msra.mxu1 %v24253_v32  ;;  %v16200_v38 = vld [vmem:[%s25178_s11 + $0x278] sm:$0xff] }
 0xfee   : > { %19397 = vmatpush3.msra.mxu0 %v24265_v47  ;;  %19360 = vmatprep.subr.mxu1 %v24245_v10 }
 0xfef   : > { %19332 = vmatmul.mubr.msk.f32.gmra.mxu0 %vm1905_vm0, %v16160_v49  ;;  %19398 = vmatprep.subr.mxu0 %v24257_v15  ;;  %v13419_v49 = vld [vmem:[%s25178_s11 + $0x80] sm:$0xff] }
 0xff0   : > { %19294 = vmatprep.mubr.msk.f32.mxu1 %vm1905_vm0, %v12405_v14  ;;  %19361 = vmatpush3.msra.mxu1 %v24245_v10  ;;  %v16232_v14 = vld [vmem:[%s25178_s11 + $0x378] sm:$0xff] }
 0xff1   : > { %19399 = vmatpush3.msra.mxu0 %v24257_v15  ;;  %19295 = vmatmul.mubr.msk.f32.gmra.mxu1 %vm1905_vm0, %v12406_v16  ;;  %v16283_v16 = vld [vmem:[%s25178_s11 + $0x180] sm:$0xff] }
 0xff2   : > { %19400 = vmatprep.subr.mxu0 %v24249_v22  ;;  %19426 = vmatprep.subr.mxu1 %v24293_v19 }
 0xff3   : > { %19334 = vmatprep.mubr.msk.f32.mxu0 %vm1905_vm0, %v16161_v57  ;;  %19401 = vmatpush3.msra.mxu0 %v24249_v22  ;;  %v13420_v57 = vld [vmem:[%s25178_s11 + $0x88] sm:$0xff] }
 0xff4   : > { %19335 = vmatmul.mubr.msk.f32.gmra.mxu0 %vm1905_vm0, %v16162_v27  ;;  %19466 = vmatprep.subr.mxu0 %v24296_v63  ;;  %v13421_v27 = vld [vmem:[%s25178_s11 + $0x90] sm:$0xff] }
 0xff5   : > { %19297 = vmatprep.mubr.msk.f32.mxu1 %vm1905_vm0, %v12407_v48  ;;  %19337 = vmatprep.mubr.msk.f32.mxu0 %vm1905_vm0, %v16163_v9  ;;  %v16284_v48 = vld [vmem:[%s25178_s11 + $0x188] sm:$0xff]  ;;  %v13422_v9 = vld [vmem:[%s25178_s11 + $0x98] sm:$0xff] }
 0xff6   : > { %19298 = vmatmul.mubr.msk.f32.gmra.mxu1 %vm1905_vm0, %v12408_v25  ;;  %v16285_v25 = vld [vmem:[%s25178_s11 + $0x190] sm:$0xff] }
 0xff7   : > { %19300 = vmatprep.mubr.msk.f32.mxu1 %vm1905_vm0, %v12409_v18  ;;  %v13429_v18 = vld [vmem:[%s25178_s11 + $0xd0] sm:$0xff] }
 0xff8   : > { %19338 = vmatmul.mubr.msk.f32.gmra.mxu0 %vm1905_vm0, %v16164_v54  ;;  %v13431_v54 = vld [vmem:[%s25178_s11 + $0xe0] sm:$0xff] }
 0xff9   : > { %19340 = vmatprep.mubr.msk.f32.mxu0 %vm1905_vm0, %v16165_v36  ;;  %v16295_v36 = vld [vmem:[%s25178_s11 + $0x1e0] sm:$0xff] }
 0xffa   : > { %19301 = vmatmul.mubr.msk.f32.gmra.mxu1 %vm1905_vm0, %v12410_v8  ;;  %v13432_v8 = vld [vmem:[%s25178_s11 + $0xe8] sm:$0xff] }
 0xffb   : > { %19303 = vmatprep.mubr.msk.f32.mxu1 %vm1905_vm0, %v12411_v53  ;;  %v13433_v53 = vld [vmem:[%s25178_s11 + $0xf0] sm:$0xff] }
 0xffc   : > { %19341 = vmatmul.mubr.msk.f32.gmra.mxu0 %vm1905_vm0, %v16166_v59  ;;  %v16296_v59 = vld [vmem:[%s25178_s11 + $0x1e8] sm:$0xff] }
 0xffd   : > { %19343 = vmatprep.mubr.msk.f32.mxu0 %vm1905_vm0, %v16167_v3  ;;  %v16297_v3 = vld [vmem:[%s25178_s11 + $0x1f0] sm:$0xff] }
 0xffe   : > { %19304 = vmatmul.mubr.msk.f32.gmra.mxu1 %vm1905_vm0, %v12412_v31  ;;  %v13434_v31 = vld [vmem:[%s25178_s11 + $0xf8] sm:$0xff] }
 0xfff   : > { %19362 = vmatprep.mubr.msk.f32.mxu1 %vm1905_vm0, %v16185_v45  ;;  %v16315_v45 = vld [vmem:[%s25178_s11 + $0x280] sm:$0xff] }
0x1000   : > { %19344 = vmatmul.mubr.msk.f32.gmra.mxu0 %vm1905_vm0, %v16168_v34  ;;  %v16298_v34 = vld [vmem:[%s25178_s11 + $0x1f8] sm:$0xff] }
0x1001   : > { %19402 = vmatprep.mubr.msk.f32.mxu0 %vm1905_vm0, %v16217_v20  ;;  %v16347_v20 = vld [vmem:[%s25178_s11 + $0x380] sm:$0xff] }
0x1002   : > { %19363 = vmatmul.mubr.msk.f32.vlgmr.msra.gmra.mxu1 %vm1905_vm0, %v16186_v37  ;;  %v16316_v37 = vld [vmem:[%s25178_s11 + $0x288] sm:$0xff] }
0x1003   : > { %19427 = vmatpush3.msra.mxu1 %v24293_v19  ;;  %19365 = vmatprep.mubr.msk.f32.mxu1 %vm1905_vm0, %v16187_v4  ;;  %v16220_v19 = vld [vmem:[%s25178_s11 + $0x318] sm:$0xff]  ;;  %v16317_v4 = vld [vmem:[%s25178_s11 + $0x290] sm:$0xff] }
0x1004   : > { %19428 = vmatprep.subr.mxu1 %v24287_v46  ;;  %19403 = vmatmul.mubr.msk.f32.vlgmr.msra.gmra.mxu0 %vm1905_vm0, %v16218_v1  ;;  %v16348_v1 = vld [vmem:[%s25178_s11 + $0x388] sm:$0xff] }
0x1005   : > { %19429 = vmatpush3.msra.mxu1 %v24287_v46  ;;  %19467 = vmatpush3.msra.mxu0 %v24296_v63  ;;  %v16189_v46 = vld [vmem:[%s25178_s11 + $0x220] sm:$0xff]  ;;  %v16195_v63 = vld [vmem:[%s25178_s11 + $0x250] sm:$0xff] }
0x1006   : > { %19430 = vmatprep.subr.mxu1 %v24281_v11  ;;  %19468 = vmatprep.subr.mxu0 %v24289_v40 }
0x1007   : > { %19366 = vmatmul.mubr.msk.f32.gmra.mxu1 %vm1905_vm0, %v16188_v28  ;;  %19469 = vmatpush3.msra.mxu0 %v24289_v40  ;;  %v16190_v40 = vld [vmem:[%s25178_s11 + $0x228] sm:$0xff]  ;;  %v16349_v28 = vld [vmem:[%s25178_s11 + $0x390] sm:$0xff] }
0x1008   : > { %19431 = vmatpush3.msra.mxu1 %v24281_v11  ;;  %19405 = vmatprep.mubr.msk.f32.mxu0 %vm1905_vm0, %v16219_v58  ;;  %v16221_v11 = vld [vmem:[%s25178_s11 + $0x320] sm:$0xff]  ;;  %v16318_v58 = vld [vmem:[%s25178_s11 + $0x298] sm:$0xff] }
0x1009   : > { %19432 = vmatprep.subr.mxu1 %v24275_v12  ;;  %19470 = vmatprep.subr.mxu0 %v24283_v29 }
0x100a   : > { %19406 = vmatmul.mubr.msk.f32.gmra.mxu0 %vm1905_vm0, %v16220_v19  ;;  %19433 = vmatpush3.msra.mxu1 %v24275_v12  ;;  %v16222_v12 = vld [vmem:[%s25178_s11 + $0x328] sm:$0xff]  ;;  %v16319_v19 = vld [vmem:[%s25178_s11 + $0x2a0] sm:$0xff] }
0x100b   : > { %19471 = vmatpush3.msra.mxu0 %v24283_v29  ;;  %19368 = vmatprep.mubr.msk.f32.mxu1 %vm1905_vm0, %v16189_v46  ;;  %v16191_v29 = vld [vmem:[%s25178_s11 + $0x230] sm:$0xff]  ;;  %v16350_v46 = vld [vmem:[%s25178_s11 + $0x398] sm:$0xff] }
0x100c   : > { %19434 = vmatprep.subr.mxu1 %v24267_v35  ;;  %19472 = vmatprep.subr.mxu0 %v24277_v42 }
0x100d   : > { %19369 = vmatmul.mubr.msk.f32.gmra.mxu1 %vm1905_vm0, %v16190_v40  ;;  %19473 = vmatpush3.msra.mxu0 %v24277_v42  ;;  %v16192_v42 = vld [vmem:[%s25178_s11 + $0x238] sm:$0xff]  ;;  %v16351_v40 = vld [vmem:[%s25178_s11 + $0x3a0] sm:$0xff] }
0x100e   : > { %19435 = vmatpush3.msra.mxu1 %v24267_v35  ;;  %19408 = vmatprep.mubr.msk.f32.mxu0 %vm1905_vm0, %v16221_v11  ;;  %v16223_v35 = vld [vmem:[%s25178_s11 + $0x330] sm:$0xff]  ;;  %v16320_v11 = vld [vmem:[%s25178_s11 + $0x2a8] sm:$0xff] }
0x100f   : > { %19436 = vmatprep.subr.mxu1 %v24259_v55  ;;  %19474 = vmatprep.subr.mxu0 %v24271_v60 }
0x1010   : > { %19409 = vmatmul.mubr.msk.f32.gmra.mxu0 %vm1905_vm0, %v16222_v12  ;;  %19437 = vmatpush3.msra.mxu1 %v24259_v55  ;;  %v16224_v55 = vld [vmem:[%s25178_s11 + $0x338] sm:$0xff]  ;;  %v16321_v12 = vld [vmem:[%s25178_s11 + $0x2b0] sm:$0xff] }
0x1011   : > { %19475 = vmatpush3.msra.mxu0 %v24271_v60  ;;  %19371 = vmatprep.mubr.msk.f32.mxu1 %vm1905_vm0, %v16191_v29  ;;  %v16193_v60 = vld [vmem:[%s25178_s11 + $0x240] sm:$0xff]  ;;  %v16352_v29 = vld [vmem:[%s25178_s11 + $0x3a8] sm:$0xff] }
0x1012   : > { %19438 = vmatprep.subr.mxu1 %v24251_v44  ;;  %19476 = vmatprep.subr.mxu0 %v24263_v50 }
0x1013   : > { %19372 = vmatmul.mubr.msk.f32.gmra.mxu1 %vm1905_vm0, %v16192_v42  ;;  %19477 = vmatpush3.msra.mxu0 %v24263_v50  ;;  %v16194_v50 = vld [vmem:[%s25178_s11 + $0x248] sm:$0xff]  ;;  %v16353_v42 = vld [vmem:[%s25178_s11 + $0x3b0] sm:$0xff] }
0x1014   : > { %19439 = vmatpush3.msra.mxu1 %v24251_v44  ;;  %19411 = vmatprep.mubr.msk.f32.mxu0 %vm1905_vm0, %v16223_v35  ;;  %v16225_v44 = vld [vmem:[%s25178_s11 + $0x340] sm:$0xff]  ;;  %v16322_v35 = vld [vmem:[%s25178_s11 + $0x2b8] sm:$0xff] }
0x1015   : > { %19440 = vmatprep.subr.mxu1 %v24243_v39  ;;  %19478 = vmatprep.subr.mxu0 %v24255_v21 }
0x1016   : > { %19412 = vmatmul.mubr.msk.f32.gmra.mxu0 %vm1905_vm0, %v16224_v55  ;;  %19441 = vmatpush3.msra.mxu1 %v24243_v39  ;;  %v16226_v39 = vld [vmem:[%s25178_s11 + $0x348] sm:$0xff]  ;;  %v16323_v55 = vld [vmem:[%s25178_s11 + $0x2c0] sm:$0xff] }
0x1017   : > { %19479 = vmatpush3.msra.mxu0 %v24255_v21  ;;  %19374 = vmatprep.mubr.msk.f32.mxu1 %vm1905_vm0, %v16193_v60  ;;  %v16227_v21 = vld [vmem:[%s25178_s11 + $0x350] sm:$0xff]  ;;  %v16354_v60 = vld [vmem:[%s25178_s11 + $0x3b8] sm:$0xff] }
0x1018   : > { %19480 = vmatprep.subr.mxu0 %v24247_v30  ;;  %19506 = vmatprep.subr.mxu1 %v24332_v6 }
0x1019   : > { %19375 = vmatmul.mubr.msk.f32.gmra.mxu1 %vm1905_vm0, %v16194_v50  ;;  %19481 = vmatpush3.msra.mxu0 %v24247_v30  ;;  %v16197_v30 = vld [vmem:[%s25178_s11 + $0x260] sm:$0xff] }
0x101a   : > { %19414 = vmatprep.mubr.msk.f32.mxu0 %vm1905_vm0, %v16225_v44  ;;  %19546 = vmatprep.subr.mxu0 %v24348_v0  ;;  %v16355_v50 = vld [vmem:[%s25178_s11 + $0x3c0] sm:$0xff]  ;;  %v16324_v44 = vld [vmem:[%s25178_s11 + $0x2c8] sm:$0xff] }
0x101b   : > { %19415 = vmatmul.mubr.msk.f32.gmra.mxu0 %vm1905_vm0, %v16226_v39  ;;  %19377 = vmatprep.mubr.msk.f32.mxu1 %vm1905_vm0, %v16195_v63  ;;  %v16325_v39 = vld [vmem:[%s25178_s11 + $0x2d0] sm:$0xff]  ;;  %v16356_v63 = vld [vmem:[%s25178_s11 + $0x3c8] sm:$0xff] }
0x101c   : > { %19417 = vmatprep.mubr.msk.f32.mxu0 %vm1905_vm0, %v16227_v21  ;;  %v16357_v21 = vld [vmem:[%s25178_s11 + $0x3d0] sm:$0xff] }
0x101d   : > { %19378 = vmatmul.mubr.msk.f32.gmra.mxu1 %vm1905_vm0, %v16196_v23  ;;  %v16326_v23 = vld [vmem:[%s25178_s11 + $0x2d8] sm:$0xff] }
0x101e   : > { %19380 = vmatprep.mubr.msk.f32.mxu1 %vm1905_vm0, %v16197_v30  ;;  %v16327_v30 = vld [vmem:[%s25178_s11 + $0x2e0] sm:$0xff] }
0x101f   : > { %19418 = vmatmul.mubr.msk.f32.gmra.mxu0 %vm1905_vm0, %v16228_v5  ;;  %v16358_v5 = vld [vmem:[%s25178_s11 + $0x3d8] sm:$0xff] }
0x1020   : > { %19420 = vmatprep.mubr.msk.f32.mxu0 %vm1905_vm0, %v16229_v52  ;;  %v16359_v52 = vld [vmem:[%s25178_s11 + $0x3e0] sm:$0xff] }
0x1021   : > { %19381 = vmatmul.mubr.msk.f32.gmra.mxu1 %vm1905_vm0, %v16198_v51  ;;  %v16328_v51 = vld [vmem:[%s25178_s11 + $0x2e8] sm:$0xff] }
0x1022   : > { %19383 = vmatprep.mubr.msk.f32.mxu1 %vm1905_vm0, %v16199_v13  ;;  %v16329_v13 = vld [vmem:[%s25178_s11 + $0x2f0] sm:$0xff] }
0x1023   : > { %19421 = vmatmul.mubr.msk.f32.gmra.mxu0 %vm1905_vm0, %v16230_v7  ;;  %v16360_v7 = vld [vmem:[%s25178_s11 + $0x3e8] sm:$0xff] }
0x1024   : > { %19423 = vmatprep.mubr.msk.f32.mxu0 %vm1905_vm0, %v16231_v43  ;;  %v16361_v43 = vld [vmem:[%s25178_s11 + $0x3f0] sm:$0xff] }
0x1025   : > { %19384 = vmatmul.mubr.msk.f32.gmra.mxu1 %vm1905_vm0, %v16200_v38  ;;  %v16330_v38 = vld [vmem:[%s25178_s11 + $0x2f8] sm:$0xff] }
0x1026   : > { %19442 = vmatprep.mubr.msk.f32.mxu1 %vm1905_vm0, %v13419_v49  ;;  %v16362_v49 = vld [vmem:[%s25178_s11 + $0x3f8] sm:$0xff] }
0x1027   : > { %19424 = vmatmul.mubr.msk.f32.gmra.mxu0 %vm1905_vm0, %v16232_v14 }
0x1028   : > { %19482 = vmatprep.mubr.msk.f32.mxu0 %vm1905_vm0, %v16283_v16 }
0x1029   : > { %19443 = vmatmul.mubr.msk.f32.vlgmr.msra.gmra.mxu1 %vm1905_vm0, %v13420_v57 }
0x102a   : > { %19507 = vmatpush3.msra.mxu1 %v24332_v6  ;;  %19445 = vmatprep.mubr.msk.f32.mxu1 %vm1905_vm0, %v13421_v27  ;;  %v16286_v6 = vld [vmem:[%s25178_s11 + $0x198] sm:$0xff] }
0x102b   : > { %19508 = vmatprep.subr.mxu1 %v24309_v41  ;;  %19483 = vmatmul.mubr.msk.f32.vlgmr.msra.gmra.mxu0 %vm1905_vm0, %v16284_v48 }
0x102c   : > { %19509 = vmatpush3.msra.mxu1 %v24309_v41  ;;  %19547 = vmatpush3.msra.mxu0 %v24348_v0  ;;  %v13423_v41 = vld [vmem:[%s25178_s11 + $0xa0] sm:$0xff]  ;;  %v16292_v0 = vld [vmem:[%s25178_s11 + $0x1c8] sm:$0xff] }
0x102d   : > { %19510 = vmatprep.subr.mxu1 %v24291_v17  ;;  %19548 = vmatprep.subr.mxu0 %v24319_v61 }
0x102e   : > { %19446 = vmatmul.mubr.msk.f32.gmra.mxu1 %vm1905_vm0, %v13422_v9  ;;  %19549 = vmatpush3.msra.mxu0 %v24319_v61  ;;  %v13424_v61 = vld [vmem:[%s25178_s11 + $0xa8] sm:$0xff] }
0x102f   : > { %19511 = vmatpush3.msra.mxu1 %v24291_v17  ;;  %19485 = vmatprep.mubr.msk.f32.mxu0 %vm1905_vm0, %v16285_v25  ;;  %v16287_v17 = vld [vmem:[%s25178_s11 + $0x1a0] sm:$0xff] }
0x1030   : > { %19512 = vmatprep.subr.mxu1 %v24279_v26  ;;  %19550 = vmatprep.subr.mxu0 %v24299_v2 }
0x1031   : > { %19486 = vmatmul.mubr.msk.f32.gmra.mxu0 %vm1905_vm0, %v16286_v6  ;;  %19513 = vmatpush3.msra.mxu1 %v24279_v26  ;;  %v16288_v26 = vld [vmem:[%s25178_s11 + $0x1a8] sm:$0xff] }
0x1032   : > { %19551 = vmatpush3.msra.mxu0 %v24299_v2  ;;  %19448 = vmatprep.mubr.msk.f32.mxu1 %vm1905_vm0, %v13423_v41  ;;  %v13425_v2 = vld [vmem:[%s25178_s11 + $0xb0] sm:$0xff] }
0x1033   : > { %19514 = vmatprep.subr.mxu1 %v24269_v24  ;;  %19552 = vmatprep.subr.mxu0 %v24285_v62 }
0x1034   : > { %19449 = vmatmul.mubr.msk.f32.gmra.mxu1 %vm1905_vm0, %v13424_v61  ;;  %19553 = vmatpush3.msra.mxu0 %v24285_v62  ;;  %v13426_v62 = vld [vmem:[%s25178_s11 + $0xb8] sm:$0xff] }
0x1035   : > { %19515 = vmatpush3.msra.mxu1 %v24269_v24  ;;  %19488 = vmatprep.mubr.msk.f32.mxu0 %vm1905_vm0, %v16287_v17  ;;  %v16289_v24 = vld [vmem:[%s25178_s11 + $0x1b0] sm:$0xff] }
0x1036   : > { %19516 = vmatprep.subr.mxu1 %v24261_v33  ;;  %19554 = vmatprep.subr.mxu0 %v24273_v56 }
0x1037   : > { %19489 = vmatmul.mubr.msk.f32.gmra.mxu0 %vm1905_vm0, %v16288_v26  ;;  %19517 = vmatpush3.msra.mxu1 %v24261_v33  ;;  %v16290_v33 = vld [vmem:[%s25178_s11 + $0x1b8] sm:$0xff] }
0x1038   : > { %19555 = vmatpush3.msra.mxu0 %v24273_v56  ;;  %19451 = vmatprep.mubr.msk.f32.mxu1 %vm1905_vm0, %v13425_v2  ;;  %v13427_v56 = vld [vmem:[%s25178_s11 + $0xc0] sm:$0xff] }
0x1039   : > { %19518 = vmatprep.subr.mxu1 %v24253_v32  ;;  %19556 = vmatprep.subr.mxu0 %v24265_v47 }
0x103a   : > { %19452 = vmatmul.mubr.msk.f32.gmra.mxu1 %vm1905_vm0, %v13426_v62  ;;  %19557 = vmatpush3.msra.mxu0 %v24265_v47  ;;  %v13428_v47 = vld [vmem:[%s25178_s11 + $0xc8] sm:$0xff] }
0x103b   : > { %19519 = vmatpush3.msra.mxu1 %v24253_v32  ;;  %19491 = vmatprep.mubr.msk.f32.mxu0 %vm1905_vm0, %v16289_v24  ;;  %v16291_v32 = vld [vmem:[%s25178_s11 + $0x1c0] sm:$0xff] }
0x103c   : > { %19520 = vmatprep.subr.mxu1 %v24245_v10  ;;  %19558 = vmatprep.subr.mxu0 %v24257_v15 }
0x103d   : > { %19492 = vmatmul.mubr.msk.f32.gmra.mxu0 %vm1905_vm0, %v16290_v33  ;;  %19521 = vmatpush3.msra.mxu1 %v24245_v10  ;;  %v16293_v10 = vld [vmem:[%s25178_s11 + $0x1d0] sm:$0xff] }
0x103e   : > { %19559 = vmatpush3.msra.mxu0 %v24257_v15  ;;  %19454 = vmatprep.mubr.msk.f32.mxu1 %vm1905_vm0, %v13427_v56  ;;  %v13430_v15 = vld [vmem:[%s25178_s11 + $0xd8] sm:$0xff] }
0x103f   : > { %19560 = vmatprep.subr.mxu0 %v24249_v22  ;;  %19455 = vmatmul.mubr.msk.f32.gmra.mxu1 %vm1905_vm0, %v13428_v47 }
0x1040   : > { %19561 = vmatpush3.msra.mxu0 %v24249_v22  ;;  %19494 = vmatprep.mubr.msk.f32.mxu0 %vm1905_vm0, %v16291_v32  ;;  %v16294_v22 = vld [vmem:[%s25178_s11 + $0x1d8] sm:$0xff] }
0x1041   : > { %19495 = vmatmul.mubr.msk.f32.gmra.mxu0 %vm1905_vm0, %v16292_v0  ;;  %19457 = vmatprep.mubr.msk.f32.mxu1 %vm1905_vm0, %v13429_v18 }
0x1042   : > { %19497 = vmatprep.mubr.msk.f32.mxu0 %vm1905_vm0, %v16293_v10 }
0x1043   : > { %19458 = vmatmul.mubr.msk.f32.gmra.mxu1 %vm1905_vm0, %v13430_v15 }
0x1044   : > { %19460 = vmatprep.mubr.msk.f32.mxu1 %vm1905_vm0, %v13431_v54  ;;  %v24960_v54 = vld [vmem:[%s25171_s4 + $0x2] ss:$0 sm:$0xff] }
0x1045   : > { %19498 = vmatmul.mubr.msk.f32.gmra.mxu0 %vm1905_vm0, %v16294_v22 }
0x1046   : > { %19500 = vmatprep.mubr.msk.f32.mxu0 %vm1905_vm0, %v16295_v36 }
0x1047   : > { %19461 = vmatmul.mubr.msk.f32.gmra.mxu1 %vm1905_vm0, %v13432_v8 }
0x1048   : > { %19463 = vmatprep.mubr.msk.f32.mxu1 %vm1905_vm0, %v13433_v53 }
0x1049   : > { %19501 = vmatmul.mubr.msk.f32.gmra.mxu0 %vm1905_vm0, %v16296_v59 }
0x104a   : > { %19503 = vmatprep.mubr.msk.f32.mxu0 %vm1905_vm0, %v16297_v3 }
0x104b   : > { %19464 = vmatmul.mubr.msk.f32.gmra.mxu1 %vm1905_vm0, %v13434_v31 }
0x104c   : > { %19522 = vmatprep.mubr.msk.f32.mxu1 %vm1905_vm0, %v16315_v45 }
0x104d   : > { %19504 = vmatmul.mubr.msk.f32.gmra.mxu0 %vm1905_vm0, %v16298_v34 }
0x104e   : > { %19562 = vmatprep.mubr.msk.f32.mxu0 %vm1905_vm0, %v16347_v20 }
0x104f   : > { %19523 = vmatmul.mubr.msk.f32.vlgmr.msra.gmra.mxu1 %vm1905_vm0, %v16316_v37 }
0x1050   : > { %19525 = vmatprep.mubr.msk.f32.mxu1 %vm1905_vm0, %v16317_v4 }
0x1051   : > { %19563 = vmatmul.mubr.msk.f32.vlgmr.msra.gmra.mxu0 %vm1905_vm0, %v16348_v1 }
0x1052   : > { %19565 = vmatprep.mubr.msk.f32.mxu0 %vm1905_vm0, %v16349_v28 }
0x1053   : > { %19526 = vmatmul.mubr.msk.f32.gmra.mxu1 %vm1905_vm0, %v16318_v58 }
0x1054   : > { %19528 = vmatprep.mubr.msk.f32.mxu1 %vm1905_vm0, %v16319_v19 }
0x1055   : > { %19566 = vmatmul.mubr.msk.f32.gmra.mxu0 %vm1905_vm0, %v16350_v46 }
0x1056   : > { %19568 = vmatprep.mubr.msk.f32.mxu0 %vm1905_vm0, %v16351_v40 }
0x1057   : > { %19529 = vmatmul.mubr.msk.f32.gmra.mxu1 %vm1905_vm0, %v16320_v11 }
0x1058   : > { %19531 = vmatprep.mubr.msk.f32.mxu1 %vm1905_vm0, %v16321_v12 }
0x1059   : > { %19569 = vmatmul.mubr.msk.f32.gmra.mxu0 %vm1905_vm0, %v16352_v29 }
0x105a   : > { %19571 = vmatprep.mubr.msk.f32.mxu0 %vm1905_vm0, %v16353_v42 }
0x105b   : > { %19532 = vmatmul.mubr.msk.f32.gmra.mxu1 %vm1905_vm0, %v16322_v35 }
0x105c   : > { %19534 = vmatprep.mubr.msk.f32.mxu1 %vm1905_vm0, %v16323_v55 }
0x105d   : > { %19572 = vmatmul.mubr.msk.f32.gmra.mxu0 %vm1905_vm0, %v16354_v60 }
0x105e   : > { %19574 = vmatprep.mubr.msk.f32.mxu0 %vm1905_vm0, %v16355_v50 }
0x105f   : > { %19535 = vmatmul.mubr.msk.f32.gmra.mxu1 %vm1905_vm0, %v16324_v44 }
0x1060   : > { %19537 = vmatprep.mubr.msk.f32.mxu1 %vm1905_vm0, %v16325_v39 }
0x1061   : > { %19575 = vmatmul.mubr.msk.f32.gmra.mxu0 %vm1905_vm0, %v16356_v63 }
0x1062   : > { %19577 = vmatprep.mubr.msk.f32.mxu0 %vm1905_vm0, %v16357_v21 }
0x1063   : > { %19538 = vmatmul.mubr.msk.f32.gmra.mxu1 %vm1905_vm0, %v16326_v23 }
0x1064   : > { %19540 = vmatprep.mubr.msk.f32.mxu1 %vm1905_vm0, %v16327_v30 }
0x1065   : > { %19578 = vmatmul.mubr.msk.f32.gmra.mxu0 %vm1905_vm0, %v16358_v5 }
0x1066   : > { %19580 = vmatprep.mubr.msk.f32.mxu0 %vm1905_vm0, %v16359_v52 }
0x1067   : > { %19541 = vmatmul.mubr.msk.f32.gmra.mxu1 %vm1905_vm0, %v16328_v51 }
0x1068   : > { %19543 = vmatprep.mubr.msk.f32.mxu1 %vm1905_vm0, %v16329_v13 }
0x1069   : > { %19581 = vmatmul.mubr.msk.f32.gmra.mxu0 %vm1905_vm0, %v16360_v7 }
0x106a   : > { %19583 = vmatprep.mubr.msk.f32.mxu0 %vm1905_vm0, %v16361_v43 }
0x106b   : > { %19544 = vmatmul.mubr.msk.f32.gmra.mxu1 %vm1905_vm0, %v16330_v38 }
0x106d   : > { %19584 = vmatmul.mubr.msk.f32.gmra.mxu0 %vm1905_vm0, %v16362_v49 }
0x109a   : > { %v19284_v14 = vpop.f32.mrf.mxu1 }
0x109b   : > { %v12607_v59 = vadd.f32 %v19284_v14, %v24960_v54 }
0x109c   : > { %v12527_v16 = vpop.f32.mrf.mxu1  ;;  %v19324_v57 = vpop.f32.mrf.mxu0 }
0x109d   : > { %v12606_v45 = vadd.f32 %v24960_v54, %v12527_v16  ;;  %v12833_v37 = vadd.f32 %v19324_v57, %v12607_v59 }
0x109e   : > { %v12753_v48 = vpop.f32.mrf.mxu0 }
0x109f   : > { %v19287_v27 = vpop.f32.mrf.mxu1  ;;  %v12832_v58 = vadd.f32 %v12753_v48, %v12606_v45 }
0x10a0   : > { %v12609_v4 = vadd.f32 %v19287_v27, %v24960_v54 }
0x10a1   : > { %v12537_v9 = vpop.f32.mrf.mxu1 }
0x10a2   : > { %v12608_v46 = vadd.f32 %v24960_v54, %v12537_v9 }
0x10a3   : > { %v19327_v25 = vpop.f32.mrf.mxu0 }
0x10a4   : > { %v12835_v42 = vadd.f32 %v19327_v25, %v12609_v4 }
0x10a5   : > { %v19290_v6 = vpop.f32.mrf.mxu1  ;;  %v12763_v41 = vpop.f32.mrf.mxu0 }
0x10a6   : > { %v12611_v44 = vadd.f32 %v19290_v6, %v24960_v54  ;;  %v12834_v39 = vadd.f32 %v12763_v41, %v12608_v46 }
0x10a7   : > { %v12547_v61 = vpop.f32.mrf.mxu1 }
0x10a8   : > { %v12610_v30 = vadd.f32 %v24960_v54, %v12547_v61 }
0x10a9   : > { %v19330_v17 = vpop.f32.mrf.mxu0 }
0x10aa   : > { %v12837_v13 = vadd.f32 %v19330_v17, %v12611_v44 }
0x10ab   : > { %v19293_v26 = vpop.f32.mrf.mxu1  ;;  %v12773_v2 = vpop.f32.mrf.mxu0 }
0x10ac   : > { %v12613_v14 = vadd.f32 %v19293_v26, %v24960_v54  ;;  %v12836_v16 = vadd.f32 %v12773_v2, %v12610_v30 }
0x10ad   : > { %v12557_v62 = vpop.f32.mrf.mxu1 }
0x10ae   : > { %v12612_v9 = vadd.f32 %v24960_v54, %v12557_v62 }
0x10af   : > { %v24939_v24 = vpop.f32.mrf.mxu0 }
0x10b0   : > { %v12839_v61 = vadd.f32 %v24939_v24, %v12613_v14 }
0x10b1   : > { %v24941_v33 = vpop.f32.mrf.mxu1  ;;  %v24943_v56 = vpop.f32.mrf.mxu0 }
0x10b2   : > { %v12615_v26 = vadd.f32 %v24941_v33, %v24960_v54  ;;  %v12838_v2 = vadd.f32 %v24943_v56, %v12612_v9 }
0x10b3   : > { %v24945_v47 = vpop.f32.mrf.mxu1 }
0x10b4   : > { %v24947_v32 = vpop.f32.mrf.mxu0 }
0x10b6   : > { %v24949_v0 = vpop.f32.mrf.mxu1  ;;  %v24951_v18 = vpop.f32.mrf.mxu0 }
0x10b7   : > { %v12617_v33 = vadd.f32 %v24949_v0, %v24960_v54 }
0x10b8   : > { %v24953_v10 = vpop.f32.mrf.mxu1  ;;  %v24955_v15 = vpop.f32.mrf.mxu0 }
0x10ba   : > { %v24962_v22 = vpop.f32.mrf.mxu1  ;;  %v24964_v36 = vpop.f32.mrf.mxu0 }
0x10bc   : > { %v24966_v8 = vpop.f32.mrf.mxu1  ;;  %v24968_v53 = vpop.f32.mrf.mxu0 }
0x10be   : > { %v24971_v3 = vpop.f32.mrf.mxu1  ;;  %v24973_v31 = vpop.f32.mrf.mxu0 }
0x10c0   : > { %v24976_v34 = vpop.f32.mrf.mxu1  ;;  %v24978_v20 = vpop.f32.mrf.mxu0 }
0x10c2   : > { %v24981_v1 = vpop.f32.mrf.mxu0  ;;  %v19364_v28 = vpop.f32.mrf.mxu1 }
0x10c3   : > { %v13059_v19 = vadd.f32 %v19364_v28, %v12833_v37 }
0x10c4   : > { %v12979_v40 = vpop.f32.mrf.mxu1  ;;  %v19404_v11 = vpop.f32.mrf.mxu0 }
0x10c5   : > { %v13058_v12 = vadd.f32 %v12979_v40, %v12832_v58  ;;  %v13285_v29 = vadd.f32 %v19404_v11, %v13059_v19  ;;  %v12614_v19 = vadd.f32 %v24960_v54, %v24945_v47  ;;  %v12616_v47 = vadd.f32 %v24960_v54, %v24953_v10 }
0x10c6   : > { %v13205_v35 = vpop.f32.mrf.mxu0 }
0x10c7   : > { %v16250_v55 = vmul.f32 -1.442695, %v13285_v29  ;;  %v19367_v60 = vpop.f32.mrf.mxu1  ;;  %v13284_v50 = vadd.f32 %v13205_v35, %v13058_v12  ;;  %v12841_v29 = vadd.f32 %v24947_v32, %v12615_v26 }
0x10c8   : > { %v13061_v63 = vadd.f32 %v19367_v60, %v12835_v42 }
0x10c9   : > { %20251 = vpow2.f32 %v16250_v55  ;;  %v16249_v21 = vmul.f32 -1.442695, %v13284_v50  ;;  %v12989_v23 = vpop.f32.mrf.mxu1  ;;  %v12840_v50 = vadd.f32 %v24951_v18, %v12614_v19  ;;  %v12618_v18 = vadd.f32 %v24960_v54, %v24966_v8 }
0x10ca   : > { %v13060_v5 = vadd.f32 %v12989_v23, %v12834_v39  ;;  %v19407_v52 = vpop.f32.mrf.mxu0  ;;  %v12619_v39 = vadd.f32 %v24962_v22, %v24960_v54  ;;  %v12843_v23 = vadd.f32 %v24955_v15, %v12617_v33  ;;  %v12842_v22 = vadd.f32 %v24964_v36, %v12616_v47 }
0x10cb   : > { %20253 = vpow2.f32 %v16249_v21  ;;  %v13287_v51 = vadd.f32 %v19407_v52, %v13061_v63  ;;  %v12621_v15 = vadd.f32 %v24971_v3, %v24960_v54  ;;  %v12844_v9 = vadd.f32 %v24973_v31, %v12618_v18 }
0x10cc   : > { %v13215_v7 = vpop.f32.mrf.mxu0  ;;  %v12620_v36 = vadd.f32 %v24960_v54, %v24976_v34 }
0x10cd   : > { %v16252_v43 = vmul.f32 -1.442695, %v13287_v51  ;;  %v19370_v38 = vpop.f32.mrf.mxu1  ;;  %v13286_v49 = vadd.f32 %v13215_v7, %v13060_v5 }
0x10ce   : > { %v13063_v57 = vadd.f32 %v19370_v38, %v12837_v13 }
0x10cf   : > { %20255 = vpow2.f32 %v16252_v43  ;;  %v16251_v27 = vmul.f32 -1.442695, %v13286_v49  ;;  %v12999_v48 = vpop.f32.mrf.mxu1  ;;  %v12845_v49 = vadd.f32 %v24968_v53, %v12619_v39 }
0x10d0   : > { %v13062_v25 = vadd.f32 %v12999_v48, %v12836_v16  ;;  %v19410_v6 = vpop.f32.mrf.mxu0 }
0x10d1   : > { %20257 = vpow2.f32 %v16251_v27  ;;  %v13289_v41 = vadd.f32 %v19410_v6, %v13063_v57 }
0x10d2   : > { %v13225_v17 = vpop.f32.mrf.mxu0 }
0x10d3   : > { %v16254_v59 = vmul.f32 -1.442695, %v13289_v41  ;;  %v19373_v45 = vpop.f32.mrf.mxu1  ;;  %v13288_v37 = vadd.f32 %v13225_v17, %v13062_v25  ;;  %v12847_v17 = vadd.f32 %v24978_v20, %v12621_v15 }
0x10d4   : > { %v13065_v4 = vadd.f32 %v19373_v45, %v12839_v61 }
0x10d5   : > { %20259 = vpow2.f32 %v16254_v59  ;;  %v16253_v28 = vmul.f32 -1.442695, %v13288_v37  ;;  %v13009_v58 = vpop.f32.mrf.mxu1 }
0x10d6   : > { %v20252_v62 = vpop.eup %20251  ;;  %v13064_v46 = vadd.f32 %v13009_v58, %v12838_v2  ;;  %v19413_v40 = vpop.f32.mrf.mxu0 }
0x10d7   : > { %v13349_v24 = vadd.f32 1.0, %v20252_v62  ;;  %20261 = vpow2.f32 %v16253_v28  ;;  %v13291_v11 = vadd.f32 %v19413_v40, %v13065_v4  ;;  %v12846_v4 = vadd.f32 %v24981_v1, %v12620_v36 }
0x10d8   : > { %v20254_v12 = vpop.eup %20253  ;;  %v13235_v56 = vpop.f32.mrf.mxu0 }
0x10d9   : > { %20263 = vrcp.f32 %v13349_v24  ;;  %v13348_v42 = vadd.f32 1.0, %v20254_v12  ;;  %v16256_v35 = vmul.f32 -1.442695, %v13291_v11  ;;  %v19376_v55 = vpop.f32.mrf.mxu1  ;;  %v13290_v60 = vadd.f32 %v13235_v56, %v13064_v46 }
0x10da   : > { %v13067_v44 = vadd.f32 %v19376_v55, %v12841_v29 }
0x10db   : > { %20265 = vrcp.f32 %v13348_v42  ;;  %v16255_v32 = vmul.f32 -1.442695, %v13290_v60  ;;  %v13019_v63 = vpop.f32.mrf.mxu1  ;;  %v19416_v21 = vpop.f32.mrf.mxu0 }
0x10dc   : > { %v20256_v0 = vpop.eup %20255  ;;  %20267 = vpow2.f32 %v16256_v35  ;;  %v13066_v30 = vadd.f32 %v13019_v63, %v12840_v50  ;;  %v13293_v5 = vadd.f32 %v19416_v21, %v13067_v44 }
0x10dd   : > { %v13351_v52 = vadd.f32 1.0, %v20256_v0  ;;  %20269 = vpow2.f32 %v16255_v32  ;;  %v19379_v10 = vpop.f32.mrf.mxu1  ;;  %v13245_v51 = vpop.f32.mrf.mxu0 }
0x10de   : > { %v20258_v13 = vpop.eup %20257  ;;  %v16258_v7 = vmul.f32 -1.442695, %v13293_v5  ;;  %v13069_v43 = vadd.f32 %v19379_v10, %v12843_v23  ;;  %v13292_v38 = vadd.f32 %v13245_v51, %v13066_v30 }
0x10df   : > { %20271 = vrcp.f32 %v13351_v52  ;;  %v13350_v14 = vadd.f32 1.0, %v20258_v13  ;;  %v13029_v16 = vpop.f32.mrf.mxu1  ;;  %v19419_v8 = vpop.f32.mrf.mxu0 }
0x10e0   : > { %20273 = vpow2.f32 %v16258_v7  ;;  %v16257_v57 = vmul.f32 -1.442695, %v13292_v38  ;;  %v13068_v27 = vadd.f32 %v13029_v16, %v12842_v22  ;;  %v13295_v48 = vadd.f32 %v19419_v8, %v13069_v43 }
0x10e1   : > { %20275 = vrcp.f32 %v13350_v14  ;;  %v19382_v25 = vpop.f32.mrf.mxu1  ;;  %v13255_v53 = vpop.f32.mrf.mxu0 }
0x10e2   : > { %v20260_v6 = vpop.eup %20259  ;;  %20277 = vpow2.f32 %v16257_v57  ;;  %v16260_v3 = vmul.f32 -1.442695, %v13295_v48  ;;  %v13071_v41 = vadd.f32 %v19382_v25, %v12845_v49  ;;  %v13294_v61 = vadd.f32 %v13255_v53, %v13068_v27 }
0x10e3   : > { %v13353_v59 = vadd.f32 1.0, %v20260_v6  ;;  %v13039_v45 = vpop.f32.mrf.mxu1  ;;  %v19422_v37 = vpop.f32.mrf.mxu0 }
0x10e4   : > { %v20262_v26 = vpop.eup %20261  ;;  %20279 = vpow2.f32 %v16260_v3  ;;  %v16259_v31 = vmul.f32 -1.442695, %v13294_v61  ;;  %v13070_v34 = vadd.f32 %v13039_v45, %v12844_v9  ;;  %v13297_v2 = vadd.f32 %v19422_v37, %v13071_v41 }
0x10e5   : > { %20281 = vrcp.f32 %v13353_v59  ;;  %v13352_v28 = vadd.f32 1.0, %v20262_v26  ;;  %v19385_v58 = vpop.f32.mrf.mxu1  ;;  %v13265_v20 = vpop.f32.mrf.mxu0 }
0x10e6   : > { %v20264_v62 = vpop.eup %20263  ;;  %20283 = vpow2.f32 %v16259_v31  ;;  %v16262_v19 = vmul.f32 -1.442695, %v13297_v2  ;;  %v13073_v46 = vadd.f32 %v19385_v58, %v12847_v17  ;;  %v13296_v40 = vadd.f32 %v13265_v20, %v13070_v34 }
0x10e7   : > { %13397 = vst [vmem:[%s25017_s29 + $0x8] sm:$0xff] %v20264_v62  ;;  %20285 = vrcp.f32 %v13352_v28  ;;  %v13049_v24 = vpop.f32.mrf.mxu1  ;;  %v19425_v11 = vpop.f32.mrf.mxu0 }
0x10e8   : > { %v20266_v12 = vpop.eup %20265  ;;  %20287 = vpow2.f32 %v16262_v19  ;;  %v16261_v29 = vmul.f32 -1.442695, %v13296_v40  ;;  %v13072_v33 = vadd.f32 %v13049_v24, %v12846_v4  ;;  %v13299_v56 = vadd.f32 %v19425_v11, %v13073_v46 }
0x10e9   : > { %v20268_v1 = vpop.eup %20267  ;;  %13396 = vst [vmem:[%s25017_s29] sm:$0xff] %v20266_v12  ;;  %v13275_v42 = vpop.f32.mrf.mxu0 }
0x10ea   : > { %v25022_v35 = vpop.f32.mrf.mxu1  ;;  %v20270_v55 = vpop.eup %20269  ;;  %v13355_v60 = vadd.f32 1.0, %v20268_v1  ;;  %20289 = vpow2.f32 %v16261_v29  ;;  %v16264_v50 = vmul.f32 -1.442695, %v13299_v56  ;;  %v13298_v47 = vadd.f32 %v13275_v42, %v13072_v33 }
0x10eb   : > { %v13354_v44 = vadd.f32 1.0, %v20270_v55  ;;  %v25026_v32 = vpop.f32.mrf.mxu0  ;;  %v13629_v1 = vadd.f32 %v25022_v35, %v24960_v54 }
0x10ec   : > { %v25024_v39 = vpop.f32.mrf.mxu1  ;;  %v20272_v63 = vpop.eup %20271  ;;  %20291 = vrcp.f32 %v13355_v60  ;;  %v16263_v21 = vmul.f32 -1.442695, %v13298_v47 }
0x10ed   : > { %v20274_v0 = vpop.eup %20273  ;;  %13399 = vst [vmem:[%s25017_s29 + $0x18] sm:$0xff] %v20272_v63  ;;  %20293 = vrcp.f32 %v13354_v44  ;;  %v25029_v23 = vpop.f32.mrf.mxu0  ;;  %v13628_v47 = vadd.f32 %v24960_v54, %v25024_v39 }
0x10ee   : > { %v20276_v30 = vpop.eup %20275  ;;  %v13357_v5 = vadd.f32 1.0, %v20274_v0  ;;  %20295 = vpow2.f32 %v16264_v50  ;;  %v25031_v18 = vpop.f32.mrf.mxu1 }
0x10ef   : > { %v20278_v52 = vpop.eup %20277  ;;  %13398 = vst [vmem:[%s25017_s29 + $0x10] sm:$0xff] %v20276_v30  ;;  %20297 = vpow2.f32 %v16263_v21  ;;  %v13854_v21 = vadd.f32 %v25026_v32, %v13629_v1  ;;  %v13631_v35 = vadd.f32 %v25031_v18, %v24960_v54 }
0x10f0   : > { %20299 = vrcp.f32 %v13357_v5  ;;  %v13356_v10 = vadd.f32 1.0, %v20278_v52  ;;  %v25034_v51 = vpop.f32.mrf.mxu1  ;;  %v13853_v5 = vadd.f32 %v25029_v23, %v13628_v47 }
0x10f1   : > { %v20280_v13 = vpop.eup %20279  ;;  %v25036_v22 = vpop.f32.mrf.mxu0  ;;  %v13630_v52 = vadd.f32 %v24960_v54, %v25034_v51 }
0x10f2   : > { %v20282_v7 = vpop.eup %20281  ;;  %20301 = vrcp.f32 %v13356_v10  ;;  %v13359_v43 = vadd.f32 1.0, %v20280_v13 }
0x10f3   : > { %v20284_v38 = vpop.eup %20283  ;;  %13401 = vst [vmem:[%s25017_s29 + $0x28] sm:$0xff] %v20282_v7  ;;  %v25039_v49 = vpop.f32.mrf.mxu0 }
0x10f4   : > { %v20286_v15 = vpop.eup %20285  ;;  %20303 = vrcp.f32 %v13359_v43  ;;  %v13358_v14 = vadd.f32 1.0, %v20284_v38  ;;  %v25041_v16 = vpop.f32.mrf.mxu1  ;;  %v13856_v43 = vadd.f32 %v25036_v22, %v13631_v35  ;;  %v13855_v23 = vadd.f32 %v25039_v49, %v13630_v52 }
0x10f5   : > { %v20288_v8 = vpop.eup %20287  ;;  %13400 = vst [vmem:[%s25017_s29 + $0x20] sm:$0xff] %v20286_v15  ;;  %v13633_v39 = vadd.f32 %v25041_v16, %v24960_v54 }
0x10f6   : > { %20305 = vrcp.f32 %v13358_v14  ;;  %v13361_v57 = vadd.f32 1.0, %v20288_v8  ;;  %v25044_v27 = vpop.f32.mrf.mxu1 }
0x10f7   : > { %v20290_v48 = vpop.eup %20289  ;;  %v25046_v9 = vpop.f32.mrf.mxu0  ;;  %v13632_v18 = vadd.f32 %v24960_v54, %v25044_v27 }
0x10f8   : > { %20307 = vrcp.f32 %v13361_v57  ;;  %v13360_v36 = vadd.f32 1.0, %v20290_v48  ;;  %v13858_v48 = vadd.f32 %v25046_v9, %v13633_v39 }
0x10f9   : > { %v20292_v25 = vpop.eup %20291  ;;  %v25048_v53 = vpop.f32.mrf.mxu0 }
0x10fa   : > { %v20294_v6 = vpop.eup %20293  ;;  %13403 = vst [vmem:[%s25017_s29 + $0x38] sm:$0xff] %v20292_v25  ;;  %20309 = vrcp.f32 %v13360_v36  ;;  %v25051_v3 = vpop.f32.mrf.mxu1  ;;  %v13857_v27 = vadd.f32 %v25048_v53, %v13632_v18 }
0x10fb   : > { %v20296_v41 = vpop.eup %20295  ;;  %13402 = vst [vmem:[%s25017_s29 + $0x30] sm:$0xff] %v20294_v6  ;;  %v13635_v16 = vadd.f32 %v25051_v3, %v24960_v54 }
0x10fc   : > { %v20298_v61 = vpop.eup %20297  ;;  %v13363_v17 = vadd.f32 1.0, %v20296_v41  ;;  %v25054_v59 = vpop.f32.mrf.mxu1 }
0x10fd   : > { %v20300_v45 = vpop.eup %20299  ;;  %v13362_v37 = vadd.f32 1.0, %v20298_v61  ;;  %v25056_v26 = vpop.f32.mrf.mxu0  ;;  %v13634_v61 = vadd.f32 %v24960_v54, %v25054_v59 }
0x10fe   : > { %13405 = vst [vmem:[%s25017_s29 + $0x48] sm:$0xff] %v20300_v45  ;;  %20311 = vrcp.f32 %v13363_v17 }
0x10ff   : > { %v20302_v31 = vpop.eup %20301  ;;  %20313 = vrcp.f32 %v13362_v37  ;;  %v25059_v34 = vpop.f32.mrf.mxu1 }
0x1100   : > { %v25061_v2 = vpop.f32.mrf.mxu0  ;;  %13404 = vst [vmem:[%s25017_s29 + $0x40] sm:$0xff] %v20302_v31  ;;  %v13860_v31 = vadd.f32 %v25056_v26, %v13635_v16  ;;  %v13637_v3 = vadd.f32 %v25059_v34, %v24960_v54 }
0x1101   : > { %v20304_v4 = vpop.eup %20303  ;;  %v25064_v28 = vpop.f32.mrf.mxu1  ;;  %v13859_v1 = vadd.f32 %v25061_v2, %v13634_v61 }
0x1102   : > { %v25066_v58 = vpop.f32.mrf.mxu0  ;;  %13407 = vst [vmem:[%s25017_s29 + $0x58] sm:$0xff] %v20304_v4  ;;  %v13636_v59 = vadd.f32 %v24960_v54, %v25064_v28 }
0x1103   : > { %v20306_v20 = vpop.eup %20305  ;;  %v25069_v62 = vpop.f32.mrf.mxu1  ;;  %v13862_v35 = vadd.f32 %v25066_v58, %v13637_v3 }
0x1104   : > { %v25071_v19 = vpop.f32.mrf.mxu0  ;;  %13406 = vst [vmem:[%s25017_s29 + $0x50] sm:$0xff] %v20306_v20  ;;  %v13639_v34 = vadd.f32 %v25069_v62, %v24960_v54 }
0x1105   : > { %v20308_v46 = vpop.eup %20307  ;;  %v25074_v40 = vpop.f32.mrf.mxu1  ;;  %v13861_v39 = vadd.f32 %v25071_v19, %v13636_v59 }
0x1106   : > { %v25076_v24 = vpop.f32.mrf.mxu0  ;;  %13409 = vst [vmem:[%s25017_s29 + $0x68] sm:$0xff] %v20308_v46  ;;  %v13638_v28 = vadd.f32 %v24960_v54, %v25074_v40 }
0x1107   : > { %v20310_v11 = vpop.eup %20309  ;;  %v25079_v12 = vpop.f32.mrf.mxu1 }
0x1108   : > { %v25081_v29 = vpop.f32.mrf.mxu0  ;;  %13408 = vst [vmem:[%s25017_s29 + $0x60] sm:$0xff] %v20310_v11  ;;  %v13641_v62 = vadd.f32 %v25079_v12, %v24960_v54 }
0x1109   : > { %v25084_v33 = vpop.f32.mrf.mxu1  ;;  %v13863_v40 = vadd.f32 %v25081_v29, %v13638_v28 }
0x110a   : > { %v25086_v56 = vpop.f32.mrf.mxu0 }
0x110b   : > { %v20312_v42 = vpop.eup %20311  ;;  %v25090_v55 = vpop.f32.mrf.mxu1  ;;  %v13866_v12 = vadd.f32 %v25086_v56, %v13641_v62 }
0x110c   : > { %v25092_v60 = vpop.f32.mrf.mxu0  ;;  %v20314_v50 = vpop.eup %20313  ;;  %13411 = vst [vmem:[%s25017_s29 + $0x78] sm:$0xff] %v20312_v42 }
0x110d   : > { %13410 = vst [vmem:[%s25017_s29 + $0x70] sm:$0xff] %v20314_v50  ;;  %v25098_v44 = vpop.f32.mrf.mxu1 }
0x110e   : > { %v25100_v63 = vpop.f32.mrf.mxu0 }
0x110f   : > { %v19524_v30 = vpop.f32.mrf.mxu1 }
0x1110   : > { %v25105_v0 = vpop.f32.mrf.mxu0  ;;  %v14079_v10 = vadd.f32 %v19524_v30, %v13854_v21 }
0x1111   : > { %v13999_v13 = vpop.f32.mrf.mxu1 }
0x1112   : > { %v19564_v7 = vpop.f32.mrf.mxu0  ;;  %v14078_v32 = vadd.f32 %v13999_v13, %v13853_v5 }
0x1113   : > { %v14304_v38 = vadd.f32 %v19564_v7, %v14079_v10  ;;  %v19527_v15 = vpop.f32.mrf.mxu1 }
0x1114   : > { %v14224_v14 = vpop.f32.mrf.mxu0  ;;  %v14081_v57 = vadd.f32 %v19527_v15, %v13856_v43 }
0x1115   : > { %v16380_v8 = vmul.f32 -1.442695, %v14304_v38  ;;  %v14303_v51 = vadd.f32 %v14224_v14, %v14078_v32  ;;  %v14009_v36 = vpop.f32.mrf.mxu1  ;;  %v13864_v38 = vadd.f32 %v25076_v24, %v13639_v34 }
0x1116   : > { %v19567_v25 = vpop.f32.mrf.mxu0  ;;  %v14080_v6 = vadd.f32 %v14009_v36, %v13855_v23 }
0x1117   : > { %20315 = vpow2.f32 %v16380_v8  ;;  %v16379_v22 = vmul.f32 -1.442695, %v14303_v51  ;;  %v14306_v41 = vadd.f32 %v19567_v25, %v14081_v57  ;;  %v19530_v49 = vpop.f32.mrf.mxu1  ;;  %v13640_v57 = vadd.f32 %v24960_v54, %v25084_v33 }
0x1118   : > { %v14234_v17 = vpop.f32.mrf.mxu0  ;;  %v14083_v37 = vadd.f32 %v19530_v49, %v13858_v48 }
0x1119   : > { %20317 = vpow2.f32 %v16379_v22  ;;  %v16382_v45 = vmul.f32 -1.442695, %v14306_v41  ;;  %v14305_v9 = vadd.f32 %v14234_v17, %v14080_v6  ;;  %v14019_v4 = vpop.f32.mrf.mxu1  ;;  %v13643_v22 = vadd.f32 %v25090_v55, %v24960_v54 }
0x111a   : > { %v19570_v20 = vpop.f32.mrf.mxu0  ;;  %v14082_v11 = vadd.f32 %v14019_v4, %v13857_v27  ;;  %v13865_v17 = vadd.f32 %v25092_v60, %v13640_v57 }
0x111b   : > { %20319 = vpow2.f32 %v16382_v45  ;;  %v16381_v46 = vmul.f32 -1.442695, %v14305_v9  ;;  %v14308_v53 = vadd.f32 %v19570_v20, %v14083_v37  ;;  %v19533_v42 = vpop.f32.mrf.mxu1  ;;  %v13642_v45 = vadd.f32 %v24960_v54, %v25098_v44 }
0x111c   : > { %v14244_v50 = vpop.f32.mrf.mxu0  ;;  %v14085_v21 = vadd.f32 %v19533_v42, %v13860_v31  ;;  %v13868_v20 = vadd.f32 %v25100_v63, %v13643_v22 }
0x111d   : > { %20321 = vpow2.f32 %v16381_v46  ;;  %v16384_v47 = vmul.f32 -1.442695, %v14308_v53  ;;  %v14307_v26 = vadd.f32 %v14244_v50, %v14082_v11  ;;  %v14029_v30 = vpop.f32.mrf.mxu1  ;;  %v13867_v44 = vadd.f32 %v25105_v0, %v13642_v45 }
0x111e   : > { %v19573_v5 = vpop.f32.mrf.mxu0  ;;  %v14084_v10 = vadd.f32 %v14029_v30, %v13859_v1 }
0x111f   : > { %20323 = vpow2.f32 %v16384_v47  ;;  %v16383_v52 = vmul.f32 -1.442695, %v14307_v26  ;;  %v14310_v2 = vadd.f32 %v19573_v5, %v14085_v21  ;;  %v19536_v13 = vpop.f32.mrf.mxu1 }
0x1120   : > { %v14254_v7 = vpop.f32.mrf.mxu0  ;;  %v14087_v32 = vadd.f32 %v19536_v13, %v13862_v35 }
0x1121   : > { %20325 = vpow2.f32 %v16383_v52  ;;  %v16386_v43 = vmul.f32 -1.442695, %v14310_v2  ;;  %v14309_v58 = vadd.f32 %v14254_v7, %v14084_v10  ;;  %v14039_v18 = vpop.f32.mrf.mxu1 }
0x1122   : > { %v19576_v15 = vpop.f32.mrf.mxu0  ;;  %v14086_v23 = vadd.f32 %v14039_v18, %v13861_v39 }
0x1123   : > { %20327 = vpow2.f32 %v16386_v43  ;;  %v16385_v14 = vmul.f32 -1.442695, %v14309_v58  ;;  %v14312_v19 = vadd.f32 %v19576_v15, %v14087_v32  ;;  %v19539_v51 = vpop.f32.mrf.mxu1 }
0x1124   : > { %v20316_v8 = vpop.eup %20315  ;;  %v14264_v48 = vpop.f32.mrf.mxu0  ;;  %v14089_v36 = vadd.f32 %v19539_v51, %v13864_v38 }
0x1125   : > { %v14368_v16 = vadd.f32 1.0, %v20316_v8  ;;  %20329 = vpow2.f32 %v16385_v14  ;;  %v16388_v24 = vmul.f32 -1.442695, %v14312_v19  ;;  %v14311_v6 = vadd.f32 %v14264_v48, %v14086_v23  ;;  %v14049_v41 = vpop.f32.mrf.mxu1 }
0x1126   : > { %v20318_v25 = vpop.eup %20317  ;;  %v19579_v27 = vpop.f32.mrf.mxu0  ;;  %v14088_v61 = vadd.f32 %v14049_v41, %v13863_v40 }
0x1127   : > { %20331 = vrcp.f32 %v14368_v16  ;;  %v14367_v29 = vadd.f32 1.0, %v20318_v25  ;;  %v14314_v49 = vadd.f32 %v19579_v27, %v14089_v36  ;;  %v16387_v37 = vmul.f32 -1.442695, %v14311_v6  ;;  %v19542_v9 = vpop.f32.mrf.mxu1 }
0x1128   : > { %v20320_v33 = vpop.eup %20319  ;;  %20333 = vpow2.f32 %v16388_v24  ;;  %v14274_v56 = vpop.f32.mrf.mxu0  ;;  %v14091_v3 = vadd.f32 %v19542_v9, %v13866_v12 }
0x1129   : > { %20335 = vrcp.f32 %v14367_v29  ;;  %v14370_v31 = vadd.f32 1.0, %v20320_v33  ;;  %v16390_v55 = vmul.f32 -1.442695, %v14314_v49  ;;  %v14313_v46 = vadd.f32 %v14274_v56, %v14088_v61  ;;  %v14059_v11 = vpop.f32.mrf.mxu1 }
0x112a   : > { %v20322_v4 = vpop.eup %20321  ;;  %20337 = vpow2.f32 %v16387_v37  ;;  %v19582_v53 = vpop.f32.mrf.mxu0  ;;  %v14090_v1 = vadd.f32 %v14059_v11, %v13865_v17 }
0x112b   : > { %20339 = vrcp.f32 %v14370_v31  ;;  %v14369_v60 = vadd.f32 1.0, %v20322_v4  ;;  %v14316_v59 = vadd.f32 %v19582_v53, %v14091_v3  ;;  %v16389_v42 = vmul.f32 -1.442695, %v14313_v46  ;;  %v19545_v50 = vpop.f32.mrf.mxu1 }
0x112c   : > { %v20324_v54 = vpop.eup %20323  ;;  %20341 = vpow2.f32 %v16390_v55  ;;  %v14284_v47 = vpop.f32.mrf.mxu0  ;;  %v14093_v35 = vadd.f32 %v19545_v50, %v13868_v20 }
0x112d   : > { %20343 = vrcp.f32 %v14369_v60  ;;  %v14372_v21 = vadd.f32 1.0, %v20324_v54  ;;  %v16392_v26 = vmul.f32 -1.442695, %v14316_v59  ;;  %v14315_v34 = vadd.f32 %v14284_v47, %v14090_v1  ;;  %v14069_v30 = vpop.f32.mrf.mxu1 }
0x112e   : > { %v20326_v63 = vpop.eup %20325  ;;  %20345 = vpow2.f32 %v16389_v42  ;;  %v19585_v5 = vpop.f32.mrf.mxu0  ;;  %v14092_v10 = vadd.f32 %v14069_v30, %v13867_v44 }
0x112f   : > { %20347 = vrcp.f32 %v14372_v21  ;;  %v14371_v52 = vadd.f32 1.0, %v20326_v63  ;;  %v14318_v2 = vadd.f32 %v19585_v5, %v14093_v35  ;;  %v16391_v0 = vmul.f32 -1.442695, %v14315_v34 }
0x1130   : > { %v20328_v39 = vpop.eup %20327  ;;  %20349 = vpow2.f32 %v16392_v26  ;;  %v14294_v28 = vpop.f32.mrf.mxu0 }
0x1131   : > { %20351 = vrcp.f32 %v14371_v52  ;;  %v14374_v13 = vadd.f32 1.0, %v20328_v39  ;;  %v16394_v7 = vmul.f32 -1.442695, %v14318_v2  ;;  %v14317_v43 = vadd.f32 %v14294_v28, %v14092_v10 }
0x1132   : > { %v20330_v32 = vpop.eup %20329  ;;  %20353 = vpow2.f32 %v16391_v0 }
0x1133   : > { %20355 = vrcp.f32 %v14374_v13  ;;  %v14373_v58 = vadd.f32 1.0, %v20330_v32  ;;  %v16393_v38 = vmul.f32 -1.442695, %v14317_v43 }
0x1134   : > { %v20332_v62 = vpop.eup %20331  ;;  %20357 = vpow2.f32 %v16394_v7 }
0x1135   : > { %v20334_v18 = vpop.eup %20333  ;;  %14416 = vst [vmem:[%s25017_s29 + $0x88] sm:$0xff] %v20332_v62  ;;  %20359 = vrcp.f32 %v14373_v58 }
0x1136   : > { %v20336_v15 = vpop.eup %20335  ;;  %v14376_v14 = vadd.f32 1.0, %v20334_v18  ;;  %20361 = vpow2.f32 %v16393_v38 }
0x1137   : > { %v20338_v23 = vpop.eup %20337  ;;  %14415 = vst [vmem:[%s25017_s29 + $0x80] sm:$0xff] %v20336_v15 }
0x1138   : > { %v20340_v19 = vpop.eup %20339  ;;  %20363 = vrcp.f32 %v14376_v14  ;;  %v14375_v8 = vadd.f32 1.0, %v20338_v23 }
0x1139   : > { %v20342_v40 = vpop.eup %20341  ;;  %14418 = vst [vmem:[%s25017_s29 + $0x98] sm:$0xff] %v20340_v19 }
0x113a   : > { %v20344_v57 = vpop.eup %20343  ;;  %20365 = vrcp.f32 %v14375_v8  ;;  %v14378_v51 = vadd.f32 1.0, %v20342_v40 }
0x113b   : > { %v20346_v48 = vpop.eup %20345  ;;  %14417 = vst [vmem:[%s25017_s29 + $0x90] sm:$0xff] %v20344_v57 }
0x113c   : > { %v20348_v16 = vpop.eup %20347  ;;  %20367 = vrcp.f32 %v14378_v51  ;;  %v14377_v24 = vadd.f32 1.0, %v20346_v48 }
0x113d   : > { %v20350_v36 = vpop.eup %20349  ;;  %14420 = vst [vmem:[%s25017_s29 + $0xa8] sm:$0xff] %v20348_v16 }
0x113e   : > { %v20352_v25 = vpop.eup %20351  ;;  %20369 = vrcp.f32 %v14377_v24  ;;  %v14380_v12 = vadd.f32 1.0, %v20350_v36 }
0x113f   : > { %v20354_v22 = vpop.eup %20353  ;;  %14419 = vst [vmem:[%s25017_s29 + $0xa0] sm:$0xff] %v20352_v25 }
0x1140   : > { %v20356_v6 = vpop.eup %20355  ;;  %20371 = vrcp.f32 %v14380_v12  ;;  %v14379_v41 = vadd.f32 1.0, %v20354_v22 }
0x1141   : > { %v20358_v27 = vpop.eup %20357  ;;  %14422 = vst [vmem:[%s25017_s29 + $0xb8] sm:$0xff] %v20356_v6 }
0x1142   : > { %v20360_v29 = vpop.eup %20359  ;;  %20373 = vrcp.f32 %v14379_v41  ;;  %v14382_v61 = vadd.f32 1.0, %v20358_v27 }
0x1143   : > { %v20362_v49 = vpop.eup %20361  ;;  %14421 = vst [vmem:[%s25017_s29 + $0xb0] sm:$0xff] %v20360_v29 }
0x1144   : > { %20375 = vrcp.f32 %v14382_v61  ;;  %v14381_v33 = vadd.f32 1.0, %v20362_v49 }
0x1145   : > { %v20364_v17 = vpop.eup %20363 }
0x1146   : > { %14424 = vst [vmem:[%s25017_s29 + $0xc8] sm:$0xff] %v20364_v17  ;;  %20377 = vrcp.f32 %v14381_v33 }
0x1147   : > { %v20366_v45 = vpop.eup %20365 }
0x1148   : > { %14423 = vst [vmem:[%s25017_s29 + $0xc0] sm:$0xff] %v20366_v45 }
0x1149   : > { %v20368_v37 = vpop.eup %20367 }
0x114a   : > { %14426 = vst [vmem:[%s25017_s29 + $0xd8] sm:$0xff] %v20368_v37 }
0x114b   : > { %v20370_v9 = vpop.eup %20369 }
0x114c   : > { %14425 = vst [vmem:[%s25017_s29 + $0xd0] sm:$0xff] %v20370_v9 }
0x114d   : > { %v20372_v56 = vpop.eup %20371 }
0x114e   : > { %14428 = vst [vmem:[%s25017_s29 + $0xe8] sm:$0xff] %v20372_v56 }
0x114f   : > { %v20374_v31 = vpop.eup %20373 }
0x1150   : > { %14427 = vst [vmem:[%s25017_s29 + $0xe0] sm:$0xff] %v20374_v31 }
0x1151   : > { %v20376_v55 = vpop.eup %20375 }
0x1152   : > { %14430 = vst [vmem:[%s25017_s29 + $0xf8] sm:$0xff] %v20376_v55 }
0x1153   : > { %v20378_v3 = vpop.eup %20377 }
0x1154   : > { %14429 = vst [vmem:[%s25017_s29 + $0xf0] sm:$0xff] %v20378_v3 }
0x1155 PF: > { %s23_s21 = sadd.s32 1, %s20466_s21  }
0x1156   : > { %p20_p1 = scmp.ge.s32.totalorder %s23_s21, 4  }
0x1158   :  { %22 = sbr.rel (!%p20_p1) target bundleno = 1 (0x1), region = 158 }
0x115d   :  { %14452 = vsyncpa [#allocation5], 1 }
0x115e   :  { %14454 = vsyncpa [#allocation5 + $0x1], 1 }

</bundles_post_ra>
